<compile_context>
chip_gen: v5e
topology: v5e:2x2
jax: 0.10.0
libtpu: 0.0.40
codegen_flags: <defaults>
</compile_context>

<pallas_src>
import functools

import jax
import jax.numpy as jnp
from jax import lax
from jax.experimental import pallas as pl
from jax.experimental.pallas import tpu as pltpu


# --------------------------------------------------------------------------
# In-kernel helper: one 3x3 "same" conv as a single im2col MXU matmul.
# --------------------------------------------------------------------------
def _im2col_conv(pad_ref, w_ref, b_ref, hh, ww, relu):
    # pad_ref : (hh+2, ww+2, cin)  zero-halo activation (bf16, VMEM scratch)
    # w_ref   : (9*cin, cout)      reshaped weights (bf16)
    # b_ref   : (1, cout)          bias (f32)
    # returns : (hh*ww, cout)      f32
    cin = pad_ref.shape[-1]
    cols = []
    for dy in range(3):
        for dx in range(3):
            tap = pad_ref[pl.ds(dy, hh), pl.ds(dx, ww), :]       # (hh, ww, cin)
            cols.append(tap.reshape(hh * ww, cin))
    patch = jnp.concatenate(cols, axis=-1)                       # (hh*ww, 9*cin)
    acc = jnp.dot(patch, w_ref[...], preferred_element_type=jnp.float32)
    acc = acc + b_ref[...]                                       # (1, cout) bcast
    if relu:
        acc = jnp.maximum(acc, 0.0)
    return acc


# --------------------------------------------------------------------------
# Fully fused UNet kernel (one image per grid step).
# --------------------------------------------------------------------------
def _unet_kernel(x_ref, w1_ref, b1_ref, w2_ref, b2_ref, w3_ref, b3_ref,
                 w4_ref, b4_ref, o_ref,
                 pad_in, pad_a, pad_b, pad_c,
                 *, H, W, Cmid, Cout_pad):
    Hp, Wp = H // 2, W // 2

    # Zero-fill halo scratches; interiors are overwritten below, borders stay 0
    # which implements padding=1 ("same") for every conv.
    pad_in[...] = jnp.zeros_like(pad_in)
    pad_a[...] = jnp.zeros_like(pad_a)
    pad_b[...] = jnp.zeros_like(pad_b)
    pad_c[...] = jnp.zeros_like(pad_c)

    pad_in[pl.ds(1, H), pl.ds(1, W), :] = x_ref[0]

    # ---- encoder: conv+relu, conv+relu, maxpool2 (all resident in VMEM) ----
    a1 = _im2col_conv(pad_in, w1_ref, b1_ref, H, W, relu=True)   # (H*W, Cmid)
    pad_a[pl.ds(1, H), pl.ds(1, W), :] = (
        a1.reshape(H, W, Cmid).astype(pad_a.dtype))

    a2 = _im2col_conv(pad_a, w2_ref, b2_ref, H, W, relu=True)    # (H*W, Cmid)
    a2 = a2.reshape(H, W, Cmid)
    a2 = a2.reshape(Hp, 2, W, Cmid).max(axis=1)
    a2 = a2.reshape(Hp, Wp, 2, Cmid).max(axis=2)                 # (Hp, Wp, Cmid)
    pad_b[pl.ds(1, Hp), pl.ds(1, Wp), :] = a2.astype(pad_b.dtype)

    # ---- decoder: conv+relu, conv ----
    a3 = _im2col_conv(pad_b, w3_ref, b3_ref, Hp, Wp, relu=True)  # (Hp*Wp, Cmid)
    pad_c[pl.ds(1, Hp), pl.ds(1, Wp), :] = (
        a3.reshape(Hp, Wp, Cmid).astype(pad_c.dtype))

    a4 = _im2col_conv(pad_c, w4_ref, b4_ref, Hp, Wp, relu=False)  # (Hp*Wp, Cout_pad)
    o_ref[...] = a4.reshape(1, Hp, Wp, Cout_pad).astype(o_ref.dtype)


# --------------------------------------------------------------------------
# Wrapper: NCHW in/out like the PyTorch module.
# --------------------------------------------------------------------------
def unet_forward(params, x_nchw, *, compute_dtype=jnp.bfloat16):
    N, Cin, H, W = x_nchw.shape
    assert H % 2 == 0 and W % 2 == 0, "MaxPool2d(2,2) needs even spatial dims"
    Cmid = params["enc1"][0].shape[-1]                    # 64
    Cout = params["dec2"][0].shape[-1]
    Cout_pad = ((Cout + 127) // 128) * 128                # lane-dense final store
    Hp, Wp = H // 2, W // 2

    x = jnp.transpose(x_nchw, (0, 2, 3, 1)).astype(compute_dtype)   # NHWC

    def prep_w(w, pad_to=None):
        cin, cout = w.shape[2], w.shape[3]
        if pad_to is not None and pad_to > cout:
            w = jnp.pad(w, ((0, 0), (0, 0), (0, 0), (0, pad_to - cout)))
            cout = pad_to
        return w.reshape(9 * cin, cout).astype(compute_dtype)       # (9*Cin, Cout)

    def prep_b(b, pad_to=None):
        if pad_to is not None and pad_to > b.shape[0]:
            b = jnp.pad(b, ((0, pad_to - b.shape[0]),))
        return b.reshape(1, -1).astype(jnp.float32)

    w1, b1 = prep_w(params["enc1"][0]), prep_b(params["enc1"][1])
    w2, b2 = prep_w(params["enc2"][0]), prep_b(params["enc2"][1])
    w3, b3 = prep_w(params["dec1"][0]), prep_b(params["dec1"][1])
    w4 = prep_w(params["dec2"][0], Cout_pad)
    b4 = prep_b(params["dec2"][1], Cout_pad)

    kernel = functools.partial(_unet_kernel, H=H, W=W,
                               Cmid=Cmid, Cout_pad=Cout_pad)

    flops = 2 * N * (H * W * 9 * Cin * Cmid
                     + H * W * 9 * Cmid * Cmid
                     + Hp * Wp * 9 * Cmid * Cmid
                     + Hp * Wp * 9 * Cmid * Cout_pad)
    bytes_accessed = (x.size * x.dtype.itemsize
                      + sum(int(a.size) * a.dtype.itemsize
                            for a in (w1, b1, w2, b2, w3, b3, w4, b4))
                      + N * Hp * Wp * Cout_pad * 4)

    def wspec(arr):
        return pl.BlockSpec(arr.shape, lambda n: (0, 0))

    out = pl.pallas_call(
        kernel,
        out_shape=jax.ShapeDtypeStruct((N, Hp, Wp, Cout_pad), jnp.float32),
        grid_spec=pltpu.PrefetchScalarGridSpec(
            num_scalar_prefetch=0,
            grid=(N,),
            in_specs=[
                pl.BlockSpec((1, H, W, Cin), lambda n: (n, 0, 0, 0)),
                wspec(w1), wspec(b1),
                wspec(w2), wspec(b2),
                wspec(w3), wspec(b3),
                wspec(w4), wspec(b4),
            ],
            out_specs=pl.BlockSpec((1, Hp, Wp, Cout_pad),
                                   lambda n: (n, 0, 0, 0)),
            scratch_shapes=[
                pltpu.VMEM((H + 2, W + 2, Cin), compute_dtype),
                pltpu.VMEM((H + 2, W + 2, Cmid), compute_dtype),
                pltpu.VMEM((Hp + 2, Wp + 2, Cmid), compute_dtype),
                pltpu.VMEM((Hp + 2, Wp + 2, Cmid), compute_dtype),
            ]),
        compiler_params=pltpu.CompilerParams(
            dimension_semantics=("parallel",),
            vmem_limit_bytes=32 * 1024 * 1024),
        cost_estimate=pl.CostEstimate(flops=flops, transcendentals=0,
                                      bytes_accessed=bytes_accessed),
    )(x, w1, b1, w2, b2, w3, b3, w4, b4)

    out = out[..., :Cout]                                  # drop channel padding
    return jnp.transpose(out, (0, 3, 1, 2))                # NHWC -> NCHW (f32)


# --------------------------------------------------------------------------
# Parameter init (HWIO layout) + pure-JAX reference (same bf16 compute points).
# --------------------------------------------------------------------------
def init_params(key, in_channels, out_channels):
    ks = jax.random.split(key, 8)

    def conv_p(kw, kb, cin, cout):
        w = jax.random.normal(kw, (3, 3, cin, cout), jnp.float32) * 0.1
        b = jax.random.normal(kb, (cout,), jnp.float32) * 0.1
        return w, b

    return {
        "enc1": conv_p(ks[0], ks[1], in_channels, 64),
        "enc2": conv_p(ks[2], ks[3], 64, 64),
        "dec1": conv_p(ks[4], ks[5], 64, 64),
        "dec2": conv_p(ks[6], ks[7], 64, out_channels),
    }


def unet_reference(params, x_nchw, *, compute_dtype=jnp.bfloat16):
    """Pure-JAX reference using the same bf16-input / f32-accumulate scheme."""
    x = jnp.transpose(x_nchw, (0, 2, 3, 1))

    def conv(x, w, b, relu):
        y = lax.conv_general_dilated(
            x.astype(compute_dtype), w.astype(compute_dtype),
            window_strides=(1, 1), padding="SAME",
            dimension_numbers=("NHWC", "HWIO", "NHWC"),
            preferred_element_type=jnp.float32) + b
        return jnp.maximum(y, 0.0) if relu else y

    x = conv(x, *params["enc1"], True)
    x = conv(x, *params["enc2"], True)
    x = lax.reduce_window(x, -jnp.inf, lax.max,
                          (1, 2, 2, 1), (1, 2, 2, 1), "VALID")
    x = conv(x, *params["dec1"], True)
    x = conv(x, *params["dec2"], False)
    return jnp.transpose(x, (0, 3, 1, 2))


if __name__ == "__main__":
    key = jax.random.PRNGKey(0)
    k_param, k_x = jax.random.split(key)

    N, C_IN, C_OUT, HW = 2, 4, 3, 16
    params = init_params(k_param, C_IN, C_OUT)
    x = jax.random.normal(k_x, (N, C_IN, HW, HW), jnp.float32)   # NCHW like PyTorch

    out = jax.block_until_ready(unet_forward(params, x))
    assert out.shape == (N, C_OUT, HW // 2, HW // 2), out.shape

    ref = jax.block_until_ready(unet_reference(params, x))
    max_err = float(jnp.max(jnp.abs(out - ref)))
    assert jnp.allclose(out, ref, rtol=1e-2, atol=1e-2), max_err

    print("KERNEL_OK")
</pallas_src>

<mosaic_0001>
module attributes {stable_mosaic.version = 11 : i64} {
  func.func @_unet_kernel(%arg0: i32, %arg1: memref<1x16x16x4xbf16, #tpu.memory_space<vmem>>, %arg2: memref<36x64xbf16, #tpu.memory_space<vmem>>, %arg3: memref<1x64xf32, #tpu.memory_space<vmem>>, %arg4: memref<576x64xbf16, #tpu.memory_space<vmem>>, %arg5: memref<1x64xf32, #tpu.memory_space<vmem>>, %arg6: memref<576x64xbf16, #tpu.memory_space<vmem>>, %arg7: memref<1x64xf32, #tpu.memory_space<vmem>>, %arg8: memref<576x128xbf16, #tpu.memory_space<vmem>>, %arg9: memref<1x128xf32, #tpu.memory_space<vmem>>, %arg10: memref<1x8x8x128xf32, #tpu.memory_space<vmem>>, %arg11: memref<18x18x4xbf16, #tpu.memory_space<vmem>>, %arg12: memref<18x18x64xbf16, #tpu.memory_space<vmem>>, %arg13: memref<10x10x64xbf16, #tpu.memory_space<vmem>>, %arg14: memref<10x10x64xbf16, #tpu.memory_space<vmem>>) attributes {dimension_semantics = [#tpu.dimension_semantics<parallel>], iteration_bounds = array<i64: 2>, scalar_prefetch = 0 : i64, scratch_operands = 4 : i64, tpu.core_type = #tpu.core_type<tc>, window_params = [{transform_indices = @transform_0, window_bounds = array<i64: 1, 16, 16, 4>}, {pipeline_mode = #tpu.pipeline_mode<synchronous>, transform_indices = @transform_1, window_bounds = array<i64: 36, 64>}, {pipeline_mode = #tpu.pipeline_mode<synchronous>, transform_indices = @transform_2, window_bounds = array<i64: 1, 64>}, {pipeline_mode = #tpu.pipeline_mode<synchronous>, transform_indices = @transform_3, window_bounds = array<i64: 576, 64>}, {pipeline_mode = #tpu.pipeline_mode<synchronous>, transform_indices = @transform_4, window_bounds = array<i64: 1, 64>}, {pipeline_mode = #tpu.pipeline_mode<synchronous>, transform_indices = @transform_5, window_bounds = array<i64: 576, 64>}, {pipeline_mode = #tpu.pipeline_mode<synchronous>, transform_indices = @transform_6, window_bounds = array<i64: 1, 64>}, {pipeline_mode = #tpu.pipeline_mode<synchronous>, transform_indices = @transform_7, window_bounds = array<i64: 576, 128>}, {pipeline_mode = #tpu.pipeline_mode<synchronous>, transform_indices = @transform_8, window_bounds = array<i64: 1, 128>}, {transform_indices = @transform_9, window_bounds = array<i64: 1, 8, 8, 128>}]} {
    %cst = arith.constant 0.000000e+00 : bf16
    %0 = vector.broadcast %cst : bf16 to vector<18x18x4xbf16>
    %c0 = arith.constant 0 : index
    %c0_0 = arith.constant 0 : index
    %c0_1 = arith.constant 0 : index
    %1 = vector.load %arg11[%c0, %c0_0, %c0_1] : memref<18x18x4xbf16, #tpu.memory_space<vmem>>, vector<18x18x4xbf16>
    tpu.vector_store %arg11[%c0, %c0_0, %c0_1], %0 {strides = array<i32>} : memref<18x18x4xbf16, #tpu.memory_space<vmem>>, vector<18x18x4xbf16>,
    %cst_2 = arith.constant 0.000000e+00 : bf16
    %2 = vector.broadcast %cst_2 : bf16 to vector<18x18x64xbf16>
    %c0_3 = arith.constant 0 : index
    %c0_4 = arith.constant 0 : index
    %c0_5 = arith.constant 0 : index
    %3 = vector.load %arg12[%c0_3, %c0_4, %c0_5] : memref<18x18x64xbf16, #tpu.memory_space<vmem>>, vector<18x18x64xbf16>
    tpu.vector_store %arg12[%c0_3, %c0_4, %c0_5], %2 {strides = array<i32>} : memref<18x18x64xbf16, #tpu.memory_space<vmem>>, vector<18x18x64xbf16>,
    %cst_6 = arith.constant 0.000000e+00 : bf16
    %4 = vector.broadcast %cst_6 : bf16 to vector<10x10x64xbf16>
    %c0_7 = arith.constant 0 : index
    %c0_8 = arith.constant 0 : index
    %c0_9 = arith.constant 0 : index
    %5 = vector.load %arg13[%c0_7, %c0_8, %c0_9] : memref<10x10x64xbf16, #tpu.memory_space<vmem>>, vector<10x10x64xbf16>
    tpu.vector_store %arg13[%c0_7, %c0_8, %c0_9], %4 {strides = array<i32>} : memref<10x10x64xbf16, #tpu.memory_space<vmem>>, vector<10x10x64xbf16>,
    %cst_10 = arith.constant 0.000000e+00 : bf16
    %6 = vector.broadcast %cst_10 : bf16 to vector<10x10x64xbf16>
    %c0_11 = arith.constant 0 : index
    %c0_12 = arith.constant 0 : index
    %c0_13 = arith.constant 0 : index
    %7 = vector.load %arg14[%c0_11, %c0_12, %c0_13] : memref<10x10x64xbf16, #tpu.memory_space<vmem>>, vector<10x10x64xbf16>
    tpu.vector_store %arg14[%c0_11, %c0_12, %c0_13], %6 {strides = array<i32>} : memref<10x10x64xbf16, #tpu.memory_space<vmem>>, vector<10x10x64xbf16>,
    %c0_14 = arith.constant 0 : index
    %c0_15 = arith.constant 0 : index
    %c0_16 = arith.constant 0 : index
    %c0_17 = arith.constant 0 : index
    %8 = vector.load %arg1[%c0_14, %c0_15, %c0_16, %c0_17] : memref<1x16x16x4xbf16, #tpu.memory_space<vmem>>, vector<1x16x16x4xbf16>
    %9 = vector.shape_cast %8 : vector<1x16x16x4xbf16> to vector<16x16x4xbf16>
    %c1 = arith.constant 1 : index
    %c1_18 = arith.constant 1 : index
    %c0_19 = arith.constant 0 : index
    %10 = vector.load %arg11[%c1, %c1_18, %c0_19] : memref<18x18x4xbf16, #tpu.memory_space<vmem>>, vector<16x16x4xbf16>
    tpu.vector_store %arg11[%c1, %c1_18, %c0_19], %9 {strides = array<i32>} : memref<18x18x4xbf16, #tpu.memory_space<vmem>>, vector<16x16x4xbf16>,
    %c0_20 = arith.constant 0 : index
    %c0_21 = arith.constant 0 : index
    %c0_22 = arith.constant 0 : index
    %11 = vector.load %arg11[%c0_20, %c0_21, %c0_22] : memref<18x18x4xbf16, #tpu.memory_space<vmem>>, vector<16x16x4xbf16>
    %12 = vector.shape_cast %11 : vector<16x16x4xbf16> to vector<256x4xbf16>
    %c0_23 = arith.constant 0 : index
    %c1_24 = arith.constant 1 : index
    %c0_25 = arith.constant 0 : index
    %13 = vector.load %arg11[%c0_23, %c1_24, %c0_25] : memref<18x18x4xbf16, #tpu.memory_space<vmem>>, vector<16x16x4xbf16>
    %14 = vector.shape_cast %13 : vector<16x16x4xbf16> to vector<256x4xbf16>
    %c0_26 = arith.constant 0 : index
    %c2 = arith.constant 2 : index
    %c0_27 = arith.constant 0 : index
    %15 = vector.load %arg11[%c0_26, %c2, %c0_27] : memref<18x18x4xbf16, #tpu.memory_space<vmem>>, vector<16x16x4xbf16>
    %16 = vector.shape_cast %15 : vector<16x16x4xbf16> to vector<256x4xbf16>
    %c1_28 = arith.constant 1 : index
    %c0_29 = arith.constant 0 : index
    %c0_30 = arith.constant 0 : index
    %17 = vector.load %arg11[%c1_28, %c0_29, %c0_30] : memref<18x18x4xbf16, #tpu.memory_space<vmem>>, vector<16x16x4xbf16>
    %18 = vector.shape_cast %17 : vector<16x16x4xbf16> to vector<256x4xbf16>
    %c1_31 = arith.constant 1 : index
    %c1_32 = arith.constant 1 : index
    %c0_33 = arith.constant 0 : index
    %19 = vector.load %arg11[%c1_31, %c1_32, %c0_33] : memref<18x18x4xbf16, #tpu.memory_space<vmem>>, vector<16x16x4xbf16>
    %20 = vector.shape_cast %19 : vector<16x16x4xbf16> to vector<256x4xbf16>
    %c1_34 = arith.constant 1 : index
    %c2_35 = arith.constant 2 : index
    %c0_36 = arith.constant 0 : index
    %21 = vector.load %arg11[%c1_34, %c2_35, %c0_36] : memref<18x18x4xbf16, #tpu.memory_space<vmem>>, vector<16x16x4xbf16>
    %22 = vector.shape_cast %21 : vector<16x16x4xbf16> to vector<256x4xbf16>
    %c2_37 = arith.constant 2 : index
    %c0_38 = arith.constant 0 : index
    %c0_39 = arith.constant 0 : index
    %23 = vector.load %arg11[%c2_37, %c0_38, %c0_39] : memref<18x18x4xbf16, #tpu.memory_space<vmem>>, vector<16x16x4xbf16>
    %24 = vector.shape_cast %23 : vector<16x16x4xbf16> to vector<256x4xbf16>
    %c2_40 = arith.constant 2 : index
    %c1_41 = arith.constant 1 : index
    %c0_42 = arith.constant 0 : index
    %25 = vector.load %arg11[%c2_40, %c1_41, %c0_42] : memref<18x18x4xbf16, #tpu.memory_space<vmem>>, vector<16x16x4xbf16>
    %26 = vector.shape_cast %25 : vector<16x16x4xbf16> to vector<256x4xbf16>
    %c2_43 = arith.constant 2 : index
    %c2_44 = arith.constant 2 : index
    %c0_45 = arith.constant 0 : index
    %27 = vector.load %arg11[%c2_43, %c2_44, %c0_45] : memref<18x18x4xbf16, #tpu.memory_space<vmem>>, vector<16x16x4xbf16>
    %28 = vector.shape_cast %27 : vector<16x16x4xbf16> to vector<256x4xbf16>
    %29 = tpu.concatenate %12, %14, %16, %18, %20, %22, %24, %26, %28 in 1 : vector<256x4xbf16>, vector<256x4xbf16>, vector<256x4xbf16>, vector<256x4xbf16>, vector<256x4xbf16>, vector<256x4xbf16>, vector<256x4xbf16>, vector<256x4xbf16>, vector<256x4xbf16> -> vector<256x36xbf16>
    %c0_46 = arith.constant 0 : index
    %c0_47 = arith.constant 0 : index
    %30 = vector.load %arg2[%c0_46, %c0_47] : memref<36x64xbf16, #tpu.memory_space<vmem>>, vector<36x64xbf16>
    %cst_48 = arith.constant dense<0.000000e+00> : vector<256x64xf32>
    %31 = tpu.matmul %29, %30, %cst_48 {dimension_numbers = #tpu.dot_dimension_numbers<[1], [0], [0], [1], [0, 0, 1, 1], [], []>} : vector<256x36xbf16>, vector<36x64xbf16>, vector<256x64xf32> -> vector<256x64xf32>
    %c0_49 = arith.constant 0 : index
    %c0_50 = arith.constant 0 : index
    %32 = vector.load %arg3[%c0_49, %c0_50] : memref<1x64xf32, #tpu.memory_space<vmem>>, vector<1x64xf32>
    %33 = vector.broadcast %32 : vector<1x64xf32> to vector<256x64xf32>
    %34 = arith.addf %31, %33 : vector<256x64xf32>
    %cst_51 = arith.constant 0.000000e+00 : f32
    %35 = vector.broadcast %cst_51 : f32 to vector<256x64xf32>
    %36 = arith.maximumf %34, %35 : vector<256x64xf32>
    %37 = vector.shape_cast %36 : vector<256x64xf32> to vector<16x16x64xf32>
    %38 = arith.truncf %37 : vector<16x16x64xf32> to vector<16x16x64xbf16>
    %c1_52 = arith.constant 1 : index
    %c1_53 = arith.constant 1 : index
    %c0_54 = arith.constant 0 : index
    %39 = vector.load %arg12[%c1_52, %c1_53, %c0_54] : memref<18x18x64xbf16, #tpu.memory_space<vmem>>, vector<16x16x64xbf16>
    tpu.vector_store %arg12[%c1_52, %c1_53, %c0_54], %38 {strides = array<i32>} : memref<18x18x64xbf16, #tpu.memory_space<vmem>>, vector<16x16x64xbf16>,
    %c0_55 = arith.constant 0 : index
    %c0_56 = arith.constant 0 : index
    %c0_57 = arith.constant 0 : index
    %40 = vector.load %arg12[%c0_55, %c0_56, %c0_57] : memref<18x18x64xbf16, #tpu.memory_space<vmem>>, vector<16x16x64xbf16>
    %41 = vector.shape_cast %40 : vector<16x16x64xbf16> to vector<256x64xbf16>
    %c0_58 = arith.constant 0 : index
    %c1_59 = arith.constant 1 : index
    %c0_60 = arith.constant 0 : index
    %42 = vector.load %arg12[%c0_58, %c1_59, %c0_60] : memref<18x18x64xbf16, #tpu.memory_space<vmem>>, vector<16x16x64xbf16>
    %43 = vector.shape_cast %42 : vector<16x16x64xbf16> to vector<256x64xbf16>
    %c0_61 = arith.constant 0 : index
    %c2_62 = arith.constant 2 : index
    %c0_63 = arith.constant 0 : index
    %44 = vector.load %arg12[%c0_61, %c2_62, %c0_63] : memref<18x18x64xbf16, #tpu.memory_space<vmem>>, vector<16x16x64xbf16>
    %45 = vector.shape_cast %44 : vector<16x16x64xbf16> to vector<256x64xbf16>
    %c1_64 = arith.constant 1 : index
    %c0_65 = arith.constant 0 : index
    %c0_66 = arith.constant 0 : index
    %46 = vector.load %arg12[%c1_64, %c0_65, %c0_66] : memref<18x18x64xbf16, #tpu.memory_space<vmem>>, vector<16x16x64xbf16>
    %47 = vector.shape_cast %46 : vector<16x16x64xbf16> to vector<256x64xbf16>
    %c1_67 = arith.constant 1 : index
    %c1_68 = arith.constant 1 : index
    %c0_69 = arith.constant 0 : index
    %48 = vector.load %arg12[%c1_67, %c1_68, %c0_69] : memref<18x18x64xbf16, #tpu.memory_space<vmem>>, vector<16x16x64xbf16>
    %49 = vector.shape_cast %48 : vector<16x16x64xbf16> to vector<256x64xbf16>
    %c1_70 = arith.constant 1 : index
    %c2_71 = arith.constant 2 : index
    %c0_72 = arith.constant 0 : index
    %50 = vector.load %arg12[%c1_70, %c2_71, %c0_72] : memref<18x18x64xbf16, #tpu.memory_space<vmem>>, vector<16x16x64xbf16>
    %51 = vector.shape_cast %50 : vector<16x16x64xbf16> to vector<256x64xbf16>
    %c2_73 = arith.constant 2 : index
    %c0_74 = arith.constant 0 : index
    %c0_75 = arith.constant 0 : index
    %52 = vector.load %arg12[%c2_73, %c0_74, %c0_75] : memref<18x18x64xbf16, #tpu.memory_space<vmem>>, vector<16x16x64xbf16>
    %53 = vector.shape_cast %52 : vector<16x16x64xbf16> to vector<256x64xbf16>
    %c2_76 = arith.constant 2 : index
    %c1_77 = arith.constant 1 : index
    %c0_78 = arith.constant 0 : index
    %54 = vector.load %arg12[%c2_76, %c1_77, %c0_78] : memref<18x18x64xbf16, #tpu.memory_space<vmem>>, vector<16x16x64xbf16>
    %55 = vector.shape_cast %54 : vector<16x16x64xbf16> to vector<256x64xbf16>
    %c2_79 = arith.constant 2 : index
    %c2_80 = arith.constant 2 : index
    %c0_81 = arith.constant 0 : index
    %56 = vector.load %arg12[%c2_79, %c2_80, %c0_81] : memref<18x18x64xbf16, #tpu.memory_space<vmem>>, vector<16x16x64xbf16>
    %57 = vector.shape_cast %56 : vector<16x16x64xbf16> to vector<256x64xbf16>
    %58 = tpu.concatenate %41, %43, %45, %47, %49, %51, %53, %55, %57 in 1 : vector<256x64xbf16>, vector<256x64xbf16>, vector<256x64xbf16>, vector<256x64xbf16>, vector<256x64xbf16>, vector<256x64xbf16>, vector<256x64xbf16>, vector<256x64xbf16>, vector<256x64xbf16> -> vector<256x576xbf16>
    %c0_82 = arith.constant 0 : index
    %c0_83 = arith.constant 0 : index
    %59 = vector.load %arg4[%c0_82, %c0_83] : memref<576x64xbf16, #tpu.memory_space<vmem>>, vector<576x64xbf16>
    %cst_84 = arith.constant dense<0.000000e+00> : vector<256x64xf32>
    %60 = tpu.matmul %58, %59, %cst_84 {dimension_numbers = #tpu.dot_dimension_numbers<[1], [0], [0], [1], [0, 0, 1, 1], [], []>} : vector<256x576xbf16>, vector<576x64xbf16>, vector<256x64xf32> -> vector<256x64xf32>
    %c0_85 = arith.constant 0 : index
    %c0_86 = arith.constant 0 : index
    %61 = vector.load %arg5[%c0_85, %c0_86] : memref<1x64xf32, #tpu.memory_space<vmem>>, vector<1x64xf32>
    %62 = vector.broadcast %61 : vector<1x64xf32> to vector<256x64xf32>
    %63 = arith.addf %60, %62 : vector<256x64xf32>
    %cst_87 = arith.constant 0.000000e+00 : f32
    %64 = vector.broadcast %cst_87 : f32 to vector<256x64xf32>
    %65 = arith.maximumf %63, %64 : vector<256x64xf32>
    %66 = vector.shape_cast %65 : vector<256x64xf32> to vector<16x16x64xf32>
    %67 = vector.shape_cast %66 : vector<16x16x64xf32> to vector<8x2x16x64xf32>
    %cst_88 = arith.constant dense<0xFF800000> : vector<8x16x64xf32>
    %68 = vector.multi_reduction <maximumf>, %67, %cst_88 [1] : vector<8x2x16x64xf32> to vector<8x16x64xf32>
    %69 = vector.shape_cast %68 : vector<8x16x64xf32> to vector<8x8x2x64xf32>
    %cst_89 = arith.constant dense<0xFF800000> : vector<8x8x64xf32>
    %70 = vector.multi_reduction <maximumf>, %69, %cst_89 [2] : vector<8x8x2x64xf32> to vector<8x8x64xf32>
    %71 = arith.truncf %70 : vector<8x8x64xf32> to vector<8x8x64xbf16>
    %c1_90 = arith.constant 1 : index
    %c1_91 = arith.constant 1 : index
    %c0_92 = arith.constant 0 : index
    %72 = vector.load %arg13[%c1_90, %c1_91, %c0_92] : memref<10x10x64xbf16, #tpu.memory_space<vmem>>, vector<8x8x64xbf16>
    tpu.vector_store %arg13[%c1_90, %c1_91, %c0_92], %71 {strides = array<i32>} : memref<10x10x64xbf16, #tpu.memory_space<vmem>>, vector<8x8x64xbf16>,
    %c0_93 = arith.constant 0 : index
    %c0_94 = arith.constant 0 : index
    %c0_95 = arith.constant 0 : index
    %73 = vector.load %arg13[%c0_93, %c0_94, %c0_95] : memref<10x10x64xbf16, #tpu.memory_space<vmem>>, vector<8x8x64xbf16>
    %74 = vector.shape_cast %73 : vector<8x8x64xbf16> to vector<64x64xbf16>
    %c0_96 = arith.constant 0 : index
    %c1_97 = arith.constant 1 : index
    %c0_98 = arith.constant 0 : index
    %75 = vector.load %arg13[%c0_96, %c1_97, %c0_98] : memref<10x10x64xbf16, #tpu.memory_space<vmem>>, vector<8x8x64xbf16>
    %76 = vector.shape_cast %75 : vector<8x8x64xbf16> to vector<64x64xbf16>
    %c0_99 = arith.constant 0 : index
    %c2_100 = arith.constant 2 : index
    %c0_101 = arith.constant 0 : index
    %77 = vector.load %arg13[%c0_99, %c2_100, %c0_101] : memref<10x10x64xbf16, #tpu.memory_space<vmem>>, vector<8x8x64xbf16>
    %78 = vector.shape_cast %77 : vector<8x8x64xbf16> to vector<64x64xbf16>
    %c1_102 = arith.constant 1 : index
    %c0_103 = arith.constant 0 : index
    %c0_104 = arith.constant 0 : index
    %79 = vector.load %arg13[%c1_102, %c0_103, %c0_104] : memref<10x10x64xbf16, #tpu.memory_space<vmem>>, vector<8x8x64xbf16>
    %80 = vector.shape_cast %79 : vector<8x8x64xbf16> to vector<64x64xbf16>
    %c1_105 = arith.constant 1 : index
    %c1_106 = arith.constant 1 : index
    %c0_107 = arith.constant 0 : index
    %81 = vector.load %arg13[%c1_105, %c1_106, %c0_107] : memref<10x10x64xbf16, #tpu.memory_space<vmem>>, vector<8x8x64xbf16>
    %82 = vector.shape_cast %81 : vector<8x8x64xbf16> to vector<64x64xbf16>
    %c1_108 = arith.constant 1 : index
    %c2_109 = arith.constant 2 : index
    %c0_110 = arith.constant 0 : index
    %83 = vector.load %arg13[%c1_108, %c2_109, %c0_110] : memref<10x10x64xbf16, #tpu.memory_space<vmem>>, vector<8x8x64xbf16>
    %84 = vector.shape_cast %83 : vector<8x8x64xbf16> to vector<64x64xbf16>
    %c2_111 = arith.constant 2 : index
    %c0_112 = arith.constant 0 : index
    %c0_113 = arith.constant 0 : index
    %85 = vector.load %arg13[%c2_111, %c0_112, %c0_113] : memref<10x10x64xbf16, #tpu.memory_space<vmem>>, vector<8x8x64xbf16>
    %86 = vector.shape_cast %85 : vector<8x8x64xbf16> to vector<64x64xbf16>
    %c2_114 = arith.constant 2 : index
    %c1_115 = arith.constant 1 : index
    %c0_116 = arith.constant 0 : index
    %87 = vector.load %arg13[%c2_114, %c1_115, %c0_116] : memref<10x10x64xbf16, #tpu.memory_space<vmem>>, vector<8x8x64xbf16>
    %88 = vector.shape_cast %87 : vector<8x8x64xbf16> to vector<64x64xbf16>
    %c2_117 = arith.constant 2 : index
    %c2_118 = arith.constant 2 : index
    %c0_119 = arith.constant 0 : index
    %89 = vector.load %arg13[%c2_117, %c2_118, %c0_119] : memref<10x10x64xbf16, #tpu.memory_space<vmem>>, vector<8x8x64xbf16>
    %90 = vector.shape_cast %89 : vector<8x8x64xbf16> to vector<64x64xbf16>
    %91 = tpu.concatenate %74, %76, %78, %80, %82, %84, %86, %88, %90 in 1 : vector<64x64xbf16>, vector<64x64xbf16>, vector<64x64xbf16>, vector<64x64xbf16>, vector<64x64xbf16>, vector<64x64xbf16>, vector<64x64xbf16>, vector<64x64xbf16>, vector<64x64xbf16> -> vector<64x576xbf16>
    %c0_120 = arith.constant 0 : index
    %c0_121 = arith.constant 0 : index
    %92 = vector.load %arg6[%c0_120, %c0_121] : memref<576x64xbf16, #tpu.memory_space<vmem>>, vector<576x64xbf16>
    %cst_122 = arith.constant dense<0.000000e+00> : vector<64x64xf32>
    %93 = tpu.matmul %91, %92, %cst_122 {dimension_numbers = #tpu.dot_dimension_numbers<[1], [0], [0], [1], [0, 0, 1, 1], [], []>} : vector<64x576xbf16>, vector<576x64xbf16>, vector<64x64xf32> -> vector<64x64xf32>
    %c0_123 = arith.constant 0 : index
    %c0_124 = arith.constant 0 : index
    %94 = vector.load %arg7[%c0_123, %c0_124] : memref<1x64xf32, #tpu.memory_space<vmem>>, vector<1x64xf32>
    %95 = vector.broadcast %94 : vector<1x64xf32> to vector<64x64xf32>
    %96 = arith.addf %93, %95 : vector<64x64xf32>
    %cst_125 = arith.constant 0.000000e+00 : f32
    %97 = vector.broadcast %cst_125 : f32 to vector<64x64xf32>
    %98 = arith.maximumf %96, %97 : vector<64x64xf32>
    %99 = vector.shape_cast %98 : vector<64x64xf32> to vector<8x8x64xf32>
    %100 = arith.truncf %99 : vector<8x8x64xf32> to vector<8x8x64xbf16>
    %c1_126 = arith.constant 1 : index
    %c1_127 = arith.constant 1 : index
    %c0_128 = arith.constant 0 : index
    %101 = vector.load %arg14[%c1_126, %c1_127, %c0_128] : memref<10x10x64xbf16, #tpu.memory_space<vmem>>, vector<8x8x64xbf16>
    tpu.vector_store %arg14[%c1_126, %c1_127, %c0_128], %100 {strides = array<i32>} : memref<10x10x64xbf16, #tpu.memory_space<vmem>>, vector<8x8x64xbf16>,
    %c0_129 = arith.constant 0 : index
    %c0_130 = arith.constant 0 : index
    %c0_131 = arith.constant 0 : index
    %102 = vector.load %arg14[%c0_129, %c0_130, %c0_131] : memref<10x10x64xbf16, #tpu.memory_space<vmem>>, vector<8x8x64xbf16>
    %103 = vector.shape_cast %102 : vector<8x8x64xbf16> to vector<64x64xbf16>
    %c0_132 = arith.constant 0 : index
    %c1_133 = arith.constant 1 : index
    %c0_134 = arith.constant 0 : index
    %104 = vector.load %arg14[%c0_132, %c1_133, %c0_134] : memref<10x10x64xbf16, #tpu.memory_space<vmem>>, vector<8x8x64xbf16>
    %105 = vector.shape_cast %104 : vector<8x8x64xbf16> to vector<64x64xbf16>
    %c0_135 = arith.constant 0 : index
    %c2_136 = arith.constant 2 : index
    %c0_137 = arith.constant 0 : index
    %106 = vector.load %arg14[%c0_135, %c2_136, %c0_137] : memref<10x10x64xbf16, #tpu.memory_space<vmem>>, vector<8x8x64xbf16>
    %107 = vector.shape_cast %106 : vector<8x8x64xbf16> to vector<64x64xbf16>
    %c1_138 = arith.constant 1 : index
    %c0_139 = arith.constant 0 : index
    %c0_140 = arith.constant 0 : index
    %108 = vector.load %arg14[%c1_138, %c0_139, %c0_140] : memref<10x10x64xbf16, #tpu.memory_space<vmem>>, vector<8x8x64xbf16>
    %109 = vector.shape_cast %108 : vector<8x8x64xbf16> to vector<64x64xbf16>
    %c1_141 = arith.constant 1 : index
    %c1_142 = arith.constant 1 : index
    %c0_143 = arith.constant 0 : index
    %110 = vector.load %arg14[%c1_141, %c1_142, %c0_143] : memref<10x10x64xbf16, #tpu.memory_space<vmem>>, vector<8x8x64xbf16>
    %111 = vector.shape_cast %110 : vector<8x8x64xbf16> to vector<64x64xbf16>
    %c1_144 = arith.constant 1 : index
    %c2_145 = arith.constant 2 : index
    %c0_146 = arith.constant 0 : index
    %112 = vector.load %arg14[%c1_144, %c2_145, %c0_146] : memref<10x10x64xbf16, #tpu.memory_space<vmem>>, vector<8x8x64xbf16>
    %113 = vector.shape_cast %112 : vector<8x8x64xbf16> to vector<64x64xbf16>
    %c2_147 = arith.constant 2 : index
    %c0_148 = arith.constant 0 : index
    %c0_149 = arith.constant 0 : index
    %114 = vector.load %arg14[%c2_147, %c0_148, %c0_149] : memref<10x10x64xbf16, #tpu.memory_space<vmem>>, vector<8x8x64xbf16>
    %115 = vector.shape_cast %114 : vector<8x8x64xbf16> to vector<64x64xbf16>
    %c2_150 = arith.constant 2 : index
    %c1_151 = arith.constant 1 : index
    %c0_152 = arith.constant 0 : index
    %116 = vector.load %arg14[%c2_150, %c1_151, %c0_152] : memref<10x10x64xbf16, #tpu.memory_space<vmem>>, vector<8x8x64xbf16>
    %117 = vector.shape_cast %116 : vector<8x8x64xbf16> to vector<64x64xbf16>
    %c2_153 = arith.constant 2 : index
    %c2_154 = arith.constant 2 : index
    %c0_155 = arith.constant 0 : index
    %118 = vector.load %arg14[%c2_153, %c2_154, %c0_155] : memref<10x10x64xbf16, #tpu.memory_space<vmem>>, vector<8x8x64xbf16>
    %119 = vector.shape_cast %118 : vector<8x8x64xbf16> to vector<64x64xbf16>
    %120 = tpu.concatenate %103, %105, %107, %109, %111, %113, %115, %117, %119 in 1 : vector<64x64xbf16>, vector<64x64xbf16>, vector<64x64xbf16>, vector<64x64xbf16>, vector<64x64xbf16>, vector<64x64xbf16>, vector<64x64xbf16>, vector<64x64xbf16>, vector<64x64xbf16> -> vector<64x576xbf16>
    %c0_156 = arith.constant 0 : index
    %c0_157 = arith.constant 0 : index
    %121 = vector.load %arg8[%c0_156, %c0_157] : memref<576x128xbf16, #tpu.memory_space<vmem>>, vector<576x128xbf16>
    %cst_158 = arith.constant dense<0.000000e+00> : vector<64x128xf32>
    %122 = tpu.matmul %120, %121, %cst_158 {dimension_numbers = #tpu.dot_dimension_numbers<[1], [0], [0], [1], [0, 0, 1, 1], [], []>} : vector<64x576xbf16>, vector<576x128xbf16>, vector<64x128xf32> -> vector<64x128xf32>
    %c0_159 = arith.constant 0 : index
    %c0_160 = arith.constant 0 : index
    %123 = vector.load %arg9[%c0_159, %c0_160] : memref<1x128xf32, #tpu.memory_space<vmem>>, vector<1x128xf32>
    %124 = vector.broadcast %123 : vector<1x128xf32> to vector<64x128xf32>
    %125 = arith.addf %122, %124 : vector<64x128xf32>
    %126 = vector.shape_cast %125 : vector<64x128xf32> to vector<1x8x8x128xf32>
    %c0_161 = arith.constant 0 : index
    %c0_162 = arith.constant 0 : index
    %c0_163 = arith.constant 0 : index
    %c0_164 = arith.constant 0 : index
    %127 = vector.load %arg10[%c0_161, %c0_162, %c0_163, %c0_164] : memref<1x8x8x128xf32, #tpu.memory_space<vmem>>, vector<1x8x8x128xf32>
    tpu.vector_store %arg10[%c0_161, %c0_162, %c0_163, %c0_164], %126 {strides = array<i32>} : memref<1x8x8x128xf32, #tpu.memory_space<vmem>>, vector<1x8x8x128xf32>,
    return
  }
  func.func @transform_0(%arg0: i32) -> (i32, i32, i32, i32) {
    %c0_i32 = arith.constant 0 : i32
    %c0_i32_0 = arith.constant 0 : i32
    %c0_i32_1 = arith.constant 0 : i32
    %c0_i32_2 = arith.constant 0 : i32
    return %arg0, %c0_i32, %c0_i32_0, %c0_i32_1 : i32, i32, i32, i32
  }
  func.func @transform_1(%arg0: i32) -> (i32, i32) {
    %c0_i32 = arith.constant 0 : i32
    %c0_i32_0 = arith.constant 0 : i32
    %c0_i32_1 = arith.constant 0 : i32
    return %c0_i32, %c0_i32_0 : i32, i32
  }
  func.func @transform_2(%arg0: i32) -> (i32, i32) {
    %c0_i32 = arith.constant 0 : i32
    %c0_i32_0 = arith.constant 0 : i32
    %c0_i32_1 = arith.constant 0 : i32
    return %c0_i32, %c0_i32_0 : i32, i32
  }
  func.func @transform_3(%arg0: i32) -> (i32, i32) {
    %c0_i32 = arith.constant 0 : i32
    %c0_i32_0 = arith.constant 0 : i32
    %c0_i32_1 = arith.constant 0 : i32
    return %c0_i32, %c0_i32_0 : i32, i32
  }
  func.func @transform_4(%arg0: i32) -> (i32, i32) {
    %c0_i32 = arith.constant 0 : i32
    %c0_i32_0 = arith.constant 0 : i32
    %c0_i32_1 = arith.constant 0 : i32
    return %c0_i32, %c0_i32_0 : i32, i32
  }
  func.func @transform_5(%arg0: i32) -> (i32, i32) {
    %c0_i32 = arith.constant 0 : i32
    %c0_i32_0 = arith.constant 0 : i32
    %c0_i32_1 = arith.constant 0 : i32
    return %c0_i32, %c0_i32_0 : i32, i32
  }
  func.func @transform_6(%arg0: i32) -> (i32, i32) {
    %c0_i32 = arith.constant 0 : i32
    %c0_i32_0 = arith.constant 0 : i32
    %c0_i32_1 = arith.constant 0 : i32
    return %c0_i32, %c0_i32_0 : i32, i32
  }
  func.func @transform_7(%arg0: i32) -> (i32, i32) {
    %c0_i32 = arith.constant 0 : i32
    %c0_i32_0 = arith.constant 0 : i32
    %c0_i32_1 = arith.constant 0 : i32
    return %c0_i32, %c0_i32_0 : i32, i32
  }
  func.func @transform_8(%arg0: i32) -> (i32, i32) {
    %c0_i32 = arith.constant 0 : i32
    %c0_i32_0 = arith.constant 0 : i32
    %c0_i32_1 = arith.constant 0 : i32
    return %c0_i32, %c0_i32_0 : i32, i32
  }
  func.func @transform_9(%arg0: i32) -> (i32, i32, i32, i32) {
    %c0_i32 = arith.constant 0 : i32
    %c0_i32_0 = arith.constant 0 : i32
    %c0_i32_1 = arith.constant 0 : i32
    %c0_i32_2 = arith.constant 0 : i32
    return %arg0, %c0_i32, %c0_i32_0, %c0_i32_1 : i32, i32, i32, i32
  }
}

</mosaic_0001>

<bundles_post_ra>
// kernel: tpu_custom_call.1
= control target key start
LH: loop header
LB: loop body
LE: loop exit
PB: predicated region body
PF: predicated region fallthrough
CT: control target
= control target key end

     0   :  { %14 = vsyncpa [#allocation7], 0  ;;  %s17639_s0 = inlined_call_operand.vmem [shape: bf16[2,16,16,4], index: 0, kind: input, shape index: {}]   ;;  %s17640_s1 = inlined_call_operand.vmem [shape: bf16[36,64], index: 1, kind: input, shape index: {}]   ;;  %s17641_s2 = inlined_call_operand.vmem [shape: f32[1,64], index: 2, kind: input, shape index: {}]   ;;  %s17642_s3 = inlined_call_operand.vmem [shape: bf16[576,64], index: 3, kind: input, shape index: {}]   ;;  %s17643_s4 = inlined_call_operand.vmem [shape: f32[1,64], index: 4, kind: input, shape index: {}]   ;;  %s17644_s5 = inlined_call_operand.vmem [shape: bf16[576,64], index: 5, kind: input, shape index: {}]   ;;  %s17645_s6 = inlined_call_operand.vmem [shape: f32[1,64], index: 6, kind: input, shape index: {}]   ;;  %s17646_s7 = inlined_call_operand.vmem [shape: bf16[576,128], index: 7, kind: input, shape index: {}]   ;;  %s17647_s8 = inlined_call_operand.vmem [shape: f32[1,128], index: 8, kind: input, shape index: {}]   ;;  %s17648_s9 = inlined_call_operand.hbm [shape: f32[2,8,8,128], index: 9, kind: output, shape index: {}]  }
   0x1   :  { %16 = vsyncpa [#allocation7 + $0x1], 0  ;;  %s13242_s30 = smov 0   ;;  %s13244_s10 = smov 0  }
   0x2   :  { %s13246_s11 = smov 0   ;;  %s13248_s12 = smov 0  }
   0x3 LB: > { %s13263_s13 = sadd.s32 4294967295, %s13179_s12   ;;  %s11589_s14 = sadd.s32 4294967294, %s13179_s12   ;;  %s13179_s12 = sphi %s13248_s12, %s17755_s12   ;;  %s13175_s11 = sphi %s13246_s11, %s17754_s11   ;;  %s13171_s10 = sphi %s13244_s10, %s17753_s10   ;;  %s13167_s30 = sphi %s13242_s30, %s17752_s30  }
   0x4   : > { %s13267_s15 = sadd.s32 1, %s13179_s12   ;;  %s223_s16 = sadd.s32 1, %s13175_s11 }
   0x5   : > { %s220_s17 = ssub.s32 %s13179_s12, %s13267_s15  ;;  %p233_p0 = scmp.ne.s32.totalorder %s13175_s11, %s13171_s10 }
   0x6   : > { %p221_p1 = scmp.eq.s32.totalorder %s220_s17, 0  ;;  %p234_p2 = scmp.eq.s32.totalorder %s13263_s13, 1 }
   0x7   : > { %p239_p3 = scmp.ne.s32.totalorder %s13171_s10, %s13167_s30  ;;  %p240_p4 = scmp.eq.s32.totalorder %s11589_s14, 1 }
   0x8   : > { %s13278_s18 = scalar_select %p221_p1, %s13175_s11, %s223_s16  }
   0x9   : > { %p13280_p5 = por %p234_p2, %p233_p0  ;;  %p13284_p6 = por %p240_p4, %p239_p3 }
   0xa   : > { %p11592_p7 = scmp.ge.s32.totalorder %s13179_s12, 1  ;;  %p290_p8 = scmp.lt.s32.totalorder %s13179_s12, 3 }
   0xc   : > { %p291_p9 = pnand %p11592_p7, %p290_p8 }
   0xe   : > { %294 = sbr.rel (%p291_p9) target bundleno = 2151 (0x867), region = 56 }
  0x13   : > { %vm17651_vm0 = vcmask 27648   ;;  %vm335_vm1 = vcmask 24576   ;;  %v13181_v0 = vmov 0   ;;  %vm1456_vm2 = vcmask 1042432   ;;  %s13182_s21 = smov 8   ;;  %p326_p10 = scmp.lt.s32.totalorder %s13263_s13, 1 }
  0x14   : > { %333 = vst.msk [vmem:[#allocation2] sm:$0xf] %vm17651_vm0, %v13181_v0  ;;  %vm1457_vm3 = vcmask 1046532   ;;  %vm1005_vm5 = vsmask.f32 3328  ;;  %s13183_s27 = smov 4  }
  0x15   : > { %334 = vst.msk [vmem:[#allocation2 + $0x4] sm:$0xf] %vm17651_vm0, %v13181_v0  ;;  %vm13306_vm4 = vmor %vm1456_vm2, %vm1457_vm3  ;;  %s327_s22 = scalar_select %p326_p10, %s13263_s13, 1  ;;  %vm1006_vm6 = vsmask.f32 7440  ;;  %vm17650_vm13 = vcmask 519168  }
  0x16   : > { %336 = vst.msk [vmem:[#allocation2 + $0x8] sm:$0x1] %vm335_vm1, %v13181_v0  ;;  %vm13361_vm7 = vmor %vm1005_vm5, %vm1006_vm6  ;;  %vm841_vm8 = vsmask.f32 7938  ;;  %vm17649_vm9 = vsmask.f32 256 }
  0x17   : > { %337 = vst.msk [vmem:[#allocation2 + $0xc] sm:$0xf] %vm17651_vm0, %v13181_v0  ;;  %s12705_s23 = sshll.u32 %s327_s22, 7  ;;  %vm517_vm10 = vsmask.f32 4368  ;;  %vm13420_vm11 = vmand %vm17651_vm0, %vm841_vm8  ;;  %s13184_s28 = smov 12  }
  0x18   : > { %338 = vst.msk [vmem:[#allocation2 + $0x10] sm:$0xf] %vm17651_vm0, %v13181_v0  ;;  %s13380_s26 = scalar_lea.vmem %s17639_s0, %s12705_s23  ;;  %vm13427_vm12 = vmor %vm17649_vm9, %vm517_vm10  ;;  %s17655_s29 = smov 24   ;;  %vm3524_vm15 = vcmask 31744   ;;  %vm3606_vm2 = vcmask 97280   ;;  %vm3639_vm3 = vcmask 130048  }
  0x19   : > { %339 = vst.msk [vmem:[#allocation2 + $0x14] sm:$0x1] %vm335_vm1, %v13181_v0  ;;  %v484_v35 = vld [vmem:[%s13380_s26] sm:$0xf]  ;;  %v485_v36 = vld [vmem:[%s13380_s26 + $0x4] sm:$0xf]  ;;  %vm13567_vm14 = vmand %vm335_vm1, %vm17649_vm9 }
  0x1a   : > { %340 = vst.msk [vmem:[#allocation2 + $0x18] sm:$0xf] %vm17651_vm0, %v13181_v0  ;;  %v520_v37 = vshrl.u32 %v484_v35, 16  ;;  %v528_v38 = vshrl.u32 %v485_v36, 16  ;;  %v523_v40 = vshll.u32 %v484_v35, 16  ;;  %v531_v42 = vshll.u32 %v485_v36, 16 }
  0x1b   : > { %v1392_v1 = vld [vmem:[#allocation2] sm:$0xe]  ;;  %341 = vst.msk [vmem:[#allocation2 + $0x1c] sm:$0xf] %vm17651_vm0, %v13181_v0  ;;  %v486_v52 = vld [vmem:[%s13380_s26 + $0x8] sm:$0xf] }
  0x1c   : > { %v958_v2 = vld [vmem:[#allocation2 + $0x4] sm:$0xf]  ;;  %v11596_v4 = vrot.slane %v1392_v1, 9  ;;  %342 = vst.msk [vmem:[#allocation2 + $0x20] sm:$0x1] %vm335_vm1, %v13181_v0  ;;  %v522_v39 = vrot.slane %v520_v37, 7 }
  0x1d   : > { %v989_v5 = vld [vmem:[#allocation2 + $0x8] sm:$0x1]  ;;  %v1461_v6 = vrot.slane %v958_v2, 5  ;;  %343 = vst.msk [vmem:[#allocation2 + $0x24] sm:$0xf] %vm17651_vm0, %v13181_v0  ;;  %v1022_v14 = vshrl.u32 %v958_v2, 16 }
  0x1e   : > { %v1464_v7 = vrot.slane %v989_v5, 5  ;;  %344 = vst.msk [vmem:[#allocation2 + $0x28] sm:$0xf] %vm17651_vm0, %v13181_v0  ;;  %v957_v15 = vld [vmem:[#allocation2] sm:$0xf]  ;;  %v1018_v18 = vshll.u32 %v958_v2, 16  ;;  %v525_v43 = vor.u32 %v523_v40, %v522_v39 }
  0x1f   : > { %v1462_v8 = vsel %vm13306_vm4, %v11596_v4, %v1461_v6  ;;  %v1463_v9 = vrot.slane %v1461_v6, 4  ;;  %345 = vst.msk [vmem:[#allocation2 + $0x2c] sm:$0x1] %vm335_vm1, %v13181_v0  ;;  %v1009_v16 = vshrl.u32 %v957_v15, 16  ;;  %v1012_v17 = vshll.u32 %v957_v15, 16  ;;  %s13186_s14 = smov 20  }
  0x20   : > { %v2932_v10 = vunpack.c.l.b16 %v1462_v8  ;;  %346 = vst.msk [vmem:[#allocation2 + $0x30] sm:$0xf] %vm17651_vm0, %v13181_v0  ;;  %v1020_v21 = vrot.slane %v1018_v18, 5  ;;  %v1024_v22 = vrot.slane %v1022_v14, 4  ;;  %v1028_v23 = vshll.u32 %v989_v5, 16  ;;  %s13187_s16 = smov 32  }
  0x21   : > { %v1465_v11 = vsel %vm13306_vm4, %v1463_v9, %v1464_v7  ;;  %347 = vst.msk [vmem:[#allocation2 + $0x34] sm:$0xf] %vm17651_vm0, %v13181_v0  ;;  %v1011_v19 = vrot.slane %v1009_v16, 4  ;;  %v1014_v20 = vrot.slane %v1012_v17, 5  ;;  %v13407_v41 = vrot.slane %v528_v38, 7  ;;  %s13188_s17 = smov 28  }
  0x22   : > { %v2933_v12 = vunpack.c.l.b16 %v1465_v11  ;;  %348 = vst.msk [vmem:[#allocation2 + $0x38] sm:$0x1] %vm335_vm1, %v13181_v0  ;;  %v1025_v25 = vor.u32 %v1024_v22, %v1020_v21  ;;  %v1030_v29 = vrot.slane %v1028_v23, 5  ;;  %v526_v44 = vrot.slane %v522_v39, 4  ;;  %v843_v47 = vld [vmem:[#allocation2 + $0xc] sm:$0xf] }
  0x23   : > { %349 = vst.msk [vmem:[#allocation2 + $0x3c] sm:$0xf] %vm17651_vm0, %v13181_v0  ;;  %v1015_v24 = vor.u32 %v1014_v20, %v1011_v19  ;;  %v533_v45 = vor.u32 %v531_v42, %v13407_v41  ;;  %v844_v49 = vsel %vm13420_vm11, %v525_v43, %v843_v47  ;;  %v487_v53 = vld [vmem:[%s13380_s26 + $0xc] sm:$0xf]  ;;  %v537_v54 = vshrl.u32 %v486_v52, 16  ;;  %s13189_s22 = smov 16  }
  0x24   : > { %v2964_v13 = vpack.c.b16 %v2933_v12, %v2932_v10  ;;  %350 = vst.msk [vmem:[#allocation2 + $0x40] sm:$0xf] %vm17651_vm0, %v13181_v0  ;;  %v1026_v28 = vrot.slane %v1025_v25, 4  ;;  %v545_v55 = vshrl.u32 %v487_v53, 16  ;;  %v488_v56 = vld [vmem:[%s13380_s26 + $0x10] sm:$0xf] }
  0x25   : > { %351 = vst.msk [vmem:[#allocation2 + $0x44] sm:$0x1] %vm335_vm1, %v13181_v0  ;;  %v1016_v27 = vrot.slane %v1015_v24, 4  ;;  %v534_v50 = vsel %vm13427_vm12, %v526_v44, %v533_v45  ;;  %v489_v57 = vld [vmem:[%s13380_s26 + $0x14] sm:$0xf]  ;;  %v539_v58 = vrot.slane %v537_v54, 7 }
  0x26   : > { %2980 = vrot.lane.b32.xlu0 %v2964_v13, %s13182_s21  ;;  %352 = vst.msk [vmem:[#allocation2 + $0x48] sm:$0xf] %vm17651_vm0, %v13181_v0  ;;  %v1031_v31 = vsel %vm13361_vm7, %v1026_v28, %v1030_v29  ;;  %v540_v59 = vshll.u32 %v486_v52, 16  ;;  %v13533_v60 = vrot.slane %v545_v55, 7  ;;  %v548_v61 = vshll.u32 %v487_v53, 16  ;;  %s13190_s23 = smov 64  }
  0x27   : > { %353 = vst.msk [vmem:[#allocation2 + $0x4c] sm:$0xf] %vm17651_vm0, %v13181_v0  ;;  %v1021_v30 = vsel %vm13361_vm7, %v1016_v27, %v1020_v21  ;;  %v2853_v33 = vunpack.c.l.b16 %v1031_v31  ;;  %v554_v63 = vshrl.u32 %v488_v56, 16  ;;  %v562_v1 = vshrl.u32 %v489_v57, 16  ;;  %v852_v9 = vld [vmem:[#allocation2 + $0x18] sm:$0xf] }
  0x28   : > { %354 = vst.msk [vmem:[#allocation2 + $0x50] sm:$0x1] %vm335_vm1, %v13181_v0  ;;  %v2852_v32 = vunpack.c.l.b16 %v1021_v30  ;;  %v535_v2 = vrot.slane %v13407_v41, 4  ;;  %v542_v4 = vor.u32 %v540_v59, %v539_v58  ;;  %v543_v5 = vrot.slane %v539_v58, 4  ;;  %v849_v17 = vld [vmem:[#allocation2 + $0x14] sm:$0x1] }
  0x29   : > { %355 = vst.msk [vmem:[#allocation2 + $0x54] sm:$0xf] %vm17651_vm0, %v13181_v0  ;;  %v550_v6 = vor.u32 %v548_v61, %v13533_v60  ;;  %v552_v8 = vrot.slane %v13533_v60, 4  ;;  %v556_v13 = vrot.slane %v554_v63, 7  ;;  %v557_v14 = vshll.u32 %v488_v56, 16 }
  0x2a   : > { %356 = vst.msk [vmem:[#allocation2 + $0x58] sm:$0xf] %vm17651_vm0, %v13181_v0  ;;  %v2884_v34 = vpack.c.b16 %v2853_v33, %v2852_v32  ;;  %v13553_v15 = vrot.slane %v562_v1, 7  ;;  %v565_v16 = vshll.u32 %v489_v57, 16  ;;  %v853_v31 = vsel %vm13420_vm11, %v542_v4, %v852_v9  ;;  %v859_v33 = vld [vmem:[#allocation2 + $0x24] sm:$0xf] }
  0x2b   : > { %357 = vst.msk [vmem:[#allocation2 + $0x5c] sm:$0x1] %vm335_vm1, %v13181_v0  ;;  %v551_v30 = vsel %vm13427_vm12, %v543_v5, %v550_v6  ;;  %v850_v39 = vsel %vm13567_vm14, %v535_v2, %v849_v17  ;;  %v560_v40 = vrot.slane %v556_v13, 4  ;;  %v856_v42 = vld [vmem:[#allocation2 + $0x20] sm:$0x1]  ;;  %vm3672_vm5 = vcmask 162816  }
  0x2c   : > { %358 = vst.msk [vmem:[#allocation2 + $0x60] sm:$0xf] %vm17651_vm0, %v13181_v0  ;;  %v567_v41 = vor.u32 %v565_v16, %v13553_v15  ;;  %v863_v57 = vld [vmem:[#allocation2 + $0x2c] sm:$0x1]  ;;  %v857_v59 = vsel %vm13567_vm14, %v552_v8, %v856_v42  ;;  %v490_v60 = vld [vmem:[%s13380_s26 + $0x18] sm:$0xf] }
  0x2d   : > { %359 = vst.msk [vmem:[#allocation2 + $0x64] sm:$0xf] %vm17651_vm0, %v13181_v0  ;;  %v491_v61 = vld [vmem:[%s13380_s26 + $0x1c] sm:$0xf]  ;;  %v571_v2 = vshrl.u32 %v490_v60, 16  ;;  %vm3705_vm6 = vcmask 195584  }
  0x2e   : > { %360 = vst.msk [vmem:[#allocation2 + $0x68] sm:$0x1] %vm335_vm1, %v13181_v0  ;;  %2900 = vrot.lane.b32.xlu0 %v2884_v34, %s13183_s27  ;;  %v559_v34 = vor.u32 %v557_v14, %v556_v13  ;;  %v568_v58 = vsel %vm13427_vm12, %v560_v40, %v567_v41  ;;  %v579_v4 = vshrl.u32 %v491_v61, 16  ;;  %vm17654_vm10 = vcmask 228352  }
  0x2f   : > { %361 = vst.msk [vmem:[#allocation2 + $0x6c] sm:$0xf] %vm17651_vm0, %v13181_v0  ;;  %v573_v9 = vrot.slane %v571_v2, 7  ;;  %vm3861_vm9 = vcmask 1041408  }
  0x30   : > { %362 = vst.msk [vmem:[#allocation2 + $0x70] sm:$0xf] %vm17651_vm0, %v13181_v0  ;;  %v860_v54 = vsel %vm13420_vm11, %v559_v34, %v859_v33 }
  0x31   : > { %363 = vst.msk [vmem:[#allocation2 + $0x74] sm:$0x1] %vm335_vm1, %v13181_v0  ;;  %v577_v17 = vrot.slane %v573_v9, 4 }
  0x32   : > { %364 = vst.msk [vmem:[#allocation2 + $0x78] sm:$0xf] %vm17651_vm0, %v13181_v0 }
  0x33   : > { %365 = vst.msk [vmem:[#allocation2 + $0x7c] sm:$0xf] %vm17651_vm0, %v13181_v0 }
  0x34   : > { %366 = vst.msk [vmem:[#allocation2 + $0x80] sm:$0x1] %vm335_vm1, %v13181_v0 }
  0x35   : > { %367 = vst.msk [vmem:[#allocation2 + $0x84] sm:$0xf] %vm17651_vm0, %v13181_v0 }
  0x36   : > { %368 = vst.msk [vmem:[#allocation2 + $0x88] sm:$0xf] %vm17651_vm0, %v13181_v0 }
  0x37   : > { %369 = vst.msk [vmem:[#allocation2 + $0x8c] sm:$0x1] %vm335_vm1, %v13181_v0 }
  0x38   : > { %370 = vst.msk [vmem:[#allocation2 + $0x90] sm:$0xf] %vm17651_vm0, %v13181_v0 }
  0x39   : > { %371 = vst.msk [vmem:[#allocation2 + $0x94] sm:$0xf] %vm17651_vm0, %v13181_v0 }
  0x3a   : > { %372 = vst.msk [vmem:[#allocation2 + $0x98] sm:$0x1] %vm335_vm1, %v13181_v0 }
  0x3b   : > { %373 = vst.msk [vmem:[#allocation2 + $0x9c] sm:$0xf] %vm17651_vm0, %v13181_v0 }
  0x3c   : > { %374 = vst.msk [vmem:[#allocation2 + $0xa0] sm:$0xf] %vm17651_vm0, %v13181_v0 }
  0x3d   : > { %375 = vst.msk [vmem:[#allocation2 + $0xa4] sm:$0x1] %vm335_vm1, %v13181_v0 }
  0x3e   : > { %376 = vst.msk [vmem:[#allocation2 + $0xa8] sm:$0xf] %vm17651_vm0, %v13181_v0 }
  0x3f   : > { %377 = vst.msk [vmem:[#allocation2 + $0xac] sm:$0xf] %vm17651_vm0, %v13181_v0 }
  0x40   : > { %378 = vst.msk [vmem:[#allocation2 + $0xb0] sm:$0x1] %vm335_vm1, %v13181_v0 }
  0x41   : > { %379 = vst.msk [vmem:[#allocation2 + $0xb4] sm:$0xf] %vm17651_vm0, %v13181_v0 }
  0x42   : > { %380 = vst.msk [vmem:[#allocation2 + $0xb8] sm:$0xf] %vm17651_vm0, %v13181_v0 }
  0x43   : > { %381 = vst.msk [vmem:[#allocation2 + $0xbc] sm:$0x1] %vm335_vm1, %v13181_v0 }
  0x44   : > { %382 = vst.msk [vmem:[#allocation2 + $0xc0] sm:$0xf] %vm17651_vm0, %v13181_v0 }
  0x45   : > { %383 = vst.msk [vmem:[#allocation2 + $0xc4] sm:$0xf] %vm17651_vm0, %v13181_v0 }
  0x46   : > { %384 = vst.msk [vmem:[#allocation2 + $0xc8] sm:$0x1] %vm335_vm1, %v13181_v0 }
  0x47   : > { %385 = vst.msk [vmem:[#allocation2 + $0xcc] sm:$0xf] %vm17651_vm0, %v13181_v0 }
  0x48   : > { %386 = vst.msk [vmem:[#allocation2 + $0xd0] sm:$0xf] %vm17651_vm0, %v13181_v0 }
  0x49   : > { %387 = vst.msk [vmem:[#allocation2 + $0xd4] sm:$0x1] %vm335_vm1, %v13181_v0  ;;  %vm3573_vm1 = vcmask 64512  }
  0x4a   : > { %845 = vst [vmem:[#allocation2 + $0xc] sm:$0xf] %v844_v49 }
  0x4b   : > { %846 = vst.msk [vmem:[#allocation2 + $0x10] sm:$0xf] %vm17651_vm0, %v534_v50 }
  0x4c   : > { %389 = vst.msk [vmem:[#allocation3] sm:$0xf] %vm17650_vm13, %v13181_v0 }
  0x4d   : > { %390 = vst.msk [vmem:[#allocation3 + $0x4] sm:$0xf] %vm17650_vm13, %v13181_v0 }
  0x4e   : > { %393 = vst.msk [vmem:[#allocation3 + $0xc] sm:$0xf] %vm17650_vm13, %v13181_v0 }
  0x4f   : > { %394 = vst.msk [vmem:[#allocation3 + $0x10] sm:$0xf] %vm17650_vm13, %v13181_v0 }
  0x50   : > { %396 = vst.msk [vmem:[#allocation3 + $0x18] sm:$0xf] %vm17650_vm13, %v13181_v0 }
  0x51   : > { %397 = vst.msk [vmem:[#allocation3 + $0x1c] sm:$0xf] %vm17650_vm13, %v13181_v0  ;;  %v959_v7 = vld [vmem:[#allocation2 + $0xc] sm:$0xf] }
  0x52   : > { %v12722_v51 = vld [vmem:[#allocation2 + $0xc] sm:$0xff]  ;;  %399 = vst.msk [vmem:[#allocation3 + $0x24] sm:$0xf] %vm17650_vm13, %v13181_v0  ;;  %v1033_v11 = vshrl.u32 %v959_v7, 16  ;;  %v1036_v12 = vshll.u32 %v959_v7, 16 }
  0x53   : > { %400 = vst.msk [vmem:[#allocation3 + $0x28] sm:$0xf] %vm17650_vm13, %v13181_v0  ;;  %3076 = vrot.lane.b32.xlu1 %v12722_v51, %s13184_s28  ;;  %v13539_v62 = vld [vmem:[#allocation2 + $0x10] sm:$0xf]  ;;  %v1571_v23 = vld [vmem:[#allocation2 + $0xc] sm:$0xf] }
  0x54   : > { %402 = vst.msk [vmem:[#allocation3 + $0x30] sm:$0xf] %vm17650_vm13, %v13181_v0  ;;  %v1468_v10 = vrot.slane %v13539_v62, 5  ;;  %v13557_v18 = vld [vmem:[#allocation2 + $0x10] sm:$0xf]  ;;  %v1035_v19 = vrot.slane %v1033_v11, 4 }
  0x55   : > { %403 = vst.msk [vmem:[#allocation3 + $0x34] sm:$0xf] %vm17650_vm13, %v13181_v0  ;;  %v1038_v20 = vrot.slane %v1036_v12, 5  ;;  %v1042_v21 = vshll.u32 %v13539_v62, 16  ;;  %v1046_v22 = vshrl.u32 %v13539_v62, 16  ;;  %v1620_v25 = vshrl.u32 %v1571_v23, 16 }
  0x56   : > { %405 = vst.msk [vmem:[#allocation3 + $0x3c] sm:$0xf] %vm17650_vm13, %v13181_v0  ;;  %v1623_v27 = vshll.u32 %v1571_v23, 16  ;;  %v1629_v28 = vshll.u32 %v13557_v18, 16  ;;  %v1633_v29 = vshrl.u32 %v13557_v18, 16  ;;  %v569_v51 = vrot.slane %v13553_v15, 4 }
  0x57   : > { %406 = vst.msk [vmem:[#allocation3 + $0x40] sm:$0xf] %vm17650_vm13, %v13181_v0  ;;  %v1393_v32 = vld [vmem:[#allocation2 + $0xc] sm:$0xe]  ;;  %v1039_v36 = vor.u32 %v1038_v20, %v1035_v19  ;;  %v1622_v37 = vrot.slane %v1620_v25, 4  ;;  %v1044_v43 = vrot.slane %v1042_v21, 5 }
  0x58   : > { %408 = vst.msk [vmem:[#allocation3 + $0x48] sm:$0xf] %vm17650_vm13, %v13181_v0  ;;  %v2003_v35 = vld [vmem:[#allocation2 + $0xc] sm:$0xe]  ;;  %v1625_v38 = vrot.slane %v1623_v27, 5  ;;  %v1048_v44 = vrot.slane %v1046_v22, 4  ;;  %v864_v7 = vsel %vm13567_vm14, %v569_v51, %v863_v57 }
  0x59   : > { %409 = vst.msk [vmem:[#allocation3 + $0x4c] sm:$0xf] %vm17650_vm13, %v13181_v0  ;;  %v1631_v47 = vrot.slane %v1629_v28, 5  ;;  %v1635_v49 = vrot.slane %v1633_v29, 4  ;;  %v11597_v50 = vrot.slane %v1393_v32, 9  ;;  %v11612_v52 = vrot.slane %v2003_v35, 9 }
  0x5a   : > { %411 = vst.msk [vmem:[#allocation3 + $0x54] sm:$0xf] %vm17650_vm13, %v13181_v0  ;;  %v1626_v45 = vor.u32 %v1625_v38, %v1622_v37  ;;  %v2069_v53 = vrot.slane %v13557_v18, 5  ;;  %v1040_v55 = vrot.slane %v1039_v36, 4  ;;  %v1049_v63 = vor.u32 %v1048_v44, %v1044_v43 }
  0x5b   : > { %412 = vst.msk [vmem:[#allocation3 + $0x58] sm:$0xf] %vm17650_vm13, %v13181_v0  ;;  %v1636_v1 = vor.u32 %v1635_v49, %v1631_v47  ;;  %v13605_v5 = vsel %vm13306_vm4, %v11597_v50, %v1468_v10  ;;  %v1470_v6 = vrot.slane %v1468_v10, 4  ;;  %v13614_v11 = vrot.slane %v579_v4, 7 }
  0x5c   : > { %414 = vst.msk [vmem:[#allocation3 + $0x60] sm:$0xf] %vm17650_vm13, %v13181_v0  ;;  %v1627_v56 = vrot.slane %v1626_v45, 4  ;;  %v2070_v8 = vsel %vm13306_vm4, %v11612_v52, %v2069_v53  ;;  %v582_v12 = vshll.u32 %v491_v61, 16  ;;  %v2071_v13 = vrot.slane %v2069_v53, 4 }
  0x5d   : > { %415 = vst.msk [vmem:[#allocation3 + $0x64] sm:$0xf] %vm17650_vm13, %v13181_v0  ;;  %v1045_v14 = vsel %vm13361_vm7, %v1040_v55, %v1044_v43  ;;  %v574_v10 = vshll.u32 %v490_v60, 16  ;;  %v13620_v15 = vrot.slane %v1049_v63, 4  ;;  %v13622_v16 = vrot.slane %v1636_v1, 4 }
  0x5e   : > { %417 = vst.msk [vmem:[#allocation3 + $0x6c] sm:$0xf] %vm17650_vm13, %v13181_v0  ;;  %v1632_v62 = vsel %vm13361_vm7, %v1627_v56, %v1631_v47  ;;  %v584_v18 = vor.u32 %v582_v12, %v13614_v11  ;;  %v2934_v19 = vunpack.c.l.b16 %v13605_v5  ;;  %v3188_v21 = vunpack.c.l.b16 %v2070_v8 }
  0x5f   : > { %418 = vst.msk [vmem:[#allocation3 + $0x70] sm:$0xf] %vm17650_vm13, %v13181_v0  ;;  %v13630_v32 = vunpack.c.l.b16 %v1632_v62  ;;  %v13635_v37 = vor.u32 %v574_v10, %v573_v9 }
  0x60   : > { %420 = vst.msk [vmem:[#allocation3 + $0x78] sm:$0xf] %vm17650_vm13, %v13181_v0  ;;  %v585_v38 = vsel %vm13427_vm12, %v577_v17, %v584_v18 }
  0x61   : > { %421 = vst.msk [vmem:[#allocation3 + $0x7c] sm:$0xf] %vm17650_vm13, %v13181_v0 }
  0x62   : > { %423 = vst.msk [vmem:[#allocation3 + $0x84] sm:$0xf] %vm17650_vm13, %v13181_v0 }
  0x63   : > { %424 = vst.msk [vmem:[#allocation3 + $0x88] sm:$0xf] %vm17650_vm13, %v13181_v0 }
  0x64   : > { %426 = vst.msk [vmem:[#allocation3 + $0x90] sm:$0xf] %vm17650_vm13, %v13181_v0 }
  0x65   : > { %427 = vst.msk [vmem:[#allocation3 + $0x94] sm:$0xf] %vm17650_vm13, %v13181_v0 }
  0x66   : > { %429 = vst.msk [vmem:[#allocation3 + $0x9c] sm:$0xf] %vm17650_vm13, %v13181_v0 }
  0x67   : > { %430 = vst.msk [vmem:[#allocation3 + $0xa0] sm:$0xf] %vm17650_vm13, %v13181_v0 }
  0x68   : > { %432 = vst.msk [vmem:[#allocation3 + $0xa8] sm:$0xf] %vm17650_vm13, %v13181_v0 }
  0x69   : > { %433 = vst.msk [vmem:[#allocation3 + $0xac] sm:$0xf] %vm17650_vm13, %v13181_v0 }
  0x6a   : > { %435 = vst.msk [vmem:[#allocation3 + $0xb4] sm:$0xf] %vm17650_vm13, %v13181_v0 }
  0x6b   : > { %436 = vst.msk [vmem:[#allocation3 + $0xb8] sm:$0xf] %vm17650_vm13, %v13181_v0 }
  0x6c   : > { %438 = vst.msk [vmem:[#allocation3 + $0xc0] sm:$0xf] %vm17650_vm13, %v13181_v0 }
  0x6d   : > { %439 = vst.msk [vmem:[#allocation3 + $0xc4] sm:$0xf] %vm17650_vm13, %v13181_v0 }
  0x6e   : > { %441 = vst.msk [vmem:[#allocation3 + $0xcc] sm:$0xf] %vm17650_vm13, %v13181_v0 }
  0x6f   : > { %442 = vst.msk [vmem:[#allocation3 + $0xd0] sm:$0xf] %vm17650_vm13, %v13181_v0 }
  0x70   : > { %444 = vst.msk [vmem:[#allocation4] sm:$0xf] %vm17650_vm13, %v13181_v0 }
  0x71   : > { %446 = vst.msk [vmem:[#allocation4 + $0x8] sm:$0xf] %vm17650_vm13, %v13181_v0 }
  0x72   : > { %448 = vst.msk [vmem:[#allocation4 + $0x10] sm:$0xf] %vm17650_vm13, %v13181_v0 }
  0x73   : > { %450 = vst.msk [vmem:[#allocation4 + $0x18] sm:$0xf] %vm17650_vm13, %v13181_v0 }
  0x74   : > { %452 = vst.msk [vmem:[#allocation4 + $0x20] sm:$0xf] %vm17650_vm13, %v13181_v0 }
  0x75   : > { %454 = vst.msk [vmem:[#allocation4 + $0x28] sm:$0xf] %vm17650_vm13, %v13181_v0 }
  0x76   : > { %456 = vst.msk [vmem:[#allocation4 + $0x30] sm:$0xf] %vm17650_vm13, %v13181_v0 }
  0x77   : > { %458 = vst.msk [vmem:[#allocation4 + $0x38] sm:$0xf] %vm17650_vm13, %v13181_v0 }
  0x78   : > { %460 = vst.msk [vmem:[#allocation4 + $0x40] sm:$0xf] %vm17650_vm13, %v13181_v0 }
  0x79   : > { %462 = vst.msk [vmem:[#allocation4 + $0x48] sm:$0xf] %vm17650_vm13, %v13181_v0 }
  0x7a   : > { %464 = vst.msk [vmem:[#allocation5] sm:$0xf] %vm17650_vm13, %v13181_v0 }
  0x7b   : > { %466 = vst.msk [vmem:[#allocation5 + $0x8] sm:$0xf] %vm17650_vm13, %v13181_v0 }
  0x7c   : > { %468 = vst.msk [vmem:[#allocation5 + $0x10] sm:$0xf] %vm17650_vm13, %v13181_v0 }
  0x7d   : > { %470 = vst.msk [vmem:[#allocation5 + $0x18] sm:$0xf] %vm17650_vm13, %v13181_v0 }
  0x7e   : > { %472 = vst.msk [vmem:[#allocation5 + $0x20] sm:$0xf] %vm17650_vm13, %v13181_v0 }
  0x7f   : > { %474 = vst.msk [vmem:[#allocation5 + $0x28] sm:$0xf] %vm17650_vm13, %v13181_v0 }
  0x80   : > { %476 = vst.msk [vmem:[#allocation5 + $0x30] sm:$0xf] %vm17650_vm13, %v13181_v0 }
  0x81   : > { %478 = vst.msk [vmem:[#allocation5 + $0x38] sm:$0xf] %vm17650_vm13, %v13181_v0 }
  0x82   : > { %480 = vst.msk [vmem:[#allocation5 + $0x40] sm:$0xf] %vm17650_vm13, %v13181_v0 }
  0x83   : > { %482 = vst.msk [vmem:[#allocation5 + $0x48] sm:$0xf] %vm17650_vm13, %v13181_v0  ;;  %vm17653_vm13 = vcmask 261120  }
  0x84   : > { %854 = vst [vmem:[#allocation2 + $0x18] sm:$0xf] %v853_v31  ;;  %v13628_v31 = vunpack.c.l.b16 %v1045_v14 }
  0x85   : > { %855 = vst.msk [vmem:[#allocation2 + $0x1c] sm:$0xf] %vm17651_vm0, %v551_v30 }
  0x86   : > { %851 = vst [vmem:[#allocation2 + $0x14] sm:$0x1] %v850_v39 }
  0x87   : > { %861 = vst [vmem:[#allocation2 + $0x24] sm:$0xf] %v860_v54 }
  0x88   : > { %862 = vst.msk [vmem:[#allocation2 + $0x28] sm:$0xf] %vm17651_vm0, %v568_v58 }
  0x89   : > { %858 = vst [vmem:[#allocation2 + $0x20] sm:$0x1] %v857_v59 }
  0x8a   : > { %865 = vst [vmem:[#allocation2 + $0x2c] sm:$0x1] %v864_v7 }
  0x8b   : > { %v2004_v20 = vld [vmem:[#allocation2 + $0x18] sm:$0xe]  ;;  %869 = vst.msk [vmem:[#allocation2 + $0x34] sm:$0xf] %vm17651_vm0, %v585_v38 }
  0x8c   : > { %v2612_v22 = vld [vmem:[#allocation2 + $0x18] sm:$0xe]  ;;  %v13626_v28 = vld [vmem:[#allocation2 + $0x1c] sm:$0xf]  ;;  %v11613_v29 = vrot.slane %v2004_v20, 9 }
  0x8d   : > { %v2180_v23 = vld [vmem:[#allocation2 + $0x18] sm:$0xf]  ;;  %v11628_v30 = vrot.slane %v2612_v22, 9  ;;  %v990_v33 = vld [vmem:[#allocation2 + $0x14] sm:$0x1]  ;;  %v2076_v34 = vrot.slane %v13626_v28, 5 }
  0x8e   : > { %v12723_v25 = vld [vmem:[#allocation2 + $0x18] sm:$0xff]  ;;  %v13633_v35 = vld [vmem:[#allocation2 + $0x14] sm:$0x1]  ;;  %v2229_v36 = vshrl.u32 %v2180_v23, 16  ;;  %v1471_v39 = vrot.slane %v990_v33, 5  ;;  %v2232_v42 = vshll.u32 %v2180_v23, 16 }
  0x8f   : > { %v12738_v27 = vld [vmem:[#allocation2 + $0x18] sm:$0xff]  ;;  %3078 = vrot.lane.b32.xlu1 %v12723_v25, %s13184_s28  ;;  %v2072_v40 = vrot.slane %v13633_v35, 5  ;;  %v1052_v43 = vshll.u32 %v990_v33, 16  ;;  %v2077_v44 = vsel %vm13306_vm4, %v11613_v29, %v2076_v34  ;;  %v2078_v45 = vrot.slane %v2076_v34, 4  ;;  %v12739_v60 = vld [vmem:[#allocation2 + $0x24] sm:$0xff] }
  0x90   : > { %3332 = vrot.lane.b32.xlu2 %v12738_v27, %s17655_s29  ;;  %v2181_v41 = vld [vmem:[#allocation2 + $0x1c] sm:$0xf]  ;;  %v2231_v49 = vrot.slane %v2229_v36, 4  ;;  %v1472_v50 = vsel %vm13306_vm4, %v1470_v6, %v1471_v39  ;;  %v13646_v51 = vld [vmem:[#allocation2 + $0x20] sm:$0x1]  ;;  %v3190_v52 = vunpack.c.l.b16 %v2077_v44  ;;  %v2234_v55 = vrot.slane %v2232_v42, 5 }
  0x91   : > { %v2678_v47 = vrot.slane %v2181_v41, 5  ;;  %v2073_v53 = vsel %vm13306_vm4, %v2071_v13, %v2072_v40  ;;  %v2212_v54 = vld [vmem:[#allocation2 + $0x20] sm:$0x1]  ;;  %v2935_v56 = vunpack.c.l.b16 %v1472_v50  ;;  %v2079_v57 = vrot.slane %v13646_v51, 5  ;;  %v2613_v8 = vld [vmem:[#allocation2 + $0x24] sm:$0xe] }
  0x92   : > { %v3189_v58 = vunpack.c.l.b16 %v2073_v53  ;;  %v2681_v63 = vrot.slane %v2212_v54, 5  ;;  %v2235_v2 = vor.u32 %v2234_v55, %v2231_v49  ;;  %v2238_v7 = vshll.u32 %v2181_v41, 16  ;;  %v13657_v62 = vld [vmem:[#allocation2 + $0x28] sm:$0xf]  ;;  %v13660_v20 = vld [vmem:[#allocation2 + $0x2c] sm:$0x1] }
  0x93   : > { %v2679_v59 = vsel %vm13306_vm4, %v11628_v30, %v2678_v47  ;;  %v2680_v61 = vrot.slane %v2678_v47, 4  ;;  %v2965_v4 = vpack.c.b16 %v2935_v56, %v2934_v19  ;;  %v2080_v5 = vsel %vm13306_vm4, %v2078_v45, %v2079_v57  ;;  %v1573_v27 = vld [vmem:[#allocation2 + $0x18] sm:$0xf] }
  0x94   : > { %v3444_v1 = vunpack.c.l.b16 %v2679_v59  ;;  %v3220_v6 = vpack.c.b16 %v3189_v58, %v3188_v21  ;;  %v3191_v9 = vunpack.c.l.b16 %v2080_v5  ;;  %v2236_v13 = vrot.slane %v2235_v2, 4 }
  0x95   : > { %v2682_v12 = vsel %vm13306_vm4, %v2680_v61, %v2681_v63  ;;  %v2242_v14 = vshrl.u32 %v2181_v41, 16  ;;  %2982 = vrot.lane.b32.xlu0 %v2965_v4, %s13182_s21  ;;  %v2240_v17 = vrot.slane %v2238_v7, 5  ;;  %v2248_v18 = vshll.u32 %v2212_v54, 16  ;;  %v961_v54 = vld [vmem:[#allocation2 + $0x18] sm:$0xf] }
  0x96   : > { %v3445_v10 = vunpack.c.l.b16 %v2682_v12  ;;  %v1054_v19 = vrot.slane %v1052_v43, 5  ;;  %v3221_v21 = vpack.c.b16 %v3191_v9, %v3190_v52  ;;  %v1639_v23 = vshll.u32 %v13633_v35, 16  ;;  %v13692_v4 = vld [vmem:[#allocation2 + $0x20] sm:$0x1]  ;;  %v2182_v9 = vld [vmem:[#allocation2 + $0x24] sm:$0xf] }
  0x97   : > { %3334 = vrot.lane.b32.xlu1 %v12739_v60, %s17655_s29  ;;  %v2244_v22 = vrot.slane %v2242_v14, 4  ;;  %v11629_v25 = vrot.slane %v2613_v8, 9  ;;  %v2241_v30 = vsel %vm13361_vm7, %v2236_v13, %v2240_v17  ;;  %v2250_v33 = vrot.slane %v2248_v18, 5 }
  0x98   : > { %3236 = vrot.lane.b32.xlu2 %v3220_v6, %s13186_s14  ;;  %v3476_v29 = vpack.c.b16 %v3445_v10, %v3444_v1  ;;  %v1055_v34 = vsel %vm13361_vm7, %v13620_v15, %v1054_v19  ;;  %v3364_v39 = vunpack.c.l.b16 %v2241_v30  ;;  %v1641_v41 = vrot.slane %v1639_v23, 5 }
  0x99   : > { %v2245_v36 = vor.u32 %v2244_v22, %v2240_v17  ;;  %v2855_v40 = vunpack.c.l.b16 %v1055_v34  ;;  %v2685_v42 = vrot.slane %v13657_v62, 5  ;;  %v2688_v35 = vrot.slane %v13660_v20, 5 }
  0x9a   : > { %v1644_v43 = vshrl.u32 %v1573_v27, 16  ;;  %v1647_v44 = vshll.u32 %v1573_v27, 16  ;;  %v1642_v49 = vsel %vm13361_vm7, %v13622_v16, %v1641_v41  ;;  %v1653_v15 = vshll.u32 %v13626_v28, 16 }
  0x9b   : > { %v2246_v45 = vrot.slane %v2245_v36, 4  ;;  %v2885_v47 = vpack.c.b16 %v2855_v40, %v13628_v31  ;;  %v3109_v38 = vunpack.c.l.b16 %v1642_v49  ;;  %v2686_v50 = vsel %vm13306_vm4, %v11629_v25, %v2685_v42  ;;  %v13682_v31 = vld [vmem:[#allocation2 + $0x1c] sm:$0xf]  ;;  %v1575_v40 = vld [vmem:[#allocation2 + $0x24] sm:$0xf] }
  0x9c   : > { %v2687_v52 = vrot.slane %v2685_v42, 4  ;;  %v1646_v53 = vrot.slane %v1644_v43, 4  ;;  %v3446_v56 = vunpack.c.l.b16 %v2686_v50  ;;  %v1649_v57 = vrot.slane %v1647_v44, 5 }
  0x9d   : > { %v2251_v55 = vsel %vm13361_vm7, %v2246_v45, %v2250_v33  ;;  %v1655_v58 = vrot.slane %v1653_v15, 5  ;;  %3238 = vrot.lane.b32.xlu0 %v3221_v21, %s13186_s14  ;;  %v3140_v59 = vpack.c.b16 %v3109_v38, %v13630_v32  ;;  %v1657_v61 = vshrl.u32 %v13626_v28, 16 }
  0x9e   : > { %v3365_v16 = vunpack.c.l.b16 %v2251_v55  ;;  %v2689_v60 = vsel %vm13306_vm4, %v2687_v52, %v2688_v35  ;;  %v1650_v1 = vor.u32 %v1649_v57, %v1646_v53  ;;  %v1663_v2 = vshll.u32 %v13646_v51, 16  ;;  %v13710_v52 = vld [vmem:[#allocation2 + $0x28] sm:$0xf]  ;;  %v13712_v57 = vld [vmem:[#allocation2 + $0x2c] sm:$0x1] }
  0x9f   : > { %3492 = vrot.lane.b32.xlu1 %v3476_v29, %s13187_s16  ;;  %v3447_v63 = vunpack.c.l.b16 %v2689_v60  ;;  %v1057_v5 = vshrl.u32 %v961_v54, 16  ;;  %v1659_v7 = vrot.slane %v1657_v61, 4  ;;  %v1060_v32 = vshll.u32 %v961_v54, 16 }
  0xa0   : > { %2902 = vrot.lane.b32.xlu2 %v2885_v47, %s13183_s27  ;;  %v3396_v6 = vpack.c.b16 %v3365_v16, %v3364_v39  ;;  %v1066_v8 = vshll.u32 %v13682_v31, 16  ;;  %v1651_v28 = vrot.slane %v1650_v1, 4  ;;  %v1665_v13 = vrot.slane %v1663_v2, 5  ;;  %v866_v2 = vld [vmem:[#allocation2 + $0x30] sm:$0xf] }
  0xa1   : > { %v13695_v12 = vpack.c.b16 %v3447_v63, %v3446_v56  ;;  %v1059_v14 = vrot.slane %v1057_v5, 4  ;;  %v1660_v10 = vor.u32 %v1659_v7, %v1655_v58  ;;  %v1062_v17 = vrot.slane %v1060_v32, 5  ;;  %v870_v5 = vld [vmem:[#allocation2 + $0x38] sm:$0x1] }
  0xa2   : > { %v1068_v18 = vrot.slane %v1066_v8, 5  ;;  %v1070_v19 = vshrl.u32 %v13682_v31, 16  ;;  %v1656_v51 = vsel %vm13361_vm7, %v1651_v28, %v1655_v58  ;;  %v1076_v21 = vshll.u32 %v13692_v4, 16 }
  0xa3   : > { %v2253_v22 = vshrl.u32 %v2182_v9, 16  ;;  %v2256_v23 = vshll.u32 %v2182_v9, 16  ;;  %v1661_v25 = vrot.slane %v1660_v10, 4  ;;  %v3110_v27 = vunpack.c.l.b16 %v1656_v51  ;;  %v13722_v9 = vld [vmem:[#allocation2 + $0x34] sm:$0xf] }
  0xa4   : > { %v1063_v29 = vor.u32 %v1062_v17, %v1059_v14  ;;  %v1072_v30 = vrot.slane %v1070_v19, 4  ;;  %v1078_v33 = vrot.slane %v1076_v21, 5  ;;  %v2262_v39 = vshll.u32 %v13657_v62, 16  ;;  %v1394_v17 = vld [vmem:[#allocation2 + $0x18] sm:$0xe] }
  0xa5   : > { %v2255_v34 = vrot.slane %v2253_v22, 4  ;;  %v2258_v36 = vrot.slane %v2256_v23, 5  ;;  %3412 = vrot.lane.b32.xlu0 %v3396_v6, %s13188_s17  ;;  %v1666_v41 = vsel %vm13361_vm7, %v1661_v25, %v1665_v13  ;;  %v2266_v43 = vshrl.u32 %v13657_v62, 16 }
  0xa6   : > { %v1064_v42 = vrot.slane %v1063_v29, 4  ;;  %v1073_v35 = vor.u32 %v1072_v30, %v1068_v18  ;;  %v3111_v44 = vunpack.c.l.b16 %v1666_v41  ;;  %v2264_v47 = vrot.slane %v2262_v39, 5 }
  0xa7   : > { %3156 = vrot.lane.b32.xlu1 %v3140_v59, %s13189_s22  ;;  %v2259_v45 = vor.u32 %v2258_v36, %v2255_v34  ;;  %v2272_v49 = vshll.u32 %v13660_v20, 16  ;;  %v2268_v50 = vrot.slane %v2266_v43, 4  ;;  %v1668_v53 = vshrl.u32 %v1575_v40, 16 }
  0xa8   : > { %v1069_v15 = vsel %vm13361_vm7, %v1064_v42, %v1068_v18  ;;  %v1074_v38 = vrot.slane %v1073_v35, 4  ;;  %v3141_v54 = vpack.c.b16 %v3111_v44, %v3110_v27  ;;  %v1671_v20 = vshll.u32 %v1575_v40, 16  ;;  %v12724_v40 = vld [vmem:[#allocation2 + $0x24] sm:$0xff] }
  0xa9   : > { %v2856_v55 = vunpack.c.l.b16 %v1069_v15  ;;  %v2260_v56 = vrot.slane %v2259_v45, 4  ;;  %v2274_v62 = vrot.slane %v2272_v49, 5  ;;  %v2269_v16 = vor.u32 %v2268_v50, %v2264_v47  ;;  %v964_v44 = vld [vmem:[#allocation2 + $0x28] sm:$0xf]  ;;  %v992_v49 = vld [vmem:[#allocation2 + $0x2c] sm:$0x1] }
  0xaa   : > { %v1079_v58 = vsel %vm13361_vm7, %v1074_v38, %v1078_v33  ;;  %v1670_v59 = vrot.slane %v1668_v53, 4  ;;  %3158 = vrot.lane.b32.xlu2 %v3141_v54, %s13189_s22  ;;  %v1677_v63 = vshll.u32 %v13710_v52, 16  ;;  %v1681_v1 = vshrl.u32 %v13710_v52, 16 }
  0xab   : > { %v2857_v60 = vunpack.c.l.b16 %v1079_v58  ;;  %v2265_v61 = vsel %vm13361_vm7, %v2260_v56, %v2264_v47  ;;  %v2270_v6 = vrot.slane %v2269_v16, 4  ;;  %v1673_v32 = vrot.slane %v1671_v20, 5  ;;  %v1395_v58 = vld [vmem:[#allocation2 + $0x24] sm:$0xe] }
  0xac   : > { %v3366_v7 = vunpack.c.l.b16 %v2265_v61  ;;  %v1687_v8 = vshll.u32 %v13712_v57, 16  ;;  %v1679_v13 = vrot.slane %v1677_v63, 5  ;;  %v1683_v14 = vrot.slane %v1681_v1, 4 }
  0xad   : > { %v2886_v28 = vpack.c.b16 %v2857_v60, %v2856_v55  ;;  %v586_v10 = vrot.slane %v13614_v11, 4  ;;  %3494 = vrot.lane.b32.xlu0 %v13695_v12, %s13187_s16  ;;  %v2275_v18 = vsel %vm13361_vm7, %v2270_v6, %v2274_v62  ;;  %v1674_v19 = vor.u32 %v1673_v32, %v1670_v59  ;;  %v963_v12 = vld [vmem:[#allocation2 + $0x24] sm:$0xf] }
  0xae   : > { %v1689_v51 = vrot.slane %v1687_v8, 5  ;;  %v867_v21 = vsel %vm13420_vm11, %v13635_v37, %v866_v2  ;;  %v3367_v22 = vunpack.c.l.b16 %v2275_v18  ;;  %v1684_v23 = vor.u32 %v1683_v14, %v1679_v13  ;;  %v2005_v18 = vld [vmem:[#allocation2 + $0x24] sm:$0xe] }
  0xaf   : > { %2904 = vrot.lane.b32.xlu1 %v2886_v28, %s13183_s27  ;;  %868 = vst [vmem:[#allocation2 + $0x30] sm:$0xf] %v867_v21  ;;  %v871_v11 = vsel %vm13567_vm14, %v586_v10, %v870_v5  ;;  %v2286_v25 = vshll.u32 %v13722_v9, 16  ;;  %v1675_v27 = vrot.slane %v1674_v19, 4  ;;  %v2290_v29 = vshrl.u32 %v13722_v9, 16 }
  0xb0   : > { %872 = vst [vmem:[#allocation2 + $0x38] sm:$0x1] %v871_v11  ;;  %v11598_v30 = vrot.slane %v1394_v17, 9  ;;  %v1475_v33 = vrot.slane %v13682_v31, 5  ;;  %v3397_v34 = vpack.c.b16 %v3367_v22, %v3366_v7  ;;  %v1685_v37 = vrot.slane %v1684_v23, 4 }
  0xb1   : > { %v13738_v36 = vrot.slane %v2286_v25, 5  ;;  %v1478_v39 = vrot.slane %v13692_v4, 5  ;;  %v1680_v41 = vsel %vm13361_vm7, %v1675_v27, %v1679_v13  ;;  %v2292_v42 = vrot.slane %v2290_v29, 4 }
  0xb2   : > { %v1476_v35 = vsel %vm13306_vm4, %v11598_v30, %v1475_v33  ;;  %v1477_v43 = vrot.slane %v1475_v33, 4  ;;  %3414 = vrot.lane.b32.xlu2 %v3397_v34, %s13188_s17  ;;  %v1690_v31 = vsel %vm13361_vm7, %v1685_v37, %v1689_v51  ;;  %v3112_v45 = vunpack.c.l.b16 %v1680_v41 }
  0xb3   : > { %v2936_v47 = vunpack.c.l.b16 %v1476_v35  ;;  %v1081_v15 = vshrl.u32 %v963_v12, 16  ;;  %v3113_v4 = vunpack.c.l.b16 %v1690_v31  ;;  %v2293_v38 = vor.u32 %v2292_v42, %v13738_v36 }
  0xb4   : > { %v1479_v50 = vsel %vm13306_vm4, %v1477_v43, %v1478_v39  ;;  %v1084_v53 = vshll.u32 %v963_v12, 16  ;;  %v1090_v56 = vshll.u32 %v964_v44, 16  ;;  %v1094_v62 = vshrl.u32 %v964_v44, 16 }
  0xb5   : > { %v2937_v54 = vunpack.c.l.b16 %v1479_v50  ;;  %v1083_v55 = vrot.slane %v1081_v15, 4  ;;  %3080 = vrot.lane.b32.xlu0 %v12724_v40, %s13184_s28  ;;  %v3142_v16 = vpack.c.b16 %v3113_v4, %v3112_v45  ;;  %v2294_v20 = vrot.slane %v2293_v38, 4 }
  0xb6   : > { %v2184_v59 = vld [vmem:[#allocation2 + $0x30] sm:$0xf]  ;;  %v1086_v60 = vrot.slane %v1084_v53, 5  ;;  %v1100_v61 = vshll.u32 %v992_v49, 16  ;;  %v1092_v6 = vrot.slane %v1090_v56, 5  ;;  %v1096_v8 = vrot.slane %v1094_v62, 4 }
  0xb7   : > { %v13752_v63 = vld [vmem:[#allocation2 + $0x38] sm:$0x1]  ;;  %v2277_v1 = vshrl.u32 %v2184_v59, 16  ;;  %v2280_v2 = vshll.u32 %v2184_v59, 16  ;;  %v2966_v5 = vpack.c.b16 %v2937_v54, %v2936_v47  ;;  %3160 = vrot.lane.b32.xlu1 %v3142_v16, %s13189_s22  ;;  %v11599_v10 = vrot.slane %v1395_v58, 9  ;;  %v12740_v19 = vld [vmem:[#allocation2 + $0x30] sm:$0xff] }
  0xb8   : > { %v2296_v7 = vshll.u32 %v13752_v63, 16  ;;  %v1087_v32 = vor.u32 %v1086_v60, %v1083_v55  ;;  %v1102_v28 = vrot.slane %v1100_v61, 5  ;;  %v1482_v17 = vrot.slane %v964_v44, 5  ;;  %v1577_v34 = vld [vmem:[#allocation2 + $0x30] sm:$0xf] }
  0xb9   : > { %v2279_v13 = vrot.slane %v2277_v1, 4  ;;  %v2282_v14 = vrot.slane %v2280_v2, 5  ;;  %v1097_v22 = vor.u32 %v1096_v8, %v1092_v6  ;;  %v1485_v23 = vrot.slane %v992_v49, 5  ;;  %v1578_v47 = vld [vmem:[#allocation2 + $0x34] sm:$0xf] }
  0xba   : > { %v2298_v51 = vrot.slane %v2296_v7, 5  ;;  %v1088_v21 = vrot.slane %v1087_v32, 4  ;;  %2984 = vrot.lane.b32.xlu2 %v2966_v5, %s13182_s21  ;;  %v1483_v25 = vsel %vm13306_vm4, %v11599_v10, %v1482_v17  ;;  %v1484_v12 = vrot.slane %v1482_v17, 4  ;;  %v1606_v54 = vld [vmem:[#allocation2 + $0x38] sm:$0x1] }
  0xbb   : > { %v2283_v11 = vor.u32 %v2282_v14, %v2279_v13  ;;  %v1098_v30 = vrot.slane %v1097_v22, 4  ;;  %v11614_v33 = vrot.slane %v2005_v18, 9  ;;  %v2938_v41 = vunpack.c.l.b16 %v1483_v25  ;;  %v2006_v55 = vld [vmem:[#allocation2 + $0x30] sm:$0xe]  ;;  %v492_v8 = vld [vmem:[%s13380_s26 + $0x20] sm:$0xf] }
  0xbc   : > { %v2299_v27 = vsel %vm13361_vm7, %v2294_v20, %v2298_v51  ;;  %v1093_v29 = vsel %vm13361_vm7, %v1088_v21, %v1092_v6  ;;  %v1486_v40 = vsel %vm13306_vm4, %v1484_v12, %v1485_v23  ;;  %v2083_v43 = vrot.slane %v13710_v52, 5  ;;  %v2614_v20 = vld [vmem:[#allocation2 + $0x30] sm:$0xe]  ;;  %v493_v23 = vld [vmem:[%s13380_s26 + $0x24] sm:$0xf] }
  0xbd   : > { %v2284_v37 = vrot.slane %v2283_v11, 4  ;;  %v2858_v39 = vunpack.c.l.b16 %v1093_v29  ;;  %3336 = vrot.lane.b32.xlu0 %v12740_v19, %s17655_s29  ;;  %v3369_v42 = vunpack.c.l.b16 %v2299_v27  ;;  %v1103_v35 = vsel %vm13361_vm7, %v1098_v30, %v1102_v28 }
  0xbe   : > { %v2086_v44 = vrot.slane %v13712_v57, 5  ;;  %v2859_v45 = vunpack.c.l.b16 %v1103_v35  ;;  %v1692_v49 = vshrl.u32 %v1577_v34, 16  ;;  %v1695_v15 = vshll.u32 %v1577_v34, 16  ;;  %v1396_v35 = vld [vmem:[#allocation2 + $0x30] sm:$0xe] }
  0xbf   : > { %v2289_v31 = vsel %vm13361_vm7, %v2284_v37, %v13738_v36  ;;  %v2939_v38 = vunpack.c.l.b16 %v1486_v40  ;;  %v2084_v50 = vsel %vm13306_vm4, %v11614_v33, %v2083_v43  ;;  %v2085_v53 = vrot.slane %v2083_v43, 4  ;;  %v13792_v37 = vld [vmem:[#allocation2 + $0x34] sm:$0xf] }
  0xc0   : > { %v3368_v4 = vunpack.c.l.b16 %v2289_v31  ;;  %v2887_v56 = vpack.c.b16 %v2859_v45, %v2858_v39  ;;  %v3192_v52 = vunpack.c.l.b16 %v2084_v50  ;;  %v1694_v62 = vrot.slane %v1692_v49, 4  ;;  %v494_v39 = vld [vmem:[%s13380_s26 + $0x28] sm:$0xf]  ;;  %v877_v50 = vld [vmem:[#allocation2 + $0x44] sm:$0x1] }
  0xc1   : > { %v1697_v57 = vrot.slane %v1695_v15, 5  ;;  %v2087_v36 = vsel %vm13306_vm4, %v2085_v53, %v2086_v44  ;;  %v1701_v16 = vshll.u32 %v1578_v47, 16  ;;  %v1705_v59 = vshrl.u32 %v1578_v47, 16  ;;  %v993_v53 = vld [vmem:[#allocation2 + $0x38] sm:$0x1] }
  0xc2   : > { %v3398_v58 = vpack.c.b16 %v3369_v42, %v3368_v4  ;;  %v3193_v60 = vunpack.c.l.b16 %v2087_v36  ;;  %v1711_v1 = vshll.u32 %v1606_v54, 16  ;;  %v11615_v2 = vrot.slane %v2006_v55, 9 }
  0xc3   : > { %v1698_v61 = vor.u32 %v1697_v57, %v1694_v62  ;;  %v1703_v5 = vrot.slane %v1701_v16, 5  ;;  %v1707_v6 = vrot.slane %v1705_v59, 4  ;;  %v2090_v7 = vrot.slane %v1578_v47, 5  ;;  %v873_v47 = vld [vmem:[#allocation2 + $0x3c] sm:$0xf] }
  0xc4   : > { %3416 = vrot.lane.b32.xlu1 %v3398_v58, %s13188_s17  ;;  %v2093_v32 = vrot.slane %v1606_v54, 5  ;;  %v3222_v28 = vpack.c.b16 %v3193_v60, %v3192_v52  ;;  %v11630_v14 = vrot.slane %v2614_v20, 9  ;;  %v1713_v17 = vrot.slane %v1711_v1, 5  ;;  %v495_v52 = vld [vmem:[%s13380_s26 + $0x2c] sm:$0xf] }
  0xc5   : > { %v1699_v13 = vrot.slane %v1698_v61, 4  ;;  %2906 = vrot.lane.b32.xlu0 %v2887_v56, %s13183_s27  ;;  %v1708_v10 = vor.u32 %v1707_v6, %v1703_v5  ;;  %v2092_v18 = vrot.slane %v2090_v7, 4  ;;  %v2692_v19 = vrot.slane %v13722_v9, 5  ;;  %v965_v61 = vld [vmem:[#allocation2 + $0x30] sm:$0xf] }
  0xc6   : > { %v2967_v51 = vpack.c.b16 %v2939_v38, %v2938_v41  ;;  %3240 = vrot.lane.b32.xlu2 %v3222_v28, %s13186_s14  ;;  %v2695_v22 = vrot.slane %v13752_v63, 5  ;;  %v588_v11 = vshrl.u32 %v492_v8, 16  ;;  %v2091_v12 = vsel %vm13306_vm4, %v11615_v2, %v2090_v7  ;;  %v880_v7 = vld [vmem:[#allocation2 + $0x48] sm:$0xf] }
  0xc7   : > { %v1704_v21 = vsel %vm13361_vm7, %v1699_v13, %v1703_v5  ;;  %v1709_v25 = vrot.slane %v1708_v10, 4  ;;  %v2094_v27 = vsel %vm13306_vm4, %v2092_v18, %v2093_v32  ;;  %v2693_v9 = vsel %vm13306_vm4, %v11630_v14, %v2692_v19 }
  0xc8   : > { %v3114_v29 = vunpack.c.l.b16 %v1704_v21  ;;  %v2694_v30 = vrot.slane %v2692_v19, 4  ;;  %v3448_v33 = vunpack.c.l.b16 %v2693_v9  ;;  %v590_v34 = vrot.slane %v588_v11, 7  ;;  %v12725_v11 = vld [vmem:[#allocation2 + $0x30] sm:$0xff] }
  0xc9   : > { %v1714_v63 = vsel %vm13361_vm7, %v1709_v25, %v1713_v17  ;;  %v591_v40 = vshll.u32 %v492_v8, 16  ;;  %v596_v41 = vshrl.u32 %v493_v23, 16  ;;  %v599_v42 = vshll.u32 %v493_v23, 16  ;;  %v884_v23 = vld [vmem:[#allocation2 + $0x50] sm:$0x1] }
  0xca   : > { %v3115_v43 = vunpack.c.l.b16 %v1714_v63  ;;  %v3194_v44 = vunpack.c.l.b16 %v2091_v12  ;;  %v3195_v31 = vunpack.c.l.b16 %v2094_v27  ;;  %v2696_v45 = vsel %vm13306_vm4, %v2694_v30, %v2695_v22 }
  0xcb   : > { %v3449_v49 = vunpack.c.l.b16 %v2696_v45  ;;  %v593_v15 = vor.u32 %v591_v40, %v590_v34  ;;  %v594_v4 = vrot.slane %v590_v34, 4  ;;  %v598_v38 = vrot.slane %v596_v41, 7 }
  0xcc   : > { %2986 = vrot.lane.b32.xlu1 %v2967_v51, %s13182_s21  ;;  %v3143_v54 = vpack.c.b16 %v3115_v43, %v3114_v29  ;;  %v11600_v55 = vrot.slane %v1396_v35, 9  ;;  %v1489_v56 = vrot.slane %v13792_v37, 5  ;;  %v605_v62 = vshrl.u32 %v494_v39, 16 }
  0xcd   : > { %v3478_v57 = vpack.c.b16 %v3449_v49, %v3448_v33  ;;  %v601_v58 = vor.u32 %v599_v42, %v598_v38  ;;  %v603_v36 = vrot.slane %v598_v38, 4  ;;  %v874_v16 = vsel %vm13420_vm11, %v593_v15, %v873_v47 }
  0xce   : > { %3162 = vrot.lane.b32.xlu0 %v3143_v54, %s13189_s22  ;;  %v3223_v59 = vpack.c.b16 %v3195_v31, %v3194_v44  ;;  %875 = vst [vmem:[#allocation2 + $0x3c] sm:$0xf] %v874_v16  ;;  %v607_v20 = vrot.slane %v605_v62, 7  ;;  %v608_v60 = vshll.u32 %v494_v39, 16  ;;  %v1492_v5 = vrot.slane %v993_v53, 5 }
  0xcf   : > { %3496 = vrot.lane.b32.xlu2 %v3478_v57, %s13187_s16  ;;  %v602_v1 = vsel %vm13427_vm12, %v594_v4, %v601_v58  ;;  %v878_v2 = vsel %vm13567_vm14, %v603_v36, %v877_v50  ;;  %v613_v6 = vshrl.u32 %v495_v52, 16  ;;  %v13813_v32 = vsel %vm13306_vm4, %v11600_v55, %v1489_v56 }
  0xd0   : > { %876 = vst.msk [vmem:[#allocation2 + $0x40] sm:$0xf] %vm17651_vm0, %v602_v1  ;;  %v1491_v8 = vrot.slane %v1489_v56, 4  ;;  %v610_v28 = vor.u32 %v608_v60, %v607_v20  ;;  %v616_v13 = vshll.u32 %v495_v52, 16  ;;  %v611_v14 = vrot.slane %v607_v20, 4 }
  0xd1   : > { %879 = vst [vmem:[#allocation2 + $0x44] sm:$0x1] %v878_v2  ;;  %v615_v10 = vrot.slane %v613_v6, 7  ;;  %v1105_v17 = vshrl.u32 %v965_v61, 16  ;;  %v1108_v18 = vshll.u32 %v965_v61, 16  ;;  %v1114_v51 = vshll.u32 %v13792_v37, 16 }
  0xd2   : > { %v881_v19 = vsel %vm13420_vm11, %v610_v28, %v880_v7  ;;  %v1118_v21 = vshrl.u32 %v13792_v37, 16  ;;  %v1124_v22 = vshll.u32 %v993_v53, 16  ;;  %v2940_v39 = vunpack.c.l.b16 %v13813_v32 }
  0xd3   : > { %v618_v25 = vor.u32 %v616_v13, %v615_v10  ;;  %v620_v12 = vrot.slane %v615_v10, 4  ;;  %882 = vst [vmem:[#allocation2 + $0x48] sm:$0xf] %v881_v19  ;;  %v1107_v27 = vrot.slane %v1105_v17, 4  ;;  %v1110_v9 = vrot.slane %v1108_v18, 5 }
  0xd4   : > { %3242 = vrot.lane.b32.xlu1 %v3223_v59, %s13186_s14  ;;  %v1116_v29 = vrot.slane %v1114_v51, 5  ;;  %v1120_v30 = vrot.slane %v1118_v21, 4  ;;  %v13827_v35 = vsel %vm13306_vm4, %v1491_v8, %v1492_v5  ;;  %v1126_v43 = vrot.slane %v1124_v22, 5 }
  0xd5   : > { %v2186_v33 = vld [vmem:[#allocation2 + $0x3c] sm:$0xf]  ;;  %v619_v37 = vsel %vm13427_vm12, %v611_v14, %v618_v25  ;;  %v885_v40 = vsel %vm13567_vm14, %v620_v12, %v884_v23  ;;  %v1111_v47 = vor.u32 %v1110_v9, %v1107_v27  ;;  %v2941_v13 = vunpack.c.l.b16 %v13827_v35 }
  0xd6   : > { %v2615_v34 = vld [vmem:[#allocation2 + $0x3c] sm:$0xe]  ;;  %v2301_v41 = vshrl.u32 %v2186_v33, 16  ;;  %v2304_v42 = vshll.u32 %v2186_v33, 16  ;;  %883 = vst.msk [vmem:[#allocation2 + $0x4c] sm:$0xf] %vm17651_vm0, %v619_v37  ;;  %v1121_v49 = vor.u32 %v1120_v30, %v1116_v29 }
  0xd7   : > { %v2007_v63 = vld [vmem:[#allocation2 + $0x3c] sm:$0xe]  ;;  %v2187_v44 = vld [vmem:[#allocation2 + $0x40] sm:$0xf]  ;;  %v11631_v31 = vrot.slane %v2615_v34, 9  ;;  %3082 = vrot.lane.b32.xlu2 %v12725_v11, %s13184_s28  ;;  %v1112_v62 = vrot.slane %v1111_v47, 4 }
  0xd8   : > { %v11616_v45 = vrot.slane %v2007_v63, 9  ;;  %886 = vst [vmem:[#allocation2 + $0x50] sm:$0x1] %v885_v40  ;;  %v2215_v15 = vld [vmem:[#allocation2 + $0x44] sm:$0x1]  ;;  %v2303_v4 = vrot.slane %v2301_v41, 4 }
  0xd9   : > { %v2306_v38 = vrot.slane %v2304_v42, 5  ;;  %v2310_v50 = vshll.u32 %v2187_v44, 16  ;;  %v2314_v53 = vshrl.u32 %v2187_v44, 16  ;;  %v2320_v54 = vshll.u32 %v2215_v15, 16  ;;  %v13831_v52 = vld [vmem:[#allocation2 + $0x40] sm:$0xf] }
  0xda   : > { %v2699_v55 = vrot.slane %v2187_v44, 5  ;;  %v2702_v56 = vrot.slane %v2215_v15, 5  ;;  %v13833_v16 = vld [vmem:[#allocation2 + $0x44] sm:$0x1]  ;;  %v2097_v59 = vrot.slane %v13831_v52, 5  ;;  %v12741_v1 = vld [vmem:[#allocation2 + $0x3c] sm:$0xff]  ;;  %v1117_v10 = vsel %vm13361_vm7, %v1112_v62, %v1116_v29 }
  0xdb   : > { %v2307_v57 = vor.u32 %v2306_v38, %v2303_v4  ;;  %v2312_v58 = vrot.slane %v2310_v50, 5  ;;  %v2316_v36 = vrot.slane %v2314_v53, 4  ;;  %v2322_v20 = vrot.slane %v2320_v54, 5  ;;  %v2616_v17 = vld [vmem:[#allocation2 + $0x48] sm:$0xe]  ;;  %v12726_v62 = vld [vmem:[#allocation2 + $0x3c] sm:$0xff] }
  0xdc   : > { %v2700_v60 = vsel %vm13306_vm4, %v11631_v31, %v2699_v55  ;;  %v2701_v61 = vrot.slane %v2699_v55, 4  ;;  %v2100_v2 = vrot.slane %v13833_v16, 5  ;;  %v2098_v8 = vsel %vm13306_vm4, %v11616_v45, %v2097_v59  ;;  %v967_v27 = vld [vmem:[#allocation2 + $0x3c] sm:$0xf]  ;;  %v13853_v9 = vld [vmem:[#allocation2 + $0x40] sm:$0xf] }
  0xdd   : > { %v2308_v5 = vrot.slane %v2307_v57, 4  ;;  %v2317_v6 = vor.u32 %v2316_v36, %v2312_v58  ;;  %v3450_v7 = vunpack.c.l.b16 %v2700_v60  ;;  %v2099_v14 = vrot.slane %v2097_v59, 4  ;;  %v13848_v22 = vld [vmem:[#allocation2 + $0x4c] sm:$0xf]  ;;  %v1579_v45 = vld [vmem:[#allocation2 + $0x3c] sm:$0xf] }
  0xde   : > { %v2703_v28 = vsel %vm13306_vm4, %v2701_v61, %v2702_v56  ;;  %v1122_v21 = vrot.slane %v1121_v49, 4  ;;  %v3196_v25 = vunpack.c.l.b16 %v2098_v8  ;;  %v2860_v12 = vunpack.c.l.b16 %v1117_v10  ;;  %v13867_v4 = vld [vmem:[#allocation2 + $0x44] sm:$0x1] }
  0xdf   : > { %v2313_v18 = vsel %vm13361_vm7, %v2308_v5, %v2312_v58  ;;  %v2318_v19 = vrot.slane %v2317_v6, 4  ;;  %v3451_v51 = vunpack.c.l.b16 %v2703_v28  ;;  %3338 = vrot.lane.b32.xlu2 %v12741_v1, %s17655_s29  ;;  %v2101_v11 = vsel %vm13306_vm4, %v2099_v14, %v2100_v2  ;;  %v13859_v34 = vld [vmem:[#allocation2 + $0x50] sm:$0x1]  ;;  %v13882_v5 = vld [vmem:[#allocation2 + $0x4c] sm:$0xf] }
  0xe0   : > { %v3370_v23 = vunpack.c.l.b16 %v2313_v18  ;;  %v1127_v33 = vsel %vm13361_vm7, %v1122_v21, %v1126_v43  ;;  %v11632_v63 = vrot.slane %v2616_v17, 9  ;;  %v3197_v40 = vunpack.c.l.b16 %v2101_v11 }
  0xe1   : > { %v2323_v29 = vsel %vm13361_vm7, %v2318_v19, %v2322_v20  ;;  %v3479_v30 = vpack.c.b16 %v3451_v51, %v3450_v7  ;;  %v2861_v41 = vunpack.c.l.b16 %v1127_v33  ;;  %v2706_v42 = vrot.slane %v13848_v22, 5  ;;  %v1581_v20 = vld [vmem:[#allocation2 + $0x48] sm:$0xf]  ;;  %v13888_v51 = vld [vmem:[#allocation2 + $0x50] sm:$0x1] }
  0xe2   : > { %v3371_v37 = vunpack.c.l.b16 %v2323_v29  ;;  %v1129_v35 = vshrl.u32 %v967_v27, 16  ;;  %v1132_v44 = vshll.u32 %v967_v27, 16  ;;  %v1138_v31 = vshll.u32 %v13853_v9, 16  ;;  %v2188_v29 = vld [vmem:[#allocation2 + $0x48] sm:$0xf] }
  0xe3   : > { %3498 = vrot.lane.b32.xlu1 %v3479_v30, %s13187_s16  ;;  %v2968_v49 = vpack.c.b16 %v2941_v13, %v2940_v39  ;;  %v2888_v43 = vpack.c.b16 %v2861_v41, %v2860_v12  ;;  %v2709_v15 = vrot.slane %v13859_v34, 5  ;;  %v13871_v38 = vsel %vm13306_vm4, %v11632_v63, %v2706_v42 }
  0xe4   : > { %v3399_v47 = vpack.c.b16 %v3371_v37, %v3370_v23  ;;  %v2708_v50 = vrot.slane %v2706_v42, 4  ;;  %v1131_v53 = vrot.slane %v1129_v35, 4  ;;  %v1134_v54 = vrot.slane %v1132_v44, 5  ;;  %v12742_v44 = vld [vmem:[#allocation2 + $0x48] sm:$0xff] }
  0xe5   : > { %v13874_v55 = vpack.c.b16 %v3197_v40, %v3196_v25  ;;  %v1140_v56 = vrot.slane %v1138_v31, 5  ;;  %v1142_v32 = vshrl.u32 %v13853_v9, 16  ;;  %v1716_v39 = vshrl.u32 %v1579_v45, 16  ;;  %v13896_v40 = vpop.permute.xlu0 %2980 }
  0xe6   : > { %3418 = vrot.lane.b32.xlu0 %v3399_v47, %s13188_s17  ;;  %v1135_v57 = vor.u32 %v1134_v54, %v1131_v53  ;;  %v1148_v58 = vshll.u32 %v13867_v4, 16  ;;  %v1719_v36 = vshll.u32 %v1579_v45, 16  ;;  %v1725_v59 = vshll.u32 %v13831_v52, 16  ;;  %v496_v53 = vld [vmem:[%s13380_s26 + $0x30] sm:$0xf] }
  0xe7   : > { %2908 = vrot.lane.b32.xlu2 %v2888_v43, %s13183_s27  ;;  %v3452_v60 = vunpack.c.l.b16 %v13871_v38  ;;  %v1144_v61 = vrot.slane %v1142_v32, 4  ;;  %v1718_v1 = vrot.slane %v1716_v39, 4  ;;  %v1729_v2 = vshrl.u32 %v13831_v52, 16 }
  0xe8   : > { %v2710_v6 = vsel %vm13306_vm4, %v2708_v50, %v2709_v15  ;;  %v1136_v7 = vrot.slane %v1135_v57, 4  ;;  %v1721_v8 = vrot.slane %v1719_v36, 5  ;;  %v1727_v28 = vrot.slane %v1725_v59, 5 }
  0xe9   : > { %v1145_v13 = vor.u32 %v1144_v61, %v1140_v56  ;;  %v1731_v14 = vrot.slane %v1729_v2, 4  ;;  %v1735_v10 = vshll.u32 %v13833_v16, 16  ;;  %v1740_v17 = vshrl.u32 %v1581_v20, 16 }
  0xea   : > { %v1150_v18 = vrot.slane %v1148_v58, 5  ;;  %v1722_v19 = vor.u32 %v1721_v8, %v1718_v1  ;;  %v1743_v52 = vshll.u32 %v1581_v20, 16  ;;  %v1749_v21 = vshll.u32 %v13882_v5, 16  ;;  %v13891_v23 = vpop.permute.xlu2 %3332  ;;  %v497_v1 = vld [vmem:[%s13380_s26 + $0x34] sm:$0xf] }
  0xeb   : > { %3084 = vrot.lane.b32.xlu1 %v12726_v62, %s13184_s28  ;;  %v1141_v11 = vsel %vm13361_vm7, %v1136_v7, %v1140_v56  ;;  %v1146_v25 = vrot.slane %v1145_v13, 4  ;;  %v1732_v12 = vor.u32 %v1731_v14, %v1727_v28  ;;  %v1737_v27 = vrot.slane %v1735_v10, 5 }
  0xec   : > { %v3453_v16 = vunpack.c.l.b16 %v2710_v6  ;;  %v1723_v30 = vrot.slane %v1722_v19, 4  ;;  %v1742_v33 = vrot.slane %v1740_v17, 4  ;;  %v1745_v63 = vrot.slane %v1743_v52, 5  ;;  %v887_v52 = vld [vmem:[#allocation2 + $0x54] sm:$0xf] }
  0xed   : > { %v1733_v37 = vrot.slane %v1732_v12, 4  ;;  %v1751_v41 = vrot.slane %v1749_v21, 5  ;;  %v1753_v42 = vshrl.u32 %v13882_v5, 16  ;;  %v1759_v35 = vshll.u32 %v13888_v51, 16  ;;  %v13924_v12 = vpop.permute.xlu1 %3076 }
  0xee   : > { %2988 = vrot.lane.b32.xlu0 %v2968_v49, %s13182_s21  ;;  %v13900_v31 = vunpack.c.l.b16 %v1141_v11  ;;  %v1728_v45 = vsel %vm13361_vm7, %v1723_v30, %v1727_v28  ;;  %v1746_v47 = vor.u32 %v1745_v63, %v1742_v33  ;;  %v2325_v43 = vshrl.u32 %v2188_v29, 16  ;;  %v2901_v33 = vpop.permute.xlu0 %2900  ;;  %v1397_v63 = vld [vmem:[#allocation2 + $0x3c] sm:$0xe] }
  0xef   : > { %v1151_v15 = vsel %vm13361_vm7, %v1146_v25, %v1150_v18  ;;  %v1738_v49 = vsel %vm13361_vm7, %v1733_v37, %v1737_v27  ;;  %v3116_v38 = vunpack.c.l.b16 %v1728_v45  ;;  %v1755_v50 = vrot.slane %v1753_v42, 4 }
  0xf0   : > { %v3117_v54 = vunpack.c.l.b16 %v1738_v49  ;;  %v1747_v56 = vrot.slane %v1746_v47, 4  ;;  %v1761_v32 = vrot.slane %v1759_v35, 5  ;;  %v2327_v39 = vrot.slane %v2325_v43, 4 }
  0xf1   : > { %v1756_v62 = vor.u32 %v1755_v50, %v1751_v41  ;;  %v2328_v57 = vshll.u32 %v2188_v29, 16  ;;  %v2334_v58 = vshll.u32 %v13848_v22, 16  ;;  %v2338_v36 = vshrl.u32 %v13848_v22, 16  ;;  %v12706_v29 = vld [vmem:[#allocation2] sm:$0xff] }
  0xf2   : > { %v2863_v59 = vunpack.c.l.b16 %v1151_v15  ;;  %v3144_v20 = vpack.c.b16 %v3117_v54, %v3116_v38  ;;  %v2344_v61 = vshll.u32 %v13859_v34, 16  ;;  %v622_v2 = vshrl.u32 %v496_v53, 16  ;;  %v13919_v17 = vpop.permute.xlu2 %3236  ;;  %v13930_v15 = vld [vmem:[#allocation2 + $0x4c] sm:$0xf] }
  0xf3   : > { %3340 = vrot.lane.b32.xlu1 %v12742_v44, %s17655_s29  ;;  %v3480_v6 = vpack.c.b16 %v3453_v16, %v3452_v60  ;;  %v1757_v7 = vrot.slane %v1756_v62, 4  ;;  %v2330_v8 = vrot.slane %v2328_v57, 5  ;;  %v2336_v28 = vrot.slane %v2334_v58, 5  ;;  %v891_v44 = vld [vmem:[#allocation2 + $0x5c] sm:$0x1] }
  0xf4   : > { %3164 = vrot.lane.b32.xlu2 %v3144_v20, %s13189_s22  ;;  %v1752_v13 = vsel %vm13361_vm7, %v1747_v56, %v1751_v41  ;;  %v2340_v14 = vrot.slane %v2338_v36, 4  ;;  %v624_v10 = vrot.slane %v622_v2, 7  ;;  %v625_v22 = vshll.u32 %v496_v53, 16  ;;  %v13941_v57 = vld [vmem:[#allocation2 + $0x50] sm:$0x1] }
  0xf5   : > { %v1762_v34 = vsel %vm13361_vm7, %v1757_v7, %v1761_v32  ;;  %v2331_v60 = vor.u32 %v2330_v8, %v2327_v39  ;;  %v630_v18 = vshrl.u32 %v497_v1, 16  ;;  %v633_v19 = vshll.u32 %v497_v1, 16  ;;  %v12707_v32 = vld [vmem:[#allocation2 + $0xc] sm:$0xff] }
  0xf6   : > { %3244 = vrot.lane.b32.xlu0 %v13874_v55, %s13186_s14  ;;  %v2889_v21 = vpack.c.b16 %v2863_v59, %v13900_v31  ;;  %v2341_v11 = vor.u32 %v2340_v14, %v2336_v28  ;;  %v2346_v25 = vrot.slane %v2344_v61, 5  ;;  %v627_v27 = vor.u32 %v625_v22, %v624_v10  ;;  %v969_v31 = vld [vmem:[#allocation2 + $0x48] sm:$0xf] }
  0xf7   : > { %v2332_v16 = vrot.slane %v2331_v60, 4  ;;  %v628_v30 = vrot.slane %v624_v10, 4  ;;  %v632_v55 = vrot.slane %v630_v18, 7  ;;  %v3118_v37 = vunpack.c.l.b16 %v1752_v13  ;;  %v1398_v14 = vld [vmem:[#allocation2 + $0x48] sm:$0xe] }
  0xf8   : > { %v3119_v41 = vunpack.c.l.b16 %v1762_v34  ;;  %v2342_v42 = vrot.slane %v2341_v11, 4  ;;  %v888_v35 = vsel %vm13420_vm11, %v627_v27, %v887_v52  ;;  %v3527_v50 = vsel %vm3524_vm15, %v12706_v29, %v2901_v33 }
  0xf9   : > { %v2337_v45 = vsel %vm13361_vm7, %v2332_v16, %v2336_v28  ;;  %v635_v47 = vor.u32 %v633_v19, %v632_v55  ;;  %v637_v43 = vrot.slane %v632_v55, 4  ;;  %889 = vst [vmem:[#allocation2 + $0x54] sm:$0xf] %v888_v35  ;;  %v11601_v53 = vrot.slane %v1397_v63, 9 }
  0xfa   : > { %v2347_v49 = vsel %vm13361_vm7, %v2342_v42, %v2346_v25  ;;  %v3372_v38 = vunpack.c.l.b16 %v2337_v45  ;;  %v1496_v62 = vrot.slane %v13853_v9, 5  ;;  %v1499_v58 = vrot.slane %v13867_v4, 5  ;;  %v2903_v4 = vpop.permute.xlu2 %2902  ;;  %v12727_v25 = vld [vmem:[#allocation2 + $0x48] sm:$0xff] }
  0xfb   : > { %2910 = vrot.lane.b32.xlu1 %v2889_v21, %s13183_s27  ;;  %v3373_v54 = vunpack.c.l.b16 %v2347_v49  ;;  %v636_v56 = vsel %vm13427_vm12, %v628_v30, %v635_v47  ;;  %v892_v39 = vsel %vm13567_vm14, %v637_v43, %v891_v44  ;;  %v1153_v36 = vshrl.u32 %v969_v31, 16 }
  0xfc   : > { %890 = vst.msk [vmem:[#allocation2 + $0x58] sm:$0xf] %vm17651_vm0, %v636_v56  ;;  %v1156_v59 = vshll.u32 %v969_v31, 16  ;;  %v1162_v20 = vshll.u32 %v13930_v15, 16  ;;  %v1497_v1 = vsel %vm13306_vm4, %v11601_v53, %v1496_v62  ;;  %v1498_v2 = vrot.slane %v1496_v62, 4 }
  0xfd   : > { %v3400_v61 = vpack.c.b16 %v3373_v54, %v3372_v38  ;;  %893 = vst [vmem:[#allocation2 + $0x5c] sm:$0x1] %v892_v39  ;;  %v1166_v9 = vshrl.u32 %v13930_v15, 16  ;;  %v3145_v7 = vpack.c.b16 %v3119_v41, %v3118_v37  ;;  %v1155_v8 = vrot.slane %v1153_v36, 4  ;;  %v2008_v37 = vld [vmem:[#allocation2 + $0x48] sm:$0xe] }
  0xfe   : > { %3500 = vrot.lane.b32.xlu0 %v3480_v6, %s13187_s16  ;;  %v1158_v28 = vrot.slane %v1156_v59, 5  ;;  %v1164_v13 = vrot.slane %v1162_v20, 5  ;;  %v1500_v10 = vsel %vm13306_vm4, %v1498_v2, %v1499_v58  ;;  %v2942_v6 = vunpack.c.l.b16 %v1497_v1 }
  0xff   : > { %3420 = vrot.lane.b32.xlu2 %v3400_v61, %s13188_s17  ;;  %v1168_v22 = vrot.slane %v1166_v9, 4  ;;  %v1172_v34 = vshll.u32 %v13941_v57, 16  ;;  %v3575_v60 = vsel %vm3573_vm1, %v3527_v50, %v13896_v40  ;;  %v3530_v18 = vsel %vm3524_vm15, %v12707_v32, %v2903_v4 }
 0x100   : > { %v2190_v19 = vld [vmem:[#allocation2 + $0x54] sm:$0xf]  ;;  %v2943_v52 = vunpack.c.l.b16 %v1500_v10  ;;  %v1159_v11 = vor.u32 %v1158_v28, %v1155_v8  ;;  %v11602_v30 = vrot.slane %v1398_v14, 9  ;;  %v1503_v63 = vrot.slane %v13930_v15, 5 }
 0x101   : > { %v3079_v21 = vpop.permute.xlu1 %3078  ;;  %v2349_v27 = vshrl.u32 %v2190_v19, 16  ;;  %v2352_v29 = vshll.u32 %v2190_v19, 16  ;;  %v1169_v16 = vor.u32 %v1168_v22, %v1164_v13  ;;  %v1174_v33 = vrot.slane %v1172_v34, 5  ;;  %v1583_v9 = vld [vmem:[#allocation2 + $0x54] sm:$0xf] }
 0x102   : > { %v1160_v55 = vrot.slane %v1159_v11, 4  ;;  %v2969_v35 = vpack.c.b16 %v2943_v52, %v2942_v6  ;;  %v1506_v49 = vrot.slane %v13941_v57, 5  ;;  %v1504_v50 = vsel %vm13306_vm4, %v11602_v30, %v1503_v63 }
 0x103   : > { %3166 = vrot.lane.b32.xlu1 %v3145_v7, %s13189_s22  ;;  %v13959_v40 = vld [vmem:[#allocation2 + $0x58] sm:$0xf]  ;;  %v2351_v41 = vrot.slane %v2349_v27, 4  ;;  %v2354_v42 = vrot.slane %v2352_v29, 5  ;;  %v1170_v44 = vrot.slane %v1169_v16, 4  ;;  %v1505_v32 = vrot.slane %v1503_v63, 4 }
 0x104   : > { %v13961_v31 = vld [vmem:[#allocation2 + $0x5c] sm:$0x1]  ;;  %v2358_v45 = vshll.u32 %v13959_v40, 16  ;;  %v2362_v47 = vshrl.u32 %v13959_v40, 16  ;;  %v1165_v43 = vsel %vm13361_vm7, %v1160_v55, %v1164_v13  ;;  %v11617_v58 = vrot.slane %v2008_v37, 9  ;;  %v12743_v7 = vld [vmem:[#allocation2 + $0x54] sm:$0xff] }
 0x105   : > { %v2355_v15 = vor.u32 %v2354_v42, %v2351_v41  ;;  %v2368_v38 = vshll.u32 %v13961_v31, 16  ;;  %v1175_v56 = vsel %vm13361_vm7, %v1170_v44, %v1174_v33  ;;  %v13975_v62 = vunpack.c.l.b16 %v1165_v43  ;;  %v1609_v19 = vld [vmem:[#allocation2 + $0x5c] sm:$0x1]  ;;  %v2009_v41 = vld [vmem:[#allocation2 + $0x54] sm:$0xe] }
 0x106   : > { %3086 = vrot.lane.b32.xlu0 %v12727_v25, %s13184_s28  ;;  %v2360_v53 = vrot.slane %v2358_v45, 5  ;;  %v2364_v54 = vrot.slane %v2362_v47, 4  ;;  %v13979_v36 = vsel %vm3606_vm2, %v3575_v60, %v13924_v12  ;;  %v1507_v1 = vsel %vm13306_vm4, %v1505_v32, %v1506_v49  ;;  %v1584_v12 = vld [vmem:[#allocation2 + $0x58] sm:$0xf] }
 0x107   : > { %v2356_v39 = vrot.slane %v2355_v15, 4  ;;  %2990 = vrot.lane.b32.xlu2 %v2969_v35, %s13182_s21  ;;  %v2983_v57 = vpop.permute.xlu0 %2982  ;;  %v2370_v20 = vrot.slane %v2368_v38, 5  ;;  %v2865_v28 = vunpack.c.l.b16 %v1175_v56  ;;  %v2944_v13 = vunpack.c.l.b16 %v1504_v50  ;;  %v2617_v38 = vld [vmem:[#allocation2 + $0x54] sm:$0xe]  ;;  %v498_v32 = vld [vmem:[%s13380_s26 + $0x38] sm:$0xf] }
 0x108   : > { %v2365_v59 = vor.u32 %v2364_v54, %v2360_v53  ;;  %v3577_v61 = vsel %vm3573_vm1, %v3530_v18, %v2983_v57  ;;  %v2104_v14 = vrot.slane %v13882_v5, 5  ;;  %v2945_v6 = vunpack.c.l.b16 %v1507_v1 }
 0x109   : > { %v13984_v2 = vpop.permute.xlu1 %3334  ;;  %v2361_v8 = vsel %vm13361_vm7, %v2356_v39, %v2360_v53  ;;  %v3610_v10 = vsel %vm3606_vm2, %v3577_v61, %v3079_v21  ;;  %v2107_v22 = vrot.slane %v13888_v51, 5  ;;  %v1764_v52 = vshrl.u32 %v1583_v9, 16  ;;  %v3159_v21 = vpop.permute.xlu2 %3158 }
 0x10a   : > { %v2366_v4 = vrot.slane %v2365_v59, 4  ;;  %v3374_v34 = vunpack.c.l.b16 %v2361_v8  ;;  %v2105_v60 = vsel %vm13306_vm4, %v11617_v58, %v2104_v14  ;;  %v2106_v18 = vrot.slane %v2104_v14, 4 }
 0x10b   : > { %v3198_v25 = vunpack.c.l.b16 %v2105_v60  ;;  %v1767_v27 = vshll.u32 %v1583_v9, 16  ;;  %v1773_v5 = vshll.u32 %v1584_v12, 16  ;;  %v1766_v16 = vrot.slane %v1764_v52, 4 }
 0x10c   : > { %v2371_v11 = vsel %vm13361_vm7, %v2366_v4, %v2370_v20  ;;  %v2108_v51 = vsel %vm13306_vm4, %v2106_v18, %v2107_v22  ;;  %v1777_v30 = vshrl.u32 %v1584_v12, 16  ;;  %v1783_v37 = vshll.u32 %v1609_v19, 16  ;;  %v3808_v4 = vld [vmem:[%s17640_s1 + $0x10] sm:$0x3] }
 0x10d   : > { %v3375_v29 = vunpack.c.l.b16 %v2371_v11  ;;  %v3199_v55 = vunpack.c.l.b16 %v2108_v51  ;;  %v1769_v33 = vrot.slane %v1767_v27, 5  ;;  %v1775_v63 = vrot.slane %v1773_v5, 5 }
 0x10e   : > { %3342 = vrot.lane.b32.xlu0 %v12743_v7, %s17655_s29  ;;  %v2890_v35 = vpack.c.b16 %v2865_v28, %v13975_v62  ;;  %v1779_v44 = vrot.slane %v1777_v30, 4  ;;  %v3643_v47 = vsel %vm3639_vm3, %v3610_v10, %v3159_v21  ;;  %v2970_v43 = vpack.c.b16 %v2945_v6, %v2944_v13  ;;  %v499_v28 = vld [vmem:[%s13380_s26 + $0x3c] sm:$0xf] }
 0x10f   : > { %v3401_v42 = vpack.c.b16 %v3375_v29, %v3374_v34  ;;  %v3239_v45 = vpop.permute.xlu0 %3238  ;;  %v3225_v49 = vpack.c.b16 %v3199_v55, %v3198_v25  ;;  %v1770_v15 = vor.u32 %v1769_v33, %v1766_v16  ;;  %v1785_v54 = vrot.slane %v1783_v37, 5  ;;  %v894_v29 = vld [vmem:[#allocation2 + $0x60] sm:$0xf]  ;;  %v1399_v16 = vld [vmem:[#allocation2 + $0x54] sm:$0xe] }
 0x110   : > { %v1780_v53 = vor.u32 %v1779_v44, %v1775_v63  ;;  %v11618_v56 = vrot.slane %v2009_v41, 9  ;;  %v3676_v62 = vsel %vm3672_vm5, %v3643_v47, %v3239_v45  ;;  %v2111_v57 = vrot.slane %v1584_v12, 5  ;;  %v14032_v37 = vld [vmem:[#allocation2 + $0x58] sm:$0xf]  ;;  %v14036_v44 = vld [vmem:[#allocation2 + $0x5c] sm:$0x1] }
 0x111   : > { %v14000_v50 = vpop.permute.xlu1 %3492  ;;  %3422 = vrot.lane.b32.xlu1 %v3401_v42, %s13188_s17  ;;  %3246 = vrot.lane.b32.xlu2 %v3225_v49, %s13186_s14  ;;  %v1771_v39 = vrot.slane %v1770_v15, 4  ;;  %v2114_v58 = vrot.slane %v1609_v19, 5  ;;  %v11633_v20 = vrot.slane %v2617_v38, 9  ;;  %v2713_v61 = vrot.slane %v13959_v40, 5  ;;  %v14027_v60 = vpop.permute.xlu2 %3414  ;;  %v500_v38 = vld [vmem:[%s13380_s26 + $0x40] sm:$0xf] }
 0x112   : > { %v1781_v59 = vrot.slane %v1780_v53, 4  ;;  %v2716_v1 = vrot.slane %v13961_v31, 5  ;;  %v2112_v7 = vsel %vm13306_vm4, %v11618_v56, %v2111_v57  ;;  %v2113_v8 = vrot.slane %v2111_v57, 4  ;;  %v501_v57 = vld [vmem:[%s13380_s26 + $0x44] sm:$0xf] }
 0x113   : > { %v1776_v9 = vsel %vm13361_vm7, %v1771_v39, %v1775_v63  ;;  %v639_v13 = vshrl.u32 %v498_v32, 16  ;;  %v14018_v40 = vsel %vm3705_vm6, %v3676_v62, %v13984_v2  ;;  %v2714_v31 = vsel %vm13306_vm4, %v11633_v20, %v2713_v61  ;;  %v12755_v20 = vld [vmem:[%s17640_s1 + $0x8] sm:$0xff] }
 0x114   : > { %v1786_v14 = vsel %vm13361_vm7, %v1781_v59, %v1785_v54  ;;  %v3120_v12 = vunpack.c.l.b16 %v1776_v9  ;;  %v2115_v6 = vsel %vm13306_vm4, %v2113_v8, %v2114_v58  ;;  %v3200_v22 = vunpack.c.l.b16 %v2112_v7  ;;  %v14059_v9 = vld [vmem:[#allocation2 + $0x54] sm:$0xf] }
 0x115   : > { %v3121_v10 = vunpack.c.l.b16 %v1786_v14  ;;  %v2715_v34 = vrot.slane %v2713_v61, 4  ;;  %v3454_v18 = vunpack.c.l.b16 %v2714_v31  ;;  %v641_v19 = vrot.slane %v639_v13, 7 }
 0x116   : > { %2912 = vrot.lane.b32.xlu0 %v2890_v35, %s13183_s27  ;;  %v642_v2 = vshll.u32 %v498_v32, 16  ;;  %v647_v52 = vshrl.u32 %v499_v28, 16  ;;  %v3201_v25 = vunpack.c.l.b16 %v2115_v6  ;;  %v650_v5 = vshll.u32 %v499_v28, 16  ;;  %v12728_v6 = vld [vmem:[#allocation2 + $0x54] sm:$0xff] }
 0x117   : > { %v3413_v11 = vpop.permute.xlu0 %3412  ;;  %v2717_v27 = vsel %vm13306_vm4, %v2715_v34, %v2716_v1  ;;  %v3822_v21 = vunpack.c.l.b16 %v3808_v4  ;;  %v3146_v30 = vpack.c.b16 %v3121_v10, %v3120_v12  ;;  %v645_v63 = vrot.slane %v641_v19, 4 }
 0x118   : > { %v3455_v55 = vunpack.c.l.b16 %v2717_v27  ;;  %v644_v33 = vor.u32 %v642_v2, %v641_v19  ;;  %v649_v41 = vrot.slane %v647_v52, 7  ;;  %v11603_v15 = vrot.slane %v1399_v16, 9  ;;  %v901_v19 = vld [vmem:[#allocation2 + $0x6c] sm:$0xf]  ;;  %v12754_v52 = vld [vmem:[%s17640_s1] sm:$0xff] }
 0x119   : > { %v3157_v51 = vpop.permute.xlu1 %3156  ;;  %2992 = vrot.lane.b32.xlu1 %v2970_v43, %s13182_s21  ;;  %v3825_v42 = vpack.c.b16 %v3822_v21, %v3822_v21  ;;  %v898_v43 = vld [vmem:[#allocation2 + $0x68] sm:$0x1]  ;;  %v1510_v32 = vrot.slane %v14032_v37, 5  ;;  %v1513_v39 = vrot.slane %v14036_v44, 5  ;;  %v2985_v7 = vpop.permute.xlu2 %2984  ;;  %v656_v28 = vshrl.u32 %v500_v38, 16 }
 0x11a   : > { %v3641_v35 = vsel %vm3639_vm3, %v13979_v36, %v3157_v51  ;;  %v3481_v45 = vpack.c.b16 %v3455_v55, %v3454_v18  ;;  %v895_v47 = vsel %vm13420_vm11, %v644_v33, %v894_v29  ;;  %v652_v53 = vor.u32 %v650_v5, %v649_v41 }
 0x11b   : > { %v3674_v49 = vsel %vm3672_vm5, %v3641_v35, %v13919_v17  ;;  %v654_v54 = vrot.slane %v649_v41, 4  ;;  %896 = vst [vmem:[#allocation2 + $0x60] sm:$0xf] %v895_v47  ;;  %v3863_v56 = vsel %vm3861_vm9, %v3825_v42, 0  ;;  %v3226_v36 = vpack.c.b16 %v3201_v25, %v3200_v22  ;;  %v12708_v17 = vld [vmem:[#allocation2 + $0x18] sm:$0xff] }
 0x11c   : > { %3502 = vrot.lane.b32.xlu2 %v3481_v45, %s13187_s16  ;;  %v3707_v62 = vsel %vm3705_vm6, %v3674_v49, %v13891_v23  ;;  %v653_v58 = vsel %vm13427_vm12, %v645_v63, %v652_v53  ;;  %3870 = vmatpush.bf16.msra.mxu0 %v3863_v56  ;;  %v1511_v61 = vsel %vm13306_vm4, %v11603_v15, %v1510_v32  ;;  %v1512_v1 = vrot.slane %v1510_v32, 4 }
 0x11d   : > { %v899_v59 = vsel %vm13567_vm14, %v654_v54, %v898_v43  ;;  %897 = vst.msk [vmem:[#allocation2 + $0x64] sm:$0xf] %vm17651_vm0, %v653_v58  ;;  %v2946_v23 = vunpack.c.l.b16 %v1511_v61  ;;  %vm17652_vm9 = vcmask 293888   ;;  %v659_v13 = vshll.u32 %v500_v38, 16 }
 0x11e   : > { %3168 = vrot.lane.b32.xlu0 %v3146_v30, %s13189_s22  ;;  %900 = vst [vmem:[#allocation2 + $0x68] sm:$0x1] %v899_v59  ;;  %v1514_v14 = vsel %vm13306_vm4, %v1512_v1, %v1513_v39  ;;  %v3740_v12 = vsel %vm17654_vm10, %v3707_v62, %v3413_v11  ;;  %v664_v4 = vshrl.u32 %v501_v57, 16  ;;  %v667_v10 = vshll.u32 %v501_v57, 16 }
 0x11f   : > { %v14062_v8 = vpop.permute.xlu0 %3494  ;;  %v2947_v22 = vunpack.c.l.b16 %v1514_v14  ;;  %v658_v18 = vrot.slane %v656_v28, 7  ;;  %v1177_v2 = vshrl.u32 %v14059_v9, 16  ;;  %v1180_v11 = vshll.u32 %v14059_v9, 16 }
 0x120   : > { %3871 = vmatpush.bf16.msra.mxu0 %v12755_v20  ;;  %v14073_v25 = vrot.slane %v664_v4, 7  ;;  %v1186_v27 = vshll.u32 %v14032_v37, 16  ;;  %v1190_v5 = vshrl.u32 %v14032_v37, 16  ;;  %v14081_v29 = vsel %vm17654_vm10, %v14018_v40, %v14027_v60 }
 0x121   : > { %v2905_v31 = vpop.permute.xlu1 %2904  ;;  %3248 = vrot.lane.b32.xlu1 %v3226_v36, %s13186_s14  ;;  %v3773_v16 = vsel %vm17653_vm13, %v3740_v12, %v14000_v50  ;;  %v661_v55 = vor.u32 %v659_v13, %v658_v18  ;;  %v14085_v42 = vpack.c.b16 %v2947_v22, %v2946_v23  ;;  %v662_v47 = vrot.slane %v658_v18, 4 }
 0x122   : > { %v3533_v34 = vsel %vm3524_vm15, %v12708_v17, %v2905_v31  ;;  %v2192_v21 = vld [vmem:[#allocation2 + $0x60] sm:$0xf]  ;;  %v669_v40 = vor.u32 %v667_v10, %v14073_v25  ;;  %v671_v50 = vrot.slane %v14073_v25, 4 }
 0x123   : > { %v2618_v51 = vld [vmem:[#allocation2 + $0x60] sm:$0xe]  ;;  %v2373_v33 = vshrl.u32 %v2192_v21, 16  ;;  %v2376_v63 = vshll.u32 %v2192_v21, 16  ;;  %v3579_v45 = vsel %vm3573_vm1, %v3533_v34, %v2985_v7  ;;  %v902_v15 = vsel %vm13420_vm11, %v661_v55, %v901_v19  ;;  %v3241_v7 = vpop.permute.xlu2 %3240 }
 0x124   : > { %v2010_v30 = vld [vmem:[#allocation2 + $0x60] sm:$0xe]  ;;  %v11634_v41 = vrot.slane %v2618_v51, 9  ;;  %3088 = vrot.lane.b32.xlu2 %v12728_v6, %s13184_s28  ;;  %v2193_v60 = vld [vmem:[#allocation2 + $0x64] sm:$0xf]  ;;  %3872 = vmatpush.bf16.msra.mxu0 %v12754_v52  ;;  %v670_v36 = vsel %vm13427_vm12, %v662_v47, %v669_v40  ;;  %v1179_v6 = vrot.slane %v1177_v2, 4 }
 0x125   : > { %v11619_v35 = vrot.slane %v2010_v30, 9  ;;  %v2375_v43 = vrot.slane %v2373_v33, 4  ;;  %v2378_v49 = vrot.slane %v2376_v63, 5  ;;  %v2218_v38 = vld [vmem:[#allocation2 + $0x68] sm:$0x1]  ;;  %v2382_v53 = vshll.u32 %v2193_v60, 16 }
 0x126   : > { %v2386_v54 = vshrl.u32 %v2193_v60, 16  ;;  %v2720_v56 = vrot.slane %v2193_v60, 5  ;;  %v2392_v62 = vshll.u32 %v2218_v38, 16  ;;  %v2723_v17 = vrot.slane %v2218_v38, 5  ;;  %v14095_v57 = vld [vmem:[#allocation2 + $0x64] sm:$0xf] }
 0x127   : > { %v3081_v32 = vpop.permute.xlu0 %3080  ;;  %v2379_v39 = vor.u32 %v2378_v49, %v2375_v43  ;;  %v14097_v58 = vld [vmem:[#allocation2 + $0x68] sm:$0x1]  ;;  %v2384_v20 = vrot.slane %v2382_v53, 5  ;;  %11844 = vmatmul.msk.bf16.vlgmr.msra.gmra.mxu0 %vm17652_vm9, %v3773_v16  ;;  %v12744_v23 = vld [vmem:[#allocation2 + $0x60] sm:$0xff]  ;;  %903 = vst [vmem:[#allocation2 + $0x6c] sm:$0xf] %v902_v15 }
 0x128   : > { %v3612_v59 = vsel %vm3606_vm2, %v3579_v45, %v3081_v32  ;;  %v2388_v61 = vrot.slane %v2386_v54, 4  ;;  %v2721_v1 = vsel %vm13306_vm4, %v11634_v41, %v2720_v56  ;;  %v2722_v9 = vrot.slane %v2720_v56, 4  ;;  %904 = vst.msk [vmem:[#allocation2 + $0x70] sm:$0xf] %vm17651_vm0, %v670_v36  ;;  %v905_v30 = vld [vmem:[#allocation2 + $0x74] sm:$0x1] }
 0x129   : > { %v2380_v28 = vrot.slane %v2379_v39, 4  ;;  %v2394_v13 = vrot.slane %v2392_v62, 5  ;;  %v3456_v14 = vunpack.c.l.b16 %v2721_v1  ;;  %v2118_v12 = vrot.slane %v14095_v57, 5  ;;  %v3161_v52 = vpop.permute.xlu1 %3160  ;;  %v973_v40 = vld [vmem:[#allocation2 + $0x60] sm:$0xf] }
 0x12a   : > { %v2389_v31 = vor.u32 %v2388_v61, %v2384_v20  ;;  %v2724_v4 = vsel %vm13306_vm4, %v2722_v9, %v2723_v17  ;;  %v2121_v10 = vrot.slane %v14097_v58, 5  ;;  %v1182_v16 = vrot.slane %v1180_v11, 5 }
 0x12b   : > { %v2385_v22 = vsel %vm13361_vm7, %v2380_v28, %v2384_v20  ;;  %v3457_v34 = vunpack.c.l.b16 %v2724_v4  ;;  %v2119_v18 = vsel %vm13306_vm4, %v11619_v35, %v2118_v12  ;;  %v2120_v19 = vrot.slane %v2118_v12, 4  ;;  %v14138_v17 = vpop.permute.xlu2 %3496  ;;  %v14141_v20 = vld [vmem:[#allocation2 + $0x68] sm:$0x1]  ;;  %v1585_v28 = vld [vmem:[#allocation2 + $0x60] sm:$0xf] }
 0x12c   : > { %v2390_v25 = vrot.slane %v2389_v31, 4  ;;  %v3376_v21 = vunpack.c.l.b16 %v2385_v22  ;;  %3344 = vrot.lane.b32.xlu2 %v12744_v23, %s17655_s29  ;;  %v3202_v51 = vunpack.c.l.b16 %v2119_v18  ;;  %v1188_v33 = vrot.slane %v1186_v27, 5 }
 0x12d   : > { %v3482_v55 = vpack.c.b16 %v3457_v34, %v3456_v14  ;;  %v2122_v2 = vsel %vm13306_vm4, %v2120_v19, %v2121_v10  ;;  %v1192_v63 = vrot.slane %v1190_v5, 4  ;;  %v1183_v45 = vor.u32 %v1182_v16, %v1179_v6  ;;  %v14126_v5 = vld [vmem:[#allocation2 + $0x64] sm:$0xf] }
 0x12e   : > { %v2395_v41 = vsel %vm13361_vm7, %v2390_v25, %v2394_v13  ;;  %v3203_v35 = vunpack.c.l.b16 %v2122_v2  ;;  %v1196_v47 = vshll.u32 %v14036_v44, 16  ;;  %v3645_v43 = vsel %vm3639_vm3, %v3612_v59, %v3161_v52  ;;  %v2619_v49 = vld [vmem:[#allocation2 + $0x6c] sm:$0xe] }
 0x12f   : > { %v3377_v11 = vunpack.c.l.b16 %v2395_v41  ;;  %3504 = vrot.lane.b32.xlu1 %v3482_v55, %s13187_s16  ;;  %v1193_v60 = vor.u32 %v1192_v63, %v1188_v33  ;;  %v906_v27 = vsel %vm13567_vm14, %v671_v50, %v905_v30  ;;  %v3337_v37 = vpop.permute.xlu0 %3336  ;;  %v1184_v15 = vrot.slane %v1183_v45, 4  ;;  %v14133_v36 = vld [vmem:[#allocation2 + $0x70] sm:$0xf]  ;;  %v12709_v41 = vld [vmem:[#allocation2 + $0x24] sm:$0xff] }
 0x130   : > { %v1198_v38 = vrot.slane %v1196_v47, 5  ;;  %907 = vst [vmem:[#allocation2 + $0x74] sm:$0x1] %v906_v27  ;;  %v11635_v53 = vrot.slane %v2619_v49, 9  ;;  %v3775_v44 = vsel %vm17653_vm13, %v14081_v29, %v14062_v8  ;;  %v14131_v56 = vpack.c.b16 %v3203_v35, %v3202_v51  ;;  %v12729_v8 = vld [vmem:[#allocation2 + $0x60] sm:$0xff] }
 0x131   : > { %v3402_v54 = vpack.c.b16 %v3377_v11, %v3376_v21  ;;  %v1194_v32 = vrot.slane %v1193_v60, 4  ;;  %v1201_v39 = vshrl.u32 %v973_v40, 16  ;;  %v1189_v50 = vsel %vm13361_vm7, %v1184_v15, %v1188_v33  ;;  %v1587_v60 = vld [vmem:[#allocation2 + $0x6c] sm:$0xf] }
 0x132   : > { %v2727_v62 = vrot.slane %v14133_v36, 5  ;;  %v3678_v59 = vsel %vm3672_vm5, %v3645_v43, %v3241_v7  ;;  %v1204_v61 = vshll.u32 %v973_v40, 16  ;;  %v2866_v1 = vunpack.c.l.b16 %v1189_v50  ;;  %v12745_v15 = vld [vmem:[#allocation2 + $0x6c] sm:$0xff] }
 0x133   : > { %3424 = vrot.lane.b32.xlu0 %v3402_v54, %s13188_s17  ;;  %v1199_v29 = vsel %vm13361_vm7, %v1194_v32, %v1198_v38  ;;  %v1203_v9 = vrot.slane %v1201_v39, 4  ;;  %v1210_v23 = vshll.u32 %v14126_v5, 16  ;;  %v1214_v10 = vshrl.u32 %v14126_v5, 16  ;;  %v14171_v54 = vld [vmem:[#allocation2 + $0x70] sm:$0xf]  ;;  %v14173_v50 = vpop.permute.xlu2 %3082 }
 0x134   : > { %v2867_v13 = vunpack.c.l.b16 %v1199_v29  ;;  %v2728_v14 = vsel %vm13306_vm4, %v11635_v53, %v2727_v62  ;;  %v2729_v12 = vrot.slane %v2727_v62, 4  ;;  %v1206_v7 = vrot.slane %v1204_v61, 5 }
 0x135   : > { %v3458_v31 = vunpack.c.l.b16 %v2728_v14  ;;  %v1212_v4 = vrot.slane %v1210_v23, 5  ;;  %v1220_v6 = vshll.u32 %v14141_v20, 16  ;;  %v1788_v19 = vshrl.u32 %v1585_v28, 16 }
 0x136   : > { %v14151_v22 = vpop.permute.xlu1 %3416  ;;  %v2891_v34 = vpack.c.b16 %v2867_v13, %v2866_v1  ;;  %v1207_v18 = vor.u32 %v1206_v7, %v1203_v9  ;;  %v1791_v52 = vshll.u32 %v1585_v28, 16  ;;  %v1216_v21 = vrot.slane %v1214_v10, 4  ;;  %v2194_v13 = vld [vmem:[#allocation2 + $0x6c] sm:$0xf] }
 0x137   : > { %3090 = vrot.lane.b32.xlu1 %v12729_v8, %s13184_s28  ;;  %v14154_v25 = vld [vmem:[#allocation2 + $0x74] sm:$0x1]  ;;  %v1222_v51 = vrot.slane %v1220_v6, 5  ;;  %v1797_v16 = vshll.u32 %v14095_v57, 16  ;;  %v1801_v30 = vshrl.u32 %v14095_v57, 16  ;;  %v1790_v33 = vrot.slane %v1788_v19, 4  ;;  %11845 = vmatmul.msk.bf16.gmra.mxu0 %vm17652_vm9, %v3775_v44  ;;  %v2907_v11 = vpop.permute.xlu0 %2906 }
 0x138   : > { %2914 = vrot.lane.b32.xlu2 %v2891_v34, %s13183_s27  ;;  %v2730_v55 = vrot.slane %v14154_v25, 5  ;;  %v1208_v2 = vrot.slane %v1207_v18, 4  ;;  %v1793_v63 = vrot.slane %v1791_v52, 5  ;;  %v1217_v35 = vor.u32 %v1216_v21, %v1212_v4  ;;  %v14180_v8 = vld [vmem:[#allocation2 + $0x74] sm:$0x1] }
 0x139   : > { %v1799_v45 = vrot.slane %v1797_v16, 5  ;;  %v1803_v47 = vrot.slane %v1801_v30, 4  ;;  %v1807_v40 = vshll.u32 %v14097_v58, 16  ;;  %v14165_v43 = vsel %vm3705_vm6, %v3678_v59, %v3337_v37 }
 0x13a   : > { %v2731_v57 = vsel %vm13306_vm4, %v2729_v12, %v2730_v55  ;;  %v1213_v27 = vsel %vm13361_vm7, %v1208_v2, %v1212_v4  ;;  %v1794_v49 = vor.u32 %v1793_v63, %v1790_v33  ;;  %v1218_v53 = vrot.slane %v1217_v35, 4  ;;  %v502_v33 = vld [vmem:[%s13380_s26 + $0x48] sm:$0xf] }
 0x13b   : > { %2994 = vrot.lane.b32.xlu0 %v14085_v42, %s13182_s21  ;;  %v3459_v38 = vunpack.c.l.b16 %v2731_v57  ;;  %v2868_v44 = vunpack.c.l.b16 %v1213_v27  ;;  %v1804_v58 = vor.u32 %v1803_v47, %v1799_v45  ;;  %v1809_v39 = vrot.slane %v1807_v40, 5  ;;  %v503_v57 = vld [vmem:[%s13380_s26 + $0x4c] sm:$0xf] }
 0x13c   : > { %v1795_v32 = vrot.slane %v1794_v49, 4  ;;  %v3536_v37 = vsel %vm3524_vm15, %v12709_v41, %v2907_v11  ;;  %v1812_v62 = vshrl.u32 %v1587_v60, 16  ;;  %v1223_v61 = vsel %vm13361_vm7, %v1218_v53, %v1222_v51 }
 0x13d   : > { %v14176_v59 = vpack.c.b16 %v3459_v38, %v3458_v31  ;;  %v1805_v42 = vrot.slane %v1804_v58, 4  ;;  %v1815_v29 = vshll.u32 %v1587_v60, 16  ;;  %v2869_v1 = vunpack.c.l.b16 %v1223_v61  ;;  %v14201_v58 = vpop.permute.xlu2 %3338 }
 0x13e   : > { %v1800_v9 = vsel %vm13361_vm7, %v1795_v32, %v1799_v45  ;;  %v1814_v23 = vrot.slane %v1812_v62, 4  ;;  %v1821_v28 = vshll.u32 %v14171_v54, 16  ;;  %v1825_v31 = vshrl.u32 %v14171_v54, 16  ;;  %v2987_v4 = vpop.permute.xlu1 %2986 }
 0x13f   : > { %3346 = vrot.lane.b32.xlu1 %v12745_v15, %s17655_s29  ;;  %v1810_v14 = vsel %vm13361_vm7, %v1805_v42, %v1809_v39  ;;  %v3122_v12 = vunpack.c.l.b16 %v1800_v9  ;;  %v1817_v7 = vrot.slane %v1815_v29, 5  ;;  %v2892_v10 = vpack.c.b16 %v2869_v1, %v2868_v44  ;;  %v908_v1 = vld [vmem:[#allocation2 + $0x78] sm:$0xf] }
 0x140   : > { %v3123_v6 = vunpack.c.l.b16 %v1810_v14  ;;  %v1823_v34 = vrot.slane %v1821_v28, 5  ;;  %v1831_v18 = vshll.u32 %v14180_v8, 16  ;;  %v1827_v52 = vrot.slane %v1825_v31, 4  ;;  %v1400_v14 = vld [vmem:[#allocation2 + $0x60] sm:$0xe] }
 0x141   : > { %v1818_v19 = vor.u32 %v1817_v7, %v1814_v23  ;;  %v2397_v21 = vshrl.u32 %v2194_v13, 16  ;;  %v2400_v51 = vshll.u32 %v2194_v13, 16  ;;  %v2406_v55 = vshll.u32 %v14133_v36, 16 }
 0x142   : > { %v3147_v16 = vpack.c.b16 %v3123_v6, %v3122_v12  ;;  %v1833_v30 = vrot.slane %v1831_v18, 5  ;;  %v2410_v2 = vshrl.u32 %v14133_v36, 16  ;;  %v1828_v41 = vor.u32 %v1827_v52, %v1823_v34  ;;  %v975_v6 = vld [vmem:[#allocation2 + $0x6c] sm:$0xf] }
 0x143   : > { %3250 = vrot.lane.b32.xlu0 %v14131_v56, %s13186_s14  ;;  %v1819_v63 = vrot.slane %v1818_v19, 4  ;;  %v2399_v35 = vrot.slane %v2397_v21, 4  ;;  %v2402_v45 = vrot.slane %v2400_v51, 5  ;;  %v2408_v47 = vrot.slane %v2406_v55, 5  ;;  %v976_v21 = vld [vmem:[#allocation2 + $0x70] sm:$0xf] }
 0x144   : > { %3170 = vrot.lane.b32.xlu2 %v3147_v16, %s13189_s22  ;;  %v2412_v40 = vrot.slane %v2410_v2, 4  ;;  %v2416_v11 = vshll.u32 %v14154_v25, 16  ;;  %v3581_v60 = vsel %vm3573_vm1, %v3536_v37, %v2987_v4  ;;  %v1829_v27 = vrot.slane %v1828_v41, 4  ;;  %v14219_v51 = vld [vmem:[#allocation2 + $0x74] sm:$0x1] }
 0x145   : > { %v1824_v36 = vsel %vm13361_vm7, %v1819_v63, %v1823_v34  ;;  %v2403_v49 = vor.u32 %v2402_v45, %v2399_v35  ;;  %v673_v15 = vshrl.u32 %v502_v33, 16  ;;  %v676_v44 = vshll.u32 %v502_v33, 16  ;;  %v12710_v41 = vld [vmem:[#allocation2 + $0x30] sm:$0xff]  ;;  %v1401_v35 = vld [vmem:[#allocation2 + $0x6c] sm:$0xe] }
 0x146   : > { %v3124_v56 = vunpack.c.l.b16 %v1824_v36  ;;  %v2413_v38 = vor.u32 %v2412_v40, %v2408_v47  ;;  %v2418_v53 = vrot.slane %v2416_v11, 5  ;;  %v1834_v25 = vsel %vm13361_vm7, %v1829_v27, %v1833_v30  ;;  %v3243_v12 = vpop.permute.xlu1 %3242 }
 0x147   : > { %2916 = vrot.lane.b32.xlu1 %v2892_v10, %s13183_s27  ;;  %v2404_v32 = vrot.slane %v2403_v49, 4  ;;  %v675_v39 = vrot.slane %v673_v15, 7  ;;  %v681_v37 = vshrl.u32 %v503_v57, 16  ;;  %v3744_v62 = vsel %vm17654_vm10, %v14165_v43, %v14151_v22  ;;  %v3163_v10 = vpop.permute.xlu0 %3162  ;;  %v912_v43 = vld [vmem:[#allocation2 + $0x80] sm:$0x1] }
 0x148   : > { %v3125_v61 = vunpack.c.l.b16 %v1834_v25  ;;  %v2414_v42 = vrot.slane %v2413_v38, 4  ;;  %v684_v29 = vshll.u32 %v503_v57, 16  ;;  %v3614_v22 = vsel %vm3606_vm2, %v3581_v60, %v14173_v50 }
 0x149   : > { %v2409_v9 = vsel %vm13361_vm7, %v2404_v32, %v2408_v47  ;;  %v678_v23 = vor.u32 %v676_v44, %v675_v39  ;;  %v679_v28 = vrot.slane %v675_v39, 4  ;;  %v683_v13 = vrot.slane %v681_v37, 7  ;;  %v12730_v47 = vld [vmem:[#allocation2 + $0x6c] sm:$0xff] }
 0x14a   : > { %v3148_v7 = vpack.c.b16 %v3125_v61, %v3124_v56  ;;  %v2419_v31 = vsel %vm13361_vm7, %v2414_v42, %v2418_v53  ;;  %v3378_v4 = vunpack.c.l.b16 %v2409_v9  ;;  %v11604_v16 = vrot.slane %v1400_v14, 9  ;;  %v2909_v56 = vpop.permute.xlu2 %2908  ;;  %v2011_v61 = vld [vmem:[#allocation2 + $0x6c] sm:$0xe] }
 0x14b   : > { %3506 = vrot.lane.b32.xlu0 %v14176_v59, %s13187_s16  ;;  %v3379_v34 = vunpack.c.l.b16 %v2419_v31  ;;  %v686_v18 = vor.u32 %v684_v29, %v683_v13  ;;  %v688_v19 = vrot.slane %v683_v13, 4  ;;  %v909_v52 = vsel %vm13420_vm11, %v678_v23, %v908_v1 }
 0x14c   : > { %910 = vst [vmem:[#allocation2 + $0x78] sm:$0xf] %v909_v52  ;;  %v1517_v30 = vrot.slane %v14126_v5, 5  ;;  %v1520_v50 = vrot.slane %v14141_v20, 5  ;;  %v3777_v55 = vsel %vm17653_vm13, %v3744_v62, %v14138_v17  ;;  %v3647_v33 = vsel %vm3639_vm3, %v3614_v22, %v3163_v10 }
 0x14d   : > { %v3403_v2 = vpack.c.b16 %v3379_v34, %v3378_v4  ;;  %v687_v59 = vsel %vm13427_vm12, %v679_v28, %v686_v18  ;;  %v913_v63 = vsel %vm13567_vm14, %v688_v19, %v912_v43  ;;  %11846 = vmatmul.msk.bf16.gmra.mxu0 %vm17652_vm9, %v3777_v55  ;;  %v1225_v17 = vshrl.u32 %v975_v6, 16 }
 0x14e   : > { %911 = vst.msk [vmem:[#allocation2 + $0x7c] sm:$0xf] %vm17651_vm0, %v687_v59  ;;  %v1518_v5 = vsel %vm13306_vm4, %v11604_v16, %v1517_v30  ;;  %v1519_v20 = vrot.slane %v1517_v30, 4  ;;  %v1228_v45 = vshll.u32 %v975_v6, 16  ;;  %v1234_v11 = vshll.u32 %v976_v21, 16 }
 0x14f   : > { %3172 = vrot.lane.b32.xlu1 %v3148_v7, %s13189_s22  ;;  %3426 = vrot.lane.b32.xlu2 %v3403_v2, %s13188_s17  ;;  %914 = vst [vmem:[#allocation2 + $0x80] sm:$0x1] %v913_v63  ;;  %v2948_v40 = vunpack.c.l.b16 %v1518_v5  ;;  %v1238_v60 = vshrl.u32 %v976_v21, 16  ;;  %v1244_v57 = vshll.u32 %v14219_v51, 16  ;;  %v3680_v27 = vsel %vm3672_vm5, %v3647_v33, %v3243_v12 }
 0x150   : > { %v1521_v36 = vsel %vm13306_vm4, %v1519_v20, %v1520_v50  ;;  %v1227_v49 = vrot.slane %v1225_v17, 4  ;;  %v1230_v15 = vrot.slane %v1228_v45, 5  ;;  %v1236_v53 = vrot.slane %v1234_v11, 5 }
 0x151   : > { %v2949_v38 = vunpack.c.l.b16 %v1521_v36  ;;  %v1240_v44 = vrot.slane %v1238_v60, 4  ;;  %v14241_v25 = vsel %vm3524_vm15, %v12710_v41, %v2909_v56  ;;  %v1246_v39 = vrot.slane %v1244_v57, 5 }
 0x152   : > { %v1231_v32 = vor.u32 %v1230_v15, %v1227_v49  ;;  %v11605_v37 = vrot.slane %v1401_v35, 9  ;;  %v1524_v62 = vrot.slane %v976_v21, 5  ;;  %v3713_v9 = vsel %vm3705_vm6, %v3680_v27, %v14201_v58 }
 0x153   : > { %3092 = vrot.lane.b32.xlu0 %v12730_v47, %s13184_s28  ;;  %v2196_v42 = vld [vmem:[#allocation2 + $0x78] sm:$0xf]  ;;  %v2972_v29 = vpack.c.b16 %v2949_v38, %v2948_v40  ;;  %v1241_v1 = vor.u32 %v1240_v44, %v1236_v53  ;;  %v1527_v23 = vrot.slane %v14219_v51, 5  ;;  %v11620_v22 = vrot.slane %v2011_v61, 9 }
 0x154   : > { %v2421_v13 = vshrl.u32 %v2196_v42, 16  ;;  %v2424_v14 = vshll.u32 %v2196_v42, 16  ;;  %v1232_v12 = vrot.slane %v1231_v32, 4  ;;  %v1525_v7 = vsel %vm13306_vm4, %v11605_v37, %v1524_v62  ;;  %v1589_v33 = vld [vmem:[#allocation2 + $0x78] sm:$0xf] }
 0x155   : > { %v14247_v28 = vpop.permute.xlu1 %3498  ;;  %v14251_v31 = vld [vmem:[#allocation2 + $0x7c] sm:$0xf]  ;;  %v1242_v4 = vrot.slane %v1241_v1, 4  ;;  %v1526_v10 = vrot.slane %v1524_v62, 4  ;;  %v2125_v43 = vrot.slane %v14171_v54, 5  ;;  %v2950_v30 = vunpack.c.l.b16 %v1525_v7 }
 0x156   : > { %v14254_v6 = vld [vmem:[#allocation2 + $0x80] sm:$0x1]  ;;  %v2423_v58 = vrot.slane %v2421_v13, 4  ;;  %v2426_v34 = vrot.slane %v2424_v14, 5  ;;  %v2430_v18 = vshll.u32 %v14251_v31, 16  ;;  %v2434_v19 = vshrl.u32 %v14251_v31, 16 }
 0x157   : > { %v12746_v21 = vld [vmem:[#allocation2 + $0x78] sm:$0xff]  ;;  %v2440_v51 = vshll.u32 %v14254_v6, 16  ;;  %2996 = vrot.lane.b32.xlu2 %v2972_v29, %s13182_s21  ;;  %v1237_v16 = vsel %vm13361_vm7, %v1232_v12, %v1236_v53  ;;  %v1247_v54 = vsel %vm13361_vm7, %v1242_v4, %v1246_v39  ;;  %v1528_v35 = vsel %vm13306_vm4, %v1526_v10, %v1527_v23  ;;  %v1612_v38 = vld [vmem:[#allocation2 + $0x80] sm:$0x1]  ;;  %v3165_v12 = vpop.permute.xlu2 %3164 }
 0x158   : > { %v3419_v52 = vpop.permute.xlu0 %3418  ;;  %v2427_v50 = vor.u32 %v2426_v34, %v2423_v58  ;;  %v2432_v55 = vrot.slane %v2430_v18, 5  ;;  %v2436_v2 = vrot.slane %v2434_v19, 4  ;;  %v2870_v59 = vunpack.c.l.b16 %v1237_v16  ;;  %v1590_v40 = vld [vmem:[#allocation2 + $0x7c] sm:$0xf]  ;;  %v2012_v62 = vld [vmem:[#allocation2 + $0x78] sm:$0xe] }
 0x159   : > { %v2871_v63 = vunpack.c.l.b16 %v1247_v54  ;;  %v3746_v41 = vsel %vm17654_vm10, %v3713_v9, %v3419_v52  ;;  %v2126_v5 = vsel %vm13306_vm4, %v11620_v22, %v2125_v43  ;;  %v2442_v45 = vrot.slane %v2440_v51, 5  ;;  %v2620_v7 = vld [vmem:[#allocation2 + $0x78] sm:$0xe] }
 0x15a   : > { %v2428_v20 = vrot.slane %v2427_v50, 4  ;;  %v2437_v17 = vor.u32 %v2436_v2, %v2432_v55  ;;  %v2127_v47 = vrot.slane %v2125_v43, 4  ;;  %v2951_v60 = vunpack.c.l.b16 %v1528_v35  ;;  %v504_v2 = vld [vmem:[%s13380_s26 + $0x50] sm:$0xf] }
 0x15b   : > { %3348 = vrot.lane.b32.xlu0 %v12746_v21, %s17655_s29  ;;  %v2893_v11 = vpack.c.b16 %v2871_v63, %v2870_v59  ;;  %v2128_v57 = vrot.slane %v14180_v8, 5  ;;  %v1836_v36 = vshrl.u32 %v1589_v33, 16  ;;  %v3204_v56 = vunpack.c.l.b16 %v2126_v5  ;;  %v505_v5 = vld [vmem:[%s13380_s26 + $0x54] sm:$0xf] }
 0x15c   : > { %v2433_v49 = vsel %vm13361_vm7, %v2428_v20, %v2432_v55  ;;  %v2438_v15 = vrot.slane %v2437_v17, 4  ;;  %v1839_v53 = vshll.u32 %v1589_v33, 16  ;;  %v1845_v37 = vshll.u32 %v1590_v40, 16 }
 0x15d   : > { %v3085_v27 = vpop.permute.xlu1 %3084  ;;  %v3380_v44 = vunpack.c.l.b16 %v2433_v49  ;;  %v2129_v32 = vsel %vm13306_vm4, %v2127_v47, %v2128_v57  ;;  %v1838_v39 = vrot.slane %v1836_v36, 4  ;;  %v1849_v29 = vshrl.u32 %v1590_v40, 16 }
 0x15e   : > { %v2443_v61 = vsel %vm13361_vm7, %v2438_v15, %v2442_v45  ;;  %v3205_v8 = vunpack.c.l.b16 %v2129_v32  ;;  %v1841_v42 = vrot.slane %v1839_v53, 5  ;;  %v14277_v23 = vpack.c.b16 %v2951_v60, %v2950_v30  ;;  %v14307_v32 = vld [vmem:[#allocation2 + $0x7c] sm:$0xf] }
 0x15f   : > { %v3381_v9 = vunpack.c.l.b16 %v2443_v61  ;;  %v1847_v13 = vrot.slane %v1845_v37, 5  ;;  %v1855_v14 = vshll.u32 %v1612_v38, 16  ;;  %v1851_v22 = vrot.slane %v1849_v29, 4  ;;  %v14310_v61 = vld [vmem:[#allocation2 + $0x80] sm:$0x1] }
 0x160   : > { %v2989_v1 = vpop.permute.xlu0 %2988  ;;  %v3228_v4 = vpack.c.b16 %v3205_v8, %v3204_v56  ;;  %v1842_v10 = vor.u32 %v1841_v42, %v1838_v39  ;;  %v11621_v43 = vrot.slane %v2012_v62, 9  ;;  %v2132_v18 = vrot.slane %v1590_v40, 5  ;;  %v506_v42 = vld [vmem:[%s13380_s26 + $0x58] sm:$0xf] }
 0x161   : > { %v3404_v58 = vpack.c.b16 %v3381_v9, %v3380_v44  ;;  %v1857_v34 = vrot.slane %v1855_v14, 5  ;;  %v2135_v19 = vrot.slane %v1612_v38, 5  ;;  %v1852_v21 = vor.u32 %v1851_v22, %v1847_v13  ;;  %v915_v44 = vld [vmem:[#allocation2 + $0x84] sm:$0xf] }
 0x162   : > { %3252 = vrot.lane.b32.xlu2 %v3228_v4, %s13186_s14  ;;  %v1843_v52 = vrot.slane %v1842_v10, 4  ;;  %v11636_v51 = vrot.slane %v2620_v7, 9  ;;  %v2734_v16 = vrot.slane %v14251_v31, 5  ;;  %v14285_v54 = vsel %vm13306_vm4, %v11621_v43, %v2132_v18 }
 0x163   : > { %3428 = vrot.lane.b32.xlu1 %v3404_v58, %s13188_s17  ;;  %2918 = vrot.lane.b32.xlu0 %v2893_v11, %s13183_s27  ;;  %v2134_v30 = vrot.slane %v2132_v18, 4  ;;  %v2737_v50 = vrot.slane %v14254_v6, 5  ;;  %v3779_v55 = vsel %vm17653_vm13, %v3746_v41, %v14247_v28  ;;  %v1853_v31 = vrot.slane %v1852_v21, 4  ;;  %v1402_v11 = vld [vmem:[#allocation2 + $0x78] sm:$0xe]  ;;  %v12711_v58 = vld [vmem:[#allocation2 + $0x3c] sm:$0xff] }
 0x164   : > { %v1848_v33 = vsel %vm13361_vm7, %v1843_v52, %v1847_v13  ;;  %v3583_v63 = vsel %vm3573_vm1, %v14241_v25, %v2989_v1  ;;  %v2735_v35 = vsel %vm13306_vm4, %v11636_v51, %v2734_v16  ;;  %11847 = vmatmul.msk.bf16.gmra.mxu0 %vm17652_vm9, %v3779_v55  ;;  %v3206_v28 = vunpack.c.l.b16 %v14285_v54  ;;  %v919_v13 = vld [vmem:[#allocation2 + $0x8c] sm:$0x1]  ;;  %v977_v51 = vld [vmem:[#allocation2 + $0x78] sm:$0xf] }
 0x165   : > { %v3341_v59 = vpop.permute.xlu1 %3340  ;;  %v3126_v20 = vunpack.c.l.b16 %v1848_v33  ;;  %v2136_v6 = vsel %vm13306_vm4, %v2134_v30, %v2135_v19  ;;  %v2736_v41 = vrot.slane %v2734_v16, 4  ;;  %v1858_v17 = vsel %vm13361_vm7, %v1853_v31, %v1857_v34  ;;  %v507_v34 = vld [vmem:[%s13380_s26 + $0x5c] sm:$0xf]  ;;  %v922_v31 = vld [vmem:[#allocation2 + $0x90] sm:$0xf] }
 0x166   : > { %v3460_v45 = vunpack.c.l.b16 %v2735_v35  ;;  %v3616_v47 = vsel %vm3606_vm2, %v3583_v63, %v3085_v27  ;;  %v690_v25 = vshrl.u32 %v504_v2, 16  ;;  %v3127_v60 = vunpack.c.l.b16 %v1858_v17  ;;  %v3421_v27 = vpop.permute.xlu2 %3420  ;;  %v12731_v63 = vld [vmem:[#allocation2 + $0x78] sm:$0xff] }
 0x167   : > { %v2738_v57 = vsel %vm13306_vm4, %v2736_v41, %v2737_v50  ;;  %v693_v36 = vshll.u32 %v504_v2, 16  ;;  %v698_v49 = vshrl.u32 %v505_v5, 16  ;;  %v3207_v15 = vunpack.c.l.b16 %v2136_v6 }
 0x168   : > { %v3245_v40 = vpop.permute.xlu0 %3244  ;;  %v3461_v56 = vunpack.c.l.b16 %v2738_v57  ;;  %v692_v38 = vrot.slane %v690_v25, 7  ;;  %v701_v53 = vshll.u32 %v505_v5, 16  ;;  %v3149_v39 = vpack.c.b16 %v3127_v60, %v3126_v20 }
 0x169   : > { %v700_v37 = vrot.slane %v698_v49, 7  ;;  %v3649_v62 = vsel %vm3639_vm3, %v3616_v47, %v3165_v12  ;;  %v11606_v8 = vrot.slane %v1402_v11, 9  ;;  %v1531_v10 = vrot.slane %v14307_v32, 5 }
 0x16a   : > { %v3484_v29 = vpack.c.b16 %v3461_v56, %v3460_v45  ;;  %v695_v1 = vor.u32 %v693_v36, %v692_v38  ;;  %v696_v9 = vrot.slane %v692_v38, 4  ;;  %v3682_v14 = vsel %vm3672_vm5, %v3649_v62, %v3245_v40 }
 0x16b   : > { %2998 = vrot.lane.b32.xlu1 %v14277_v23, %s13182_s21  ;;  %3174 = vrot.lane.b32.xlu0 %v3149_v39, %s13189_s22  ;;  %v703_v7 = vor.u32 %v701_v53, %v700_v37  ;;  %v705_v4 = vrot.slane %v700_v37, 4  ;;  %v3715_v12 = vsel %vm3705_vm6, %v3682_v14, %v3341_v59  ;;  %v1534_v43 = vrot.slane %v14310_v61, 5 }
 0x16c   : > { %3508 = vrot.lane.b32.xlu2 %v3484_v29, %s13187_s16  ;;  %v916_v22 = vsel %vm13420_vm11, %v695_v1, %v915_v44  ;;  %v707_v18 = vshrl.u32 %v506_v42, 16  ;;  %v1533_v52 = vrot.slane %v1531_v10, 4  ;;  %v3748_v54 = vsel %vm17654_vm10, %v3715_v12, %v3421_v27 }
 0x16d   : > { %v704_v23 = vsel %vm13427_vm12, %v696_v9, %v703_v7  ;;  %917 = vst [vmem:[#allocation2 + $0x84] sm:$0xf] %v916_v22  ;;  %v920_v19 = vsel %vm13567_vm14, %v705_v4, %v919_v13  ;;  %v2911_v21 = vpop.permute.xlu1 %2910  ;;  %v710_v50 = vshll.u32 %v506_v42, 16  ;;  %v3229_v55 = vpack.c.b16 %v3207_v15, %v3206_v28 }
 0x16e   : > { %918 = vst.msk [vmem:[#allocation2 + $0x88] sm:$0xf] %vm17651_vm0, %v704_v23  ;;  %v709_v30 = vrot.slane %v707_v18, 7  ;;  %v14332_v2 = vsel %vm13306_vm4, %v11606_v8, %v1531_v10  ;;  %v715_v59 = vshrl.u32 %v507_v34, 16  ;;  %v718_v33 = vshll.u32 %v507_v34, 16  ;;  %v2991_v11 = vpop.permute.xlu2 %2990 }
 0x16f   : > { %921 = vst [vmem:[#allocation2 + $0x8c] sm:$0x1] %v920_v19  ;;  %v14336_v35 = vsel %vm13306_vm4, %v1533_v52, %v1534_v43  ;;  %v3542_v5 = vsel %vm3524_vm15, %v12711_v58, %v2911_v21  ;;  %v1249_v6 = vshrl.u32 %v977_v51, 16  ;;  %v1252_v45 = vshll.u32 %v977_v51, 16 }
 0x170   : > { %v3501_v16 = vpop.permute.xlu0 %3500  ;;  %v712_v20 = vor.u32 %v710_v50, %v709_v30  ;;  %v713_v28 = vrot.slane %v709_v30, 4  ;;  %v14340_v17 = vrot.slane %v715_v59, 7  ;;  %v1258_v40 = vshll.u32 %v14307_v32, 16 }
 0x171   : > { %v3781_v41 = vsel %vm17653_vm13, %v3748_v54, %v3501_v16  ;;  %v1251_v25 = vrot.slane %v1249_v6, 4  ;;  %v1254_v57 = vrot.slane %v1252_v45, 5  ;;  %v1262_v36 = vshrl.u32 %v14307_v32, 16 }
 0x172   : > { %v923_v47 = vsel %vm13420_vm11, %v712_v20, %v922_v31  ;;  %v720_v60 = vor.u32 %v718_v33, %v14340_v17  ;;  %v1268_v49 = vshll.u32 %v14310_v61, 16  ;;  %v2952_v38 = vunpack.c.l.b16 %v14332_v2 }
 0x173   : > { %3254 = vrot.lane.b32.xlu1 %v3229_v55, %s13186_s14  ;;  %924 = vst [vmem:[#allocation2 + $0x90] sm:$0xf] %v923_v47  ;;  %v2953_v53 = vunpack.c.l.b16 %v14336_v35  ;;  %v3585_v39 = vsel %vm3573_vm1, %v3542_v5, %v2991_v11  ;;  %v1255_v14 = vor.u32 %v1254_v57, %v1251_v25  ;;  %v722_v16 = vrot.slane %v14340_v17, 4  ;;  %v926_v47 = vld [vmem:[#allocation2 + $0x98] sm:$0x1] }
 0x174   : > { %v2198_v15 = vld [vmem:[#allocation2 + $0x84] sm:$0xf]  ;;  %3094 = vrot.lane.b32.xlu2 %v12731_v63, %s13184_s28  ;;  %11848 = vmatmul.msk.bf16.gmra.mxu0 %vm17652_vm9, %v3781_v41  ;;  %v721_v32 = vsel %vm13427_vm12, %v713_v28, %v720_v60  ;;  %v1260_v6 = vrot.slane %v1258_v40, 5  ;;  %v1264_v45 = vrot.slane %v1262_v36, 4  ;;  %v1270_v36 = vrot.slane %v1268_v49, 5 }
 0x175   : > { %v2621_v56 = vld [vmem:[#allocation2 + $0x84] sm:$0xe]  ;;  %v2199_v37 = vld [vmem:[#allocation2 + $0x88] sm:$0xf]  ;;  %v2445_v27 = vshrl.u32 %v2198_v15, 16  ;;  %v2448_v62 = vshll.u32 %v2198_v15, 16  ;;  %v3167_v63 = vpop.permute.xlu1 %3166  ;;  %v14375_v17 = vpack.c.b16 %v2953_v53, %v2952_v38 }
 0x176   : > { %v2013_v44 = vld [vmem:[#allocation2 + $0x84] sm:$0xe]  ;;  %v11637_v8 = vrot.slane %v2621_v56, 9  ;;  %v2221_v42 = vld [vmem:[#allocation2 + $0x8c] sm:$0x1]  ;;  %v2454_v29 = vshll.u32 %v2199_v37, 16  ;;  %v3247_v38 = vpop.permute.xlu2 %3246  ;;  %v1265_v53 = vor.u32 %v1264_v45, %v1260_v6 }
 0x177   : > { %v2458_v1 = vshrl.u32 %v2199_v37, 16  ;;  %v2741_v9 = vrot.slane %v2199_v37, 5  ;;  %v2447_v7 = vrot.slane %v2445_v27, 4  ;;  %v2450_v4 = vrot.slane %v2448_v62, 5  ;;  %v14356_v22 = vld [vmem:[#allocation2 + $0x88] sm:$0xf] }
 0x178   : > { %v3087_v13 = vpop.permute.xlu0 %3086  ;;  %v2464_v12 = vshll.u32 %v2221_v42, 16  ;;  %v2744_v10 = vrot.slane %v2221_v42, 5  ;;  %v2456_v43 = vrot.slane %v2454_v29, 5  ;;  %v12747_v23 = vld [vmem:[#allocation2 + $0x84] sm:$0xff]  ;;  %v14360_v19 = vld [vmem:[#allocation2 + $0x8c] sm:$0x1] }
 0x179   : > { %v2460_v58 = vrot.slane %v2458_v1, 4  ;;  %v2742_v34 = vsel %vm13306_vm4, %v11637_v8, %v2741_v9  ;;  %v2743_v18 = vrot.slane %v2741_v9, 4  ;;  %v2451_v52 = vor.u32 %v2450_v4, %v2447_v7  ;;  %925 = vst.msk [vmem:[#allocation2 + $0x94] sm:$0xf] %vm17651_vm0, %v721_v32  ;;  %v979_v37 = vld [vmem:[#allocation2 + $0x84] sm:$0xf] }
 0x17a   : > { %v3462_v21 = vunpack.c.l.b16 %v2742_v34  ;;  %v11622_v51 = vrot.slane %v2013_v44, 9  ;;  %v2466_v30 = vrot.slane %v2464_v12, 5  ;;  %v2139_v55 = vrot.slane %v14356_v22, 5  ;;  %v2622_v25 = vld [vmem:[#allocation2 + $0x90] sm:$0xe] }
 0x17b   : > { %v2461_v54 = vor.u32 %v2460_v58, %v2456_v43  ;;  %v2745_v50 = vsel %vm13306_vm4, %v2743_v18, %v2744_v10  ;;  %v2452_v2 = vrot.slane %v2451_v52, 4  ;;  %v2142_v33 = vrot.slane %v14360_v19, 5  ;;  %v14386_v27 = vld [vmem:[#allocation2 + $0x88] sm:$0xf]  ;;  %v14396_v49 = vld [vmem:[#allocation2 + $0x8c] sm:$0x1] }
 0x17c   : > { %v3463_v59 = vunpack.c.l.b16 %v2745_v50  ;;  %v1256_v31 = vrot.slane %v1255_v14, 4  ;;  %3350 = vrot.lane.b32.xlu2 %v12747_v23, %s17655_s29  ;;  %v14371_v5 = vsel %vm13306_vm4, %v11622_v51, %v2139_v55  ;;  %v2141_v20 = vrot.slane %v2139_v55, 4  ;;  %v1591_v12 = vld [vmem:[#allocation2 + $0x84] sm:$0xf] }
 0x17d   : > { %v2462_v35 = vrot.slane %v2461_v54, 4  ;;  %v2457_v41 = vsel %vm13361_vm7, %v2452_v2, %v2456_v43  ;;  %v3618_v57 = vsel %vm3606_vm2, %v3585_v39, %v3087_v13  ;;  %v3208_v44 = vunpack.c.l.b16 %v14371_v5  ;;  %v12732_v10 = vld [vmem:[#allocation2 + $0x84] sm:$0xff] }
 0x17e   : > { %v3485_v28 = vpack.c.b16 %v3463_v59, %v3462_v21  ;;  %v3382_v60 = vunpack.c.l.b16 %v2457_v41  ;;  %v1261_v15 = vsel %vm13361_vm7, %v1256_v31, %v1260_v6  ;;  %v2143_v39 = vsel %vm13306_vm4, %v2141_v20, %v2142_v33  ;;  %v12712_v6 = vld [vmem:[#allocation2 + $0x48] sm:$0xff] }
 0x17f   : > { %v2467_v11 = vsel %vm13361_vm7, %v2462_v35, %v2466_v30  ;;  %v3651_v62 = vsel %vm3639_vm3, %v3618_v57, %v3167_v63  ;;  %v927_v8 = vsel %vm13567_vm14, %v722_v16, %v926_v47  ;;  %v11638_v42 = vrot.slane %v2622_v25, 9  ;;  %v3503_v57 = vpop.permute.xlu2 %3502 }
 0x180   : > { %v3343_v56 = vpop.permute.xlu0 %3342  ;;  %v3383_v40 = vunpack.c.l.b16 %v2467_v11  ;;  %3510 = vrot.lane.b32.xlu1 %v3485_v28, %s13187_s16  ;;  %v14393_v32 = vld [vmem:[#allocation2 + $0x94] sm:$0xf]  ;;  %v1266_v1 = vrot.slane %v1265_v53, 4  ;;  %v2872_v9 = vunpack.c.l.b16 %v1261_v15  ;;  %928 = vst [vmem:[#allocation2 + $0x98] sm:$0x1] %v927_v8  ;;  %v3684_v13 = vsel %vm3672_vm5, %v3651_v62, %v3247_v38 }
 0x181   : > { %v2748_v61 = vrot.slane %v14393_v32, 5  ;;  %v1273_v14 = vshrl.u32 %v979_v37, 16  ;;  %v1276_v7 = vshll.u32 %v979_v37, 16  ;;  %v1282_v4 = vshll.u32 %v14386_v27, 16  ;;  %v1593_v38 = vld [vmem:[#allocation2 + $0x90] sm:$0xf] }
 0x182   : > { %v3405_v29 = vpack.c.b16 %v3383_v40, %v3382_v60  ;;  %v3209_v43 = vunpack.c.l.b16 %v2143_v39  ;;  %v1271_v58 = vsel %vm13361_vm7, %v1266_v1, %v1270_v36  ;;  %v3717_v52 = vsel %vm3705_vm6, %v3684_v13, %v3343_v56  ;;  %v14422_v39 = vld [vmem:[#allocation2 + $0x94] sm:$0xf] }
 0x183   : > { %v14405_v34 = vsel %vm13306_vm4, %v11638_v42, %v2748_v61  ;;  %v2750_v18 = vrot.slane %v2748_v61, 4  ;;  %v2873_v23 = vunpack.c.l.b16 %v1271_v58  ;;  %v1275_v21 = vrot.slane %v1273_v14, 4  ;;  %v3423_v55 = vpop.permute.xlu1 %3422 }
 0x184   : > { %3430 = vrot.lane.b32.xlu0 %v3405_v29, %s13188_s17  ;;  %v1278_v51 = vrot.slane %v1276_v7, 5  ;;  %v1284_v16 = vrot.slane %v1282_v4, 5  ;;  %v1286_v54 = vshrl.u32 %v14386_v27, 16  ;;  %v1292_v30 = vshll.u32 %v14396_v49, 16 }
 0x185   : > { %v1860_v50 = vshrl.u32 %v1591_v12, 16  ;;  %v2894_v2 = vpack.c.b16 %v2873_v23, %v2872_v9  ;;  %v1863_v33 = vshll.u32 %v1591_v12, 16  ;;  %v1869_v31 = vshll.u32 %v14356_v22, 16 }
 0x186   : > { %v1279_v59 = vor.u32 %v1278_v51, %v1275_v21  ;;  %v1288_v63 = vrot.slane %v1286_v54, 4  ;;  %v1294_v35 = vrot.slane %v1292_v30, 5  ;;  %v1873_v20 = vshrl.u32 %v14356_v22, 16 }
 0x187   : > { %v1862_v5 = vrot.slane %v1860_v50, 4  ;;  %2920 = vrot.lane.b32.xlu2 %v2894_v2, %s13183_s27  ;;  %v14414_v41 = vld [vmem:[#allocation2 + $0x98] sm:$0x1]  ;;  %v1865_v45 = vrot.slane %v1863_v33, 5  ;;  %v1871_v47 = vrot.slane %v1869_v31, 5  ;;  %v1879_v25 = vshll.u32 %v14360_v19, 16 }
 0x188   : > { %3096 = vrot.lane.b32.xlu1 %v12732_v10, %s13184_s28  ;;  %v1280_v28 = vrot.slane %v1279_v59, 4  ;;  %v2913_v11 = vpop.permute.xlu0 %2912  ;;  %v2751_v60 = vrot.slane %v14414_v41, 5  ;;  %v1289_v15 = vor.u32 %v1288_v63, %v1284_v16  ;;  %v1875_v56 = vrot.slane %v1873_v20, 4  ;;  %v12748_v19 = vld [vmem:[#allocation2 + $0x90] sm:$0xff]  ;;  %v508_v20 = vld [vmem:[%s13380_s26 + $0x60] sm:$0xf] }
 0x189   : > { %v3750_v40 = vsel %vm17654_vm10, %v3717_v52, %v3423_v55  ;;  %v3230_v22 = vpack.c.b16 %v3209_v43, %v3208_v44  ;;  %v3464_v53 = vunpack.c.l.b16 %v14405_v34  ;;  %v1866_v37 = vor.u32 %v1865_v45, %v1862_v5  ;;  %v2200_v34 = vld [vmem:[#allocation2 + $0x90] sm:$0xf] }
 0x18a   : > { %v1285_v36 = vsel %vm13361_vm7, %v1280_v28, %v1284_v16  ;;  %v1290_v62 = vrot.slane %v1289_v15, 4  ;;  %v1876_v8 = vor.u32 %v1875_v56, %v1871_v47  ;;  %v1881_v42 = vrot.slane %v1879_v25, 5  ;;  %v509_v56 = vld [vmem:[%s13380_s26 + $0x64] sm:$0xf] }
 0x18b   : > { %v14427_v29 = vsel %vm3524_vm15, %v12712_v6, %v2913_v11  ;;  %v2752_v44 = vsel %vm13306_vm4, %v2750_v18, %v2751_v60  ;;  %v1867_v1 = vrot.slane %v1866_v37, 4  ;;  %v3783_v9 = vsel %vm17653_vm13, %v3750_v40, %v3503_v57  ;;  %v2993_v51 = vpop.permute.xlu1 %2992  ;;  %v3089_v6 = vpop.permute.xlu2 %3088 }
 0x18c   : > { %3000 = vrot.lane.b32.xlu0 %v14375_v17, %s13182_s21  ;;  %v1884_v61 = vshrl.u32 %v1593_v38, 16  ;;  %v1295_v13 = vsel %vm13361_vm7, %v1290_v62, %v1294_v35  ;;  %v1877_v14 = vrot.slane %v1876_v8, 4  ;;  %11849 = vmatmul.msk.bf16.gmra.mxu0 %vm17652_vm9, %v3783_v9  ;;  %v14435_v17 = vld [vmem:[#allocation2 + $0x98] sm:$0x1]  ;;  %v1887_v7 = vshll.u32 %v1593_v38, 16 }
 0x18d   : > { %v1893_v4 = vshll.u32 %v14422_v39, 16  ;;  %v2874_v12 = vunpack.c.l.b16 %v1285_v36  ;;  %v2875_v10 = vunpack.c.l.b16 %v1295_v13  ;;  %v1872_v43 = vsel %vm13361_vm7, %v1867_v1, %v1871_v47  ;;  %v1403_v8 = vld [vmem:[#allocation2 + $0x84] sm:$0xe] }
 0x18e   : > { %v1886_v58 = vrot.slane %v1884_v61, 4  ;;  %v3465_v18 = vunpack.c.l.b16 %v2752_v44  ;;  %v1882_v23 = vsel %vm13361_vm7, %v1877_v14, %v1881_v42  ;;  %v3128_v52 = vunpack.c.l.b16 %v1872_v43 }
 0x18f   : > { %v1889_v21 = vrot.slane %v1887_v7, 5  ;;  %v3129_v16 = vunpack.c.l.b16 %v1882_v23  ;;  %v1895_v54 = vrot.slane %v1893_v4, 5  ;;  %v1897_v30 = vshrl.u32 %v14422_v39, 16  ;;  %v929_v7 = vld [vmem:[#allocation2 + $0x9c] sm:$0xf] }
 0x190   : > { %3352 = vrot.lane.b32.xlu1 %v12748_v19, %s17655_s29  ;;  %v1903_v50 = vshll.u32 %v14435_v17, 16  ;;  %v2469_v2 = vshrl.u32 %v2200_v34, 16  ;;  %v2472_v59 = vshll.u32 %v2200_v34, 16  ;;  %v2478_v33 = vshll.u32 %v14393_v32, 16 }
 0x191   : > { %v1890_v55 = vor.u32 %v1889_v21, %v1886_v58  ;;  %v2895_v31 = vpack.c.b16 %v2875_v10, %v2874_v12  ;;  %v3150_v63 = vpack.c.b16 %v3129_v16, %v3128_v52  ;;  %v1899_v35 = vrot.slane %v1897_v30, 4  ;;  %v981_v52 = vld [vmem:[#allocation2 + $0x90] sm:$0xf]  ;;  %v3169_v16 = vpop.permute.xlu0 %3168 }
 0x192   : > { %v2482_v5 = vshrl.u32 %v14393_v32, 16  ;;  %v2471_v45 = vrot.slane %v2469_v2, 4  ;;  %v2474_v47 = vrot.slane %v2472_v59, 5  ;;  %v2480_v25 = vrot.slane %v2478_v33, 5  ;;  %v982_v33 = vld [vmem:[#allocation2 + $0x94] sm:$0xf] }
 0x193   : > { %v1891_v28 = vrot.slane %v1890_v55, 4  ;;  %3176 = vrot.lane.b32.xlu2 %v3150_v63, %s13189_s22  ;;  %v1900_v11 = vor.u32 %v1899_v35, %v1895_v54  ;;  %v1905_v60 = vrot.slane %v1903_v50, 5  ;;  %v2488_v15 = vshll.u32 %v14414_v41, 16  ;;  %v3249_v43 = vpop.permute.xlu1 %3248  ;;  %v3345_v63 = vpop.permute.xlu2 %3344 }
 0x194   : > { %3256 = vrot.lane.b32.xlu0 %v3230_v22, %s13186_s14  ;;  %v2484_v57 = vrot.slane %v2482_v5, 4  ;;  %v2475_v32 = vor.u32 %v2474_v47, %v2471_v45  ;;  %v724_v38 = vshrl.u32 %v508_v20, 16  ;;  %v727_v36 = vshll.u32 %v508_v20, 16  ;;  %v1001_v20 = vld [vmem:[#allocation2 + $0x98] sm:$0x1] }
 0x195   : > { %v1896_v40 = vsel %vm13361_vm7, %v1891_v28, %v1895_v54  ;;  %v3486_v22 = vpack.c.b16 %v3465_v18, %v3464_v53  ;;  %v1901_v37 = vrot.slane %v1900_v11, 4  ;;  %v2490_v62 = vrot.slane %v2488_v15, 5  ;;  %v933_v54 = vld [vmem:[#allocation2 + $0xa4] sm:$0x1]  ;;  %v12733_v11 = vld [vmem:[#allocation2 + $0x90] sm:$0xff] }
 0x196   : > { %v2485_v19 = vor.u32 %v2484_v57, %v2480_v25  ;;  %v3130_v42 = vunpack.c.l.b16 %v1896_v40  ;;  %v2476_v44 = vrot.slane %v2475_v32, 4  ;;  %v726_v1 = vrot.slane %v724_v38, 7  ;;  %v2014_v38 = vld [vmem:[#allocation2 + $0x90] sm:$0xe] }
 0x197   : > { %v732_v9 = vshrl.u32 %v509_v56, 16  ;;  %v1906_v41 = vsel %vm13361_vm7, %v1901_v37, %v1905_v60  ;;  %v3587_v13 = vsel %vm3573_vm1, %v14427_v29, %v2993_v51  ;;  %v735_v14 = vshll.u32 %v509_v56, 16 }
 0x198   : > { %2922 = vrot.lane.b32.xlu1 %v2895_v31, %s13183_s27  ;;  %v2486_v61 = vrot.slane %v2485_v19, 4  ;;  %v3131_v53 = vunpack.c.l.b16 %v1906_v41  ;;  %v2481_v4 = vsel %vm13361_vm7, %v2476_v44, %v2480_v25  ;;  %v729_v12 = vor.u32 %v727_v36, %v726_v1 }
 0x199   : > { %v11607_v10 = vrot.slane %v1403_v8, 9  ;;  %v3384_v34 = vunpack.c.l.b16 %v2481_v4  ;;  %v730_v18 = vrot.slane %v726_v1, 4  ;;  %v734_v23 = vrot.slane %v732_v9, 7 }
 0x19a   : > { %v2491_v58 = vsel %vm13361_vm7, %v2486_v61, %v2490_v62  ;;  %v3151_v21 = vpack.c.b16 %v3131_v53, %v3130_v42  ;;  %v930_v51 = vsel %vm13420_vm11, %v729_v12, %v929_v7  ;;  %v1538_v30 = vrot.slane %v14386_v27, 5 }
 0x19b   : > { %v3385_v29 = vunpack.c.l.b16 %v2491_v58  ;;  %v737_v50 = vor.u32 %v735_v14, %v734_v23  ;;  %v739_v55 = vrot.slane %v734_v23, 4  ;;  %931 = vst [vmem:[#allocation2 + $0x9c] sm:$0xf] %v930_v51  ;;  %v3620_v2 = vsel %vm3606_vm2, %v3587_v13, %v3089_v6  ;;  %v1404_v6 = vld [vmem:[#allocation2 + $0x90] sm:$0xe] }
 0x19c   : > { %3512 = vrot.lane.b32.xlu0 %v3486_v22, %s13187_s16  ;;  %v1541_v59 = vrot.slane %v14396_v49, 5  ;;  %v1539_v35 = vsel %vm13306_vm4, %v11607_v10, %v1538_v30  ;;  %v1540_v5 = vrot.slane %v1538_v30, 4  ;;  %v1297_v28 = vshrl.u32 %v981_v52, 16 }
 0x19d   : > { %v3406_v31 = vpack.c.b16 %v3385_v29, %v3384_v34  ;;  %v738_v45 = vsel %vm13427_vm12, %v730_v18, %v737_v50  ;;  %v934_v27 = vsel %vm13567_vm14, %v739_v55, %v933_v54  ;;  %v2954_v47 = vunpack.c.l.b16 %v1539_v35  ;;  %v2915_v55 = vpop.permute.xlu2 %2914 }
 0x19e   : > { %v1300_v25 = vshll.u32 %v981_v52, 16  ;;  %932 = vst.msk [vmem:[#allocation2 + $0xa0] sm:$0xf] %vm17651_vm0, %v738_v45  ;;  %v1542_v49 = vsel %vm13306_vm4, %v1540_v5, %v1541_v59  ;;  %v1299_v60 = vrot.slane %v1297_v28, 4  ;;  %v1306_v57 = vshll.u32 %v982_v33, 16 }
 0x19f   : > { %3432 = vrot.lane.b32.xlu2 %v3406_v31, %s13188_s17  ;;  %v1310_v15 = vshrl.u32 %v982_v33, 16  ;;  %935 = vst [vmem:[#allocation2 + $0xa4] sm:$0x1] %v934_v27  ;;  %v2955_v56 = vunpack.c.l.b16 %v1542_v49  ;;  %v1316_v32 = vshll.u32 %v1001_v20, 16  ;;  %v3653_v36 = vsel %vm3639_vm3, %v3620_v2, %v3169_v16 }
 0x1a0   : > { %3178 = vrot.lane.b32.xlu1 %v3151_v21, %s13189_s22  ;;  %v1302_v40 = vrot.slane %v1300_v25, 5  ;;  %v1308_v22 = vrot.slane %v1306_v57, 5  ;;  %v11608_v19 = vrot.slane %v1404_v6, 9  ;;  %v3686_v8 = vsel %vm3672_vm5, %v3653_v36, %v3249_v43 }
 0x1a1   : > { %v1312_v37 = vrot.slane %v1310_v15, 4  ;;  %v2975_v62 = vpack.c.b16 %v2955_v56, %v2954_v47  ;;  %v1545_v44 = vrot.slane %v982_v33, 5  ;;  %v1318_v41 = vrot.slane %v1316_v32, 5  ;;  %v14483_v14 = vpop.permute.xlu1 %3504  ;;  %v12713_v32 = vld [vmem:[#allocation2 + $0x54] sm:$0xff] }
 0x1a2   : > { %v1303_v42 = vor.u32 %v1302_v40, %v1299_v60  ;;  %v2202_v1 = vld [vmem:[#allocation2 + $0x9c] sm:$0xf]  ;;  %v1548_v61 = vrot.slane %v1001_v20, 5  ;;  %v11623_v13 = vrot.slane %v2014_v38, 9  ;;  %v3719_v58 = vsel %vm3705_vm6, %v3686_v8, %v3345_v63 }
 0x1a3   : > { %v1313_v9 = vor.u32 %v1312_v37, %v1308_v22  ;;  %v2493_v7 = vshrl.u32 %v2202_v1, 16  ;;  %v2496_v53 = vshll.u32 %v2202_v1, 16  ;;  %v14487_v12 = vsel %vm13306_vm4, %v11608_v19, %v1545_v44  ;;  %v1595_v35 = vld [vmem:[#allocation2 + $0x9c] sm:$0xf] }
 0x1a4   : > { %3098 = vrot.lane.b32.xlu0 %v12733_v11, %s13184_s28  ;;  %v1304_v4 = vrot.slane %v1303_v42, 4  ;;  %v1547_v34 = vrot.slane %v1545_v44, 4  ;;  %v2146_v18 = vrot.slane %v14422_v39, 5  ;;  %v2956_v51 = vunpack.c.l.b16 %v14487_v12 }
 0x1a5   : > { %v1314_v10 = vrot.slane %v1313_v9, 4  ;;  %v3425_v43 = vpop.permute.xlu0 %3424  ;;  %v14491_v23 = vld [vmem:[#allocation2 + $0xa0] sm:$0xf]  ;;  %v2495_v52 = vrot.slane %v2493_v7, 4  ;;  %v2498_v21 = vrot.slane %v2496_v53, 5  ;;  %v2149_v11 = vrot.slane %v14435_v17, 5 }
 0x1a6   : > { %v1309_v29 = vsel %vm13361_vm7, %v1304_v4, %v1308_v22  ;;  %v12749_v16 = vld [vmem:[#allocation2 + $0x9c] sm:$0xff]  ;;  %v14496_v54 = vld [vmem:[#allocation2 + $0xa4] sm:$0x1]  ;;  %v2502_v30 = vshll.u32 %v14491_v23, 16  ;;  %v2506_v50 = vshrl.u32 %v14491_v23, 16  ;;  %v2147_v2 = vsel %vm13306_vm4, %v11623_v13, %v2146_v18 }
 0x1a7   : > { %3002 = vrot.lane.b32.xlu2 %v2975_v62, %s13182_s21  ;;  %v1319_v39 = vsel %vm13361_vm7, %v1314_v10, %v1318_v41  ;;  %v2499_v59 = vor.u32 %v2498_v21, %v2495_v52  ;;  %v2512_v33 = vshll.u32 %v14496_v54, 16  ;;  %v3752_v31 = vsel %vm17654_vm10, %v3719_v58, %v3425_v43  ;;  %v14509_v27 = vld [vmem:[#allocation2 + $0xa0] sm:$0xf]  ;;  %v14513_v15 = vld [vmem:[#allocation2 + $0xa4] sm:$0x1]  ;;  %v3171_v21 = vpop.permute.xlu2 %3170 }
 0x1a8   : > { %v1549_v63 = vsel %vm13306_vm4, %v1547_v34, %v1548_v61  ;;  %v2504_v5 = vrot.slane %v2502_v30, 5  ;;  %v2508_v20 = vrot.slane %v2506_v50, 4  ;;  %v2876_v28 = vunpack.c.l.b16 %v1309_v29  ;;  %v2623_v61 = vld [vmem:[#allocation2 + $0x9c] sm:$0xe] }
 0x1a9   : > { %v2148_v45 = vrot.slane %v2146_v18, 4  ;;  %v2500_v47 = vrot.slane %v2499_v59, 4  ;;  %v2877_v25 = vunpack.c.l.b16 %v1319_v39  ;;  %v2957_v6 = vunpack.c.l.b16 %v1549_v63  ;;  %v3091_v42 = vpop.permute.xlu1 %3090  ;;  %v2015_v18 = vld [vmem:[#allocation2 + $0x9c] sm:$0xe] }
 0x1aa   : > { %v2509_v49 = vor.u32 %v2508_v20, %v2504_v5  ;;  %v2514_v60 = vrot.slane %v2512_v33, 5  ;;  %v3210_v57 = vunpack.c.l.b16 %v2147_v2  ;;  %v1908_v56 = vshrl.u32 %v1595_v35, 16  ;;  %v511_v20 = vld [vmem:[%s13380_s26 + $0x6c] sm:$0xf] }
 0x1ab   : > { %v2505_v40 = vsel %vm13361_vm7, %v2500_v47, %v2504_v5  ;;  %v2150_v38 = vsel %vm13306_vm4, %v2148_v45, %v2149_v11  ;;  %v1911_v36 = vshll.u32 %v1595_v35, 16  ;;  %v1917_v22 = vshll.u32 %v14509_v27, 16 }
 0x1ac   : > { %3354 = vrot.lane.b32.xlu0 %v12749_v16, %s17655_s29  ;;  %v2510_v37 = vrot.slane %v2509_v49, 4  ;;  %v3386_v17 = vunpack.c.l.b16 %v2505_v40  ;;  %v3211_v19 = vunpack.c.l.b16 %v2150_v38  ;;  %v1910_v62 = vrot.slane %v1908_v56, 4 }
 0x1ad   : > { %v2995_v8 = vpop.permute.xlu0 %2994  ;;  %v1913_v44 = vrot.slane %v1911_v36, 5  ;;  %v1919_v1 = vrot.slane %v1917_v22, 5  ;;  %v1921_v9 = vshrl.u32 %v14509_v27, 16  ;;  %v1927_v41 = vshll.u32 %v14513_v15, 16 }
 0x1ae   : > { %v2515_v13 = vsel %vm13361_vm7, %v2510_v37, %v2514_v60  ;;  %v2896_v7 = vpack.c.b16 %v2877_v25, %v2876_v28  ;;  %v3231_v53 = vpack.c.b16 %v3211_v19, %v3210_v57  ;;  %v3785_v4 = vsel %vm17653_vm13, %v3752_v31, %v14483_v14  ;;  %v510_v31 = vld [vmem:[%s13380_s26 + $0x68] sm:$0xf] }
 0x1af   : > { %v3387_v10 = vunpack.c.l.b16 %v2515_v13  ;;  %v3548_v43 = vsel %vm3524_vm15, %v12713_v32, %v2915_v55  ;;  %v1914_v58 = vor.u32 %v1913_v44, %v1910_v62  ;;  %v1923_v34 = vrot.slane %v1921_v9, 4  ;;  %11850 = vmatmul.msk.bf16.gmra.mxu0 %vm17652_vm9, %v3785_v4  ;;  %v940_v44 = vld [vmem:[#allocation2 + $0xb0] sm:$0x1]  ;;  %v14560_v13 = vld [vmem:[%s17641_s2] ss:$0 sm:$0xff] }
 0x1b0   : > { %3258 = vrot.lane.b32.xlu2 %v3231_v53, %s13186_s14  ;;  %v1929_v52 = vrot.slane %v1927_v41, 5  ;;  %v2153_v29 = vrot.slane %v14509_v27, 5  ;;  %v11639_v16 = vrot.slane %v2623_v61, 9  ;;  %v2755_v39 = vrot.slane %v14491_v23, 5  ;;  %v3427_v61 = vpop.permute.xlu2 %3426 }
 0x1b1   : > { %v3407_v30 = vpack.c.b16 %v3387_v10, %v3386_v17  ;;  %v1915_v50 = vrot.slane %v1914_v58, 4  ;;  %v1924_v14 = vor.u32 %v1923_v34, %v1919_v1  ;;  %v2976_v55 = vpack.c.b16 %v2957_v6, %v2956_v51  ;;  %v936_v17 = vld [vmem:[#allocation2 + $0xa8] sm:$0xf] }
 0x1b2   : > { %v3589_v2 = vsel %vm3573_vm1, %v3548_v43, %v2995_v8  ;;  %v11624_v59 = vrot.slane %v2015_v18, 9  ;;  %v2758_v33 = vrot.slane %v14496_v54, 5  ;;  %v2156_v5 = vrot.slane %v14513_v15, 5  ;;  %v3347_v15 = vpop.permute.xlu1 %3346 }
 0x1b3   : > { %3434 = vrot.lane.b32.xlu1 %v3407_v30, %s13188_s17  ;;  %v1920_v63 = vsel %vm13361_vm7, %v1915_v50, %v1919_v1  ;;  %v1925_v35 = vrot.slane %v1924_v14, 4  ;;  %v2756_v23 = vsel %vm13306_vm4, %v11639_v16, %v2755_v39  ;;  %v2155_v51 = vrot.slane %v2153_v29, 4  ;;  %v12734_v30 = vld [vmem:[#allocation2 + $0x9c] sm:$0xff]  ;;  %v14576_v50 = vld [vmem:[#allocation2 + $0xa4] sm:$0x1] }
 0x1b4   : > { %2924 = vrot.lane.b32.xlu0 %v2896_v7, %s13183_s27  ;;  %v3132_v12 = vunpack.c.l.b16 %v1920_v63  ;;  %v2757_v28 = vrot.slane %v2755_v39, 4  ;;  %v3622_v45 = vsel %vm3606_vm2, %v3589_v2, %v3091_v42  ;;  %v3466_v47 = vunpack.c.l.b16 %v2756_v23  ;;  %v3874_v7 = vpop.f32.mrf.mxu0  ;;  %v1405_v14 = vld [vmem:[#allocation2 + $0x9c] sm:$0xe] }
 0x1b5   : > { %v3251_v27 = vpop.permute.xlu0 %3250  ;;  %v1930_v54 = vsel %vm13361_vm7, %v1925_v35, %v1929_v52  ;;  %v741_v25 = vshrl.u32 %v510_v31, 16  ;;  %v744_v6 = vshll.u32 %v510_v31, 16  ;;  %v749_v60 = vshrl.u32 %v511_v20, 16 }
 0x1b6   : > { %v3133_v11 = vunpack.c.l.b16 %v1930_v54  ;;  %v2759_v49 = vsel %vm13306_vm4, %v2757_v28, %v2758_v33  ;;  %v752_v57 = vshll.u32 %v511_v20, 16  ;;  %v2154_v56 = vsel %vm13306_vm4, %v11624_v59, %v2153_v29  ;;  %v14574_v29 = vld [vmem:[#allocation2 + $0xa0] sm:$0xf] }
 0x1b7   : > { %v3467_v40 = vunpack.c.l.b16 %v2759_v49  ;;  %v743_v32 = vrot.slane %v741_v25, 7  ;;  %v3655_v38 = vsel %vm3639_vm3, %v3622_v45, %v3171_v21  ;;  %v2157_v22 = vsel %vm13306_vm4, %v2155_v51, %v2156_v5 }
 0x1b8   : > { %v3152_v36 = vpack.c.b16 %v3133_v11, %v3132_v12  ;;  %v751_v37 = vrot.slane %v749_v60, 7  ;;  %v3688_v19 = vsel %vm3672_vm5, %v3655_v38, %v3251_v27  ;;  %v3212_v53 = vunpack.c.l.b16 %v2154_v56 }
 0x1b9   : > { %v3487_v62 = vpack.c.b16 %v3467_v40, %v3466_v47  ;;  %v746_v8 = vor.u32 %v744_v6, %v743_v32  ;;  %v747_v42 = vrot.slane %v743_v32, 4  ;;  %v3721_v1 = vsel %vm3705_vm6, %v3688_v19, %v3347_v15 }
 0x1ba   : > { %v754_v9 = vor.u32 %v752_v57, %v751_v37  ;;  %v756_v41 = vrot.slane %v751_v37, 4  ;;  %v3213_v4 = vunpack.c.l.b16 %v2157_v22  ;;  %v3754_v43 = vsel %vm17654_vm10, %v3721_v1, %v3427_v61 }
 0x1bb   : > { %3004 = vrot.lane.b32.xlu1 %v2976_v55, %s13182_s21  ;;  %3514 = vrot.lane.b32.xlu2 %v3487_v62, %s13187_s16  ;;  %v937_v10 = vsel %vm13420_vm11, %v746_v8, %v936_v17  ;;  %v3875_v52 = vadd.f32 %v14560_v13, %v3874_v7  ;;  %v11609_v2 = vrot.slane %v1405_v14, 9  ;;  %v1552_v59 = vrot.slane %v14574_v29, 5 }
 0x1bc   : > { %3180 = vrot.lane.b32.xlu0 %v3152_v36, %s13189_s22  ;;  %v755_v58 = vsel %vm13427_vm12, %v747_v42, %v754_v9  ;;  %938 = vst [vmem:[#allocation2 + $0xa8] sm:$0xf] %v937_v10  ;;  %v941_v34 = vsel %vm13567_vm14, %v756_v41, %v940_v44  ;;  %v3232_v16 = vpack.c.b16 %v3213_v4, %v3212_v53  ;;  %v1555_v33 = vrot.slane %v14576_v50, 5  ;;  %v3876_v31 = vpop.f32.mrf.mxu0  ;;  %v4341_v36 = vld [vmem:[#allocation3 + $0xc] sm:$0xf] }
 0x1bd   : > { %v3507_v18 = vpop.permute.xlu0 %3506  ;;  %939 = vst.msk [vmem:[#allocation2 + $0xac] sm:$0xf] %vm17651_vm0, %v755_v58  ;;  %v3954_v39 = vmax.f32 %v3875_v52, 0.0  ;;  %vm391_vm0 = vcmask 516096   ;;  %v3877_v45 = vadd.f32 %v14560_v13, %v3876_v31  ;;  %v1554_v19 = vrot.slane %v1552_v59, 4 }
 0x1be   : > { %v3787_v21 = vsel %vm17653_vm13, %v3754_v43, %v3507_v18  ;;  %942 = vst [vmem:[#allocation2 + $0xb0] sm:$0x1] %v941_v34  ;;  %v1553_v43 = vsel %vm13306_vm4, %v11609_v2, %v1552_v59  ;;  %v14615_v34 = vld [vmem:[%s13380_s26 + $0x70] sm:$0xf]  ;;  %v14627_v59 = vpop.permute.xlu2 %2996  ;;  %v14632_v31 = vld [vmem:[%s13380_s26 + $0x74] sm:$0xf] }
 0x1bf   : > { %11851 = vmatmul.msk.bf16.gmra.mxu0 %vm17652_vm9, %v3787_v21  ;;  %v3986_v55 = vpack.c.bf16 %v3954_v39, %v3954_v39  ;;  %vm17669_vm9 = vcmask 519168   ;;  %395 = vst.msk [vmem:[#allocation3 + $0x14] sm:$0x1] %vm391_vm0, %v13181_v0  ;;  %v3955_v53 = vmax.f32 %v3877_v45, 0.0  ;;  %v1556_v58 = vsel %vm13306_vm4, %v1554_v19, %v1555_v33  ;;  %v12714_v45 = vld [vmem:[#allocation2 + $0x60] sm:$0xff] }
 0x1c0   : > { %vm14588_vm13 = vmand %vm17669_vm9, %vm841_vm8  ;;  %392 = vst.msk [vmem:[#allocation3 + $0x8] sm:$0x1] %vm391_vm0, %v13181_v0  ;;  %v2959_v2 = vunpack.c.l.b16 %v1556_v58  ;;  %vm17672_vm8 = vsmask.f32 256 }
 0x1c1   : > { %v4019_v5 = vshrl.u32 %v3986_v55, 16  ;;  %v4022_v23 = vshll.u32 %v3986_v55, 16  ;;  %398 = vst.msk [vmem:[#allocation3 + $0x20] sm:$0x1] %vm391_vm0, %v13181_v0  ;;  %v2958_v55 = vunpack.c.l.b16 %v1553_v43  ;;  %vm14643_vm9 = vmand %vm391_vm0, %vm17672_vm8  ;;  %vm17675_vm8 = vcmask 519168  }
 0x1c2   : > { %401 = vst.msk [vmem:[#allocation3 + $0x2c] sm:$0x1] %vm391_vm0, %v13181_v0  ;;  %v769_v43 = vshll.u32 %v14632_v31, 16 }
 0x1c3   : > { %3260 = vrot.lane.b32.xlu1 %v3232_v16, %s13186_s14  ;;  %v2204_v63 = vld [vmem:[#allocation2 + $0xa8] sm:$0xf]  ;;  %3100 = vrot.lane.b32.xlu2 %v12734_v30, %s13184_s28  ;;  %v14584_v6 = vrot.slane %v4019_v5, 7  ;;  %v3987_v30 = vpack.c.bf16 %v3955_v53, %v3955_v53  ;;  %404 = vst.msk [vmem:[#allocation3 + $0x38] sm:$0x1] %vm391_vm0, %v13181_v0  ;;  %v758_v5 = vshrl.u32 %v14615_v34, 16 }
 0x1c4   : > { %v2624_v35 = vld [vmem:[#allocation2 + $0xa8] sm:$0xe]  ;;  %v2205_v20 = vld [vmem:[#allocation2 + $0xac] sm:$0xf]  ;;  %v2517_v12 = vshrl.u32 %v2204_v63, 16  ;;  %v2520_v51 = vshll.u32 %v2204_v63, 16 }
 0x1c5   : > { %v11640_v28 = vrot.slane %v2624_v35, 9  ;;  %v2224_v27 = vld [vmem:[#allocation2 + $0xb0] sm:$0x1]  ;;  %v2526_v54 = vshll.u32 %v2205_v20, 16  ;;  %v2530_v47 = vshrl.u32 %v2205_v20, 16  ;;  %v2762_v25 = vrot.slane %v2205_v20, 5  ;;  %v3093_v58 = vpop.permute.xlu0 %3092 }
 0x1c6   : > { %v2519_v11 = vrot.slane %v2517_v12, 4  ;;  %v2522_v49 = vrot.slane %v2520_v51, 5  ;;  %v2536_v60 = vshll.u32 %v2224_v27, 16  ;;  %v2765_v57 = vrot.slane %v2224_v27, 5  ;;  %v12750_v22 = vld [vmem:[#allocation2 + $0xa8] sm:$0xff]  ;;  %v2917_v27 = vpop.permute.xlu1 %2916 }
 0x1c7   : > { %v2528_v56 = vrot.slane %v2526_v54, 5  ;;  %v2532_v40 = vrot.slane %v2530_v47, 4  ;;  %v2763_v32 = vsel %vm13306_vm4, %v11640_v28, %v2762_v25  ;;  %v2764_v38 = vrot.slane %v2762_v25, 4  ;;  %v14601_v61 = vld [vmem:[#allocation2 + $0xac] sm:$0xf] }
 0x1c8   : > { %v2523_v37 = vor.u32 %v2522_v49, %v2519_v11  ;;  %v3468_v17 = vunpack.c.l.b16 %v2763_v32  ;;  %v4024_v62 = vor.u32 %v4022_v23, %v14584_v6  ;;  %v2538_v42 = vrot.slane %v2536_v60, 5  ;;  %v2016_v21 = vld [vmem:[#allocation2 + $0xa8] sm:$0xe]  ;;  %v14623_v39 = vld [vmem:[#allocation2 + $0xb0] sm:$0x1] }
 0x1c9   : > { %v2533_v8 = vor.u32 %v2532_v40, %v2528_v56  ;;  %v2766_v44 = vsel %vm13306_vm4, %v2764_v38, %v2765_v57  ;;  %v2160_v16 = vrot.slane %v14601_v61, 5  ;;  %v4027_v33 = vshrl.u32 %v3987_v30, 16  ;;  %407 = vst.msk [vmem:[#allocation3 + $0x44] sm:$0x1] %vm391_vm0, %v13181_v0  ;;  %v12735_v28 = vld [vmem:[#allocation2 + $0xa8] sm:$0xff] }
 0x1ca   : > { %v2524_v1 = vrot.slane %v2523_v37, 4  ;;  %v3469_v9 = vunpack.c.l.b16 %v2766_v44  ;;  %v4342_v41 = vsel %vm14588_vm13, %v4024_v62, %v4341_v36  ;;  %v11625_v35 = vrot.slane %v2016_v21, 9  ;;  %410 = vst.msk [vmem:[#allocation3 + $0x50] sm:$0x1] %vm391_vm0, %v13181_v0  ;;  %v4347_v47 = vld [vmem:[#allocation3 + $0x14] sm:$0x1] }
 0x1cb   : > { %v2534_v7 = vrot.slane %v2533_v8, 4  ;;  %4343 = vst [vmem:[#allocation3 + $0xc] sm:$0xf] %v4342_v41  ;;  %3356 = vrot.lane.b32.xlu2 %v12750_v22, %s17655_s29  ;;  %v2162_v23 = vrot.slane %v2160_v16, 4  ;;  %v2163_v20 = vrot.slane %v14623_v39, 5  ;;  %v4029_v12 = vrot.slane %v4027_v33, 7 }
 0x1cc   : > { %v2529_v4 = vsel %vm13361_vm7, %v2524_v1, %v2528_v56  ;;  %v3488_v10 = vpack.c.b16 %v3469_v9, %v3468_v17  ;;  %v4030_v51 = vshll.u32 %v3987_v30, 16  ;;  %413 = vst.msk [vmem:[#allocation3 + $0x5c] sm:$0x1] %vm391_vm0, %v13181_v0  ;;  %v766_v25 = vshrl.u32 %v14632_v31, 16  ;;  %v983_v56 = vld [vmem:[#allocation2 + $0x9c] sm:$0xf] }
 0x1cd   : > { %v2539_v18 = vsel %vm13361_vm7, %v2534_v7, %v2538_v42  ;;  %v3388_v52 = vunpack.c.l.b16 %v2529_v4  ;;  %416 = vst.msk [vmem:[#allocation3 + $0x68] sm:$0x1] %vm391_vm0, %v13181_v0  ;;  %v2977_v11 = vpack.c.b16 %v2959_v2, %v2958_v55  ;;  %v4025_v49 = vrot.slane %v14584_v6, 4  ;;  %v14674_v4 = vpop.permute.xlu2 %3252  ;;  %v985_v30 = vld [vmem:[#allocation2 + $0xa8] sm:$0xf] }
 0x1ce   : > { %v3389_v14 = vunpack.c.l.b16 %v2539_v18  ;;  %3516 = vrot.lane.b32.xlu1 %v3488_v10, %s13187_s16  ;;  %v4032_v60 = vor.u32 %v4030_v51, %v4029_v12  ;;  %v4034_v57 = vrot.slane %v4029_v12, 4  ;;  %419 = vst.msk [vmem:[#allocation3 + $0x74] sm:$0x1] %vm391_vm0, %v13181_v0  ;;  %v1321_v40 = vshrl.u32 %v983_v56, 16  ;;  %v3173_v33 = vpop.permute.xlu1 %3172 }
 0x1cf   : > { %422 = vst.msk [vmem:[#allocation3 + $0x80] sm:$0x1] %vm391_vm0, %v13181_v0  ;;  %v1324_v32 = vshll.u32 %v983_v56, 16  ;;  %v1330_v38 = vshll.u32 %v14574_v29, 16  ;;  %v1334_v36 = vshrl.u32 %v14574_v29, 16  ;;  %v2161_v22 = vsel %vm13306_vm4, %v11625_v35, %v2160_v16 }
 0x1d0   : > { %v3408_v63 = vpack.c.b16 %v3389_v14, %v3388_v52  ;;  %v2164_v6 = vsel %vm13306_vm4, %v2162_v23, %v2163_v20  ;;  %v4033_v37 = vsel %vm13427_vm12, %v4025_v49, %v4032_v60  ;;  %v4348_v17 = vsel %vm14643_vm9, %v4034_v57, %v4347_v47  ;;  %425 = vst.msk [vmem:[#allocation3 + $0x8c] sm:$0x1] %vm391_vm0, %v13181_v0  ;;  %v14690_v14 = vld [vmem:[#allocation2 + $0xac] sm:$0xf]  ;;  %v1597_v35 = vld [vmem:[#allocation2 + $0xa8] sm:$0xf] }
 0x1d1   : > { %4344 = vst.msk [vmem:[#allocation3 + $0x10] sm:$0xf] %vm17675_vm8, %v4033_v37  ;;  %v1323_v29 = vrot.slane %v1321_v40, 4  ;;  %v1326_v19 = vrot.slane %v1324_v32, 5  ;;  %v1332_v62 = vrot.slane %v1330_v38, 5  ;;  %v1336_v8 = vrot.slane %v1334_v36, 4 }
 0x1d2   : > { %3436 = vrot.lane.b32.xlu0 %v3408_v63, %s13188_s17  ;;  %4349 = vst [vmem:[#allocation3 + $0x14] sm:$0x1] %v4348_v17  ;;  %v761_v42 = vshll.u32 %v14615_v34, 16  ;;  %v3551_v44 = vsel %vm3524_vm15, %v12714_v45, %v2917_v27  ;;  %v1340_v41 = vshll.u32 %v14576_v50, 16  ;;  %v3214_v7 = vunpack.c.l.b16 %v2161_v22  ;;  %v14706_v47 = vld [vmem:[#allocation2 + $0xb0] sm:$0x1] }
 0x1d3   : > { %428 = vst.msk [vmem:[#allocation3 + $0x98] sm:$0x1] %vm391_vm0, %v13181_v0  ;;  %v1327_v1 = vor.u32 %v1326_v19, %v1323_v29  ;;  %v1337_v9 = vor.u32 %v1336_v8, %v1332_v62  ;;  %v3215_v53 = vunpack.c.l.b16 %v2164_v6  ;;  %v14678_v10 = vrot.slane %v758_v5, 7  ;;  %v514_v56 = vld [vmem:[%s13380_s26 + $0x78] sm:$0xf] }
 0x1d4   : > { %431 = vst.msk [vmem:[#allocation3 + $0xa4] sm:$0x1] %vm391_vm0, %v13181_v0  ;;  %v14684_v18 = vrot.slane %v766_v25, 7  ;;  %v1342_v21 = vrot.slane %v1340_v41, 5  ;;  %v3591_v16 = vsel %vm3573_vm1, %v3551_v44, %v14627_v59  ;;  %v1345_v31 = vshrl.u32 %v985_v30, 16  ;;  %v3879_v41 = vpop.f32.mrf.mxu0 }
 0x1d5   : > { %434 = vst.msk [vmem:[#allocation3 + $0xb0] sm:$0x1] %vm391_vm0, %v13181_v0  ;;  %v1328_v50 = vrot.slane %v1327_v1, 4  ;;  %v1338_v52 = vrot.slane %v1337_v9, 4  ;;  %v1348_v63 = vshll.u32 %v985_v30, 16  ;;  %v3233_v59 = vpack.c.b16 %v3215_v53, %v3214_v7  ;;  %v3509_v17 = vpop.permute.xlu2 %3508  ;;  %v3349_v9 = vpop.permute.xlu0 %3348 }
 0x1d6   : > { %3102 = vrot.lane.b32.xlu1 %v12735_v28, %s13184_s28  ;;  %437 = vst.msk [vmem:[#allocation3 + $0xbc] sm:$0x1] %vm391_vm0, %v13181_v0  ;;  %v1354_v20 = vshll.u32 %v14690_v14, 16  ;;  %v1347_v12 = vrot.slane %v1345_v31, 4  ;;  %v1358_v28 = vshrl.u32 %v14690_v14, 16  ;;  %v1932_v45 = vshrl.u32 %v1597_v35, 16 }
 0x1d7   : > { %440 = vst.msk [vmem:[#allocation3 + $0xc8] sm:$0x1] %vm391_vm0, %v13181_v0  ;;  %v1333_v55 = vsel %vm13361_vm7, %v1328_v50, %v1332_v62  ;;  %v1343_v2 = vsel %vm13361_vm7, %v1338_v52, %v1342_v21  ;;  %v1350_v51 = vrot.slane %v1348_v63, 5  ;;  %v3624_v49 = vsel %vm3606_vm2, %v3591_v16, %v3093_v58  ;;  %v14737_v1 = vld [vmem:[#allocation2 + $0xb4] sm:$0xf]  ;;  %v3429_v50 = vpop.permute.xlu1 %3428 }
 0x1d8   : > { %443 = vst.msk [vmem:[#allocation3 + $0xd4] sm:$0x1] %vm391_vm0, %v13181_v0  ;;  %v2878_v5 = vunpack.c.l.b16 %v1333_v55  ;;  %v2879_v23 = vunpack.c.l.b16 %v1343_v2  ;;  %v14708_v25 = vrot.slane %v1354_v20, 5  ;;  %v1360_v60 = vrot.slane %v1358_v28, 4  ;;  %v515_v52 = vld [vmem:[%s13380_s26 + $0x7c] sm:$0xf] }
 0x1d9   : > { %445 = vst.msk [vmem:[#allocation4 + $0x4] sm:$0x1] %vm391_vm0, %v13181_v0  ;;  %v1934_v57 = vrot.slane %v1932_v45, 4  ;;  %v1351_v40 = vor.u32 %v1350_v51, %v1347_v12  ;;  %v1941_v38 = vshll.u32 %v14601_v61, 16  ;;  %v1945_v36 = vshrl.u32 %v14601_v61, 16  ;;  %s323_s26 = sand.u32 1, %s13171_s10  }
 0x1da   : > { %3006 = vrot.lane.b32.xlu0 %v2977_v11, %s13182_s21  ;;  %447 = vst.msk [vmem:[#allocation4 + $0xc] sm:$0x1] %vm391_vm0, %v13181_v0  ;;  %v2897_v27 = vpack.c.b16 %v2879_v23, %v2878_v5  ;;  %v1935_v11 = vshll.u32 %v1597_v35, 16  ;;  %v3657_v22 = vsel %vm3639_vm3, %v3624_v49, %v3173_v33  ;;  %v1364_v6 = vshll.u32 %v14706_v47, 16  ;;  %v947_v5 = vld [vmem:[#allocation2 + $0xbc] sm:$0x1] }
 0x1db   : > { %449 = vst.msk [vmem:[#allocation4 + $0x14] sm:$0x1] %vm391_vm0, %v13181_v0  ;;  %v1951_v37 = vshll.u32 %v14623_v39, 16  ;;  %v1361_v29 = vor.u32 %v1360_v60, %v14708_v25  ;;  %v1943_v62 = vrot.slane %v1941_v38, 5  ;;  %v1947_v61 = vrot.slane %v1945_v36, 4  ;;  %v12715_v38 = vld [vmem:[#allocation2 + $0x6c] sm:$0xff] }
 0x1dc   : > { %451 = vst.msk [vmem:[#allocation4 + $0x1c] sm:$0x1] %vm391_vm0, %v13181_v0  ;;  %2926 = vrot.lane.b32.xlu2 %v2897_v27, %s13183_s27  ;;  %v1937_v32 = vrot.slane %v1935_v11, 5  ;;  %v14733_v8 = vor.u32 %v761_v42, %v14678_v10  ;;  %v764_v39 = vrot.slane %v14678_v10, 4  ;;  %v771_v44 = vor.u32 %v769_v43, %v14684_v18 }
 0x1dd   : > { %453 = vst.msk [vmem:[#allocation4 + $0x24] sm:$0x1] %vm391_vm0, %v13181_v0  ;;  %v775_v7 = vshrl.u32 %v514_v56, 16  ;;  %v3690_v53 = vsel %vm3672_vm5, %v3657_v22, %v14674_v4  ;;  %v3880_v58 = vadd.f32 %v14560_v13, %v3879_v41  ;;  %v1352_v34 = vrot.slane %v1351_v40, 4  ;;  %v2919_v36 = vpop.permute.xlu0 %2918  ;;  %v954_v41 = vld [vmem:[#allocation2 + $0xc8] sm:$0x1] }
 0x1de   : > { %455 = vst.msk [vmem:[#allocation4 + $0x2c] sm:$0x1] %vm391_vm0, %v13181_v0  ;;  %v1938_v19 = vor.u32 %v1937_v32, %v1934_v57  ;;  %v1366_v10 = vrot.slane %v1364_v6, 5  ;;  %v1948_v43 = vor.u32 %v1947_v61, %v1943_v62  ;;  %v1953_v21 = vrot.slane %v1951_v37, 5  ;;  %v14778_v57 = vpop.permute.xlu2 %3094  ;;  %v14790_v37 = vld [vmem:[#allocation3 + $0xc] sm:$0xf] }
 0x1df   : > { %457 = vst.msk [vmem:[#allocation4 + $0x34] sm:$0x1] %vm391_vm0, %v13181_v0  ;;  %v14747_v16 = vrot.slane %v775_v7, 7  ;;  %v3956_v30 = vmax.f32 %v3880_v58, 0.0  ;;  %v1362_v55 = vrot.slane %v1361_v29, 4  ;;  %v778_v2 = vshll.u32 %v514_v56, 16 }
 0x1e0   : > { %459 = vst.msk [vmem:[#allocation4 + $0x3c] sm:$0x1] %vm391_vm0, %v13181_v0  ;;  %v1939_v42 = vrot.slane %v1938_v19, 4  ;;  %v773_v33 = vrot.slane %v14684_v18, 4  ;;  %v3723_v31 = vsel %vm3705_vm6, %v3690_v53, %v3349_v9  ;;  %v1949_v63 = vrot.slane %v1948_v43, 4 }
 0x1e1   : > { %461 = vst.msk [vmem:[#allocation4 + $0x44] sm:$0x1] %vm391_vm0, %v13181_v0  ;;  %v783_v35 = vshrl.u32 %v515_v52, 16  ;;  %v3988_v23 = vpack.c.bf16 %v3956_v30, %v3956_v30  ;;  %v3756_v12 = vsel %vm17654_vm10, %v3723_v31, %v3429_v50  ;;  %v14769_v51 = vor.u32 %v778_v2, %v14747_v16  ;;  %v14780_v56 = vld [vmem:[#allocation2 + $0xc0] sm:$0xf] }
 0x1e2   : > { %3262 = vrot.lane.b32.xlu0 %v3233_v59, %s13186_s14  ;;  %463 = vst.msk [vmem:[#allocation4 + $0x4c] sm:$0x1] %vm391_vm0, %v13181_v0  ;;  %v1944_v4 = vsel %vm13361_vm7, %v1939_v42, %v1943_v62  ;;  %v944_v59 = vsel %vm13420_vm11, %v14733_v8, %v14737_v1  ;;  %v1954_v18 = vsel %vm13361_vm7, %v1949_v63, %v1953_v21  ;;  %v786_v45 = vshll.u32 %v515_v52, 16  ;;  %v4350_v62 = vld [vmem:[#allocation3 + $0x18] sm:$0xf] }
 0x1e3   : > { %465 = vst.msk [vmem:[#allocation5 + $0x4] sm:$0x1] %vm391_vm0, %v13181_v0  ;;  %v3134_v20 = vunpack.c.l.b16 %v1944_v4  ;;  %v785_v28 = vrot.slane %v783_v35, 7  ;;  %v4036_v27 = vshrl.u32 %v3988_v23, 16  ;;  %v1357_v11 = vsel %vm13361_vm7, %v1352_v34, %v14708_v25  ;;  %v3881_v25 = vpop.f32.mrf.mxu0  ;;  %v4455_v7 = vld [vmem:[#allocation3] sm:$0xf] }
 0x1e4   : > { %467 = vst.msk [vmem:[#allocation5 + $0xc] sm:$0x1] %vm391_vm0, %v13181_v0  ;;  %v1367_v49 = vsel %vm13361_vm7, %v1362_v55, %v1366_v10  ;;  %v3135_v60 = vunpack.c.l.b16 %v1954_v18  ;;  %v772_v40 = vsel %vm13427_vm12, %v764_v39, %v771_v44  ;;  %v948_v32 = vsel %vm13567_vm14, %v773_v33, %v947_v5  ;;  %v2999_v44 = vpop.permute.xlu1 %2998  ;;  %v4456_v53 = vld [vmem:[#allocation3 + $0x4] sm:$0xf]  ;;  %v1406_v55 = vld [vmem:[#allocation2 + $0xa8] sm:$0xe] }
 0x1e5   : > { %469 = vst.msk [vmem:[#allocation5 + $0x14] sm:$0x1] %vm391_vm0, %v13181_v0  ;;  %vm17676_vm8 = vcmask 261120   ;;  %v781_v6 = vrot.slane %v14747_v16, 4  ;;  %v14794_v29 = vrot.slane %v4036_v27, 7  ;;  %v4039_v19 = vshll.u32 %v3988_v23, 16 }
 0x1e6   : > { %471 = vst.msk [vmem:[#allocation5 + $0x1c] sm:$0x1] %vm391_vm0, %v13181_v0  ;;  %v3789_v22 = vsel %vm17676_vm8, %v3756_v12, %v3509_v17  ;;  %v3153_v61 = vpack.c.b16 %v3135_v60, %v3134_v20  ;;  %v3882_v8 = vadd.f32 %v14560_v13, %v3881_v25  ;;  %vm17677_vm10 = vcmask 293888   ;;  %v3351_v35 = vpop.permute.xlu2 %3350  ;;  %v3175_v12 = vpop.permute.xlu0 %3174 }
 0x1e7   : > { %473 = vst.msk [vmem:[#allocation5 + $0x24] sm:$0x1] %vm391_vm0, %v13181_v0  ;;  %11852 = vmatmul.msk.bf16.gmra.mxu0 %vm17677_vm10, %v3789_v22  ;;  %v14800_v17 = vunpack.c.l.b16 %v1357_v11  ;;  %v14802_v39 = vunpack.c.l.b16 %v1367_v49  ;;  %v788_v1 = vor.u32 %v786_v45, %v785_v28  ;;  %v951_v9 = vsel %vm13420_vm11, %v14769_v51, %v14780_v56  ;;  %v4354_v45 = vld [vmem:[#allocation3 + $0x20] sm:$0x1] }
 0x1e8   : > { %475 = vst.msk [vmem:[#allocation5 + $0x2c] sm:$0x1] %vm391_vm0, %v13181_v0  ;;  %v4041_v58 = vor.u32 %v4039_v19, %v14794_v29  ;;  %3182 = vrot.lane.b32.xlu2 %v3153_v61, %s13189_s22  ;;  %v3957_v34 = vmax.f32 %v3882_v8, 0.0  ;;  %v790_v42 = vrot.slane %v785_v28, 4  ;;  %v4528_v50 = vshrl.u32 %v14790_v37, 16 }
 0x1e9   : > { %477 = vst.msk [vmem:[#allocation5 + $0x34] sm:$0x1] %vm391_vm0, %v13181_v0  ;;  %v3554_v46 = vsel %vm3524_vm15, %v12715_v38, %v2919_v36  ;;  %v1559_v52 = vrot.slane %v14690_v14, 5  ;;  %v4504_v10 = vshrl.u32 %v4455_v7, 16  ;;  %v4507_v43 = vshll.u32 %v4455_v7, 16 }
 0x1ea   : > { %479 = vst.msk [vmem:[#allocation5 + $0x3c] sm:$0x1] %vm391_vm0, %v13181_v0  ;;  %v4351_v21 = vsel %vm14588_vm13, %v4041_v58, %v4350_v62  ;;  %v3989_v16 = vpack.c.bf16 %v3957_v34, %v3957_v34  ;;  %v3593_v30 = vsel %vm3573_vm1, %v3554_v46, %v2999_v44  ;;  %v4513_v4 = vshll.u32 %v4456_v53, 16 }
 0x1eb   : > { %481 = vst.msk [vmem:[#allocation5 + $0x44] sm:$0x1] %vm391_vm0, %v13181_v0  ;;  %v11610_v2 = vrot.slane %v1406_v55, 9  ;;  %v1561_v33 = vrot.slane %v1559_v52, 4  ;;  %v1562_v31 = vrot.slane %v14706_v47, 5  ;;  %v4506_v63 = vrot.slane %v4504_v10, 4 }
 0x1ec   : > { %483 = vst.msk [vmem:[#allocation5 + $0x4c] sm:$0x1] %vm391_vm0, %v13181_v0  ;;  %vm17678_vm11 = vcmask 27648   ;;  %v4044_v14 = vshrl.u32 %v3989_v16, 16  ;;  %v789_v0 = vsel %vm13427_vm12, %v781_v6, %v788_v1  ;;  %v955_v5 = vsel %vm13567_vm14, %v790_v42, %v954_v41  ;;  %v3255_v56 = vpop.permute.xlu1 %3254 }
 0x1ed   : > { %945 = vst [vmem:[#allocation2 + $0xb4] sm:$0xf] %v944_v59  ;;  %v4517_v23 = vshrl.u32 %v4456_v53, 16  ;;  %v4047_v20 = vshll.u32 %v3989_v16, 16  ;;  %v3884_v59 = vpop.f32.mrf.mxu0  ;;  %v1560_v18 = vsel %vm13306_vm4, %v11610_v2, %v1559_v52  ;;  %v1563_v47 = vsel %vm13306_vm4, %v1561_v33, %v1562_v31  ;;  %vm17679_vm0 = vmmov %vm17678_vm11 }
 0x1ee   : > { %946 = vst.msk [vmem:[#allocation2 + $0xb8] sm:$0xf] %vm17678_vm11, %v772_v40  ;;  %v4509_v51 = vrot.slane %v4507_v43, 5  ;;  %v4046_v28 = vrot.slane %v4044_v14, 7  ;;  %v3626_v27 = vsel %vm3606_vm2, %v3593_v30, %v14778_v57  ;;  %v3885_v24 = vadd.f32 %v14560_v13, %v3884_v59  ;;  %v14836_v40 = vld [vmem:[#allocation3 + $0x8] sm:$0x1]  ;;  %v14864_v30 = vpop.permute.xlu2 %2920 }
 0x1ef   : > { %949 = vst [vmem:[#allocation2 + $0xbc] sm:$0x1] %v948_v32  ;;  %v2960_v11 = vunpack.c.l.b16 %v1560_v18  ;;  %v4042_v49 = vrot.slane %v14794_v29, 4  ;;  %v2961_v60 = vunpack.c.l.b16 %v1563_v47  ;;  %v14838_v38 = vrot.slane %v4513_v4, 5 }
 0x1f0   : > { %4352 = vst [vmem:[#allocation3 + $0x18] sm:$0xf] %v4351_v21  ;;  %v4510_v32 = vor.u32 %v4509_v51, %v4506_v63  ;;  %v4049_v36 = vor.u32 %v4047_v20, %v4046_v28  ;;  %v4051_v25 = vrot.slane %v4046_v28, 4  ;;  %v3958_v22 = vmax.f32 %v3885_v24, 0.0 }
 0x1f1   : > { %952 = vst [vmem:[#allocation2 + $0xc0] sm:$0xf] %v951_v9  ;;  %v14841_v6 = vrot.slane %v4517_v23, 4  ;;  %v2898_v57 = vpack.c.b16 %v14802_v39, %v14800_v17  ;;  %v3659_v29 = vsel %vm3639_vm3, %v3626_v27, %v3175_v12  ;;  %v14846_v62 = vrot.slane %v4528_v50, 4  ;;  %v4357_v39 = vld [vmem:[#allocation3 + $0x24] sm:$0xf] }
 0x1f2   : > { %953 = vst.msk [vmem:[#allocation2 + $0xc4] sm:$0xf] %vm17679_vm0, %v789_v0  ;;  %v4511_v19 = vrot.slane %v4510_v32, 4  ;;  %v4050_v8 = vsel %vm13427_vm12, %v4042_v49, %v4049_v36  ;;  %v4355_v44 = vsel %vm14643_vm9, %v4051_v25, %v4354_v45  ;;  %v14852_v41 = vpack.c.b16 %v2961_v60, %v2960_v11 }
 0x1f3   : > { %956 = vst [vmem:[#allocation2 + $0xc8] sm:$0x1] %v955_v5  ;;  %v3692_v7 = vsel %vm3672_vm5, %v3659_v29, %v3255_v56  ;;  %v4523_v46 = vshll.u32 %v14836_v40, 16  ;;  %vm17680_vm14 = vcmask 519168   ;;  %v14860_v21 = vpack.c.bf16 %v3958_v22, %v3958_v22 }
 0x1f4   : > { %v2625_v61 = vld [vmem:[#allocation2 + $0xb4] sm:$0xe]  ;;  %v4516_v50 = vsel %vm13361_vm7, %v4511_v19, %v14838_v38  ;;  %4353 = vst.msk [vmem:[#allocation3 + $0x1c] sm:$0xf] %vm17680_vm14, %v4050_v8  ;;  %v4520_v16 = vor.u32 %v14841_v6, %v14838_v38  ;;  %v14874_v63 = vsel %vm3705_vm6, %v3692_v7, %v3351_v35  ;;  %v14885_v28 = vpop.permute.xlu1 %3510  ;;  %vm17681_vm10 = vcmask 228352   ;;  %vm17683_vm0 = vmmov %vm17680_vm14 }
 0x1f5   : > { %v1599_v1 = vld [vmem:[#allocation2 + $0xb4] sm:$0xf]  ;;  %v2207_v58 = vld [vmem:[#allocation2 + $0xb8] sm:$0xf]  ;;  %v11641_v34 = vrot.slane %v2625_v61, 9  ;;  %v14869_v33 = vunpack.c.l.b16 %v4516_v50  ;;  %v14876_v14 = vpop.f32.mrf.mxu0  ;;  %v4053_v8 = vshrl.u32 %v14860_v21, 16  ;;  %vm17684_vm14 = vmmov %vm17681_vm10 }
 0x1f6   : > { %v2206_v9 = vld [vmem:[#allocation2 + $0xb4] sm:$0xf]  ;;  %v1956_v42 = vshrl.u32 %v1599_v1, 16  ;;  %v2225_v52 = vld [vmem:[#allocation2 + $0xbc] sm:$0x1]  ;;  %v2769_v10 = vrot.slane %v2207_v58, 5  ;;  %v14871_v31 = vpop.permute.xlu0 %3430  ;;  %v3887_v6 = vadd.f32 %v14560_v13, %v14876_v14 }
 0x1f7   : > { %v12751_v53 = vld [vmem:[#allocation2 + $0xb4] sm:$0xff]  ;;  %v1959_v43 = vshll.u32 %v1599_v1, 16  ;;  %v2772_v55 = vrot.slane %v2225_v52, 5  ;;  %4356 = vst [vmem:[#allocation3 + $0x20] sm:$0x1] %v4355_v44  ;;  %v2541_v51 = vshrl.u32 %v2206_v9, 16 }
 0x1f8   : > { %3358 = vrot.lane.b32.xlu1 %v12751_v53, %s17655_s29  ;;  %v14867_v4 = vld [vmem:[#allocation2 + $0xb8] sm:$0xf]  ;;  %v1958_v2 = vrot.slane %v1956_v42, 4  ;;  %v2770_v0 = vsel %vm13306_vm4, %v11641_v34, %v2769_v10  ;;  %v2771_v5 = vrot.slane %v2769_v10, 4  ;;  %v14880_v23 = vld [vmem:[#allocation2 + $0xbc] sm:$0x1]  ;;  %v14894_v42 = vpop.permute.xlu2 %3176 }
 0x1f9   : > { %v1961_v20 = vrot.slane %v1959_v43, 5  ;;  %v1965_v12 = vshll.u32 %v14867_v4, 16  ;;  %v3470_v59 = vunpack.c.l.b16 %v2770_v0  ;;  %v1969_v18 = vshrl.u32 %v14867_v4, 16  ;;  %v2208_v44 = vld [vmem:[#allocation2 + $0xc0] sm:$0xf] }
 0x1fa   : > { %v1975_v47 = vshll.u32 %v14880_v23, 16  ;;  %v2773_v35 = vsel %vm13306_vm4, %v2771_v5, %v2772_v55  ;;  %v2544_v24 = vshll.u32 %v2206_v9, 16  ;;  %v2543_v56 = vrot.slane %v2541_v51, 4  ;;  %v14892_v34 = vld [vmem:[#allocation2 + $0xc4] sm:$0xf] }
 0x1fb   : > { %v1962_v45 = vor.u32 %v1961_v20, %v1958_v2  ;;  %v1967_v27 = vrot.slane %v1965_v12, 5  ;;  %v3471_v11 = vunpack.c.l.b16 %v2773_v35  ;;  %v1971_v49 = vrot.slane %v1969_v18, 4 }
 0x1fc   : > { %v1977_v60 = vrot.slane %v1975_v47, 5  ;;  %v2546_v36 = vrot.slane %v2544_v24, 5  ;;  %v2550_v25 = vshll.u32 %v2207_v58, 16  ;;  %v2554_v22 = vshrl.u32 %v2207_v58, 16  ;;  %v14912_v18 = vpop.permute.xlu1 %3096  ;;  %v12736_v24 = vld [vmem:[#allocation2 + $0xb4] sm:$0xff] }
 0x1fd   : > { %v1963_v32 = vrot.slane %v1962_v45, 4  ;;  %v3489_v29 = vpack.c.b16 %v3471_v11, %v3470_v59  ;;  %v1972_v19 = vor.u32 %v1971_v49, %v1967_v27  ;;  %v2560_v61 = vshll.u32 %v2225_v52, 16  ;;  %v14905_v55 = vpop.f32.mrf.mxu0 }
 0x1fe   : > { %v2547_v7 = vor.u32 %v2546_v36, %v2543_v56  ;;  %v2552_v53 = vrot.slane %v2550_v25, 5  ;;  %v2556_v9 = vrot.slane %v2554_v22, 4  ;;  %v14901_v10 = vrot.slane %v4053_v8, 7  ;;  %v14903_v43 = vpop.permute.xlu0 %3000 }
 0x1ff   : > { %v1968_v1 = vsel %vm13361_vm7, %v1963_v32, %v1967_v27  ;;  %3518 = vrot.lane.b32.xlu0 %v3489_v29, %s13187_s16  ;;  %v1973_v58 = vrot.slane %v1972_v19, 4  ;;  %v2562_v52 = vrot.slane %v2560_v61, 5  ;;  %v4056_v5 = vshll.u32 %v14860_v21, 16  ;;  %v14917_v21 = vld [vmem:[#allocation2 + $0xc8] sm:$0x1]  ;;  %v12716_v27 = vld [vmem:[#allocation2 + $0x78] sm:$0xff] }
 0x200   : > { %2928 = vrot.lane.b32.xlu1 %v2898_v57, %s13183_s27  ;;  %v3136_v50 = vunpack.c.l.b16 %v1968_v1  ;;  %v2548_v2 = vrot.slane %v2547_v7, 4  ;;  %v2557_v0 = vor.u32 %v2556_v9, %v2552_v53  ;;  %v2565_v20 = vshrl.u32 %v2208_v44, 16 }
 0x201   : > { %v1978_v12 = vsel %vm13361_vm7, %v1973_v58, %v1977_v60  ;;  %v4059_v17 = vrot.slane %v14901_v10, 4  ;;  %v2568_v57 = vshll.u32 %v2208_v44, 16  ;;  %v2574_v59 = vshll.u32 %v14892_v34, 16  ;;  %v4458_v44 = vld [vmem:[#allocation3 + $0x10] sm:$0xf] }
 0x202   : > { %v3137_v47 = vunpack.c.l.b16 %v1978_v12  ;;  %v2553_v51 = vsel %vm13361_vm7, %v2548_v2, %v2552_v53  ;;  %v2558_v35 = vrot.slane %v2557_v0, 4  ;;  %v4058_v45 = vor.u32 %v4056_v5, %v14901_v10  ;;  %v14951_v12 = vpop.permute.xlu2 %3432 }
 0x203   : > { %v3390_v11 = vunpack.c.l.b16 %v2553_v51  ;;  %v2567_v49 = vrot.slane %v2565_v20, 4  ;;  %v2570_v60 = vrot.slane %v2568_v57, 5  ;;  %v2576_v56 = vrot.slane %v2574_v59, 5  ;;  %v2017_v20 = vld [vmem:[#allocation2 + $0xb4] sm:$0xe] }
 0x204   : > { %v3154_v32 = vpack.c.b16 %v3137_v47, %v3136_v50  ;;  %v2563_v36 = vsel %vm13361_vm7, %v2558_v35, %v2562_v52  ;;  %v4358_v25 = vsel %vm14588_vm13, %v4058_v45, %v4357_v39  ;;  %v2578_v22 = vshrl.u32 %v14892_v34, 16  ;;  %v4488_v52 = vld [vmem:[#allocation3 + $0x14] sm:$0x1]  ;;  %v14953_v39 = vpop.permute.xlu1 %3352 }
 0x205   : > { %v3391_v29 = vunpack.c.l.b16 %v2563_v36  ;;  %4359 = vst [vmem:[#allocation3 + $0x24] sm:$0xf] %v4358_v25  ;;  %v2571_v19 = vor.u32 %v2570_v60, %v2567_v49  ;;  %v2584_v61 = vshll.u32 %v14917_v21, 16  ;;  %v4521_v8 = vrot.slane %v4520_v16, 4  ;;  %v14941_v40 = vpop.f32.mrf.mxu0 }
 0x206   : > { %v2580_v1 = vrot.slane %v2578_v22, 4  ;;  %v4525_v7 = vrot.slane %v4523_v46, 5  ;;  %v3557_v53 = vsel %vm3524_vm15, %v12716_v27, %v14864_v30  ;;  %v3758_v9 = vsel %vm17681_vm10, %v14874_v63, %v14871_v31  ;;  %v14939_v16 = vpop.permute.xlu0 %3256  ;;  %vm17685_vm10 = vmmov %vm17676_vm8 }
 0x207   : > { %3104 = vrot.lane.b32.xlu0 %v12736_v24, %s13184_s28  ;;  %v3409_v58 = vpack.c.b16 %v3391_v29, %v3390_v11  ;;  %v2572_v50 = vrot.slane %v2571_v19, 4  ;;  %v2586_v38 = vrot.slane %v2584_v61, 5  ;;  %v4531_v31 = vshll.u32 %v14790_v37, 16  ;;  %v12752_v37 = vld [vmem:[#allocation2 + $0xc0] sm:$0xff] }
 0x208   : > { %3184 = vrot.lane.b32.xlu1 %v3154_v32, %s13189_s22  ;;  %v2581_v46 = vor.u32 %v2580_v1, %v2576_v56  ;;  %v4526_v30 = vsel %vm13361_vm7, %v4521_v8, %v4525_v7  ;;  %v4537_v63 = vshll.u32 %v4458_v44, 16  ;;  %v3959_v14 = vmax.f32 %v3887_v6, 0.0  ;;  %v2626_v7 = vld [vmem:[#allocation2 + $0xc0] sm:$0xe] }
 0x209   : > { %3438 = vrot.lane.b32.xlu2 %v3409_v58, %s13188_s17  ;;  %v2577_v2 = vsel %vm13361_vm7, %v2572_v50, %v2576_v56  ;;  %v14949_v0 = vunpack.c.l.b16 %v4526_v30  ;;  %v4541_v5 = vshrl.u32 %v4458_v44, 16  ;;  %v4533_v47 = vrot.slane %v4531_v31, 5  ;;  %v4361_v50 = vld [vmem:[#allocation3 + $0x2c] sm:$0x1] }
 0x20a   : > { %v2582_v57 = vrot.slane %v2581_v46, 4  ;;  %v3392_v59 = vunpack.c.l.b16 %v2577_v2  ;;  %v4539_v51 = vrot.slane %v4537_v63, 5  ;;  %v3991_v45 = vpack.c.bf16 %v3959_v14, %v3959_v14 }
 0x20b   : > { %v6376_v35 = vpack.c.b16 %v14949_v0, %v14869_v33  ;;  %v4543_v27 = vrot.slane %v4541_v5, 4  ;;  %v4547_v24 = vshll.u32 %v4488_v52, 16  ;;  %v4534_v49 = vor.u32 %v4533_v47, %v14846_v62 }
 0x20c   : > { %v2587_v11 = vsel %vm13361_vm7, %v2582_v57, %v2586_v38  ;;  %v11626_v60 = vrot.slane %v2017_v20, 9  ;;  %v2167_v56 = vrot.slane %v14867_v4, 5  ;;  %v4061_v36 = vshrl.u32 %v3991_v45, 16  ;;  %v14980_v2 = vpop.permute.xlu1 %2922  ;;  %v4459_v20 = vld [vmem:[#allocation3 + $0x18] sm:$0xf]  ;;  %v14994_v57 = vpop.permute.xlu2 %3002 }
 0x20d   : > { %v3393_v32 = vunpack.c.l.b16 %v2587_v11  ;;  %v4064_v25 = vshll.u32 %v3991_v45, 16  ;;  %v4544_v22 = vor.u32 %v4543_v27, %v4539_v51  ;;  %v4535_v29 = vrot.slane %v4534_v49, 4  ;;  %v14967_v4 = vpop.f32.mrf.mxu0  ;;  %v4489_v11 = vld [vmem:[#allocation3 + $0x20] sm:$0x1] }
 0x20e   : > { %v4549_v19 = vrot.slane %v4547_v24, 5  ;;  %v2168_v33 = vsel %vm13306_vm4, %v11626_v60, %v2167_v56  ;;  %v2169_v61 = vrot.slane %v2167_v56, 4  ;;  %v4063_v44 = vrot.slane %v4061_v36, 7  ;;  %v14965_v58 = vpop.permute.xlu0 %3512  ;;  %v15007_v24 = vld [vmem:[%s17641_s2] ss:$0 sm:$0xff] }
 0x20f   : > { %3360 = vrot.lane.b32.xlu0 %v12752_v37, %s17655_s29  ;;  %v3410_v8 = vpack.c.b16 %v3393_v32, %v3392_v59  ;;  %v4545_v1 = vrot.slane %v4544_v22, 4  ;;  %v2170_v62 = vrot.slane %v14880_v23, 5  ;;  %v4540_v38 = vsel %vm13361_vm7, %v4535_v29, %v4539_v51 }
 0x210   : > { %v3216_v6 = vunpack.c.l.b16 %v2168_v33  ;;  %v3595_v46 = vsel %vm3573_vm1, %v3557_v53, %v14903_v43  ;;  %v3791_v30 = vsel %vm17676_vm8, %v3758_v9, %v14885_v28  ;;  %v4066_v23 = vor.u32 %v4064_v25, %v4063_v44 }
 0x211   : > { %3440 = vrot.lane.b32.xlu1 %v3410_v8, %s13188_s17  ;;  %3008 = vrot.lane.b32.xlu2 %v14852_v41, %s13182_s21  ;;  %v4068_v52 = vrot.slane %v4063_v44, 4  ;;  %v4550_v31 = vsel %vm13361_vm7, %v4545_v1, %v4549_v19  ;;  %v6346_v63 = vunpack.c.l.b16 %v4540_v38  ;;  %v2171_v43 = vsel %vm13306_vm4, %v2169_v61, %v2170_v62 }
 0x212   : > { %v6347_v0 = vunpack.c.l.b16 %v4550_v31  ;;  %vm17682_vm11 = vcmask 293888   ;;  %v3890_v28 = vadd.f32 %v14560_v13, %v14905_v55  ;;  %v11642_v53 = vrot.slane %v2626_v7, 9  ;;  %v4460_v55 = vld [vmem:[#allocation3 + $0x1c] sm:$0xf]  ;;  %v12717_v7 = vld [vmem:[#allocation2 + $0x84] sm:$0xff] }
 0x213   : > { %11853 = vmatmul.msk.bf16.gmra.mxu0 %vm17682_vm11, %v3791_v30  ;;  %v4067_v41 = vsel %vm13427_vm12, %v4059_v17, %v4066_v23  ;;  %v4362_v9 = vsel %vm14643_vm9, %v4068_v52, %v4361_v50  ;;  %v3217_v14 = vunpack.c.l.b16 %v2171_v43  ;;  %v2776_v5 = vrot.slane %v14892_v34, 5  ;;  %v4364_v50 = vld [vmem:[#allocation3 + $0x30] sm:$0xf]  ;;  %vm17686_vm8 = vmmov %vm17682_vm11 }
 0x214   : > { %4360 = vst.msk [vmem:[#allocation3 + $0x28] sm:$0xf] %vm17683_vm0, %v4067_v41  ;;  %v6377_v59 = vpack.c.b16 %v6347_v0, %v6346_v63  ;;  %v3960_v47 = vmax.f32 %v3890_v28, 0.0  ;;  %v2779_v13 = vrot.slane %v14917_v21, 5  ;;  %v3628_v10 = vsel %vm3606_vm2, %v3595_v46, %v14912_v18  ;;  %v15020_v61 = vpop.permute.xlu1 %3178  ;;  %vm17687_vm11 = vmmov %vm17683_vm0 }
 0x215   : > { %4363 = vst [vmem:[#allocation3 + $0x2c] sm:$0x1] %v4362_v9  ;;  %v3234_v17 = vpack.c.b16 %v3217_v14, %v3216_v6  ;;  %v2777_v51 = vsel %vm13306_vm4, %v11642_v53, %v2776_v5  ;;  %v2778_v37 = vrot.slane %v2776_v5, 4  ;;  %v3661_v34 = vsel %vm3639_vm3, %v3628_v10, %v14894_v42  ;;  %v3896_v32 = vpop.f32.mrf.mxu0  ;;  %v15026_v53 = vpop.permute.xlu2 %3258  ;;  %v4368_v14 = vld [vmem:[#allocation3 + $0x38] sm:$0x1]  ;;  %vm17688_vm0 = vmmov %vm17684_vm14 }
 0x216   : > { %v3992_v45 = vpack.c.bf16 %v3960_v47, %v3960_v47  ;;  %v3472_v27 = vunpack.c.l.b16 %v2777_v51  ;;  %v3892_v18 = vadd.f32 %v15007_v24, %v14941_v40  ;;  %v4552_v49 = vshrl.u32 %v4459_v20, 16  ;;  %v15014_v56 = vpop.permute.xlu0 %3098 }
 0x217   : > { %6392 = vrot.lane.b32.xlu0 %v6376_v35, %s13190_s23  ;;  %v2780_v21 = vsel %vm13306_vm4, %v2778_v37, %v2779_v13  ;;  %v4555_v60 = vshll.u32 %v4459_v20, 16  ;;  %v4561_v42 = vshll.u32 %v4460_v55, 16  ;;  %v3694_v22 = vsel %vm3672_vm5, %v3661_v34, %v14939_v16 }
 0x218   : > { %v4070_v36 = vshrl.u32 %v3992_v45, 16  ;;  %v3473_v25 = vunpack.c.l.b16 %v2780_v21  ;;  %v3961_v29 = vmax.f32 %v3892_v18, 0.0  ;;  %v4554_v40 = vrot.slane %v4552_v49, 4 }
 0x219   : > { %6394 = vrot.lane.b32.xlu1 %v6377_v59, %s13190_s23  ;;  %3264 = vrot.lane.b32.xlu2 %v3234_v17, %s13186_s14  ;;  %v4557_v35 = vrot.slane %v4555_v60, 5  ;;  %v4563_v19 = vrot.slane %v4561_v42, 5  ;;  %v4565_v33 = vshrl.u32 %v4460_v55, 16  ;;  %v4073_v44 = vshll.u32 %v3992_v45, 16  ;;  %v4371_v42 = vld [vmem:[#allocation3 + $0x3c] sm:$0xf] }
 0x21a   : > { %v4072_v8 = vrot.slane %v4070_v36, 7  ;;  %v3993_v1 = vpack.c.bf16 %v3961_v29, %v3961_v29  ;;  %v4571_v62 = vshll.u32 %v4489_v11, 16  ;;  %v3727_v16 = vsel %vm3705_vm6, %v3694_v22, %v14953_v39 }
 0x21b   : > { %v4558_v38 = vor.u32 %v4557_v35, %v4554_v40  ;;  %v4567_v6 = vrot.slane %v4565_v33, 4  ;;  %v3895_v46 = vadd.f32 %v15007_v24, %v14967_v4  ;;  %v3490_v23 = vpack.c.b16 %v3473_v25, %v3472_v27  ;;  %v4462_v34 = vld [vmem:[#allocation3 + $0x28] sm:$0xf] }
 0x21c   : > { %v4075_v30 = vor.u32 %v4073_v44, %v4072_v8  ;;  %v4078_v52 = vshrl.u32 %v3993_v1, 16  ;;  %v4081_v31 = vshll.u32 %v3993_v1, 16  ;;  %v4573_v43 = vrot.slane %v4571_v62, 5  ;;  %v4490_v21 = vld [vmem:[#allocation3 + $0x2c] sm:$0x1] }
 0x21d   : > { %v4559_v63 = vrot.slane %v4558_v38, 4  ;;  %v4568_v0 = vor.u32 %v4567_v6, %v4563_v19  ;;  %v3962_v28 = vmax.f32 %v3895_v46, 0.0  ;;  %v3760_v39 = vsel %vm17684_vm14, %v3727_v16, %v14951_v12  ;;  %v3899_v10 = vpop.f32.mrf.mxu0  ;;  %v4461_v12 = vld [vmem:[#allocation3 + $0x24] sm:$0xf]  ;;  %vm17689_vm14 = vmmov %vm17685_vm10 }
 0x21e   : > { %v4365_v41 = vsel %vm14588_vm13, %v4075_v30, %v4364_v50  ;;  %v4080_v9 = vrot.slane %v4078_v52, 7  ;;  %v3560_v4 = vsel %vm3524_vm15, %v12717_v7, %v14980_v2  ;;  %v3793_v47 = vsel %vm17685_vm10, %v3760_v39, %v14965_v58  ;;  %v3355_v13 = vpop.permute.xlu0 %3354  ;;  %v3515_v30 = vpop.permute.xlu2 %3514  ;;  %vm17690_vm10 = vmmov %vm17687_vm11 }
 0x21f   : > { %4366 = vst [vmem:[#allocation3 + $0x30] sm:$0xf] %v4365_v41  ;;  %v4564_v5 = vsel %vm13361_vm7, %v4559_v63, %v4563_v19  ;;  %v4569_v20 = vrot.slane %v4568_v0, 4  ;;  %v3994_v59 = vpack.c.bf16 %v3962_v28, %v3962_v28  ;;  %v4076_v55 = vrot.slane %v4072_v8, 4 }
 0x220   : > { %v4083_v17 = vor.u32 %v4081_v31, %v4080_v9  ;;  %v4085_v51 = vrot.slane %v4080_v9, 4  ;;  %v6348_v37 = vunpack.c.l.b16 %v4564_v5  ;;  %v3597_v18 = vsel %vm3573_vm1, %v3560_v4, %v14994_v57 }
 0x221   : > { %3520 = vrot.lane.b32.xlu2 %v3490_v23, %s13187_s16  ;;  %v4574_v2 = vsel %vm13361_vm7, %v4569_v20, %v4573_v43  ;;  %v4087_v45 = vshrl.u32 %v3994_v59, 16  ;;  %v4090_v27 = vshll.u32 %v3994_v59, 16  ;;  %v3897_v36 = vadd.f32 %v15007_v24, %v3896_v32  ;;  %v12718_v23 = vld [vmem:[#allocation2 + $0x90] sm:$0xff] }
 0x222   : > { %v4084_v11 = vsel %vm13427_vm12, %v4076_v55, %v4083_v17  ;;  %v4369_v49 = vsel %vm14643_vm9, %v4085_v51, %v4368_v14  ;;  %v6349_v60 = vunpack.c.l.b16 %v4574_v2  ;;  %v4576_v22 = vshrl.u32 %v4461_v12, 16 }
 0x223   : > { %11854 = vmatmul.msk.bf16.gmra.mxu0 %vm17686_vm8, %v3793_v47  ;;  %4367 = vst.msk [vmem:[#allocation3 + $0x34] sm:$0xf] %vm17687_vm11, %v4084_v11  ;;  %v4089_v25 = vrot.slane %v4087_v45, 7  ;;  %v4579_v29 = vshll.u32 %v4461_v12, 16  ;;  %v4585_v57 = vshll.u32 %v4462_v34, 16  ;;  %v3630_v40 = vsel %vm3606_vm2, %v3597_v18, %v15014_v56  ;;  %vm17691_vm11 = vmmov %vm17690_vm10 }
 0x224   : > { %4370 = vst [vmem:[#allocation3 + $0x38] sm:$0x1] %v4369_v49  ;;  %v3963_v35 = vmax.f32 %v3897_v36, 0.0  ;;  %v4589_v19 = vshrl.u32 %v4462_v34, 16  ;;  %v4595_v33 = vshll.u32 %v4490_v21, 16  ;;  %v6378_v8 = vpack.c.b16 %v6349_v60, %v6348_v37 }
 0x225   : > { %v3435_v58 = vpop.permute.xlu1 %3434  ;;  %v4092_v44 = vor.u32 %v4090_v27, %v4089_v25  ;;  %v4578_v1 = vrot.slane %v4576_v22, 4  ;;  %v4581_v62 = vrot.slane %v4579_v29, 5  ;;  %v4093_v7 = vrot.slane %v4089_v25, 4  ;;  %v3901_v31 = vpop.f32.mrf.mxu0  ;;  %v4378_v49 = vld [vmem:[#allocation3 + $0x48] sm:$0xf] }
 0x226   : > { %v3995_v50 = vpack.c.bf16 %v3963_v35, %v3963_v35  ;;  %v4587_v32 = vrot.slane %v4585_v57, 5  ;;  %v4591_v38 = vrot.slane %v4589_v19, 4  ;;  %v3663_v46 = vsel %vm3639_vm3, %v3630_v40, %v15020_v61  ;;  %v4463_v52 = vld [vmem:[#allocation3 + $0x30] sm:$0xf]  ;;  %v2925_v41 = vpop.permute.xlu0 %2924 }
 0x227   : > { %v4372_v6 = vsel %vm14588_vm13, %v4092_v44, %v4371_v42  ;;  %v4582_v16 = vor.u32 %v4581_v62, %v4578_v1  ;;  %v3900_v56 = vadd.f32 %v15007_v24, %v3899_v10  ;;  %v4597_v43 = vrot.slane %v4595_v33, 5  ;;  %v4375_v10 = vld [vmem:[#allocation3 + $0x44] sm:$0x1]  ;;  %v3101_v62 = vpop.permute.xlu2 %3100 }
 0x228   : > { %4373 = vst [vmem:[#allocation3 + $0x3c] sm:$0xf] %v4372_v6  ;;  %v4095_v63 = vshrl.u32 %v3995_v50, 16  ;;  %v4592_v0 = vor.u32 %v4591_v38, %v4587_v32  ;;  %v3696_v28 = vsel %vm3672_vm5, %v3663_v46, %v15026_v53  ;;  %v4098_v9 = vshll.u32 %v3995_v50, 16 }
 0x229   : > { %6396 = vrot.lane.b32.xlu2 %v6378_v8, %s13190_s23  ;;  %v4583_v39 = vrot.slane %v4582_v16, 4  ;;  %v3729_v61 = vsel %vm3705_vm6, %v3696_v28, %v3355_v13  ;;  %v3964_v4 = vmax.f32 %v3900_v56, 0.0  ;;  %v4600_v47 = vshrl.u32 %v4463_v52, 16 }
 0x22a   : > { %v4097_v5 = vrot.slane %v4095_v63, 7  ;;  %v4593_v20 = vrot.slane %v4592_v0, 4  ;;  %v3762_v59 = vsel %vm17688_vm0, %v3729_v61, %v3435_v58  ;;  %v3563_v53 = vsel %vm3524_vm15, %v12718_v23, %v2925_v41  ;;  %v4464_v51 = vld [vmem:[#allocation3 + $0x34] sm:$0xf] }
 0x22b   : > { %v4588_v55 = vsel %vm13361_vm7, %v4583_v39, %v4587_v32  ;;  %v3996_v17 = vpack.c.bf16 %v3964_v4, %v3964_v4  ;;  %v4603_v37 = vshll.u32 %v4463_v52, 16  ;;  %v3795_v2 = vsel %vm17689_vm14, %v3762_v59, %v3515_v30  ;;  %v4491_v60 = vld [vmem:[#allocation3 + $0x38] sm:$0x1] }
 0x22c   : > { %v4100_v12 = vor.u32 %v4098_v9, %v4097_v5  ;;  %v4102_v34 = vrot.slane %v4097_v5, 4  ;;  %v4598_v13 = vsel %vm13361_vm7, %v4593_v20, %v4597_v43  ;;  %v6350_v45 = vunpack.c.l.b16 %v4588_v55 }
 0x22d   : > { %v3005_v14 = vpop.permute.xlu1 %3004  ;;  %v6351_v27 = vunpack.c.l.b16 %v4598_v13  ;;  %v4104_v18 = vshrl.u32 %v3996_v17, 16  ;;  %v4602_v21 = vrot.slane %v4600_v47, 4  ;;  %v4605_v42 = vrot.slane %v4603_v37, 5  ;;  %v3904_v40 = vpop.f32.mrf.mxu0 }
 0x22e   : > { %v4101_v58 = vsel %vm13427_vm12, %v4093_v7, %v4100_v12  ;;  %v4376_v11 = vsel %vm14643_vm9, %v4102_v34, %v4375_v10  ;;  %v4609_v36 = vshll.u32 %v4464_v51, 16  ;;  %v4107_v29 = vshll.u32 %v3996_v17, 16  ;;  %v3181_v6 = vpop.permute.xlu0 %3180  ;;  %v4382_v34 = vld [vmem:[#allocation3 + $0x50] sm:$0x1] }
 0x22f   : > { %4374 = vst.msk [vmem:[#allocation3 + $0x40] sm:$0xf] %vm17690_vm10, %v4101_v58  ;;  %v6379_v25 = vpack.c.b16 %v6351_v27, %v6350_v45  ;;  %v15073_v22 = vrot.slane %v4104_v18, 7  ;;  %v4613_v57 = vshrl.u32 %v4464_v51, 16  ;;  %v4606_v35 = vor.u32 %v4605_v42, %v4602_v21  ;;  %v4465_v44 = vld [vmem:[#allocation3 + $0x3c] sm:$0xf]  ;;  %vm17692_vm10 = vmmov %vm17686_vm8 }
 0x230   : > { %4377 = vst [vmem:[#allocation3 + $0x44] sm:$0x1] %v4376_v11  ;;  %v4611_v19 = vrot.slane %v4609_v36, 5  ;;  %v3599_v33 = vsel %vm3573_vm1, %v3563_v53, %v3005_v14  ;;  %v3902_v8 = vadd.f32 %v15007_v24, %v3901_v31  ;;  %v4619_v50 = vshll.u32 %v4491_v60, 16 }
 0x231   : > { %6398 = vrot.lane.b32.xlu0 %v6379_v25, %s13190_s23  ;;  %v4109_v1 = vor.u32 %v4107_v29, %v15073_v22  ;;  %v4615_v7 = vrot.slane %v4613_v57, 4  ;;  %v4607_v32 = vrot.slane %v4606_v35, 4  ;;  %v3632_v16 = vsel %vm3606_vm2, %v3599_v33, %v3101_v62 }
 0x232   : > { %v3965_v38 = vmax.f32 %v3902_v8, 0.0  ;;  %v4624_v46 = vshrl.u32 %v4465_v44, 16  ;;  %v4627_v52 = vshll.u32 %v4465_v44, 16  ;;  %v4621_v28 = vrot.slane %v4619_v50, 5 }
 0x233   : > { %11855 = vmatmul.msk.bf16.gmra.mxu0 %vm17686_vm8, %v3795_v2  ;;  %v4379_v30 = vsel %vm14588_vm13, %v4109_v1, %v4378_v49  ;;  %v4616_v56 = vor.u32 %v4615_v7, %v4611_v19  ;;  %v4612_v31 = vsel %vm13361_vm7, %v4607_v32, %v4611_v19  ;;  %v3665_v41 = vsel %vm3639_vm3, %v3632_v16, %v3181_v6  ;;  %v3357_v49 = vpop.permute.xlu2 %3356  ;;  %vm17693_vm8 = vmmov %vm17691_vm11 }
 0x234   : > { %4380 = vst [vmem:[#allocation3 + $0x48] sm:$0xf] %v4379_v30  ;;  %v3997_v63 = vpack.c.bf16 %v3965_v38, %v3965_v38  ;;  %v4626_v0 = vrot.slane %v4624_v46, 4  ;;  %v4629_v9 = vrot.slane %v4627_v52, 5  ;;  %v4110_v39 = vrot.slane %v15073_v22, 4 }
 0x235   : > { %v3261_v23 = vpop.permute.xlu1 %3260  ;;  %v4617_v43 = vrot.slane %v4616_v56, 4  ;;  %v3905_v5 = vadd.f32 %v15007_v24, %v3904_v40  ;;  %v6352_v59 = vunpack.c.l.b16 %v4612_v31  ;;  %v3906_v17 = vpop.f32.mrf.mxu0  ;;  %v4385_v56 = vld [vmem:[#allocation3 + $0x54] sm:$0xf] }
 0x236   : > { %v4112_v61 = vshrl.u32 %v3997_v63, 16  ;;  %v3698_v4 = vsel %vm3672_vm5, %v3665_v41, %v3261_v23  ;;  %v4466_v14 = vld [vmem:[#allocation3 + $0x40] sm:$0xf]  ;;  %v4630_v10 = vor.u32 %v4629_v9, %v4626_v0  ;;  %v4115_v37 = vshll.u32 %v3997_v63, 16 }
 0x237   : > { %v4622_v20 = vsel %vm13361_vm7, %v4617_v43, %v4621_v28  ;;  %v4492_v47 = vld [vmem:[#allocation3 + $0x44] sm:$0x1]  ;;  %v4633_v55 = vshll.u32 %v4466_v14, 16  ;;  %v4637_v12 = vshrl.u32 %v4466_v14, 16  ;;  %v3966_v45 = vmax.f32 %v3905_v5, 0.0 }
 0x238   : > { %v6353_v53 = vunpack.c.l.b16 %v4622_v20  ;;  %v4114_v51 = vrot.slane %v4112_v61, 7  ;;  %v4643_v2 = vshll.u32 %v4492_v47, 16  ;;  %v3907_v27 = vadd.f32 %v15007_v24, %v3906_v17  ;;  %v12811_v61 = vld [vmem:[%s17642_s3 + $0x38] sm:$0xff] }
 0x239   : > { %v4635_v13 = vrot.slane %v4633_v55, 5  ;;  %v4639_v11 = vrot.slane %v4637_v12, 4  ;;  %v4631_v60 = vrot.slane %v4630_v10, 4  ;;  %v3998_v42 = vpack.c.bf16 %v3966_v45, %v3966_v45  ;;  %7485 = vmatpush.bf16.msra.mxu1 %v12811_v61  ;;  %12937 = vmatpush.bf16.msra.mxu2 %v12811_v61  ;;  %v12810_v45 = vld [vmem:[%s17642_s3 + $0x30] sm:$0xff] }
 0x23a   : > { %v6380_v18 = vpack.c.b16 %v6353_v53, %v6352_v59  ;;  %v4117_v21 = vor.u32 %v4115_v37, %v4114_v51  ;;  %v4119_v58 = vrot.slane %v4114_v51, 4  ;;  %v3967_v36 = vmax.f32 %v3907_v27, 0.0 }
 0x23b   : > { %v3731_v29 = vsel %vm3705_vm6, %v3698_v4, %v3357_v49  ;;  %v4640_v57 = vor.u32 %v4639_v11, %v4635_v13  ;;  %v4467_v40 = vld [vmem:[#allocation3 + $0x48] sm:$0xf]  ;;  %v4636_v35 = vsel %vm13361_vm7, %v4631_v60, %v4635_v13  ;;  %v4121_v19 = vshrl.u32 %v3998_v42, 16 }
 0x23c   : > { %6400 = vrot.lane.b32.xlu1 %v6380_v18, %s13190_s23  ;;  %v4118_v25 = vsel %vm13427_vm12, %v4110_v39, %v4117_v21  ;;  %v4383_v22 = vsel %vm14643_vm9, %v4119_v58, %v4382_v34  ;;  %v3999_v33 = vpack.c.bf16 %v3967_v36, %v3967_v36  ;;  %v4648_v8 = vshrl.u32 %v4467_v40, 16  ;;  %v4389_v39 = vld [vmem:[#allocation3 + $0x5c] sm:$0x1] }
 0x23d   : > { %4381 = vst.msk [vmem:[#allocation3 + $0x4c] sm:$0xf] %vm17691_vm11, %v4118_v25  ;;  %v4641_v44 = vrot.slane %v4640_v57, 4  ;;  %v4645_v1 = vrot.slane %v4643_v2, 5  ;;  %v4651_v7 = vshll.u32 %v4467_v40, 16  ;;  %v4123_v32 = vrot.slane %v4121_v19, 7  ;;  %v3909_v2 = vpop.f32.mrf.mxu0  ;;  %7486 = vmatpush.bf16.msra.mxu1 %v12810_v45  ;;  %12938 = vmatpush.bf16.msra.mxu2 %v12810_v45  ;;  %vm17694_vm11 = vmmov %vm17693_vm8 }
 0x23e   : > { %4384 = vst [vmem:[#allocation3 + $0x50] sm:$0x1] %v4383_v22  ;;  %v4124_v38 = vshll.u32 %v3998_v42, 16  ;;  %v4129_v6 = vshrl.u32 %v3999_v33, 16  ;;  %v6354_v30 = vunpack.c.l.b16 %v4636_v35  ;;  %v4650_v23 = vrot.slane %v4648_v8, 4  ;;  %v2927_v22 = vpop.permute.xlu2 %2926  ;;  %v12809_v57 = vld [vmem:[%s17642_s3 + $0x28] sm:$0xff] }
 0x23f   : > { %v4646_v46 = vsel %vm13361_vm7, %v4641_v44, %v4645_v1  ;;  %v4653_v0 = vrot.slane %v4651_v7, 5  ;;  %v4132_v28 = vshll.u32 %v3999_v33, 16  ;;  %v4127_v4 = vrot.slane %v4123_v32, 4  ;;  %v4392_v44 = vld [vmem:[#allocation3 + $0x60] sm:$0xf]  ;;  %v12808_v1 = vld [vmem:[%s17642_s3 + $0x20] sm:$0xff] }
 0x240   : > { %v3517_v62 = vpop.permute.xlu1 %3516  ;;  %v6355_v52 = vunpack.c.l.b16 %v4646_v46  ;;  %v4126_v31 = vor.u32 %v4124_v38, %v4123_v32  ;;  %v4131_v43 = vrot.slane %v4129_v6, 7  ;;  %v3910_v58 = vadd.f32 %v15007_v24, %v3909_v2 }
 0x241   : > { %v4654_v47 = vor.u32 %v4653_v0, %v4650_v23  ;;  %7487 = vmatpush.bf16.msra.mxu1 %v12809_v57  ;;  %12939 = vmatpush.bf16.msra.mxu2 %v12809_v57 }
 0x242   : > { %v6381_v41 = vpack.c.b16 %v6355_v52, %v6354_v30  ;;  %v4386_v9 = vsel %vm14588_vm13, %v4126_v31, %v4385_v56  ;;  %v4134_v14 = vor.u32 %v4132_v28, %v4131_v43  ;;  %v4136_v5 = vrot.slane %v4131_v43, 4  ;;  %v12807_v56 = vld [vmem:[%s17642_s3 + $0x18] sm:$0xff] }
 0x243   : > { %4387 = vst [vmem:[#allocation3 + $0x54] sm:$0xf] %v4386_v9  ;;  %v4655_v34 = vrot.slane %v4654_v47, 4  ;;  %v3968_v49 = vmax.f32 %v3910_v58, 0.0  ;;  %v12719_v9 = vld [vmem:[#allocation2 + $0x9c] sm:$0xff] }
 0x244   : > { %v3437_v50 = vpop.permute.xlu0 %3436  ;;  %v4468_v20 = vld [vmem:[#allocation3 + $0x4c] sm:$0xf]  ;;  %6402 = vrot.lane.b32.xlu2 %v6381_v41, %s13190_s23  ;;  %v4135_v17 = vsel %vm13427_vm12, %v4127_v4, %v4134_v14  ;;  %v4390_v53 = vsel %vm14643_vm9, %v4136_v5, %v4389_v39  ;;  %v4396_v4 = vld [vmem:[#allocation3 + $0x68] sm:$0x1]  ;;  %v12806_v14 = vld [vmem:[%s17642_s3 + $0x10] sm:$0xff] }
 0x245   : > { %v3764_v16 = vsel %vm17688_vm0, %v3731_v29, %v3437_v50  ;;  %v4493_v59 = vld [vmem:[#allocation3 + $0x50] sm:$0x1]  ;;  %v4657_v10 = vshll.u32 %v4468_v20, 16  ;;  %v4661_v55 = vshrl.u32 %v4468_v20, 16  ;;  %4388 = vst.msk [vmem:[#allocation3 + $0x58] sm:$0xf] %vm17693_vm8, %v4135_v17  ;;  %v4000_v36 = vpack.c.bf16 %v3968_v49, %v3968_v49  ;;  %v3911_v40 = vpop.f32.mrf.mxu0  ;;  %7488 = vmatpush.bf16.msra.mxu1 %v12808_v1  ;;  %12940 = vmatpush.bf16.msra.mxu2 %v12808_v1 }
 0x246   : > { %v3797_v63 = vsel %vm17689_vm14, %v3764_v16, %v3517_v62  ;;  %v4667_v12 = vshll.u32 %v4493_v59, 16  ;;  %4391 = vst [vmem:[#allocation3 + $0x5c] sm:$0x1] %v4390_v53  ;;  %v3912_v33 = vadd.f32 %v15007_v24, %v3911_v40 }
 0x247   : > { %11856 = vmatmul.msk.bf16.gmra.mxu0 %vm17692_vm10, %v3797_v63  ;;  %v4659_v51 = vrot.slane %v4657_v10, 5  ;;  %v4663_v37 = vrot.slane %v4661_v55, 4  ;;  %v4138_v29 = vshrl.u32 %v4000_v36, 16  ;;  %v4141_v19 = vshll.u32 %v4000_v36, 16  ;;  %v3183_v63 = vpop.permute.xlu2 %3182 }
 0x248   : > { %v4669_v21 = vrot.slane %v4667_v12, 5  ;;  %v3969_v32 = vmax.f32 %v3912_v33, 0.0  ;;  %v3103_v55 = vpop.permute.xlu1 %3102  ;;  %v3566_v12 = vsel %vm3524_vm15, %v12719_v9, %v2927_v22 }
 0x249   : > { %v4664_v13 = vor.u32 %v4663_v37, %v4659_v51  ;;  %v4660_v27 = vsel %vm13361_vm7, %v4655_v34, %v4659_v51  ;;  %v4140_v35 = vrot.slane %v4138_v29, 7  ;;  %7489 = vmatpush.bf16.msra.mxu1 %v12807_v56  ;;  %12941 = vmatpush.bf16.msra.mxu2 %v12807_v56  ;;  %v12805_v34 = vld [vmem:[%s17642_s3 + $0x8] sm:$0xff] }
 0x24a   : > { %v6356_v60 = vunpack.c.l.b16 %v4660_v27  ;;  %v4469_v8 = vld [vmem:[#allocation3 + $0x54] sm:$0xf]  ;;  %v4001_v46 = vpack.c.bf16 %v3969_v32, %v3969_v32 }
 0x24b   : > { %v4665_v18 = vrot.slane %v4664_v13, 4  ;;  %v4672_v62 = vshrl.u32 %v4469_v8, 16  ;;  %v4675_v7 = vshll.u32 %v4469_v8, 16  ;;  %v4143_v50 = vor.u32 %v4141_v19, %v4140_v35 }
 0x24c   : > { %v4146_v30 = vshrl.u32 %v4001_v46, 16  ;;  %v4470_v23 = vld [vmem:[#allocation3 + $0x58] sm:$0xf]  ;;  %v4149_v43 = vshll.u32 %v4001_v46, 16  ;;  %v3007_v39 = vpop.permute.xlu0 %3006  ;;  %v4144_v61 = vrot.slane %v4140_v35, 4 }
 0x24d   : > { %v4670_v11 = vsel %vm13361_vm7, %v4665_v18, %v4669_v21  ;;  %v4674_v38 = vrot.slane %v4672_v62, 4  ;;  %v4677_v6 = vrot.slane %v4675_v7, 5  ;;  %v4393_v16 = vsel %vm14588_vm13, %v4143_v50, %v4392_v44  ;;  %v4494_v52 = vld [vmem:[#allocation3 + $0x5c] sm:$0x1]  ;;  %7490 = vmatpush.bf16.msra.mxu1 %v12806_v14  ;;  %12942 = vmatpush.bf16.msra.mxu2 %v12806_v14 }
 0x24e   : > { %v6357_v42 = vunpack.c.l.b16 %v4670_v11  ;;  %4394 = vst [vmem:[#allocation3 + $0x60] sm:$0xf] %v4393_v16  ;;  %v4148_v0 = vrot.slane %v4146_v30, 7  ;;  %v4681_v28 = vshll.u32 %v4470_v23, 16  ;;  %v4685_v41 = vshrl.u32 %v4470_v23, 16  ;;  %v12804_v11 = vld [vmem:[%s17642_s3] sm:$0xff] }
 0x24f   : > { %v4678_v31 = vor.u32 %v4677_v6, %v4674_v38  ;;  %v4691_v5 = vshll.u32 %v4494_v52, 16  ;;  %v3601_v27 = vsel %vm3573_vm1, %v3566_v12, %v3007_v39  ;;  %v4399_v23 = vld [vmem:[#allocation3 + $0x6c] sm:$0xf] }
 0x250   : > { %v6382_v25 = vpack.c.b16 %v6357_v42, %v6356_v60  ;;  %v4151_v20 = vor.u32 %v4149_v43, %v4148_v0  ;;  %v4153_v59 = vrot.slane %v4148_v0, 4  ;;  %v4683_v47 = vrot.slane %v4681_v28, 5  ;;  %v12720_v43 = vld [vmem:[#allocation2 + $0xa8] sm:$0xff] }
 0x251   : > { %v4687_v10 = vrot.slane %v4685_v41, 4  ;;  %v4679_v51 = vrot.slane %v4678_v31, 4  ;;  %v4693_v45 = vrot.slane %v4691_v5, 5  ;;  %v3634_v21 = vsel %vm3606_vm2, %v3601_v27, %v3103_v55  ;;  %7491 = vmatpush.bf16.msra.mxu1 %v12805_v34  ;;  %12943 = vmatpush.bf16.msra.mxu2 %v12805_v34 }
 0x252   : > { %6404 = vrot.lane.b32.xlu0 %v6382_v25, %s13190_s23  ;;  %v4152_v17 = vsel %vm13427_vm12, %v4144_v61, %v4151_v20  ;;  %v4397_v53 = vsel %vm14643_vm9, %v4153_v59, %v4396_v4  ;;  %v3667_v35 = vsel %vm3639_vm3, %v3634_v21, %v3183_v63 }
 0x253   : > { %v4688_v37 = vor.u32 %v4687_v10, %v4683_v47  ;;  %4395 = vst.msk [vmem:[#allocation3 + $0x64] sm:$0xf] %vm17694_vm11, %v4152_v17  ;;  %v4684_v13 = vsel %vm13361_vm7, %v4679_v51, %v4683_v47  ;;  %vm17695_vm11 = vmmov %vm17688_vm0 }
 0x254   : > { %4398 = vst [vmem:[#allocation3 + $0x68] sm:$0x1] %v4397_v53  ;;  %v6358_v49 = vunpack.c.l.b16 %v4684_v13  ;;  %v3263_v22 = vpop.permute.xlu0 %3262 }
 0x255   : > { %v4689_v2 = vrot.slane %v4688_v37, 4  ;;  %v4471_v25 = vld [vmem:[#allocation3 + $0x60] sm:$0xf]  ;;  %7492 = vmatpush.bf16.msra.mxu1 %v12804_v11  ;;  %12944 = vmatpush.bf16.msra.mxu2 %v12804_v11  ;;  %v3700_v44 = vsel %vm3672_vm5, %v3667_v35, %v3263_v22 }
 0x256   : > { %v4696_v57 = vshrl.u32 %v4471_v25, 16  ;;  %v4699_v40 = vshll.u32 %v4471_v25, 16 }
 0x257   : > { %v4694_v18 = vsel %vm13361_vm7, %v4689_v2, %v4693_v45  ;;  %v4403_v45 = vld [vmem:[#allocation3 + $0x74] sm:$0x1] }
 0x258   : > { %v6359_v60 = vunpack.c.l.b16 %v4694_v18  ;;  %v4698_v1 = vrot.slane %v4696_v57, 4  ;;  %v4701_v62 = vrot.slane %v4699_v40, 5 }
 0x25a   : > { %v6383_v29 = vpack.c.b16 %v6359_v60, %v6358_v49  ;;  %v4472_v46 = vld [vmem:[#allocation3 + $0x64] sm:$0xf]  ;;  %v4702_v52 = vor.u32 %v4701_v62, %v4698_v1 }
 0x25b   : > { %v4495_v30 = vld [vmem:[#allocation3 + $0x68] sm:$0x1]  ;;  %v4705_v31 = vshll.u32 %v4472_v46, 16  ;;  %v4709_v63 = vshrl.u32 %v4472_v46, 16 }
 0x25c   : > { %6406 = vrot.lane.b32.xlu1 %v6383_v29, %s13190_s23  ;;  %v4715_v14 = vshll.u32 %v4495_v30, 16  ;;  %v4703_v47 = vrot.slane %v4702_v52, 4 }
 0x25d   : > { %v4707_v61 = vrot.slane %v4705_v31, 5  ;;  %v4711_v4 = vrot.slane %v4709_v63, 4 }
 0x25e   : > { %v4717_v37 = vrot.slane %v4715_v14, 5 }
 0x25f   : > { %v4712_v10 = vor.u32 %v4711_v4, %v4707_v61  ;;  %v4708_v53 = vsel %vm13361_vm7, %v4703_v47, %v4707_v61 }
 0x261   : > { %v4713_v51 = vrot.slane %v4712_v10, 4 }
 0x263   : > { %v3439_v42 = vpop.permute.xlu2 %3438  ;;  %v4718_v27 = vsel %vm13361_vm7, %v4713_v51, %v4717_v37 }
 0x264   : > { %v3914_v58 = vpop.f32.mrf.mxu0  ;;  %v6361_v11 = vunpack.c.l.b16 %v4718_v27 }
 0x265   : > { %v3915_v36 = vadd.f32 %v15007_v24, %v3914_v58  ;;  %v6360_v58 = vunpack.c.l.b16 %v4708_v53  ;;  %v12835_v53 = vld [vmem:[%s17642_s3 + $0xf8] sm:$0xff] }
 0x266   : > { %7752 = vmatpush.bf16.msrb.mxu0 %v12835_v53 }
 0x267   : > { %v3970_v19 = vmax.f32 %v3915_v36, 0.0  ;;  %v6384_v29 = vpack.c.b16 %v6361_v11, %v6360_v58 }
 0x269   : > { %v4002_v8 = vpack.c.bf16 %v3970_v19, %v3970_v19  ;;  %6408 = vrot.lane.b32.xlu2 %v6384_v29, %s13190_s23 }
 0x26a   : > { %v3359_v33 = vpop.permute.xlu1 %3358 }
 0x26b   : > { %v3733_v7 = vsel %vm3705_vm6, %v3700_v44, %v3359_v33  ;;  %v4155_v50 = vshrl.u32 %v4002_v8, 16  ;;  %v4158_v6 = vshll.u32 %v4002_v8, 16  ;;  %v3009_v0 = vpop.permute.xlu2 %3008 }
 0x26c   : > { %v3916_v32 = vpop.f32.mrf.mxu0  ;;  %v3766_v56 = vsel %vm17688_vm0, %v3733_v7, %v3439_v42  ;;  %vm17696_vm0 = vmmov %vm17689_vm14 }
 0x26d   : > { %v4157_v38 = vrot.slane %v4155_v50, 7  ;;  %v3917_v16 = vadd.f32 %v15007_v24, %v3916_v32 }
 0x26f   : > { %v4160_v28 = vor.u32 %v4158_v6, %v4157_v38  ;;  %v3971_v41 = vmax.f32 %v3917_v16, 0.0  ;;  %v4161_v2 = vrot.slane %v4157_v38, 4 }
 0x271   : > { %v3519_v9 = vpop.permute.xlu0 %3518  ;;  %v4400_v20 = vsel %vm14588_vm13, %v4160_v28, %v4399_v23  ;;  %v4003_v59 = vpack.c.bf16 %v3971_v41, %v3971_v41  ;;  %v12756_v23 = vld [vmem:[#allocation3] sm:$0xff] }
 0x272   : > { %v2929_v39 = vpop.permute.xlu1 %2928  ;;  %v3799_v5 = vsel %vm17689_vm14, %v3766_v56, %v3519_v9  ;;  %4401 = vst [vmem:[#allocation3 + $0x6c] sm:$0xf] %v4400_v20  ;;  %vm17697_vm14 = vmmov %vm17692_vm10 }
 0x273   : > { %11857 = vmatmul.msk.bf16.gmra.mxu0 %vm17692_vm10, %v3799_v5  ;;  %v3569_v55 = vsel %vm3524_vm15, %v12720_v43, %v2929_v39  ;;  %v4163_v17 = vshrl.u32 %v4003_v59, 16  ;;  %v4166_v34 = vshll.u32 %v4003_v59, 16  ;;  %v3265_v42 = vpop.permute.xlu2 %3264  ;;  %vm6888_vm10 = vcmask 523264  }
 0x274   : > { %v3603_v13 = vsel %vm3573_vm1, %v3569_v55, %v3009_v0 }
 0x275   : > { %v4165_v12 = vrot.slane %v4163_v17, 7 }
 0x277   : > { %v4168_v18 = vor.u32 %v4166_v34, %v4165_v12  ;;  %v4170_v21 = vrot.slane %v4165_v12, 4  ;;  %v12757_v12 = vld [vmem:[#allocation3 + $0xc] sm:$0xff] }
 0x279   : > { %v3105_v49 = vpop.permute.xlu0 %3104  ;;  %v4169_v25 = vsel %vm13427_vm12, %v4161_v2, %v4168_v18  ;;  %v4404_v22 = vsel %vm14643_vm9, %v4170_v21, %v4403_v45  ;;  %v4473_v40 = vld [vmem:[#allocation3 + $0x6c] sm:$0xf]  ;;  %v4406_v45 = vld [vmem:[#allocation3 + $0x78] sm:$0xf] }
 0x27a   : > { %v3185_v60 = vpop.permute.xlu1 %3184  ;;  %v3636_v36 = vsel %vm3606_vm2, %v3603_v13, %v3105_v49  ;;  %4402 = vst.msk [vmem:[#allocation3 + $0x70] sm:$0xf] %vm17693_vm8, %v4169_v25  ;;  %v4720_v35 = vshrl.u32 %v4473_v40, 16  ;;  %v4723_v19 = vshll.u32 %v4473_v40, 16 }
 0x27b   : > { %v3669_v57 = vsel %vm3639_vm3, %v3636_v36, %v3185_v60  ;;  %4405 = vst [vmem:[#allocation3 + $0x74] sm:$0x1] %v4404_v22  ;;  %v3521_v50 = vpop.permute.xlu2 %3520  ;;  %v4410_v22 = vld [vmem:[#allocation3 + $0x80] sm:$0x1] }
 0x27c   : > { %v3702_v33 = vsel %vm3672_vm5, %v3669_v57, %v3265_v42  ;;  %v4722_v44 = vrot.slane %v4720_v35, 4  ;;  %v4725_v1 = vrot.slane %v4723_v19, 5 }
 0x27e   : > { %v4726_v46 = vor.u32 %v4725_v1, %v4722_v44 }
 0x280   : > { %v4727_v43 = vrot.slane %v4726_v46, 4 }
 0x281   : > { %v3361_v8 = vpop.permute.xlu0 %3360  ;;  %v4474_v38 = vld [vmem:[#allocation3 + $0x70] sm:$0xf] }
 0x282   : > { %v3735_v62 = vsel %vm3705_vm6, %v3702_v33, %v3361_v8  ;;  %v4496_v6 = vld [vmem:[#allocation3 + $0x74] sm:$0x1]  ;;  %v4729_v30 = vshll.u32 %v4474_v38, 16  ;;  %v4733_v56 = vshrl.u32 %v4474_v38, 16  ;;  %v12758_v38 = vld [vmem:[#allocation3 + $0x18] sm:$0xff] }
 0x283   : > { %v3441_v7 = vpop.permute.xlu1 %3440  ;;  %v4739_v63 = vshll.u32 %v4496_v6, 16 }
 0x284   : > { %v3768_v32 = vsel %vm17695_vm11, %v3735_v62, %v3441_v7  ;;  %v4731_v52 = vrot.slane %v4729_v30, 5  ;;  %v4735_v31 = vrot.slane %v4733_v56, 4  ;;  %v4413_v30 = vld [vmem:[#allocation3 + $0x84] sm:$0xf]  ;;  %vm17698_vm11 = vmmov %vm17693_vm8 }
 0x285   : > { %v3801_v16 = vsel %vm17696_vm0, %v3768_v32, %v3521_v50  ;;  %v4741_v61 = vrot.slane %v4739_v63, 5  ;;  %v6397_v50 = vpop.permute.xlu2 %6396  ;;  %vm17699_vm0 = vmmov %vm17693_vm8 }
 0x286   : > { %11858 = vmatmul.msk.bf16.gmra.mxu0 %vm17697_vm14, %v3801_v16  ;;  %v4736_v28 = vor.u32 %v4735_v31, %v4731_v52  ;;  %v4732_v9 = vsel %vm13361_vm7, %v4727_v43, %v4731_v52  ;;  %v6899_v52 = vsel %vm6888_vm10, %v12758_v38, %v6397_v50  ;;  %v12839_v43 = vld [vmem:[%s17642_s3 + $0x118] sm:$0xff]  ;;  %vm17700_vm14 = vmmov %vm17699_vm0 }
 0x287   : > { %v6362_v14 = vunpack.c.l.b16 %v4732_v9  ;;  %7845 = vmatpush.bf16.msrb.mxu1 %v12839_v43 }
 0x288   : > { %v4737_v39 = vrot.slane %v4736_v28, 4 }
 0x289   : > { %v6393_v0 = vpop.permute.xlu0 %6392 }
 0x28a   : > { %v6891_v41 = vsel %vm6888_vm10, %v12756_v23, %v6393_v0  ;;  %v4742_v4 = vsel %vm13361_vm7, %v4737_v39, %v4741_v61  ;;  %v12834_v0 = vld [vmem:[%s17642_s3 + $0xf0] sm:$0xff] }
 0x28b   : > { %7493 = vmatmul.bf16.vlgmr.msra.gmra.mxu1 %v6891_v41  ;;  %v6363_v5 = vunpack.c.l.b16 %v4742_v4  ;;  %v6395_v51 = vpop.permute.xlu1 %6394  ;;  %7753 = vmatpush.bf16.msrb.mxu0 %v12834_v0 }
 0x28c   : > { %v6895_v27 = vsel %vm6888_vm10, %v12757_v12, %v6395_v51  ;;  %v4417_v51 = vld [vmem:[#allocation3 + $0x8c] sm:$0x1] }
 0x28d   : > { %v6385_v47 = vpack.c.b16 %v6363_v5, %v6362_v14 }
 0x28f   : > { %6410 = vrot.lane.b32.xlu0 %v6385_v47, %s13190_s23 }
 0x290   : > { %v3919_v20 = vpop.f32.mrf.mxu0 }
 0x291   : > { %v3920_v59 = vadd.f32 %v15007_v24, %v3919_v20 }
 0x293   : > { %v3972_v10 = vmax.f32 %v3920_v59, 0.0 }
 0x295   : > { %v4004_v55 = vpack.c.bf16 %v3972_v10, %v3972_v10 }
 0x297   : > { %v4172_v17 = vshrl.u32 %v4004_v55, 16  ;;  %v4175_v13 = vshll.u32 %v4004_v55, 16 }
 0x298   : > { %v3921_v37 = vpop.f32.mrf.mxu0 }
 0x299   : > { %v4174_v34 = vrot.slane %v4172_v17, 7  ;;  %v3922_v2 = vadd.f32 %v15007_v24, %v3921_v37  ;;  %v15222_v17 = vld [vmem:[%s17641_s2] ss:$0 sm:$0xff] }
 0x29b   : > { %v4177_v18 = vor.u32 %v4175_v13, %v4174_v34  ;;  %v3973_v21 = vmax.f32 %v3922_v2, 0.0  ;;  %7498 = vmatmul.bf16.gmra.mxu1 %v6895_v27  ;;  %v4178_v29 = vrot.slane %v4174_v34, 4 }
 0x29d   : > { %v4407_v58 = vsel %vm14588_vm13, %v4177_v18, %v4406_v45  ;;  %v4005_v11 = vpack.c.bf16 %v3973_v21, %v3973_v21 }
 0x29e   : > { %4408 = vst [vmem:[#allocation3 + $0x78] sm:$0xf] %v4407_v58 }
 0x29f   : > { %v4180_v49 = vshrl.u32 %v4005_v11, 16  ;;  %v4183_v36 = vshll.u32 %v4005_v11, 16 }
 0x2a0   : > { %v3924_v60 = vpop.f32.mrf.mxu0 }
 0x2a1   : > { %v4182_v42 = vrot.slane %v4180_v49, 7  ;;  %v3925_v25 = vadd.f32 %v15007_v24, %v3924_v60 }
 0x2a3   : > { %v4185_v57 = vor.u32 %v4183_v36, %v4182_v42  ;;  %v4187_v40 = vrot.slane %v4182_v42, 4  ;;  %v3974_v35 = vmax.f32 %v3925_v25, 0.0 }
 0x2a5   : > { %v4186_v19 = vsel %vm13427_vm12, %v4178_v29, %v4185_v57  ;;  %v4411_v33 = vsel %vm14643_vm9, %v4187_v40, %v4410_v22  ;;  %v4006_v8 = vpack.c.bf16 %v3974_v35, %v3974_v35  ;;  %v4475_v44 = vld [vmem:[#allocation3 + $0x78] sm:$0xf]  ;;  %v6399_v40 = vpop.permute.xlu0 %6398 }
 0x2a6   : > { %4409 = vst.msk [vmem:[#allocation3 + $0x7c] sm:$0xf] %vm17693_vm8, %v4186_v19  ;;  %v4744_v1 = vshrl.u32 %v4475_v44, 16  ;;  %v4747_v62 = vshll.u32 %v4475_v44, 16  ;;  %v12759_v19 = vld [vmem:[#allocation3 + $0x24] sm:$0xff]  ;;  %vm17701_vm8 = vmmov %vm17699_vm0 }
 0x2a7   : > { %4412 = vst [vmem:[#allocation3 + $0x80] sm:$0x1] %v4411_v33  ;;  %v4189_v7 = vshrl.u32 %v4006_v8, 16  ;;  %v4192_v16 = vshll.u32 %v4006_v8, 16 }
 0x2a8   : > { %v3926_v32 = vpop.f32.mrf.mxu0  ;;  %v4746_v56 = vrot.slane %v4744_v1, 4  ;;  %v4749_v23 = vrot.slane %v4747_v62, 5  ;;  %v4420_v62 = vld [vmem:[#allocation3 + $0x90] sm:$0xf] }
 0x2a9   : > { %v4191_v6 = vrot.slane %v4189_v7, 7  ;;  %v3927_v46 = vadd.f32 %v15007_v24, %v3926_v32  ;;  %v6903_v32 = vsel %vm6888_vm10, %v12759_v19, %v6399_v40  ;;  %v4427_v19 = vld [vmem:[#allocation3 + $0x9c] sm:$0xf] }
 0x2aa   : > { %v4750_v39 = vor.u32 %v4749_v23, %v4746_v56 }
 0x2ab   : > { %v4194_v31 = vor.u32 %v4192_v16, %v4191_v6  ;;  %v3975_v63 = vmax.f32 %v3927_v46, 0.0  ;;  %7503 = vmatmul.bf16.gmra.mxu1 %v6899_v52  ;;  %v4195_v34 = vrot.slane %v4191_v6, 4 }
 0x2ac   : > { %v4751_v37 = vrot.slane %v4750_v39, 4 }
 0x2ad   : > { %v4414_v28 = vsel %vm14588_vm13, %v4194_v31, %v4413_v30  ;;  %v4007_v24 = vpack.c.bf16 %v3975_v63, %v3975_v63  ;;  %v4476_v41 = vld [vmem:[#allocation3 + $0x7c] sm:$0xf] }
 0x2ae   : > { %4415 = vst [vmem:[#allocation3 + $0x84] sm:$0xf] %v4414_v28  ;;  %v4497_v9 = vld [vmem:[#allocation3 + $0x80] sm:$0x1]  ;;  %v4753_v61 = vshll.u32 %v4476_v41, 16  ;;  %v4757_v4 = vshrl.u32 %v4476_v41, 16 }
 0x2af   : > { %v4197_v14 = vshrl.u32 %v4007_v24, 16  ;;  %v4763_v47 = vshll.u32 %v4497_v9, 16  ;;  %v4200_v55 = vshll.u32 %v4007_v24, 16 }
 0x2b0   : > { %v3929_v5 = vpop.f32.mrf.mxu0  ;;  %v4755_v20 = vrot.slane %v4753_v61, 5  ;;  %v4759_v59 = vrot.slane %v4757_v4, 4  ;;  %v4424_v61 = vld [vmem:[#allocation3 + $0x98] sm:$0x1] }
 0x2b1   : > { %v4199_v10 = vrot.slane %v4197_v14, 7  ;;  %v3930_v53 = vadd.f32 %v15222_v17, %v3929_v5  ;;  %v4765_v21 = vrot.slane %v4763_v47, 5 }
 0x2b2   : > { %v4760_v12 = vor.u32 %v4759_v59, %v4755_v20  ;;  %v4756_v27 = vsel %vm13361_vm7, %v4751_v37, %v4755_v20 }
 0x2b3   : > { %v4202_v13 = vor.u32 %v4200_v55, %v4199_v10  ;;  %v4204_v2 = vrot.slane %v4199_v10, 4  ;;  %v3976_v45 = vmax.f32 %v3930_v53, 0.0  ;;  %v6364_v29 = vunpack.c.l.b16 %v4756_v27  ;;  %v15240_v10 = vld [vmem:[#allocation3 + $0x1c] sm:$0xf] }
 0x2b4   : > { %v4761_v18 = vrot.slane %v4760_v12, 4 }
 0x2b5   : > { %v4203_v58 = vsel %vm13427_vm12, %v4195_v34, %v4202_v13  ;;  %v4418_v11 = vsel %vm14643_vm9, %v4204_v2, %v4417_v51  ;;  %v4008_v49 = vpack.c.bf16 %v3976_v45, %v3976_v45  ;;  %v4477_v60 = vld [vmem:[#allocation3 + $0x84] sm:$0xf] }
 0x2b6   : > { %4416 = vst.msk [vmem:[#allocation3 + $0x88] sm:$0xf] %vm17698_vm11, %v4203_v58  ;;  %v4766_v42 = vsel %vm13361_vm7, %v4761_v18, %v4765_v21  ;;  %v4768_v36 = vshrl.u32 %v4477_v60, 16  ;;  %v4771_v25 = vshll.u32 %v4477_v60, 16  ;;  %v6170_v18 = vrot.slane %v15240_v10, 5  ;;  %vm17702_vm11 = vmmov %vm17699_vm0 }
 0x2b7   : > { %4419 = vst [vmem:[#allocation3 + $0x8c] sm:$0x1] %v4418_v11  ;;  %v4206_v22 = vshrl.u32 %v4008_v49, 16  ;;  %v6365_v57 = vunpack.c.l.b16 %v4766_v42  ;;  %v4209_v8 = vshll.u32 %v4008_v49, 16  ;;  %v6401_v49 = vpop.permute.xlu1 %6400 }
 0x2b8   : > { %v3931_v35 = vpop.f32.mrf.mxu0  ;;  %v4770_v7 = vrot.slane %v4768_v36, 4  ;;  %v4773_v50 = vrot.slane %v4771_v25, 5  ;;  %v12760_v25 = vld [vmem:[#allocation3 + $0x30] sm:$0xff] }
 0x2b9   : > { %v4208_v33 = vrot.slane %v4206_v22, 7  ;;  %v6386_v44 = vpack.c.b16 %v6365_v57, %v6364_v29  ;;  %v3932_v1 = vadd.f32 %v15222_v17, %v3931_v35  ;;  %v15253_v35 = vld [vmem:[#allocation3 + $0x20] sm:$0x1] }
 0x2ba   : > { %v4774_v23 = vor.u32 %v4773_v50, %v4770_v7 }
 0x2bb   : > { %v4211_v38 = vor.u32 %v4209_v8, %v4208_v33  ;;  %6412 = vrot.lane.b32.xlu1 %v6386_v44, %s13190_s23  ;;  %v3977_v6 = vmax.f32 %v3932_v1, 0.0  ;;  %7508 = vmatmul.bf16.gmra.mxu1 %v6903_v32  ;;  %v4212_v5 = vrot.slane %v4208_v33, 4  ;;  %v6172_v33 = vrot.slane %v6170_v18, 4 }
 0x2bc   : > { %v4775_v4 = vrot.slane %v4774_v23, 4  ;;  %v6907_v8 = vsel %vm6888_vm10, %v12760_v25, %v6401_v49 }
 0x2bd   : > { %v4421_v16 = vsel %vm14588_vm13, %v4211_v38, %v4420_v62  ;;  %v4009_v46 = vpack.c.bf16 %v3977_v6, %v3977_v6  ;;  %v4478_v30 = vld [vmem:[#allocation3 + $0x88] sm:$0xf]  ;;  %v6173_v62 = vrot.slane %v15253_v35, 5 }
 0x2be   : > { %4422 = vst [vmem:[#allocation3 + $0x90] sm:$0xf] %v4421_v16  ;;  %v4498_v56 = vld [vmem:[#allocation3 + $0x8c] sm:$0x1]  ;;  %v4777_v52 = vshll.u32 %v4478_v30, 16  ;;  %v4781_v31 = vshrl.u32 %v4478_v30, 16 }
 0x2bf   : > { %v4214_v63 = vshrl.u32 %v4009_v46, 16  ;;  %v4787_v28 = vshll.u32 %v4498_v56, 16  ;;  %v4217_v9 = vshll.u32 %v4009_v46, 16  ;;  %v6174_v30 = vsel %vm13306_vm4, %v6172_v33, %v6173_v62 }
 0x2c0   : > { %v4779_v0 = vrot.slane %v4777_v52, 5  ;;  %v4783_v43 = vrot.slane %v4781_v31, 4 }
 0x2c1   : > { %v4216_v41 = vrot.slane %v4214_v63, 7  ;;  %v4789_v51 = vrot.slane %v4787_v28, 5  ;;  %v15264_v28 = vld [vmem:[#allocation2 + $0xb8] sm:$0xf] }
 0x2c2   : > { %v4784_v14 = vor.u32 %v4783_v43, %v4779_v0  ;;  %v4780_v55 = vsel %vm13361_vm7, %v4775_v4, %v4779_v0 }
 0x2c3   : > { %v4219_v20 = vor.u32 %v4217_v9, %v4216_v41  ;;  %v4221_v59 = vrot.slane %v4216_v41, 4  ;;  %v6366_v21 = vunpack.c.l.b16 %v4780_v55  ;;  %v4431_v41 = vld [vmem:[#allocation3 + $0xa4] sm:$0x1] }
 0x2c4   : > { %v3934_v24 = vpop.f32.mrf.mxu0  ;;  %v4785_v53 = vrot.slane %v4784_v14, 4 }
 0x2c5   : > { %v3935_v39 = vadd.f32 %v15222_v17, %v3934_v24  ;;  %v4220_v37 = vsel %vm13427_vm12, %v4212_v5, %v4219_v20  ;;  %v4425_v12 = vsel %vm14643_vm9, %v4221_v59, %v4424_v61  ;;  %v4479_v13 = vld [vmem:[#allocation3 + $0x90] sm:$0xf]  ;;  %v15269_v20 = vld [vmem:[#allocation2 + $0xbc] sm:$0x1]  ;;  %v1407_v59 = vld [vmem:[#allocation2 + $0xb4] sm:$0xe] }
 0x2c6   : > { %4423 = vst.msk [vmem:[#allocation3 + $0x94] sm:$0xf] %vm17699_vm0, %v4220_v37  ;;  %v4790_v2 = vsel %vm13361_vm7, %v4785_v53, %v4789_v51  ;;  %v4792_v45 = vshrl.u32 %v4479_v13, 16  ;;  %v4795_v27 = vshll.u32 %v4479_v13, 16  ;;  %v11611_v55 = vrot.slane %v1407_v59, 9 }
 0x2c7   : > { %v3978_v47 = vmax.f32 %v3935_v39, 0.0  ;;  %4426 = vst [vmem:[#allocation3 + $0x98] sm:$0x1] %v4425_v12  ;;  %v6367_v58 = vunpack.c.l.b16 %v4790_v2  ;;  %v1566_v39 = vrot.slane %v15264_v28, 5  ;;  %v1569_v51 = vrot.slane %v15269_v20, 5 }
 0x2c8   : > { %v4794_v36 = vrot.slane %v4792_v45, 4  ;;  %v4797_v40 = vrot.slane %v4795_v27, 5  ;;  %v6104_v13 = vld [vmem:[#allocation3 + $0x18] sm:$0xe]  ;;  %v6403_v27 = vpop.permute.xlu2 %6402  ;;  %v5095_v59 = vld [vmem:[#allocation3 + $0x14] sm:$0x1] }
 0x2c9   : > { %v4010_v34 = vpack.c.bf16 %v3978_v47, %v3978_v47  ;;  %v6387_v22 = vpack.c.b16 %v6367_v58, %v6366_v21  ;;  %v1568_v53 = vrot.slane %v1566_v39, 4  ;;  %v1567_v21 = vsel %vm13306_vm4, %v11611_v55, %v1566_v39  ;;  %v12762_v39 = vld [vmem:[#allocation3 + $0x48] sm:$0xff] }
 0x2ca   : > { %v4798_v38 = vor.u32 %v4797_v40, %v4794_v36  ;;  %v2018_v40 = vld [vmem:[#allocation2 + $0xc0] sm:$0xe] }
 0x2cb   : > { %v4223_v11 = vshrl.u32 %v4010_v34, 16  ;;  %v4226_v60 = vshll.u32 %v4010_v34, 16  ;;  %6414 = vrot.lane.b32.xlu2 %v6387_v22, %s13190_s23  ;;  %7513 = vmatmul.bf16.gmra.mxu1 %v6907_v8  ;;  %v1570_v58 = vsel %vm13306_vm4, %v1568_v53, %v1569_v51  ;;  %v2962_v22 = vunpack.c.l.b16 %v1567_v21  ;;  %v5495_v53 = vld [vmem:[#allocation3 + $0xc] sm:$0xe]  ;;  %v5066_v51 = vld [vmem:[#allocation3 + $0x1c] sm:$0xf] }
 0x2cc   : > { %v3936_v42 = vpop.f32.mrf.mxu0  ;;  %v4799_v43 = vrot.slane %v4798_v38, 4  ;;  %v11627_v33 = vrot.slane %v2018_v40, 9  ;;  %v5097_v40 = vld [vmem:[#allocation3 + $0x2c] sm:$0x1] }
 0x2cd   : > { %v4225_v29 = vrot.slane %v4223_v11, 7  ;;  %v3937_v57 = vadd.f32 %v15222_v17, %v3936_v42  ;;  %v4480_v32 = vld [vmem:[#allocation3 + $0x94] sm:$0xf]  ;;  %v12761_v11 = vld [vmem:[#allocation3 + $0x3c] sm:$0xff]  ;;  %v11892_v42 = vrot.slane %v6104_v13, 9 }
 0x2ce   : > { %v4499_v6 = vld [vmem:[#allocation3 + $0x98] sm:$0x1]  ;;  %v4801_v16 = vshll.u32 %v4480_v32, 16  ;;  %v4805_v46 = vshrl.u32 %v4480_v32, 16  ;;  %v6911_v25 = vsel %vm6888_vm10, %v12761_v11, %v6403_v27  ;;  %v5568_v27 = vrot.slane %v5066_v51, 5 }
 0x2cf   : > { %v4228_v44 = vor.u32 %v4226_v60, %v4225_v29  ;;  %v3979_v1 = vmax.f32 %v3937_v57, 0.0  ;;  %v4811_v23 = vshll.u32 %v4499_v6, 16  ;;  %v4229_v24 = vrot.slane %v4225_v29, 4  ;;  %v15283_v60 = vld [vmem:[#allocation2 + $0xc4] sm:$0xf] }
 0x2d0   : > { %v4803_v52 = vrot.slane %v4801_v16, 5  ;;  %v4807_v31 = vrot.slane %v4805_v46, 4  ;;  %v2174_v36 = vrot.slane %v15283_v60, 5  ;;  %v2963_v29 = vunpack.c.l.b16 %v1570_v58  ;;  %v15288_v57 = vld [vmem:[#allocation2 + $0xc8] sm:$0x1] }
 0x2d1   : > { %v4428_v7 = vsel %vm14588_vm13, %v4228_v44, %v4427_v19  ;;  %v4011_v50 = vpack.c.bf16 %v3979_v1, %v3979_v1  ;;  %v4813_v5 = vrot.slane %v4811_v23, 5  ;;  %v6171_v19 = vsel %vm13306_vm4, %v11892_v42, %v6170_v18  ;;  %v15301_v6 = vld [vmem:[#allocation2 + $0xd0] sm:$0xf]  ;;  %v5096_v42 = vld [vmem:[#allocation3 + $0x20] sm:$0x1] }
 0x2d2   : > { %4429 = vst [vmem:[#allocation3 + $0x9c] sm:$0xf] %v4428_v7  ;;  %v4808_v9 = vor.u32 %v4807_v31, %v4803_v52  ;;  %v4804_v14 = vsel %vm13361_vm7, %v4799_v43, %v4803_v52  ;;  %v2176_v8 = vrot.slane %v2174_v36, 4  ;;  %v2177_v44 = vrot.slane %v15288_v57, 5  ;;  %v6405_v43 = vpop.permute.xlu0 %6404 }
 0x2d3   : > { %v4231_v56 = vshrl.u32 %v4011_v50, 16  ;;  %v4234_v0 = vshll.u32 %v4011_v50, 16  ;;  %v6368_v2 = vunpack.c.l.b16 %v4804_v14  ;;  %v6841_v1 = vunpack.c.l.b16 %v6174_v30  ;;  %v2627_v30 = vld [vmem:[#allocation2 + $0xcc] sm:$0xe] }
 0x2d4   : > { %v4809_v47 = vrot.slane %v4808_v9, 4  ;;  %v6840_v62 = vunpack.c.l.b16 %v6171_v19  ;;  %v2979_v7 = vpack.c.b16 %v2963_v29, %v2962_v22  ;;  %v2175_v50 = vsel %vm13306_vm4, %v11627_v33, %v2174_v36  ;;  %v5496_v22 = vld [vmem:[#allocation3 + $0x18] sm:$0xe] }
 0x2d5   : > { %v4233_v63 = vrot.slane %v4231_v56, 7  ;;  %v2178_v32 = vsel %vm13306_vm4, %v2176_v8, %v2177_v44  ;;  %v2783_v18 = vrot.slane %v15301_v6, 5  ;;  %v3218_v16 = vunpack.c.l.b16 %v2175_v50  ;;  %v15305_v56 = vld [vmem:[#allocation2 + $0xd4] sm:$0x1]  ;;  %v12763_v19 = vld [vmem:[#allocation3 + $0x54] sm:$0xff] }
 0x2d6   : > { %v4814_v34 = vsel %vm13361_vm7, %v4809_v47, %v4813_v5  ;;  %v15299_v38 = vpack.c.b16 %v6841_v1, %v6840_v62  ;;  %v3219_v46 = vunpack.c.l.b16 %v2178_v32  ;;  %v11643_v23 = vrot.slane %v2627_v30, 9  ;;  %v5497_v62 = vld [vmem:[#allocation3 + $0x24] sm:$0xe] }
 0x2d7   : > { %v4236_v61 = vor.u32 %v4234_v0, %v4233_v63  ;;  %v4238_v4 = vrot.slane %v4233_v63, 4  ;;  %v6369_v45 = vunpack.c.l.b16 %v4814_v34  ;;  %v2785_v52 = vrot.slane %v2783_v18, 4  ;;  %v5064_v0 = vld [vmem:[#allocation3 + $0x10] sm:$0xf] }
 0x2d8   : > { %v2786_v31 = vrot.slane %v15305_v56, 5  ;;  %v3235_v63 = vpack.c.b16 %v3219_v46, %v3218_v16  ;;  %v5570_v29 = vrot.slane %v5568_v27, 4  ;;  %v5571_v1 = vrot.slane %v5096_v42, 5 }
 0x2d9   : > { %v4237_v37 = vsel %vm13427_vm12, %v4229_v24, %v4236_v61  ;;  %v4432_v12 = vsel %vm14643_vm9, %v4238_v4, %v4431_v41  ;;  %v6388_v49 = vpack.c.b16 %v6369_v45, %v6368_v2  ;;  %v12833_v24 = vld [vmem:[%s17642_s3 + $0xe8] sm:$0xff]  ;;  %v2784_v41 = vsel %vm13306_vm4, %v11643_v23, %v2783_v18 }
 0x2da   : > { %4430 = vst.msk [vmem:[#allocation3 + $0xa0] sm:$0xf] %vm17700_vm14, %v4237_v37  ;;  %v2787_v9 = vsel %vm13306_vm4, %v2785_v52, %v2786_v31  ;;  %7754 = vmatpush.bf16.msrb.mxu0 %v12833_v24  ;;  %v5561_v61 = vrot.slane %v5064_v0, 5  ;;  %v6915_v4 = vsel %vm6888_vm10, %v12762_v39, %v6405_v43  ;;  %v3474_v14 = vunpack.c.l.b16 %v2784_v41  ;;  %v5070_v31 = vld [vmem:[#allocation3 + $0x34] sm:$0xf]  ;;  %v12838_v43 = vld [vmem:[%s17642_s3 + $0x110] sm:$0xff] }
 0x2db   : > { %4433 = vst [vmem:[#allocation3 + $0xa4] sm:$0x1] %v4432_v12  ;;  %6416 = vrot.lane.b32.xlu1 %v6388_v49, %s13190_s23  ;;  %7518 = vmatmul.bf16.gmra.mxu1 %v6911_v25  ;;  %v3475_v5 = vunpack.c.l.b16 %v2787_v9  ;;  %v5564_v37 = vrot.slane %v5095_v59, 5  ;;  %v5068_v12 = vld [vmem:[#allocation3 + $0x28] sm:$0xf]  ;;  %v11876_v2 = vrot.slane %v5495_v53, 9  ;;  %v6407_v25 = vpop.permute.xlu1 %6406  ;;  %v5572_v52 = vsel %vm13306_vm4, %v5570_v29, %v5571_v1 }
 0x2dc   : > { %v5563_v47 = vrot.slane %v5561_v61, 4  ;;  %v5575_v21 = vrot.slane %v5068_v12, 5  ;;  %v6919_v50 = vsel %vm6888_vm10, %v12763_v19, %v6407_v25  ;;  %v11877_v18 = vrot.slane %v5496_v22, 9  ;;  %v4434_v0 = vld [vmem:[#allocation3 + $0xa8] sm:$0xf]  ;;  %7846 = vmatpush.bf16.msrb.mxu1 %v12838_v43 }
 0x2dd   : > { %v3491_v55 = vpack.c.b16 %v3475_v5, %v3474_v14  ;;  %v5562_v11 = vsel %vm13306_vm4, %v11876_v2, %v5561_v61  ;;  %v5578_v16 = vrot.slane %v5097_v40, 5  ;;  %v12832_v24 = vld [vmem:[%s17642_s3 + $0xe0] sm:$0xff]  ;;  %v11878_v41 = vrot.slane %v5497_v62, 9  ;;  %v5498_v59 = vld [vmem:[#allocation3 + $0x30] sm:$0xe] }
 0x2de   : > { %v5565_v45 = vsel %vm13306_vm4, %v5563_v47, %v5564_v37  ;;  %v6616_v33 = vunpack.c.l.b16 %v5562_v11  ;;  %v5577_v8 = vrot.slane %v5575_v21, 4  ;;  %7755 = vmatpush.bf16.msrb.mxu0 %v12832_v24  ;;  %v6619_v14 = vunpack.c.l.b16 %v5572_v52  ;;  %v5098_v12 = vld [vmem:[#allocation3 + $0x38] sm:$0x1]  ;;  %v987_v29 = vld [vmem:[#allocation2 + $0xb4] sm:$0xf] }
 0x2df   : > { %v6617_v49 = vunpack.c.l.b16 %v5565_v45  ;;  %v5576_v5 = vsel %vm13306_vm4, %v11878_v41, %v5575_v21  ;;  %v5582_v47 = vrot.slane %v5070_v31, 5  ;;  %v11879_v45 = vrot.slane %v5498_v59, 9  ;;  %v5499_v21 = vld [vmem:[#allocation3 + $0x3c] sm:$0xe]  ;;  %v5074_v19 = vld [vmem:[#allocation3 + $0x4c] sm:$0xf] }
 0x2e0   : > { %v5579_v9 = vsel %vm13306_vm4, %v5577_v8, %v5578_v16  ;;  %v6620_v2 = vunpack.c.l.b16 %v5576_v5  ;;  %v4438_v8 = vld [vmem:[#allocation3 + $0xb0] sm:$0x1]  ;;  %v1382_v1 = vshrl.u32 %v15264_v28, 16  ;;  %v1372_v16 = vshll.u32 %v987_v29, 16  ;;  %v5500_v43 = vld [vmem:[#allocation3 + $0x48] sm:$0xe] }
 0x2e1   : > { %v6648_v32 = vpack.c.b16 %v6617_v49, %v6616_v33  ;;  %v6621_v37 = vunpack.c.l.b16 %v5579_v9  ;;  %v5584_v11 = vrot.slane %v5582_v47, 4  ;;  %v5585_v49 = vrot.slane %v5098_v12, 5 }
 0x2e2   : > { %v5583_v40 = vsel %vm13306_vm4, %v11879_v45, %v5582_v47  ;;  %v5596_v24 = vrot.slane %v5074_v19, 5  ;;  %v1374_v5 = vrot.slane %v1372_v16, 5  ;;  %v1384_v47 = vrot.slane %v1382_v1, 4 }
 0x2e3   : > { %3010 = vrot.lane.b32.xlu1 %v2979_v7, %s13182_s21  ;;  %v6650_v22 = vpack.c.b16 %v6621_v37, %v6620_v2  ;;  %v6622_v52 = vunpack.c.l.b16 %v5583_v40  ;;  %v1388_v19 = vshll.u32 %v15269_v20, 16  ;;  %vm8769_vm14 = vcmask 1045509  }
 0x2eb   : > { %3266 = vrot.lane.b32.xlu1 %v3235_v63, %s13186_s14  ;;  %7523 = vmatmul.bf16.gmra.mxu1 %v6915_v4  ;;  %v15327_v63 = vld [vmem:[#allocation3 + $0x40] sm:$0xf]  ;;  %v5569_v4 = vsel %vm13306_vm4, %v11877_v18, %v5568_v27  ;;  %v5099_v27 = vld [vmem:[#allocation3 + $0x44] sm:$0x1]  ;;  %v1369_v18 = vshrl.u32 %v987_v29, 16 }
 0x2ec   : > { %v5592_v62 = vrot.slane %v5099_v27, 5  ;;  %v12737_v27 = vld [vmem:[#allocation2 + $0xc0] sm:$0xff] }
 0x2ed   : > { %3106 = vrot.lane.b32.xlu2 %v12737_v27, %s13184_s28 }
 0x2f0   : > { %v3939_v34 = vpop.f32.mrf.mxu0 }
 0x2f1   : > { %v3940_v13 = vadd.f32 %v15222_v17, %v3939_v34  ;;  %v6618_v34 = vunpack.c.l.b16 %v5569_v4  ;;  %v6409_v4 = vpop.permute.xlu2 %6408 }
 0x2f3   : > { %3522 = vrot.lane.b32.xlu1 %v3491_v55, %s13187_s16  ;;  %v3980_v58 = vmax.f32 %v3940_v13, 0.0  ;;  %v5589_v55 = vrot.slane %v15327_v63, 5 }
 0x2f5   : > { %v4012_v36 = vpack.c.bf16 %v3980_v58, %v3980_v58  ;;  %v6649_v58 = vpack.c.b16 %v6619_v14, %v6618_v34  ;;  %v5591_v42 = vrot.slane %v5589_v55, 4  ;;  %v1371_v14 = vrot.slane %v1369_v18, 4  ;;  %v5100_v34 = vld [vmem:[#allocation3 + $0x50] sm:$0x1] }
 0x2f7   : > { %v4240_v44 = vshrl.u32 %v4012_v36, 16  ;;  %v4243_v30 = vshll.u32 %v4012_v36, 16  ;;  %v1375_v29 = vor.u32 %v1374_v5, %v1371_v14 }
 0x2f8   : > { %v3941_v7 = vpop.f32.mrf.mxu0 }
 0x2f9   : > { %v4242_v46 = vrot.slane %v4240_v44, 7  ;;  %v3942_v23 = vadd.f32 %v15222_v17, %v3941_v7  ;;  %v1378_v44 = vshll.u32 %v15264_v28, 16 }
 0x2fb   : > { %6664 = vrot.lane.b32.xlu1 %v6648_v32, %s13190_s23  ;;  %v4245_v39 = vor.u32 %v4243_v30, %v4242_v46  ;;  %v3981_v61 = vmax.f32 %v3942_v23, 0.0  ;;  %7528 = vmatmul.bf16.gmra.mxu1 %v6919_v50  ;;  %v4246_v33 = vrot.slane %v4242_v46, 4  ;;  %v5586_v23 = vsel %vm13306_vm4, %v5584_v11, %v5585_v49 }
 0x2fc   : > { %v11880_v46 = vrot.slane %v5499_v21, 9  ;;  %v15362_v59 = vrot.slane %v1378_v44, 5  ;;  %v6623_v37 = vunpack.c.l.b16 %v5586_v23  ;;  %v5598_v11 = vrot.slane %v5596_v24, 4 }
 0x2fd   : > { %v4435_v53 = vsel %vm14588_vm13, %v4245_v39, %v4434_v0  ;;  %v4013_v51 = vpack.c.bf16 %v3981_v61, %v3981_v61  ;;  %v5593_v0 = vsel %vm13306_vm4, %v5591_v42, %v5592_v62  ;;  %v1601_v42 = vld [vmem:[#allocation2 + $0xc0] sm:$0xf]  ;;  %v4441_v62 = vld [vmem:[#allocation3 + $0xb4] sm:$0xf] }
 0x2fe   : > { %4436 = vst [vmem:[#allocation3 + $0xa8] sm:$0xf] %v4435_v53  ;;  %v5590_v61 = vsel %vm13306_vm4, %v11880_v46, %v5589_v55  ;;  %v6625_v12 = vunpack.c.l.b16 %v5593_v0  ;;  %v1385_v40 = vor.u32 %v1384_v47, %v15362_v59  ;;  %v6651_v1 = vpack.c.b16 %v6623_v37, %v6622_v52  ;;  %v15381_v0 = vld [vmem:[#allocation3 + $0x58] sm:$0xf] }
 0x2ff   : > { %v4248_v13 = vshrl.u32 %v4013_v51, 16  ;;  %v4251_v25 = vshll.u32 %v4013_v51, 16  ;;  %v12764_v51 = vld [vmem:[#allocation3 + $0x60] sm:$0xff]  ;;  %v1993_v47 = vshrl.u32 %v15283_v60, 16 }
 0x300   : > { %v6923_v21 = vsel %vm6888_vm10, %v12764_v51, %v6409_v4  ;;  %v1386_v52 = vrot.slane %v1385_v40, 4 }
 0x301   : > { %v4250_v36 = vrot.slane %v4248_v13, 7  ;;  %v11881_v13 = vrot.slane %v5500_v43, 9 }
 0x303   : > { %6666 = vrot.lane.b32.xlu1 %v6649_v58, %s13190_s23  ;;  %v4253_v7 = vor.u32 %v4251_v25, %v4250_v36  ;;  %v4255_v50 = vrot.slane %v4250_v36, 4  ;;  %v3944_v32 = vpop.f32.mrf.mxu0  ;;  %v6624_v58 = vunpack.c.l.b16 %v5590_v61  ;;  %v15368_v36 = vsel %vm13306_vm4, %v11881_v13, %v5596_v24 }
 0x304   : > { %v3945_v30 = vadd.f32 %v15222_v17, %v3944_v32  ;;  %v1980_v32 = vshrl.u32 %v1601_v42, 16  ;;  %v6626_v16 = vunpack.c.l.b16 %v15368_v36  ;;  %v1989_v61 = vshll.u32 %v15283_v60, 16 }
 0x305   : > { %v4254_v31 = vsel %vm13427_vm12, %v4246_v33, %v4253_v7  ;;  %v4439_v63 = vsel %vm14643_vm9, %v4255_v50, %v4438_v8  ;;  %v4483_v28 = vld [vmem:[#allocation3 + $0xa8] sm:$0xf]  ;;  %v5599_v33 = vrot.slane %v5100_v34, 5  ;;  %v2608_v36 = vshll.u32 %v15305_v56, 16 }
 0x306   : > { %4437 = vst.msk [vmem:[#allocation3 + $0xac] sm:$0xf] %vm17701_vm8, %v4254_v31  ;;  %v3982_v41 = vmax.f32 %v3945_v30, 0.0  ;;  %v4840_v9 = vshrl.u32 %v4483_v28, 16  ;;  %v4843_v39 = vshll.u32 %v4483_v28, 16  ;;  %v1983_v31 = vshll.u32 %v1601_v42, 16 }
 0x307   : > { %4440 = vst [vmem:[#allocation3 + $0xb0] sm:$0x1] %v4439_v63  ;;  %v15378_v18 = vsel %vm13306_vm4, %v5598_v11, %v5599_v33  ;;  %v1390_v28 = vrot.slane %v1388_v19, 5  ;;  %v1982_v51 = vrot.slane %v1980_v32, 4  ;;  %v15397_v11 = vrot.slane %v1989_v61, 5 }
 0x308   : > { %v4014_v53 = vpack.c.bf16 %v3982_v41, %v3982_v41  ;;  %v4842_v2 = vrot.slane %v4840_v9, 4  ;;  %v4845_v45 = vrot.slane %v4843_v39, 5  ;;  %v6411_v9 = vpop.permute.xlu0 %6410  ;;  %v12765_v39 = vld [vmem:[#allocation3 + $0x6c] sm:$0xff]  ;;  %v1985_v37 = vrot.slane %v1983_v31, 5  ;;  %v5101_v32 = vld [vmem:[#allocation3 + $0x5c] sm:$0x1] }
 0x309   : > { %vm8771_vm8 = vcmask 1046534  }
 0x30a   : > { %v4257_v49 = vshrl.u32 %v4014_v53, 16  ;;  %v4260_v55 = vshll.u32 %v4014_v53, 16  ;;  %v4846_v50 = vor.u32 %v4845_v45, %v4842_v2  ;;  %v1391_v2 = vsel %vm13361_vm7, %v1386_v52, %v1390_v28  ;;  %v12831_v28 = vld [vmem:[%s17642_s3 + $0xd8] sm:$0xff] }
 0x30b   : > { %6668 = vrot.lane.b32.xlu1 %v6650_v22, %s13190_s23  ;;  %7533 = vmatmul.bf16.gmra.mxu1 %v6923_v21  ;;  %v3946_v25 = vpop.f32.mrf.mxu0  ;;  %v15374_v22 = vpack.c.b16 %v6625_v12, %v6624_v58  ;;  %v5603_v12 = vrot.slane %v15381_v0, 5  ;;  %v6927_v45 = vsel %vm6888_vm10, %v12765_v39, %v6411_v9  ;;  %v4445_v21 = vld [vmem:[#allocation3 + $0xbc] sm:$0x1]  ;;  %v2883_v39 = vunpack.c.l.b16 %v1391_v2 }
 0x30c   : > { %v4259_v8 = vrot.slane %v4257_v49, 7  ;;  %v3947_v44 = vadd.f32 %v15222_v17, %v3946_v25  ;;  %v1376_v17 = vrot.slane %v1375_v29, 4  ;;  %v4847_v4 = vrot.slane %v4846_v50, 4  ;;  %v2210_v49 = vld [vmem:[#allocation2 + $0xcc] sm:$0xf]  ;;  %7756 = vmatpush.bf16.msrb.mxu0 %v12831_v28 }
 0x30d   : > { %v4484_v7 = vld [vmem:[#allocation3 + $0xac] sm:$0xf]  ;;  %v1995_v29 = vrot.slane %v1993_v47, 4  ;;  %v2592_v50 = vshll.u32 %v2210_v49, 16 }
 0x30e   : > { %v4262_v20 = vor.u32 %v4260_v55, %v4259_v8  ;;  %v3983_v30 = vmax.f32 %v3947_v44, 0.0  ;;  %v4501_v23 = vld [vmem:[#allocation3 + $0xb0] sm:$0x1]  ;;  %v4849_v46 = vshll.u32 %v4484_v7, 16  ;;  %v4853_v63 = vshrl.u32 %v4484_v7, 16 }
 0x30f   : > { %v4859_v5 = vshll.u32 %v4501_v23, 16  ;;  %v1381_v60 = vsel %vm13361_vm7, %v1376_v17, %v15362_v59  ;;  %v4263_v55 = vrot.slane %v4259_v8, 4  ;;  %v1986_v44 = vor.u32 %v1985_v37, %v1982_v51 }
 0x310   : > { %v4442_v43 = vsel %vm14588_vm13, %v4262_v20, %v4441_v62  ;;  %v4015_v24 = vpack.c.bf16 %v3983_v30, %v3983_v30  ;;  %v4851_v41 = vrot.slane %v4849_v46, 5  ;;  %v4855_v14 = vrot.slane %v4853_v63, 4 }
 0x311   : > { %4443 = vst [vmem:[#allocation3 + $0xb4] sm:$0xf] %v4442_v43  ;;  %v4861_v25 = vrot.slane %v4859_v5, 5  ;;  %v2589_v7 = vshrl.u32 %v2210_v49, 16  ;;  %v2598_v59 = vshll.u32 %v15301_v6, 16  ;;  %v2602_v46 = vshrl.u32 %v15301_v6, 16 }
 0x312   : > { %v4265_v53 = vshrl.u32 %v4015_v24, 16  ;;  %v4852_v34 = vsel %vm13361_vm7, %v4847_v4, %v4851_v41  ;;  %v4856_v13 = vor.u32 %v4855_v14, %v4851_v41  ;;  %v4268_v58 = vshll.u32 %v4015_v24, 16  ;;  %v15418_v4 = vld [vmem:[#allocation3 + $0x64] sm:$0xf]  ;;  %v15420_v14 = vld [vmem:[#allocation3 + $0x18] sm:$0xf] }
 0x313   : > { %6670 = vrot.lane.b32.xlu1 %v6651_v1, %s13190_s23  ;;  %v6372_v33 = vunpack.c.l.b16 %v4852_v34  ;;  %v5501_v1 = vld [vmem:[#allocation3 + $0x54] sm:$0xe]  ;;  %v1996_v31 = vor.u32 %v1995_v29, %v15397_v11  ;;  %v1999_v63 = vshll.u32 %v15288_v57, 16  ;;  %v6627_v24 = vunpack.c.l.b16 %v15378_v18 }
 0x314   : > { %v4267_v27 = vrot.slane %v4265_v53, 7  ;;  %v4857_v42 = vrot.slane %v4856_v13, 4  ;;  %v11882_v6 = vrot.slane %v5501_v1, 9  ;;  %v5606_v41 = vrot.slane %v5101_v32, 5  ;;  %v15425_v13 = vpop.f32.mrf.mxu1 }
 0x315   : > { %v2882_v9 = vunpack.c.l.b16 %v1381_v60  ;;  %v1987_v61 = vrot.slane %v1986_v44, 4  ;;  %v5605_v57 = vrot.slane %v5603_v12, 4  ;;  %v2591_v5 = vrot.slane %v2589_v7, 4 }
 0x316   : > { %v4270_v40 = vor.u32 %v4268_v58, %v4267_v27  ;;  %v4272_v19 = vrot.slane %v4267_v27, 4  ;;  %v4862_v62 = vsel %vm13361_vm7, %v4857_v42, %v4861_v25  ;;  %v15423_v47 = vrot.slane %v2598_v59, 5 }
 0x317   : > { %v6373_v30 = vunpack.c.l.b16 %v4862_v62  ;;  %v2604_v18 = vrot.slane %v2602_v46, 4  ;;  %v1997_v53 = vrot.slane %v1996_v31, 4  ;;  %v2001_v51 = vrot.slane %v1999_v63, 5  ;;  %v4482_v62 = vld [vmem:[#allocation3 + $0xa0] sm:$0xf] }
 0x318   : > { %v4271_v8 = vsel %vm13427_vm12, %v4263_v55, %v4270_v40  ;;  %v4446_v20 = vsel %vm14643_vm9, %v4272_v19, %v4445_v21  ;;  %v4485_v23 = vld [vmem:[#allocation3 + $0xb4] sm:$0xf]  ;;  %v5610_v2 = vrot.slane %v15418_v4, 5  ;;  %v5724_v27 = vshll.u32 %v15420_v14, 16  ;;  %v5102_v21 = vld [vmem:[#allocation3 + $0x68] sm:$0x1] }
 0x319   : > { %4444 = vst.msk [vmem:[#allocation3 + $0xb8] sm:$0xf] %vm17702_vm11, %v4271_v8  ;;  %v4864_v17 = vshrl.u32 %v4485_v23, 16  ;;  %v4867_v52 = vshll.u32 %v4485_v23, 16  ;;  %v6390_v43 = vpack.c.b16 %v6373_v30, %v6372_v33  ;;  %v2899_v58 = vpack.c.b16 %v2883_v39, %v2882_v9  ;;  %v5502_v8 = vld [vmem:[#allocation3 + $0x60] sm:$0xe] }
 0x31a   : > { %4447 = vst [vmem:[#allocation3 + $0xbc] sm:$0x1] %v4446_v20  ;;  %v6653_v60 = vpack.c.b16 %v6627_v24, %v6626_v16  ;;  %v5604_v49 = vsel %vm13306_vm4, %v11882_v6, %v5603_v12  ;;  %v5607_v55 = vsel %vm13306_vm4, %v5605_v57, %v5606_v41  ;;  %v1992_v42 = vsel %vm13361_vm7, %v1987_v61, %v15397_v11  ;;  %v15449_v31 = vld [vmem:[#allocation3 + $0x70] sm:$0xf] }
 0x31b   : > { %6672 = vrot.lane.b32.xlu1 %v15374_v22, %s13190_s23  ;;  %7538 = vmatmul.bf16.gmra.mxu1 %v6927_v45  ;;  %v2594_v22 = vrot.slane %v2592_v50, 5  ;;  %v4866_v37 = vrot.slane %v4864_v17, 4  ;;  %v4869_v34 = vrot.slane %v4867_v52, 5  ;;  %v5721_v45 = vshrl.u32 %v15420_v14, 16  ;;  %v4481_v52 = vld [vmem:[#allocation3 + $0x9c] sm:$0xf] }
 0x31c   : > { %6420 = vrot.lane.b32.xlu0 %v6390_v43, %s13190_s23  ;;  %v2605_v40 = vor.u32 %v2604_v18, %v15423_v47  ;;  %v2002_v16 = vsel %vm13361_vm7, %v1997_v53, %v2001_v51  ;;  %v6628_v44 = vunpack.c.l.b16 %v5604_v49  ;;  %v6629_v1 = vunpack.c.l.b16 %v5607_v55  ;;  %v12837_v49 = vld [vmem:[%s17642_s3 + $0x108] sm:$0xff] }
 0x31d   : > { %v2595_v29 = vor.u32 %v2594_v22, %v2591_v5  ;;  %v4870_v19 = vor.u32 %v4869_v34, %v4866_v37  ;;  %v5612_v11 = vrot.slane %v5610_v2, 4  ;;  %v5613_v7 = vrot.slane %v5102_v21, 5  ;;  %v15457_v5 = vpop.f32.mrf.mxu1  ;;  %7847 = vmatpush.bf16.msrb.mxu1 %v12837_v49 }
 0x31e   : > { %v3138_v50 = vunpack.c.l.b16 %v1992_v42  ;;  %v3139_v20 = vunpack.c.l.b16 %v2002_v16  ;;  %v2606_v23 = vrot.slane %v2605_v40, 4  ;;  %v2610_v46 = vrot.slane %v2608_v36, 5  ;;  %v5674_v16 = vld [vmem:[#allocation3 + $0x24] sm:$0xf] }
 0x31f   : > { %v2596_v30 = vrot.slane %v2595_v29, 4  ;;  %v4871_v63 = vrot.slane %v4870_v19, 4  ;;  %v4825_v28 = vshll.u32 %v4482_v62, 16  ;;  %v4829_v43 = vshrl.u32 %v4482_v62, 16 }
 0x320   : > { %v4486_v25 = vld [vmem:[#allocation3 + $0xb8] sm:$0xf]  ;;  %v6654_v24 = vpack.c.b16 %v6629_v1, %v6628_v44  ;;  %v11883_v6 = vrot.slane %v5502_v8, 9  ;;  %v5614_v41 = vsel %vm13306_vm4, %v5612_v11, %v5613_v7  ;;  %v5730_v9 = vshll.u32 %v15240_v10, 16  ;;  %v4500_v44 = vld [vmem:[#allocation3 + $0xa4] sm:$0x1] }
 0x321   : > { %v4502_v0 = vld [vmem:[#allocation3 + $0xbc] sm:$0x1]  ;;  %v4873_v12 = vshll.u32 %v4486_v25, 16  ;;  %v4877_v33 = vshrl.u32 %v4486_v25, 16  ;;  %v5617_v14 = vrot.slane %v15449_v31, 5  ;;  %v3155_v22 = vpack.c.b16 %v3139_v20, %v3138_v50 }
 0x322   : > { %v4883_v56 = vshll.u32 %v4502_v0, 16  ;;  %v2601_v18 = vsel %vm13361_vm7, %v2596_v30, %v15423_v47  ;;  %v4816_v53 = vshrl.u32 %v4481_v52, 16  ;;  %v4819_v51 = vshll.u32 %v4481_v52, 16  ;;  %v12766_v25 = vld [vmem:[#allocation3 + $0x78] sm:$0xff]  ;;  %v5503_v11 = vld [vmem:[#allocation3 + $0x6c] sm:$0xe] }
 0x323   : > { %6674 = vrot.lane.b32.xlu1 %v6653_v60, %s13190_s23  ;;  %v4875_v59 = vrot.slane %v4873_v12, 5  ;;  %v4879_v32 = vrot.slane %v4877_v33, 4  ;;  %v2611_v34 = vsel %vm13361_vm7, %v2606_v23, %v2610_v46  ;;  %v4831_v60 = vrot.slane %v4829_v43, 4 }
 0x324   : > { %2930 = vrot.lane.b32.xlu0 %v2899_v58, %s13183_s27  ;;  %v4885_v57 = vrot.slane %v4883_v56, 5  ;;  %v15466_v58 = vrot.slane %v4825_v28, 5  ;;  %v5723_v47 = vrot.slane %v5721_v45, 4  ;;  %v5726_v42 = vrot.slane %v5724_v27, 5  ;;  %v5103_v45 = vld [vmem:[#allocation3 + $0x74] sm:$0x1] }
 0x325   : > { %v4880_v17 = vor.u32 %v4879_v32, %v4875_v59  ;;  %v4876_v39 = vsel %vm13361_vm7, %v4871_v63, %v4875_v59  ;;  %v5611_v29 = vsel %vm13306_vm4, %v11883_v6, %v5610_v2  ;;  %v6631_v40 = vunpack.c.l.b16 %v5614_v41  ;;  %v15484_v32 = vld [vmem:[#allocation3 + $0x7c] sm:$0xf]  ;;  %v5675_v63 = vld [vmem:[#allocation3 + $0x28] sm:$0xf]  ;;  %v15489_v6 = vpop.f32.mrf.mxu1  ;;  %s11593_s27 = sshll.u32 %s323_s26, 6 }
 0x326   : > { %v6374_v55 = vunpack.c.l.b16 %v4876_v39  ;;  %v5734_v36 = vshrl.u32 %v15240_v10, 16  ;;  %v3394_v19 = vunpack.c.l.b16 %v2601_v18  ;;  %v3395_v12 = vunpack.c.l.b16 %v2611_v34  ;;  %v5104_v34 = vld [vmem:[#allocation3 + $0x80] sm:$0x1]  ;;  %s17587_s25 = scalar_lea.vmem [#allocation6], %s11593_s27 }
 0x327   : > { %v4881_v61 = vrot.slane %v4880_v17, 4  ;;  %v5619_v27 = vrot.slane %v5617_v14, 4  ;;  %v4818_v4 = vrot.slane %v4816_v53, 4  ;;  %v4821_v62 = vrot.slane %v4819_v51, 5  ;;  %s11524_s29 = sshll.u32 %s17587_s25, 4  ;;  %s11525_s29 = int_to_ptr.vmem [resolvable:$true] %s11524_s29 }
 0x328   : > { %v4832_v2 = vor.u32 %v4831_v60, %v15466_v58  ;;  %v6630_v10 = vunpack.c.l.b16 %v5611_v29  ;;  %v5727_v7 = vor.u32 %v5726_v42, %v5723_v47  ;;  %v15481_v50 = vrot.slane %v5730_v9, 5  ;;  %v5676_v47 = vld [vmem:[#allocation3 + $0x30] sm:$0xf]  ;;  %v5504_v42 = vld [vmem:[#allocation3 + $0x78] sm:$0xe] }
 0x329   : > { %v4886_v37 = vsel %vm13361_vm7, %v4881_v61, %v4885_v57  ;;  %v5740_v59 = vshll.u32 %v15253_v35, 16  ;;  %v4835_v56 = vshll.u32 %v4500_v44, 16  ;;  %v5736_v8 = vrot.slane %v5734_v36, 4  ;;  %v12753_v35 = vld [vmem:[#allocation2 + $0xcc] sm:$0xff] }
 0x32a   : > { %v6375_v21 = vunpack.c.l.b16 %v4886_v37  ;;  %v5620_v20 = vrot.slane %v5103_v45, 5  ;;  %v5745_v30 = vshrl.u32 %v5674_v16, 16  ;;  %v3411_v23 = vpack.c.b16 %v3395_v12, %v3394_v19 }
 0x32b   : > { %6676 = vrot.lane.b32.xlu1 %v6654_v24, %s13190_s23  ;;  %v6655_v46 = vpack.c.b16 %v6631_v40, %v6630_v10  ;;  %v11884_v31 = vrot.slane %v5503_v11, 9  ;;  %v5748_v17 = vshll.u32 %v5674_v16, 16  ;;  %v4822_v52 = vor.u32 %v4821_v62, %v4818_v4  ;;  %v15501_v40 = vld [vmem:[#allocation3 + $0x88] sm:$0xf]  ;;  %v6415_v11 = vpop.permute.xlu2 %6414  ;;  %v12772_v10 = vld [vmem:[#allocation3 + $0xc] sm:$0xff] }
 0x32c   : > { %3186 = vrot.lane.b32.xlu0 %v3155_v22, %s13189_s22  ;;  %v6391_v0 = vpack.c.b16 %v6375_v21, %v6374_v55  ;;  %v4833_v28 = vrot.slane %v4832_v2, 4  ;;  %v5621_v43 = vsel %vm13306_vm4, %v5619_v27, %v5620_v20  ;;  %v5624_v24 = vrot.slane %v15484_v32, 5  ;;  %v5677_v22 = vld [vmem:[#allocation3 + $0x34] sm:$0xf]  ;;  %s17703_s22 = smov 24   ;;  %v12767_v20 = vld [vmem:[#allocation3 + $0x84] sm:$0xff] }
 0x32d   : > { %v6413_v33 = vpop.permute.xlu1 %6412  ;;  %v15492_v41 = vrot.slane %v5727_v7, 4  ;;  %v4837_v9 = vrot.slane %v4835_v56, 5  ;;  %v5618_v39 = vsel %vm13306_vm4, %v11884_v31, %v5617_v14  ;;  %v5754_v61 = vshll.u32 %v5675_v63, 16  ;;  %v5705_v27 = vld [vmem:[#allocation3 + $0x2c] sm:$0x1] }
 0x32e   : > { %v6931_v1 = vsel %vm6888_vm10, %v12766_v25, %v6413_v33  ;;  %6422 = vrot.lane.b32.xlu2 %v6391_v0, %s13190_s23  ;;  %v5758_v57 = vshrl.u32 %v5675_v63, 16  ;;  %v5737_v18 = vor.u32 %v5736_v8, %v15481_v50  ;;  %v5742_v53 = vrot.slane %v5740_v59, 5 }
 0x32f   : > { %7543 = vmatmul.bf16.gmra.mxu1 %v6931_v1  ;;  %v6633_v51 = vunpack.c.l.b16 %v5621_v43  ;;  %v5747_v37 = vrot.slane %v5745_v30, 4  ;;  %v4823_v60 = vrot.slane %v4822_v52, 4  ;;  %v4838_v49 = vsel %vm13361_vm7, %v4833_v28, %v4837_v9  ;;  %v12830_v1 = vld [vmem:[%s17642_s3 + $0xd0] sm:$0xff]  ;;  %v5105_v28 = vld [vmem:[#allocation3 + $0x8c] sm:$0x1] }
 0x330   : > { %v5750_v55 = vrot.slane %v5748_v17, 5  ;;  %v5626_v21 = vrot.slane %v5624_v24, 4  ;;  %v6632_v14 = vunpack.c.l.b16 %v5618_v39  ;;  %v5778_v25 = vshll.u32 %v5677_v22, 16  ;;  %7757 = vmatpush.bf16.msrb.mxu0 %v12830_v1  ;;  %v5706_v43 = vld [vmem:[#allocation3 + $0x38] sm:$0x1] }
 0x331   : > { %v5782_v29 = vshrl.u32 %v5677_v22, 16  ;;  %v4828_v36 = vsel %vm13361_vm7, %v4823_v60, %v15466_v58  ;;  %v15506_v16 = vrot.slane %v5754_v61, 5  ;;  %v5760_v0 = vrot.slane %v5758_v57, 4  ;;  %v5505_v57 = vld [vmem:[#allocation3 + $0x84] sm:$0xe] }
 0x332   : > { %v5627_v19 = vrot.slane %v5104_v34, 5  ;;  %v6371_v12 = vunpack.c.l.b16 %v4838_v49  ;;  %v5738_v33 = vrot.slane %v5737_v18, 4  ;;  %v6656_v44 = vpack.c.b16 %v6633_v51, %v6632_v14  ;;  %v15532_v22 = vld [vmem:[#allocation3 + $0x94] sm:$0xf]  ;;  %v5679_v34 = vld [vmem:[#allocation3 + $0x40] sm:$0xf] }
 0x333   : > { %6678 = vrot.lane.b32.xlu1 %v6655_v46, %s13190_s23  ;;  %v5769_v45 = vshrl.u32 %v5676_v47, 16  ;;  %v11885_v4 = vrot.slane %v5504_v42, 9  ;;  %v5772_v2 = vshll.u32 %v5676_v47, 16  ;;  %v5631_v58 = vrot.slane %v15501_v40, 5  ;;  %v15524_v46 = vpop.f32.mrf.mxu1  ;;  %v12773_v40 = vld [vmem:[#allocation3 + $0x18] sm:$0xff] }
 0x334   : > { %3442 = vrot.lane.b32.xlu0 %v3411_v23, %s13188_s17  ;;  %v5628_v62 = vsel %vm13306_vm4, %v5626_v21, %v5627_v19  ;;  %v6370_v7 = vunpack.c.l.b16 %v4828_v36  ;;  %v5751_v59 = vor.u32 %v5750_v55, %v5747_v37  ;;  %v15515_v32 = vrot.slane %v5778_v25, 5  ;;  %s13137_s17 = scalar_lea.hbm %s17648_s9, 128 }
 0x335   : > { %v5784_v56 = vrot.slane %v5782_v29, 4  ;;  %v5733_v8 = vsel %vm13361_vm7, %v15492_v41, %v15481_v50  ;;  %v5761_v30 = vor.u32 %v5760_v0, %v15506_v16  ;;  %v5625_v23 = vsel %vm13306_vm4, %v11885_v4, %v5624_v24  ;;  %v5681_v29 = vld [vmem:[#allocation3 + $0x4c] sm:$0xf]  ;;  %v5678_v0 = vld [vmem:[#allocation3 + $0x3c] sm:$0xf] }
 0x336   : > { %3362 = vrot.lane.b32.xlu2 %v12753_v35, %s17703_s22  ;;  %v6389_v31 = vpack.c.b16 %v6371_v12, %v6370_v7  ;;  %v5743_v63 = vsel %vm13361_vm7, %v5738_v33, %v5742_v53  ;;  %v5764_v17 = vshll.u32 %v5705_v27, 16  ;;  %v6635_v52 = vunpack.c.l.b16 %v5628_v62  ;;  %v5680_v27 = vld [vmem:[#allocation3 + $0x48] sm:$0xf]  ;;  %v12827_v62 = vld [vmem:[%s17642_s3 + $0xb8] sm:$0xff]  ;;  %s12936_s22 = sshll.u32 %s13263_s13, 6  ;;  %s11512_s13 = scalar_lea.sflag [#allocation7], %s323_s26 }
 0x337   : > { %v6935_v50 = vsel %vm6888_vm10, %v12767_v20, %v6415_v11  ;;  %v5771_v35 = vrot.slane %v5769_v45, 4  ;;  %v5774_v41 = vrot.slane %v5772_v2, 5  ;;  %v5633_v9 = vrot.slane %v5631_v58, 4  ;;  %v5106_v2 = vld [vmem:[#allocation3 + $0x98] sm:$0x1]  ;;  %7663 = vmatpush.bf16.msra.mxu3 %v12827_v62  ;;  %s11523_s16 = scalar_lea.hbm %s17648_s9, %s12936_s22 }
 0x338   : > { %v5752_v24 = vrot.slane %v5751_v59, 4  ;;  %v6634_v39 = vunpack.c.l.b16 %v5625_v23  ;;  %v5785_v61 = vor.u32 %v5784_v56, %v15515_v32  ;;  %v6760_v18 = vunpack.c.l.b16 %v5733_v8  ;;  %v5507_v62 = vld [vmem:[#allocation3 + $0x9c] sm:$0xe] }
 0x339   : > { %v6761_v53 = vunpack.c.l.b16 %v5743_v63  ;;  %v5762_v51 = vrot.slane %v5761_v30, 4  ;;  %v5634_v37 = vrot.slane %v5105_v28, 5  ;;  %v5766_v49 = vrot.slane %v5764_v17, 5  ;;  %v5506_v63 = vld [vmem:[#allocation3 + $0x90] sm:$0xe] }
 0x33a   : > { %v5757_v60 = vsel %vm13361_vm7, %v5752_v24, %v15506_v16  ;;  %v6657_v55 = vpack.c.b16 %v6635_v52, %v6634_v39  ;;  %v5788_v21 = vshll.u32 %v5706_v43, 16  ;;  %v5775_v47 = vor.u32 %v5774_v41, %v5771_v35  ;;  %v15556_v17 = vld [vmem:[#allocation3 + $0xa0] sm:$0xf]  ;;  %v5707_v28 = vld [vmem:[#allocation3 + $0x44] sm:$0x1] }
 0x33b   : > { %6680 = vrot.lane.b32.xlu1 %v6656_v44, %s13190_s23  ;;  %v11886_v14 = vrot.slane %v5505_v57, 9  ;;  %v5635_v42 = vsel %vm13306_vm4, %v5633_v9, %v5634_v37  ;;  %v5638_v25 = vrot.slane %v15532_v22, 5  ;;  %v5786_v36 = vrot.slane %v5785_v61, 4  ;;  %v15549_v20 = vpop.f32.mrf.mxu1 }
 0x33c   : > { %6536 = vrot.lane.b32.xlu0 %v12772_v10, %s13190_s23  ;;  %v5802_v19 = vshll.u32 %v5679_v34, 16  ;;  %v5806_v12 = vshrl.u32 %v5679_v34, 16  ;;  %v6792_v33 = vpack.c.b16 %v6761_v53, %v6760_v18  ;;  %v5767_v16 = vsel %vm13361_vm7, %v5762_v51, %v5766_v49  ;;  %v12826_v18 = vld [vmem:[%s17642_s3 + $0xb0] sm:$0xff]  ;;  %v12774_v51 = vld [vmem:[#allocation3 + $0x24] sm:$0xff] }
 0x33d   : > { %v6762_v44 = vunpack.c.l.b16 %v5757_v60  ;;  %v5632_v45 = vsel %vm13306_vm4, %v11886_v14, %v5631_v58  ;;  %v5790_v1 = vrot.slane %v5788_v21, 5  ;;  %v6637_v4 = vunpack.c.l.b16 %v5635_v42  ;;  %7664 = vmatpush.bf16.msra.mxu3 %v12826_v18  ;;  %v5063_v42 = vld [vmem:[#allocation3 + $0xc] sm:$0xf] }
 0x33e   : > { %6418 = vrot.lane.b32.xlu2 %v6389_v31, %s13190_s23  ;;  %v5826_v11 = vshll.u32 %v5681_v29, 16  ;;  %v5830_v10 = vshrl.u32 %v5681_v29, 16  ;;  %v5776_v7 = vrot.slane %v5775_v47, 4  ;;  %v5793_v59 = vshrl.u32 %v5678_v0, 16 }
 0x33f   : > { %7548 = vmatmul.bf16.gmra.mxu1 %v6935_v50  ;;  %v5796_v56 = vshll.u32 %v5678_v0, 16  ;;  %v5640_v8 = vrot.slane %v5638_v25, 4  ;;  %v5791_v58 = vsel %vm13361_vm7, %v5786_v36, %v5790_v1  ;;  %v6636_v30 = vunpack.c.l.b16 %v5632_v45  ;;  %v5708_v0 = vld [vmem:[#allocation3 + $0x50] sm:$0x1] }
 0x340   : > { %v15554_v23 = vrot.slane %v5802_v19, 5  ;;  %v5808_v31 = vrot.slane %v5806_v12, 4  ;;  %v6763_v52 = vunpack.c.l.b16 %v5767_v16  ;;  %v5641_v50 = vrot.slane %v5106_v2, 5  ;;  %v12825_v12 = vld [vmem:[%s17642_s3 + $0xa8] sm:$0xff]  ;;  %v15586_v2 = vld [vmem:[#allocation3 + $0xac] sm:$0xf] }
 0x341   : > { %v5817_v43 = vshrl.u32 %v5680_v27, 16  ;;  %v5820_v35 = vshll.u32 %v5680_v27, 16  ;;  %v5781_v41 = vsel %vm13361_vm7, %v5776_v7, %v15515_v32  ;;  %v6658_v9 = vpack.c.b16 %v6637_v4, %v6636_v30  ;;  %7665 = vmatpush.bf16.msra.mxu3 %v12825_v12 }
 0x342   : > { %v15561_v24 = vrot.slane %v5826_v11, 5  ;;  %v5832_v39 = vrot.slane %v5830_v10, 4  ;;  %v15563_v61 = vunpack.c.l.b16 %v5791_v58  ;;  %v11887_v57 = vrot.slane %v5506_v63, 9  ;;  %v13009_v63 = vld [vmem:[#allocation3 + $0x10] sm:$0xf] }
 0x343   : > { %6682 = vrot.lane.b32.xlu1 %v6657_v55, %s13190_s23  ;;  %v5642_v22 = vsel %vm13306_vm4, %v5640_v8, %v5641_v50  ;;  %v5645_v53 = vrot.slane %v15556_v17, 5  ;;  %v5795_v32 = vrot.slane %v5793_v59, 4  ;;  %v5798_v37 = vrot.slane %v5796_v56, 5  ;;  %v12768_v55 = vld [vmem:[#allocation3 + $0x90] sm:$0xff]  ;;  %v5683_v59 = vld [vmem:[#allocation3 + $0x58] sm:$0xf]  ;;  %v15588_v8 = vpop.f32.mrf.mxu1 }
 0x344   : > { %6538 = vrot.lane.b32.xlu0 %v12773_v40, %s13190_s23  ;;  %v5809_v34 = vor.u32 %v5808_v31, %v15554_v23  ;;  %v5812_v60 = vshll.u32 %v5707_v28, 16  ;;  %v15573_v49 = vunpack.c.l.b16 %v5781_v41  ;;  %v5639_v21 = vsel %vm13306_vm4, %v11887_v57, %v5638_v25  ;;  %v12824_v50 = vld [vmem:[%s17642_s3 + $0xa0] sm:$0xff]  ;;  %v12775_v41 = vld [vmem:[#allocation3 + $0x30] sm:$0xff] }
 0x345   : > { %v5819_v47 = vrot.slane %v5817_v43, 4  ;;  %v5822_v14 = vrot.slane %v5820_v35, 5  ;;  %v6793_v29 = vpack.c.b16 %v6763_v52, %v6762_v44  ;;  %v6639_v36 = vunpack.c.l.b16 %v5642_v22  ;;  %7666 = vmatpush.bf16.msra.mxu3 %v12824_v50 }
 0x346   : > { %6808 = vrot.lane.b32.xlu2 %v6792_v33, %s13190_s23  ;;  %v5833_v19 = vor.u32 %v5832_v39, %v15561_v24  ;;  %v5107_v33 = vld [vmem:[#allocation3 + $0xa4] sm:$0x1]  ;;  %v6794_v25 = vpack.c.b16 %v15563_v61, %v15573_v49  ;;  %v5647_v45 = vrot.slane %v5645_v53, 4  ;;  %v5799_v27 = vor.u32 %v5798_v37, %v5795_v32  ;;  %v5682_v61 = vld [vmem:[#allocation3 + $0x54] sm:$0xf] }
 0x347   : > { %v5810_v44 = vrot.slane %v5809_v34, 4  ;;  %v5814_v1 = vrot.slane %v5812_v60, 5  ;;  %v6638_v4 = vunpack.c.l.b16 %v5639_v21  ;;  %v5823_v11 = vor.u32 %v5822_v14, %v5819_v47  ;;  %v12829_v21 = vld [vmem:[%s17642_s3 + $0xc8] sm:$0xff] }
 0x348   : > { %v5836_v10 = vshll.u32 %v5708_v0, 16  ;;  %v5648_v7 = vrot.slane %v5107_v33, 5  ;;  %v5112_v56 = vshrl.u32 %v5063_v42, 16  ;;  %v5834_v30 = vrot.slane %v5833_v19, 4  ;;  %7758 = vmatpush.bf16.msrb.mxu0 %v12829_v21  ;;  %v5508_v33 = vld [vmem:[#allocation3 + $0xa8] sm:$0xe] }
 0x349   : > { %v6659_v58 = vpack.c.b16 %v6639_v36, %v6638_v4  ;;  %v5115_v31 = vshll.u32 %v5063_v42, 16  ;;  %v5121_v17 = vshll.u32 %v13009_v63, 16  ;;  %v11888_v52 = vrot.slane %v5507_v62, 9  ;;  %v5685_v62 = vld [vmem:[#allocation3 + $0x64] sm:$0xf] }
 0x34a   : > { %v5649_v28 = vsel %vm13306_vm4, %v5647_v45, %v5648_v7  ;;  %v5652_v43 = vrot.slane %v15586_v2, 5  ;;  %v5125_v35 = vshrl.u32 %v13009_v63, 16  ;;  %v5815_v39 = vsel %vm13361_vm7, %v5810_v44, %v5814_v1 }
 0x34b   : > { %6684 = vrot.lane.b32.xlu1 %v6658_v9, %s13190_s23  ;;  %v5800_v9 = vrot.slane %v5799_v27, 4  ;;  %v5850_v57 = vshll.u32 %v5683_v59, 16  ;;  %v5854_v22 = vshrl.u32 %v5683_v59, 16  ;;  %v5824_v18 = vrot.slane %v5823_v11, 4  ;;  %v5709_v11 = vld [vmem:[#allocation3 + $0x5c] sm:$0x1] }
 0x34c   : > { %6540 = vrot.lane.b32.xlu0 %v12774_v51, %s13190_s23  ;;  %v5838_v51 = vrot.slane %v5836_v10, 5  ;;  %v5646_v32 = vsel %vm13306_vm4, %v11888_v52, %v5645_v53  ;;  %v5114_v37 = vrot.slane %v5112_v56, 4  ;;  %v6641_v49 = vunpack.c.l.b16 %v5649_v28  ;;  %v5108_v53 = vld [vmem:[#allocation3 + $0xb0] sm:$0x1]  ;;  %v12822_v59 = vld [vmem:[%s17642_s3 + $0x90] sm:$0xff] }
 0x34d   : > { %v6417_v40 = vpop.permute.xlu1 %6416  ;;  %v5805_v34 = vsel %vm13361_vm7, %v5800_v9, %v15554_v23  ;;  %v5117_v47 = vrot.slane %v5115_v31, 5  ;;  %v15613_v14 = vrot.slane %v5121_v17, 5  ;;  %v5654_v23 = vrot.slane %v5652_v43, 4  ;;  %v15640_v28 = vld [vmem:[#allocation3 + $0x18] sm:$0xf] }
 0x34e   : > { %v6939_v16 = vsel %vm6888_vm10, %v12768_v55, %v6417_v40  ;;  %6810 = vrot.lane.b32.xlu2 %v6793_v29, %s13190_s23  ;;  %v12823_v55 = vld [vmem:[%s17642_s3 + $0x98] sm:$0xff]  ;;  %v5839_v42 = vsel %vm13361_vm7, %v5834_v30, %v5838_v51  ;;  %v5841_v29 = vshrl.u32 %v5682_v61, 16  ;;  %v5127_v40 = vrot.slane %v5125_v35, 4  ;;  %v5109_v51 = vld [vmem:[#allocation3 + $0xbc] sm:$0x1] }
 0x34f   : > { %7553 = vmatmul.bf16.gmra.mxu1 %v6939_v16  ;;  %v6767_v36 = vunpack.c.l.b16 %v5815_v39  ;;  %v6640_v0 = vunpack.c.l.b16 %v5646_v32  ;;  %v15618_v19 = vrot.slane %v5850_v57, 5  ;;  %v5856_v12 = vrot.slane %v5854_v22, 4  ;;  %v15620_v16 = vld [vmem:[#allocation3 + $0xb8] sm:$0xf]  ;;  %7667 = vmatpush.bf16.msra.mxu3 %v12823_v55  ;;  %v12776_v30 = vld [vmem:[#allocation3 + $0x3c] sm:$0xff] }
 0x350   : > { %v5829_v45 = vsel %vm13361_vm7, %v5824_v18, %v15561_v24  ;;  %v5844_v27 = vshll.u32 %v5682_v61, 16  ;;  %v5655_v44 = vrot.slane %v5108_v53, 5  ;;  %v6766_v1 = vunpack.c.l.b16 %v5805_v34  ;;  %v12821_v18 = vld [vmem:[%s17642_s3 + $0x88] sm:$0xff] }
 0x351   : > { %v15625_v4 = vunpack.c.l.b16 %v5839_v42  ;;  %v5118_v2 = vor.u32 %v5117_v47, %v5114_v37  ;;  %v11889_v10 = vrot.slane %v5508_v33, 9  ;;  %v5659_v24 = vrot.slane %v15620_v16, 5  ;;  %v13010_v37 = vld [vmem:[#allocation3 + $0x14] sm:$0x1] }
 0x352   : > { %v5656_v7 = vsel %vm13306_vm4, %v5654_v23, %v5655_v44  ;;  %v5128_v56 = vor.u32 %v5127_v40, %v15613_v14  ;;  %v6795_v31 = vpack.c.b16 %v6767_v36, %v6766_v1  ;;  %v15636_v63 = vunpack.c.l.b16 %v5829_v45  ;;  %v5509_v23 = vld [vmem:[#allocation3 + $0xb4] sm:$0xe]  ;;  %v5687_v45 = vld [vmem:[#allocation3 + $0x70] sm:$0xf] }
 0x353   : > { %6686 = vrot.lane.b32.xlu1 %v6659_v58, %s13190_s23  ;;  %v15634_v58 = vpop.f32.mrf.mxu1  ;;  %v5843_v17 = vrot.slane %v5841_v29, 4  ;;  %v5857_v52 = vor.u32 %v5856_v12, %v15618_v19  ;;  %v5846_v50 = vrot.slane %v5844_v27, 5  ;;  %v5653_v35 = vsel %vm13306_vm4, %v11889_v10, %v5652_v43  ;;  %7668 = vmatpush.bf16.msra.mxu3 %v12822_v59 }
 0x354   : > { %6542 = vrot.lane.b32.xlu0 %v12775_v41, %s13190_s23  ;;  %v5684_v41 = vld [vmem:[#allocation3 + $0x60] sm:$0xf]  ;;  %v5874_v9 = vshll.u32 %v5685_v62, 16  ;;  %v5878_v39 = vshrl.u32 %v5685_v62, 16  ;;  %v5860_v61 = vshll.u32 %v5709_v11, 16  ;;  %v6643_v22 = vunpack.c.l.b16 %v5656_v7  ;;  %v12836_v62 = vld [vmem:[%s17642_s3 + $0x100] sm:$0xff] }
 0x355   : > { %v15605_v60 = vpop.permute.xlu1 %3010  ;;  %v15650_v32 = vrot.slane %v5118_v2, 4  ;;  %v5131_v34 = vshll.u32 %v13010_v37, 16  ;;  %v6796_v43 = vpack.c.b16 %v15625_v4, %v15636_v63  ;;  %v5129_v55 = vrot.slane %v5128_v56, 4  ;;  %v13011_v2 = vld [vmem:[#allocation3 + $0x1c] sm:$0xf]  ;;  %v12777_v7 = vld [vmem:[#allocation3 + $0x48] sm:$0xff]  ;;  %7848 = vmatpush.bf16.msrb.mxu1 %v12836_v62 }
 0x356   : > { %6812 = vrot.lane.b32.xlu2 %v6794_v25, %s13190_s23  ;;  %v6660_v25 = vpack.c.b16 %v6641_v49, %v6640_v0  ;;  %v5661_v49 = vrot.slane %v5659_v24, 4  ;;  %v5136_v21 = vshrl.u32 %v15640_v28, 16  ;;  %v5858_v53 = vrot.slane %v5857_v52, 4  ;;  %v5710_v56 = vld [vmem:[#allocation3 + $0x68] sm:$0x1] }
 0x357   : > { %v6642_v47 = vunpack.c.l.b16 %v5653_v35  ;;  %v5865_v42 = vshrl.u32 %v5684_v41, 16  ;;  %v5868_v29 = vshll.u32 %v5684_v41, 16  ;;  %v5847_v40 = vor.u32 %v5846_v50, %v5843_v17  ;;  %7669 = vmatpush.bf16.msra.mxu3 %v12821_v18 }
 0x358   : > { %v15656_v36 = vrot.slane %v5874_v9, 5  ;;  %v5880_v0 = vrot.slane %v5878_v39, 4  ;;  %v5662_v12 = vrot.slane %v5109_v51, 5  ;;  %v5862_v33 = vrot.slane %v5860_v61, 5 }
 0x359   : > { %v6661_v16 = vpack.c.b16 %v6643_v22, %v6642_v47  ;;  %v5133_v27 = vrot.slane %v5131_v34, 5  ;;  %v5139_v44 = vshll.u32 %v15640_v28, 16  ;;  %v11890_v1 = vrot.slane %v5509_v23, 9 }
 0x35a   : > { %v5663_v4 = vsel %vm13306_vm4, %v5661_v49, %v5662_v12  ;;  %v5145_v11 = vshll.u32 %v13011_v2, 16  ;;  %v5149_v10 = vshrl.u32 %v13011_v2, 16  ;;  %v5863_v59 = vsel %vm13361_vm7, %v5858_v53, %v5862_v33 }
 0x35b   : > { %6688 = vrot.lane.b32.xlu1 %v6660_v25, %s13190_s23  ;;  %v12820_v25 = vld [vmem:[%s17642_s3 + $0x80] sm:$0xff]  ;;  %v5134_v63 = vsel %vm13361_vm7, %v5129_v55, %v5133_v27  ;;  %v5881_v17 = vor.u32 %v5880_v0, %v15656_v36  ;;  %v5660_v52 = vsel %vm13306_vm4, %v11890_v1, %v5659_v24  ;;  %v5898_v28 = vshll.u32 %v5687_v45, 16  ;;  %v15675_v35 = vpop.f32.mrf.mxu1  ;;  %v13012_v1 = vld [vmem:[#allocation3 + $0x20] sm:$0x1] }
 0x35c   : > { %6544 = vrot.lane.b32.xlu0 %v12776_v30, %s13190_s23  ;;  %v5867_v30 = vrot.slane %v5865_v42, 4  ;;  %v5902_v50 = vshrl.u32 %v5687_v45, 16  ;;  %7670 = vmatpush.bf16.msra.mxu3 %v12820_v25  ;;  %v5848_v41 = vrot.slane %v5847_v40, 4  ;;  %v6645_v39 = vunpack.c.l.b16 %v5663_v4  ;;  %v5686_v24 = vld [vmem:[#allocation3 + $0x6c] sm:$0xf] }
 0x35d   : > { %v15645_v57 = vpop.permute.xlu1 %3266  ;;  %v5124_v61 = vsel %vm13361_vm7, %v15650_v32, %v15613_v14  ;;  %v5138_v22 = vrot.slane %v5136_v21, 4  ;;  %v5884_v18 = vshll.u32 %v5710_v56, 16  ;;  %v6569_v51 = vunpack.c.l.b16 %v5134_v63  ;;  %v5711_v45 = vld [vmem:[#allocation3 + $0x74] sm:$0x1]  ;;  %v5688_v56 = vld [vmem:[#allocation3 + $0x78] sm:$0xf] }
 0x35e   : > { %6814 = vrot.lane.b32.xlu2 %v6795_v31, %s13190_s23  ;;  %v5870_v31 = vrot.slane %v5868_v29, 5  ;;  %v5141_v37 = vrot.slane %v5139_v44, 5  ;;  %v15684_v34 = vrot.slane %v5145_v11, 5  ;;  %v5853_v49 = vsel %vm13361_vm7, %v5848_v41, %v15618_v19 }
 0x35f   : > { %v6771_v55 = vunpack.c.l.b16 %v5863_v59  ;;  %v6644_v53 = vunpack.c.l.b16 %v5660_v52  ;;  %v5151_v47 = vrot.slane %v5149_v10, 4  ;;  %v5882_v29 = vrot.slane %v5881_v17, 4 }
 0x360   : > { %v5871_v42 = vor.u32 %v5870_v31, %v5867_v30  ;;  %v15690_v23 = vrot.slane %v5898_v28, 5  ;;  %v5904_v14 = vrot.slane %v5902_v50, 4  ;;  %v5889_v21 = vshrl.u32 %v5686_v24, 16 }
 0x361   : > { %v6662_v32 = vpack.c.b16 %v6645_v39, %v6644_v53  ;;  %v5892_v40 = vshll.u32 %v5686_v24, 16  ;;  %v6568_v0 = vunpack.c.l.b16 %v5124_v61  ;;  %v6770_v12 = vunpack.c.l.b16 %v5853_v49  ;;  %v5691_v53 = vld [vmem:[#allocation3 + $0x88] sm:$0xf] }
 0x362   : > { %v5886_v33 = vrot.slane %v5884_v18, 5  ;;  %v5142_v27 = vor.u32 %v5141_v37, %v5138_v22  ;;  %v5152_v44 = vor.u32 %v5151_v47, %v15684_v34  ;;  %v5155_v4 = vshll.u32 %v13012_v1, 16 }
 0x363   : > { %6690 = vrot.lane.b32.xlu1 %v6661_v16, %s13190_s23  ;;  %v5689_v16 = vld [vmem:[#allocation3 + $0x7c] sm:$0xf]  ;;  %v6600_v19 = vpack.c.b16 %v6569_v51, %v6568_v0  ;;  %v6797_v25 = vpack.c.b16 %v6771_v55, %v6770_v12  ;;  %v5872_v62 = vrot.slane %v5871_v42, 4  ;;  %v5905_v11 = vor.u32 %v5904_v14, %v15690_v23  ;;  %v15699_v52 = vpop.f32.mrf.mxu1  ;;  %v12819_v55 = vld [vmem:[%s17642_s3 + $0x78] sm:$0xff] }
 0x364   : > { %6546 = vrot.lane.b32.xlu0 %v12777_v7, %s13190_s23  ;;  %v5887_v2 = vsel %vm13361_vm7, %v5882_v29, %v5886_v33  ;;  %v5891_v10 = vrot.slane %v5889_v21, 4  ;;  %v5894_v7 = vrot.slane %v5892_v40, 5  ;;  %v5922_v30 = vshll.u32 %v5689_v16, 16  ;;  %7574 = vmatpush.bf16.msrb.mxu2 %v12819_v55  ;;  %v12818_v21 = vld [vmem:[%s17642_s3 + $0x70] sm:$0xff]  ;;  %v5067_v12 = vld [vmem:[#allocation3 + $0x24] sm:$0xf] }
 0x365   : > { %v15678_v9 = vpop.permute.xlu1 %3522  ;;  %v5926_v31 = vshrl.u32 %v5689_v16, 16  ;;  %v5908_v63 = vshll.u32 %v5711_v45, 16  ;;  %v5877_v28 = vsel %vm13361_vm7, %v5872_v62, %v15656_v36  ;;  %v5143_v50 = vrot.slane %v5142_v27, 4  ;;  %v13013_v36 = vld [vmem:[#allocation3 + $0x28] sm:$0xf]  ;;  %v12780_v55 = vld [vmem:[#allocation3 + $0x6c] sm:$0xff] }
 0x366   : > { %6816 = vrot.lane.b32.xlu2 %v6796_v43, %s13190_s23  ;;  %v12778_v43 = vld [vmem:[#allocation3 + $0x54] sm:$0xff]  ;;  %v5153_v41 = vrot.slane %v5152_v44, 4  ;;  %v6773_v39 = vunpack.c.l.b16 %v5887_v2  ;;  %v5906_v61 = vrot.slane %v5905_v11, 4  ;;  %v5913_v22 = vshrl.u32 %v5688_v56, 16 }
 0x367   : > { %v5157_v18 = vrot.slane %v5155_v4, 5  ;;  %v5895_v24 = vor.u32 %v5894_v7, %v5891_v10  ;;  %v5916_v51 = vshll.u32 %v5688_v56, 16  ;;  %v15705_v37 = vrot.slane %v5922_v30, 5 }
 0x368   : > { %v5928_v49 = vrot.slane %v5926_v31, 4  ;;  %v6772_v47 = vunpack.c.l.b16 %v5877_v28  ;;  %v5910_v42 = vrot.slane %v5908_v63, 5  ;;  %v5169_v29 = vshll.u32 %v13013_v36, 16  ;;  %7575 = vmatpush.bf16.msrb.mxu2 %v12818_v21 }
 0x369   : > { %v5173_v14 = vshrl.u32 %v13013_v36, 16  ;;  %v5148_v40 = vsel %vm13361_vm7, %v5143_v50, %v15684_v34  ;;  %v5158_v0 = vsel %vm13361_vm7, %v5153_v41, %v5157_v18  ;;  %v5946_v45 = vshll.u32 %v5691_v53, 16  ;;  %v5693_v18 = vld [vmem:[#allocation3 + $0x94] sm:$0xf]  ;;  %v13014_v36 = vld [vmem:[#allocation3 + $0x2c] sm:$0x1] }
 0x36a   : > { %v6798_v33 = vpack.c.b16 %v6773_v39, %v6772_v47  ;;  %v5911_v16 = vsel %vm13361_vm7, %v5906_v61, %v5910_v42  ;;  %v5896_v27 = vrot.slane %v5895_v24, 4  ;;  %v5915_v44 = vrot.slane %v5913_v22, 4  ;;  %v12817_v61 = vld [vmem:[%s17642_s3 + $0x68] sm:$0xff] }
 0x36b   : > { %6692 = vrot.lane.b32.xlu1 %v6662_v32, %s13190_s23  ;;  %v12779_v32 = vld [vmem:[#allocation3 + $0x60] sm:$0xff]  ;;  %v5918_v1 = vrot.slane %v5916_v51, 5  ;;  %v5929_v4 = vor.u32 %v5928_v49, %v15705_v37  ;;  %v5160_v34 = vshrl.u32 %v5067_v12, 16  ;;  %v5163_v62 = vshll.u32 %v5067_v12, 16  ;;  %v15730_v28 = vpop.f32.mrf.mxu1  ;;  %v12816_v12 = vld [vmem:[%s17642_s3 + $0x60] sm:$0xff] }
 0x36c   : > { %6548 = vrot.lane.b32.xlu0 %v12778_v43, %s13190_s23  ;;  %v5712_v43 = vld [vmem:[#allocation3 + $0x80] sm:$0x1]  ;;  %v15722_v2 = vrot.slane %v5169_v29, 5  ;;  %v5175_v11 = vrot.slane %v5173_v14, 4  ;;  %v5901_v10 = vsel %vm13361_vm7, %v5896_v27, %v15690_v23  ;;  %v6775_v7 = vunpack.c.l.b16 %v5911_v16  ;;  %v12828_v23 = vld [vmem:[%s17642_s3 + $0xc0] sm:$0xff]  ;;  %7576 = vmatpush.bf16.msrb.mxu2 %v12817_v61 }
 0x36d   : > { %v6665_v59 = vpop.permute.xlu1 %6664  ;;  %v6571_v56 = vunpack.c.l.b16 %v5158_v0  ;;  %v15728_v63 = vrot.slane %v5946_v45, 5  ;;  %v5919_v50 = vor.u32 %v5918_v1, %v5915_v44  ;;  %v5930_v41 = vrot.slane %v5929_v4, 4  ;;  %7759 = vmatpush.bf16.msrb.mxu0 %v12828_v23  ;;  %v15748_v4 = vpop.permute.xlu2 %3106 }
 0x36e   : > { %v7019_v17 = vsel %vm6888_vm10, %v6600_v19, %v6665_v59  ;;  %6818 = vrot.lane.b32.xlu2 %v6797_v25, %s13190_s23  ;;  %v5950_v19 = vshrl.u32 %v5691_v53, 16  ;;  %v5690_v25 = vld [vmem:[#allocation3 + $0x84] sm:$0xf]  ;;  %v5932_v59 = vshll.u32 %v5712_v43, 16  ;;  %v6570_v39 = vunpack.c.l.b16 %v5148_v40  ;;  %v5692_v43 = vld [vmem:[#allocation3 + $0x90] sm:$0xf] }
 0x36f   : > { %7671 = vmatmul.bf16.vlgmr.msra.gmra.mxu3 %v7019_v17  ;;  %v5937_v30 = vshrl.u32 %v5690_v25, 16  ;;  %v5940_v31 = vshll.u32 %v5690_v25, 16  ;;  %v6774_v22 = vunpack.c.l.b16 %v5901_v10  ;;  %v5162_v24 = vrot.slane %v5160_v34, 4 }
 0x370   : > { %v5952_v17 = vrot.slane %v5950_v19, 4  ;;  %v5165_v51 = vrot.slane %v5163_v62, 5  ;;  %v5176_v49 = vor.u32 %v5175_v11, %v15722_v2  ;;  %v5934_v53 = vrot.slane %v5932_v59, 5  ;;  %v5069_v11 = vld [vmem:[#allocation3 + $0x30] sm:$0xf]  ;;  %7577 = vmatpush.bf16.msrb.mxu2 %v12816_v12 }
 0x371   : > { %v6601_v42 = vpack.c.b16 %v6571_v56, %v6570_v39  ;;  %v5179_v29 = vshll.u32 %v13014_v36, 16  ;;  %v6799_v14 = vpack.c.b16 %v6775_v7, %v6774_v22  ;;  %v5939_v21 = vrot.slane %v5937_v30, 4  ;;  %v5714_v36 = vld [vmem:[#allocation3 + $0x98] sm:$0x1] }
 0x372   : > { %v5942_v40 = vrot.slane %v5940_v31, 5  ;;  %v5953_v0 = vor.u32 %v5952_v17, %v15728_v63  ;;  %v5935_v16 = vsel %vm13361_vm7, %v5930_v41, %v5934_v53  ;;  %v5970_v45 = vshll.u32 %v5693_v18, 16  ;;  %v5695_v41 = vld [vmem:[#allocation3 + $0xa0] sm:$0xf] }
 0x373   : > { %v5974_v19 = vshrl.u32 %v5693_v18, 16  ;;  %v5166_v44 = vor.u32 %v5165_v51, %v5162_v24  ;;  %v5177_v1 = vrot.slane %v5176_v49, 4  ;;  %v5181_v62 = vrot.slane %v5179_v29, 5  ;;  %v15760_v22 = vpop.f32.mrf.mxu1  ;;  %v12781_v18 = vld [vmem:[#allocation3 + $0x78] sm:$0xff]  ;;  %v13015_v49 = vld [vmem:[#allocation3 + $0x34] sm:$0xf] }
 0x374   : > { %6550 = vrot.lane.b32.xlu0 %v12779_v32, %s13190_s23  ;;  %v5713_v32 = vld [vmem:[#allocation3 + $0x8c] sm:$0x1]  ;;  %v6777_v10 = vunpack.c.l.b16 %v5935_v16  ;;  %v5943_v7 = vor.u32 %v5942_v40, %v5939_v21  ;;  %v5954_v59 = vrot.slane %v5953_v0, 4  ;;  %v5961_v56 = vshrl.u32 %v5692_v43, 16 }
 0x375   : > { %v6667_v47 = vpop.permute.xlu1 %6666  ;;  %v5956_v34 = vshll.u32 %v5713_v32, 16  ;;  %v5964_v30 = vshll.u32 %v5692_v43, 16  ;;  %v15753_v31 = vrot.slane %v5970_v45, 5  ;;  %v5976_v17 = vrot.slane %v5974_v19, 4  ;;  %v12814_v32 = vld [vmem:[%s17642_s3 + $0x50] sm:$0xff] }
 0x376   : > { %6820 = vrot.lane.b32.xlu2 %v6798_v33, %s13190_s23  ;;  %v5920_v33 = vrot.slane %v5919_v50, 4  ;;  %v7023_v27 = vsel %vm6888_vm10, %v6601_v42, %v6667_v47  ;;  %v12815_v50 = vld [vmem:[%s17642_s3 + $0x58] sm:$0xff]  ;;  %v5182_v61 = vsel %vm13361_vm7, %v5177_v1, %v5181_v62  ;;  %v5184_v23 = vshrl.u32 %v5069_v11, 16 }
 0x377   : > { %v5958_v24 = vrot.slane %v5956_v34, 5  ;;  %v5187_v51 = vshll.u32 %v5069_v11, 16  ;;  %v5197_v53 = vshrl.u32 %v13015_v49, 16  ;;  %v5944_v42 = vrot.slane %v5943_v7, 4  ;;  %7578 = vmatpush.bf16.msrb.mxu2 %v12815_v50  ;;  %v5697_v50 = vld [vmem:[#allocation3 + $0xac] sm:$0xf] }
 0x378   : > { %v5925_v25 = vsel %vm13361_vm7, %v5920_v33, %v15705_v37  ;;  %v5167_v37 = vrot.slane %v5166_v44, 4  ;;  %v5994_v29 = vshll.u32 %v5695_v41, 16  ;;  %v5963_v40 = vrot.slane %v5961_v56, 4 }
 0x379   : > { %v6776_v39 = vunpack.c.l.b16 %v5925_v25  ;;  %v5959_v21 = vsel %vm13361_vm7, %v5954_v59, %v5958_v24  ;;  %v5966_v0 = vrot.slane %v5964_v30, 5  ;;  %v5977_v12 = vor.u32 %v5976_v17, %v15753_v31 }
 0x37a   : > { %v5172_v33 = vsel %vm13361_vm7, %v5167_v37, %v15722_v2  ;;  %v6573_v16 = vunpack.c.l.b16 %v5182_v61  ;;  %v5186_v43 = vrot.slane %v5184_v23, 4  ;;  %v5949_v45 = vsel %vm13361_vm7, %v5944_v42, %v15728_v63  ;;  %v12813_v2 = vld [vmem:[%s17642_s3 + $0x48] sm:$0xff] }
 0x37b   : > { %v6800_v47 = vpack.c.b16 %v6777_v10, %v6776_v39  ;;  %v5980_v19 = vshll.u32 %v5714_v36, 16  ;;  %v5189_v44 = vrot.slane %v5187_v51, 5  ;;  %v6779_v25 = vunpack.c.l.b16 %v5959_v21  ;;  %7579 = vmatpush.bf16.msrb.mxu2 %v12814_v32 }
 0x37c   : > { %6552 = vrot.lane.b32.xlu0 %v12780_v55, %s13190_s23  ;;  %v5193_v55 = vshll.u32 %v13015_v49, 16  ;;  %v15778_v34 = vrot.slane %v5994_v29, 5  ;;  %v5199_v11 = vrot.slane %v5197_v53, 4  ;;  %v5967_v7 = vor.u32 %v5966_v0, %v5963_v40  ;;  %v12812_v49 = vld [vmem:[%s17642_s3 + $0x40] sm:$0xff]  ;;  %v15790_v53 = vpop.f32.mrf.mxu1 }
 0x37d   : > { %v5978_v59 = vrot.slane %v5977_v12, 4  ;;  %v6778_v63 = vunpack.c.l.b16 %v5949_v45  ;;  %v6572_v17 = vunpack.c.l.b16 %v5172_v33  ;;  %v6669_v39 = vpop.permute.xlu1 %6668  ;;  %v5982_v37 = vrot.slane %v5980_v19, 5  ;;  %v5696_v0 = vld [vmem:[#allocation3 + $0xa8] sm:$0xf]  ;;  %v13016_v12 = vld [vmem:[#allocation3 + $0x38] sm:$0x1] }
 0x37e   : > { %6822 = vrot.lane.b32.xlu2 %v6799_v14, %s13190_s23  ;;  %v5998_v14 = vshrl.u32 %v5695_v41, 16  ;;  %v15776_v1 = vrot.slane %v5193_v55, 5  ;;  %v12782_v41 = vld [vmem:[#allocation3 + $0x84] sm:$0xff]  ;;  %v5190_v61 = vor.u32 %v5189_v44, %v5186_v43  ;;  %v6018_v36 = vshll.u32 %v5697_v50, 16 }
 0x37f   : > { %7676 = vmatmul.bf16.gmra.mxu3 %v7023_v27  ;;  %v5694_v27 = vld [vmem:[#allocation3 + $0x9c] sm:$0xf]  ;;  %v6801_v23 = vpack.c.b16 %v6779_v25, %v6778_v63  ;;  %v6602_v51 = vpack.c.b16 %v6573_v16, %v6572_v17  ;;  %7580 = vmatpush.bf16.msrb.mxu2 %v12813_v2  ;;  %v5983_v42 = vsel %vm13361_vm7, %v5978_v59, %v5982_v37  ;;  %v6022_v29 = vshrl.u32 %v5697_v50, 16  ;;  %v12783_v50 = vld [vmem:[#allocation3 + $0x90] sm:$0xff] }
 0x380   : > { %v6000_v62 = vrot.slane %v5998_v14, 4  ;;  %v5985_v56 = vshrl.u32 %v5694_v27, 16  ;;  %v5988_v30 = vshll.u32 %v5694_v27, 16  ;;  %v5200_v55 = vor.u32 %v5199_v11, %v15776_v1  ;;  %v12770_v14 = vld [vmem:[#allocation3 + $0xa8] sm:$0xff] }
 0x381   : > { %v7027_v40 = vsel %vm6888_vm10, %v6602_v51, %v6669_v39  ;;  %v5203_v33 = vshll.u32 %v13016_v12, 16  ;;  %v5191_v19 = vrot.slane %v5190_v61, 4  ;;  %v6781_v44 = vunpack.c.l.b16 %v5983_v42  ;;  %v5699_v39 = vld [vmem:[#allocation3 + $0xb8] sm:$0xf]  ;;  %v13017_v61 = vld [vmem:[#allocation3 + $0x40] sm:$0xf] }
 0x382   : > { %v6001_v24 = vor.u32 %v6000_v62, %v15778_v34  ;;  %v5987_v32 = vrot.slane %v5985_v56, 4  ;;  %v5990_v21 = vrot.slane %v5988_v30, 5  ;;  %v5201_v62 = vrot.slane %v5200_v55, 4  ;;  %v5071_v56 = vld [vmem:[#allocation3 + $0x3c] sm:$0xf] }
 0x383   : > { %7581 = vmatpush.bf16.msrb.mxu2 %v12812_v49  ;;  %v6009_v11 = vshrl.u32 %v5696_v0, 16  ;;  %v15803_v59 = vrot.slane %v6018_v36, 5  ;;  %v6024_v63 = vrot.slane %v6022_v29, 4  ;;  %v5205_v17 = vrot.slane %v5203_v33, 5  ;;  %v5716_v51 = vld [vmem:[#allocation3 + $0xb0] sm:$0x1] }
 0x384   : > { %6554 = vrot.lane.b32.xlu0 %v12781_v18, %s13190_s23  ;;  %v5715_v18 = vld [vmem:[#allocation3 + $0xa4] sm:$0x1]  ;;  %v6002_v25 = vrot.slane %v6001_v24, 4  ;;  %v5196_v37 = vsel %vm13361_vm7, %v5191_v19, %v15776_v1  ;;  %v5208_v55 = vshrl.u32 %v5071_v56, 16  ;;  %v15814_v12 = vpop.f32.mrf.mxu1  ;;  %vm8773_vm11 = vcmask 1047559  }
 0x385   : > { %v6004_v45 = vshll.u32 %v5715_v18, 16  ;;  %v5221_v18 = vshrl.u32 %v13017_v61, 16  ;;  %v5206_v49 = vsel %vm13361_vm7, %v5201_v62, %v5205_v17  ;;  %v6011_v36 = vrot.slane %v6009_v11, 4 }
 0x386   : > { %6824 = vrot.lane.b32.xlu2 %v6800_v47, %s13190_s23  ;;  %v5968_v47 = vrot.slane %v5967_v7, 4  ;;  %v6012_v7 = vshll.u32 %v5696_v0, 16  ;;  %v6574_v0 = vunpack.c.l.b16 %v5196_v37  ;;  %v6575_v62 = vunpack.c.l.b16 %v5206_v49  ;;  %v12784_v37 = vld [vmem:[#allocation3 + $0x9c] sm:$0xff] }
 0x387   : > { %v5223_v19 = vrot.slane %v5221_v18, 4  ;;  %v5210_v11 = vrot.slane %v5208_v55, 4  ;;  %v13018_v55 = vld [vmem:[#allocation3 + $0x44] sm:$0x1] }
 0x388   : > { %v15783_v10 = vpop.permute.xlu2 %6422  ;;  %v5973_v43 = vsel %vm13361_vm7, %v5968_v47, %v15753_v31  ;;  %v5991_v31 = vor.u32 %v5990_v21, %v5987_v32  ;;  %v12721_v47 = vld [vmem:[#allocation2 + $0xb4] sm:$0xff]  ;;  %v6014_v29 = vrot.slane %v6012_v7, 5  ;;  %v5698_v32 = vld [vmem:[#allocation3 + $0xb4] sm:$0xf]  ;;  %v6042_v21 = vshll.u32 %v5699_v39, 16 }
 0x389   : > { %v6780_v30 = vunpack.c.l.b16 %v5973_v43  ;;  %v5211_v43 = vshll.u32 %v5071_v56, 16  ;;  %v6033_v17 = vshrl.u32 %v5698_v32, 16  ;;  %v6036_v56 = vshll.u32 %v5698_v32, 16 }
 0x38a   : > { %v5992_v1 = vrot.slane %v5991_v31, 4  ;;  %v6603_v49 = vpack.c.b16 %v6575_v62, %v6574_v0 }
 0x38b   : > { %v6802_v24 = vpack.c.b16 %v6781_v44, %v6780_v30  ;;  %v6015_v30 = vor.u32 %v6014_v29, %v6011_v36  ;;  %v5213_v18 = vrot.slane %v5211_v43, 5 }
 0x38c   : > { %6556 = vrot.lane.b32.xlu0 %v12782_v41, %s13190_s23  ;;  %v6006_v41 = vrot.slane %v6004_v45, 5  ;;  %v5997_v44 = vsel %vm13361_vm7, %v5992_v1, %v15778_v34  ;;  %v13019_v1 = vld [vmem:[#allocation3 + $0x4] sm:$0xf] }
 0x38d   : > { %v6016_v29 = vrot.slane %v6015_v30, 4  ;;  %v4953_v32 = vrot.slane %v13019_v1, 5 }
 0x38e   : > { %v6421_v16 = vpop.permute.xlu0 %6420  ;;  %6826 = vrot.lane.b32.xlu2 %v6801_v23, %s13190_s23  ;;  %v5217_v23 = vshll.u32 %v13017_v61, 16  ;;  %v6007_v42 = vsel %vm13361_vm7, %v6002_v25, %v6006_v41  ;;  %v15824_v41 = vrot.slane %v6042_v21, 5  ;;  %v6671_v61 = vpop.permute.xlu1 %6670  ;;  %v5717_v21 = vld [vmem:[#allocation3 + $0xbc] sm:$0x1] }
 0x38f   : > { %7681 = vmatmul.bf16.gmra.mxu3 %v7027_v40  ;;  %v6947_v27 = vsel %vm6888_vm10, %v12770_v14, %v6421_v16  ;;  %v6025_v14 = vor.u32 %v6024_v63, %v15803_v59  ;;  %v6046_v40 = vshrl.u32 %v5699_v39, 16  ;;  %v6028_v16 = vshll.u32 %v5716_v51, 16 }
 0x390   : > { %7563 = vmatmul.bf16.vlgmr.msra.gmra.mxu2 %v6947_v27  ;;  %v15801_v2 = vpop.permute.xlu2 %3362  ;;  %v15817_v45 = vrot.slane %v5217_v23, 5  ;;  %v12769_v27 = vld [vmem:[#allocation3 + $0x9c] sm:$0xff]  ;;  %v6783_v25 = vunpack.c.l.b16 %v6007_v42  ;;  %v6782_v23 = vunpack.c.l.b16 %v5997_v44  ;;  %v12771_v42 = vld [vmem:[#allocation3 + $0xb4] sm:$0xff]  ;;  %v5214_v44 = vor.u32 %v5213_v18, %v5210_v11 }
 0x391   : > { %v6026_v31 = vrot.slane %v6025_v14, 4  ;;  %v6048_v39 = vrot.slane %v6046_v40, 4  ;;  %v6030_v34 = vrot.slane %v6028_v16, 5  ;;  %v4887_v40 = vld [vmem:[#allocation3] sm:$0xe]  ;;  %v6038_v16 = vrot.slane %v6036_v56, 5 }
 0x392   : > { %v6803_v36 = vpack.c.b16 %v6783_v25, %v6782_v23  ;;  %v4955_v56 = vrot.slane %v4953_v32, 4  ;;  %v5215_v18 = vrot.slane %v5214_v44, 4 }
 0x393   : > { %v6031_v14 = vsel %vm13361_vm7, %v6026_v31, %v6030_v34  ;;  %v6049_v43 = vor.u32 %v6048_v39, %v15824_v41  ;;  %v6052_v31 = vshll.u32 %v5717_v21, 16 }
 0x394   : > { %6558 = vrot.lane.b32.xlu0 %v12783_v50, %s13190_s23  ;;  %v5220_v21 = vsel %vm13361_vm7, %v5215_v18, %v15817_v45 }
 0x395   : > { %v6050_v39 = vrot.slane %v6049_v43, 4  ;;  %v6054_v34 = vrot.slane %v6052_v31, 5 }
 0x396   : > { %v2931_v33 = vpop.permute.xlu0 %2930  ;;  %6828 = vrot.lane.b32.xlu2 %v6802_v24, %s13190_s23  ;;  %v5224_v24 = vor.u32 %v5223_v19, %v15817_v45 }
 0x397   : > { %v3572_v7 = vsel %vm3524_vm15, %v12721_v47, %v2931_v33  ;;  %v5227_v47 = vshll.u32 %v13018_v55, 16  ;;  %v6035_v33 = vrot.slane %v6033_v17, 4  ;;  %v15843_v17 = vpop.f32.mrf.mxu1  ;;  %vm17705_vm15 = vcmask 228352  }
 0x398   : > { %v6419_v63 = vpop.permute.xlu2 %6418  ;;  %v3605_v51 = vsel %vm3573_vm1, %v3572_v7, %v15605_v60  ;;  %v7031_v60 = vsel %vm6888_vm10, %v6603_v49, %v6671_v61  ;;  %v5225_v25 = vrot.slane %v5224_v24, 4  ;;  %v6021_v7 = vsel %vm13361_vm7, %v6016_v29, %v15803_v59  ;;  %17704 = vst [vmem:[#allocation9_spill] sm:$0xff] %v15843_v17  ;;  %v12785_v61 = vld [vmem:[#allocation3 + $0xa8] sm:$0xff] }
 0x399   : > { %v6943_v50 = vsel %vm6888_vm10, %v12769_v27, %v6419_v63  ;;  %v3638_v19 = vsel %vm3606_vm2, %v3605_v51, %v15748_v4  ;;  %v6951_v27 = vsel %vm6888_vm10, %v12771_v42, %v15783_v10  ;;  %v13020_v63 = vld [vmem:[#allocation3 + $0x8] sm:$0x1]  ;;  %v6785_v10 = vunpack.c.l.b16 %v6031_v14  ;;  %v13021_v51 = vld [vmem:[#allocation3 + $0x4c] sm:$0xf] }
 0x39a   : > { %7558 = vmatmul.bf16.gmra.mxu1 %v6943_v50  ;;  %v4956_v30 = vrot.slane %v13020_v63, 5  ;;  %v11860_v50 = vrot.slane %v4887_v40, 9  ;;  %v6039_v11 = vor.u32 %v6038_v16, %v6035_v33  ;;  %v6784_v23 = vunpack.c.l.b16 %v6021_v7  ;;  %v5073_v24 = vld [vmem:[#allocation3 + $0x48] sm:$0xf]  ;;  %v6673_v63 = vpop.permute.xlu1 %6672 }
 0x39b   : > { %v5241_v49 = vshll.u32 %v13021_v51, 16  ;;  %v6055_v29 = vsel %vm13361_vm7, %v6050_v39, %v6054_v34  ;;  %v13022_v14 = vld [vmem:[#allocation3 + $0x28] sm:$0xf]  ;;  %v5232_v16 = vshrl.u32 %v5073_v24, 16  ;;  %v5235_v43 = vshll.u32 %v5073_v24, 16 }
 0x39c   : > { %6560 = vrot.lane.b32.xlu0 %v12784_v37, %s13190_s23  ;;  %v5229_v37 = vrot.slane %v5227_v47, 5  ;;  %v4954_v55 = vsel %vm13306_vm4, %v11860_v50, %v4953_v32  ;;  %v4957_v42 = vsel %vm13306_vm4, %v4955_v56, %v4956_v30  ;;  %v5245_v47 = vshrl.u32 %v13021_v51, 16  ;;  %v12786_v30 = vld [vmem:[#allocation3 + $0xb4] sm:$0xff]  ;;  %v6105_v39 = vld [vmem:[#allocation3 + $0x24] sm:$0xe] }
 0x39d   : > { %v6177_v1 = vrot.slane %v13022_v14, 5  ;;  %vm17706_vm1 = vcmask 261120   ;;  %v6787_v44 = vunpack.c.l.b16 %v6055_v29  ;;  %vm17707_vm2 = vcmask 293888  }
 0x39e   : > { %v3187_v0 = vpop.permute.xlu0 %3186  ;;  %6830 = vrot.lane.b32.xlu2 %v6803_v36, %s13190_s23  ;;  %v5230_v59 = vsel %vm13361_vm7, %v5225_v25, %v5229_v37  ;;  %v6040_v36 = vrot.slane %v6039_v11, 4  ;;  %v15868_v25 = vrot.slane %v5241_v49, 5  ;;  %v5234_v50 = vrot.slane %v5232_v16, 4 }
 0x39f   : > { %7686 = vmatmul.bf16.gmra.mxu3 %v7031_v60  ;;  %v3671_v62 = vsel %vm3639_vm3, %v3638_v19, %v3187_v0  ;;  %v6577_v32 = vunpack.c.l.b16 %v5230_v59  ;;  %v6424_v0 = vunpack.c.l.b16 %v4954_v55  ;;  %v6425_v19 = vunpack.c.l.b16 %v4957_v42  ;;  %v15871_v7 = vpop.f32.mrf.mxu1  ;;  %v13025_v59 = vld [vmem:[#allocation3 + $0x50] sm:$0x1]  ;;  %v4888_v55 = vld [vmem:[#allocation3 + $0xc] sm:$0xe]  ;;  %vm17726_vm3 = vmmov %vm17699_vm0 }
 0x3a0   : > { %v3704_v4 = vsel %vm3672_vm5, %v3671_v62, %v15645_v57  ;;  %7568 = vmatmul.bf16.gmra.mxu2 %v6951_v27  ;;  %v6804_v57 = vpack.c.b16 %v6785_v10, %v6784_v23  ;;  %v6045_v27 = vsel %vm13361_vm7, %v6040_v36, %v15824_v41  ;;  %v6576_v62 = vunpack.c.l.b16 %v5220_v21  ;;  %17708 = vst [vmem:[#allocation10_spill] sm:$0xff] %v15871_v7  ;;  %v13023_v23 = vld [vmem:[#allocation3 + $0x2c] sm:$0x1] }
 0x3a1   : > { %v3737_v33 = vsel %vm3705_vm6, %v3704_v4, %v15801_v2  ;;  %v5247_v2 = vrot.slane %v5245_v47, 4  ;;  %v6786_v31 = vunpack.c.l.b16 %v6045_v27  ;;  %v6456_v4 = vpack.c.b16 %v6425_v19, %v6424_v0  ;;  %v5075_v0 = vld [vmem:[#allocation3 + $0x54] sm:$0xf]  ;;  %v13027_v19 = vld [vmem:[#allocation3 + $0x58] sm:$0xf] }
 0x3a2   : > { %v6179_v41 = vrot.slane %v6177_v1, 4  ;;  %v6604_v10 = vpack.c.b16 %v6577_v32, %v6576_v62  ;;  %v5237_v56 = vrot.slane %v5235_v43, 5  ;;  %v6180_v34 = vrot.slane %v13023_v23, 5  ;;  %v12788_v62 = vld [vmem:[#allocation3 + $0x18] sm:$0xff]  ;;  %v6675_v23 = vpop.permute.xlu1 %6674 }
 0x3a3   : > { %v5248_v11 = vor.u32 %v5247_v2, %v15868_v25  ;;  %v5251_v24 = vshll.u32 %v13025_v59, 16  ;;  %v11893_v49 = vrot.slane %v6105_v39, 9  ;;  %v5265_v27 = vshll.u32 %v13027_v19, 16 }
 0x3a4   : > { %6562 = vrot.lane.b32.xlu0 %v12785_v61, %s13190_s23  ;;  %v7035_v37 = vsel %vm6888_vm10, %v6604_v10, %v6673_v63  ;;  %v5238_v42 = vor.u32 %v5237_v56, %v5234_v50  ;;  %v5259_v56 = vshll.u32 %v5075_v0, 16  ;;  %vm8763_vm5 = vcmask 1042434  }
 0x3a5   : > { %v5249_v47 = vrot.slane %v5248_v11, 4  ;;  %v6178_v36 = vsel %vm13306_vm4, %v11893_v49, %v6177_v1  ;;  %v5253_v14 = vrot.slane %v5251_v24, 5  ;;  %v15896_v11 = vrot.slane %v5265_v27, 5 }
 0x3a6   : > { %v3443_v40 = vpop.permute.xlu0 %3442  ;;  %6832 = vrot.lane.b32.xlu2 %v6804_v57, %s13190_s23  ;;  %v6181_v57 = vsel %vm13306_vm4, %v6179_v41, %v6180_v34  ;;  %v5239_v43 = vrot.slane %v5238_v42, 4  ;;  %v6842_v2 = vunpack.c.l.b16 %v6178_v36  ;;  %v5261_v24 = vrot.slane %v5259_v56, 5 }
 0x3a7   : > { %v3770_v60 = vsel %vm17705_vm15, %v3737_v33, %v3443_v40  ;;  %v6843_v21 = vunpack.c.l.b16 %v6181_v57  ;;  %v11861_v40 = vrot.slane %v4888_v55, 9  ;;  %v13026_v33 = vld [vmem:[#allocation3 + $0x14] sm:$0x1]  ;;  %v15884_v16 = vpop.f32.mrf.mxu1  ;;  %v6106_v57 = vld [vmem:[#allocation3 + $0x30] sm:$0xe]  ;;  %vm8765_vm6 = vcmask 1043459  }
 0x3a8   : > { %v3803_v45 = vsel %vm17706_vm1, %v3770_v60, %v15678_v9  ;;  %v6805_v9 = vpack.c.b16 %v6787_v44, %v6786_v31  ;;  %v4963_v32 = vrot.slane %v13026_v33, 5  ;;  %17709 = vst [vmem:[#allocation11_spill] sm:$0xff] %v15884_v16  ;;  %v5254_v60 = vsel %vm13361_vm7, %v5249_v47, %v5253_v14  ;;  %v6809_v44 = vpop.permute.xlu2 %6808  ;;  %v13029_v47 = vld [vmem:[#allocation3 + $0x38] sm:$0x1] }
 0x3a9   : > { %11859 = vmatmul.msk.bf16.gmra.mxu0 %vm17707_vm2, %v3803_v45  ;;  %v5269_v45 = vshrl.u32 %v13027_v19, 16  ;;  %v6873_v31 = vpack.c.b16 %v6843_v21, %v6842_v2  ;;  %v6579_v10 = vunpack.c.l.b16 %v5254_v60  ;;  %v7083_v50 = vsel %vm6888_vm10, %v12788_v62, %v6809_v44  ;;  %v13031_v21 = vld [vmem:[#allocation3 + $0x5c] sm:$0x1]  ;;  %v4889_v60 = vld [vmem:[#allocation3 + $0x18] sm:$0xe] }
 0x3aa   : > { %12244 = vmatmul.msk.bf16.vlgmr.msrb.gmra.mxu1 %vm6888_vm10, %v15299_v38  ;;  %v13024_v38 = vld [vmem:[#allocation3 + $0x10] sm:$0xf]  ;;  %v6187_v36 = vrot.slane %v13029_v47, 5  ;;  %v11862_v62 = vrot.slane %v4889_v60, 9  ;;  %vm8767_vm0 = vcmask 1044484  }
 0x3ab   : > { %v4960_v18 = vrot.slane %v13024_v38, 5  ;;  %v5271_v39 = vrot.slane %v5269_v45, 4 }
 0x3ac   : > { %6564 = vrot.lane.b32.xlu0 %v12786_v30, %s13190_s23  ;;  %v5244_v30 = vsel %vm13361_vm7, %v5239_v43, %v15868_v25 }
 0x3ad   : > { %v4962_v29 = vrot.slane %v4960_v18, 4  ;;  %v4961_v1 = vsel %vm13306_vm4, %v11861_v40, %v4960_v18  ;;  %v5275_v40 = vshll.u32 %v13031_v21, 16 }
 0x3ae   : > { %v6537_v61 = vpop.permute.xlu0 %6536  ;;  %6834 = vrot.lane.b32.xlu2 %v6805_v9, %s13190_s23  ;;  %v5256_v9 = vshrl.u32 %v5075_v0, 16  ;;  %v6426_v34 = vunpack.c.l.b16 %v4961_v1  ;;  %v13032_v1 = vld [vmem:[#allocation3 + $0x20] sm:$0x1] }
 0x3af   : > { %7691 = vmatmul.bf16.gmra.mxu3 %v7035_v37  ;;  %v6955_v51 = vsel %vm6888_vm10, %v6456_v4, %v6537_v61  ;;  %v4964_v63 = vsel %vm13306_vm4, %v4962_v29, %v4963_v32  ;;  %v13028_v4 = vld [vmem:[#allocation3 + $0x34] sm:$0xf]  ;;  %v6578_v61 = vunpack.c.l.b16 %v5244_v30  ;;  %v15901_v42 = vpop.f32.mrf.mxu1  ;;  %v13030_v29 = vld [vmem:[#allocation3 + $0x1c] sm:$0xf]  ;;  %v11894_v32 = vrot.slane %v6106_v57, 9 }
 0x3b0   : > { %7582 = vmatmul.bf16.vlgmr.msrb.gmra.mxu2 %v6955_v51  ;;  %v6184_v41 = vrot.slane %v13028_v4, 5  ;;  %v6427_v37 = vunpack.c.l.b16 %v4964_v63  ;;  %v5258_v59 = vrot.slane %v5256_v9, 4  ;;  %v5272_v51 = vor.u32 %v5271_v39, %v15896_v11  ;;  %17710 = vst [vmem:[#allocation12_spill] sm:$0xff] %v15901_v42  ;;  %v5077_v4 = vld [vmem:[#allocation3 + $0x60] sm:$0xf]  ;;  %v6811_v56 = vpop.permute.xlu2 %6810 }
 0x3b1   : > { %v6605_v38 = vpack.c.b16 %v6579_v10, %v6578_v61  ;;  %v4967_v14 = vrot.slane %v13030_v29, 5  ;;  %v5277_v44 = vrot.slane %v5275_v40, 5  ;;  %v4970_v63 = vrot.slane %v13032_v1, 5  ;;  %v13033_v10 = vld [vmem:[#allocation3 + $0x64] sm:$0xf]  ;;  %v6677_v29 = vpop.permute.xlu1 %6676 }
 0x3b2   : > { %v6186_v18 = vrot.slane %v6184_v41, 4  ;;  %v6457_v49 = vpack.c.b16 %v6427_v37, %v6426_v34  ;;  %v5262_v0 = vor.u32 %v5261_v24, %v5258_v59  ;;  %v5273_v19 = vrot.slane %v5272_v51, 4  ;;  %v12789_v37 = vld [vmem:[#allocation3 + $0x24] sm:$0xff] }
 0x3b3   : > { %v7039_v55 = vsel %vm6888_vm10, %v6605_v38, %v6675_v23  ;;  %v6185_v27 = vsel %vm13306_vm4, %v11894_v32, %v6184_v41  ;;  %v4969_v45 = vrot.slane %v4967_v14, 4  ;;  %v5289_v9 = vshll.u32 %v13033_v10, 16  ;;  %v13034_v38 = vld [vmem:[#allocation3 + $0x40] sm:$0xf] }
 0x3b4   : > { %v6188_v43 = vsel %vm13306_vm4, %v6186_v18, %v6187_v36  ;;  %v5263_v30 = vrot.slane %v5262_v0, 4  ;;  %v6844_v39 = vunpack.c.l.b16 %v6185_v27  ;;  %v4968_v41 = vsel %vm13306_vm4, %v11862_v62, %v4967_v14  ;;  %v6107_v0 = vld [vmem:[#allocation3 + $0x3c] sm:$0xe]  ;;  %v13035_v27 = vld [vmem:[#allocation3 + $0x44] sm:$0x1] }
 0x3b5   : > { %v6845_v2 = vunpack.c.l.b16 %v6188_v43  ;;  %v4971_v61 = vsel %vm13306_vm4, %v4969_v45, %v4970_v63  ;;  %v5280_v59 = vshrl.u32 %v5077_v4, 16  ;;  %v7087_v51 = vsel %vm6888_vm10, %v12789_v37, %v6811_v56  ;;  %v13037_v62 = vld [vmem:[#allocation3 + $0x68] sm:$0x1] }
 0x3b6   : > { %v6539_v25 = vpop.permute.xlu0 %6538  ;;  %v5268_v23 = vsel %vm13361_vm7, %v5263_v30, %v15896_v11  ;;  %v5291_v57 = vrot.slane %v5289_v9, 5  ;;  %v6429_v47 = vunpack.c.l.b16 %v4971_v61  ;;  %v6428_v14 = vunpack.c.l.b16 %v4968_v41 }
 0x3b7   : > { %v6959_v33 = vsel %vm6888_vm10, %v6457_v49, %v6539_v25  ;;  %v6874_v34 = vpack.c.b16 %v6845_v2, %v6844_v39  ;;  %v6191_v25 = vrot.slane %v13034_v38, 5  ;;  %v15917_v24 = vpop.f32.mrf.mxu1  ;;  %v5283_v49 = vshll.u32 %v5077_v4, 16 }
 0x3b8   : > { %17711 = vst [vmem:[#allocation13_spill] sm:$0xff] %v15917_v24  ;;  %v6580_v36 = vunpack.c.l.b16 %v5268_v23  ;;  %v6458_v60 = vpack.c.b16 %v6429_v47, %v6428_v14  ;;  %v6194_v45 = vrot.slane %v13035_v27, 5  ;;  %v5299_v1 = vshll.u32 %v13037_v62, 16  ;;  %v13038_v23 = vld [vmem:[#allocation3 + $0x2c] sm:$0x1]  ;;  %v6813_v47 = vpop.permute.xlu2 %6812 }
 0x3b9   : > { %7760 = vmatmul.bf16.vlgmr.msrb.gmra.mxu0 %v7083_v50  ;;  %v5293_v50 = vshrl.u32 %v13033_v10, 16  ;;  %v6193_v40 = vrot.slane %v6191_v25, 4  ;;  %v5285_v32 = vrot.slane %v5283_v49, 5  ;;  %v4890_v10 = vld [vmem:[#allocation3 + $0x24] sm:$0xe]  ;;  %v6679_v62 = vpop.permute.xlu1 %6678 }
 0x3ba   : > { %12245 = vmatmul.msk.bf16.gmra.mxu1 %vm6888_vm10, %v6873_v31  ;;  %v5278_v31 = vsel %vm13361_vm7, %v5273_v19, %v5277_v44  ;;  %v13036_v44 = vld [vmem:[#allocation3 + $0x28] sm:$0xf]  ;;  %v5301_v37 = vrot.slane %v5299_v1, 5  ;;  %v11863_v61 = vrot.slane %v4890_v10, 9 }
 0x3bb   : > { %v6581_v18 = vunpack.c.l.b16 %v5278_v31  ;;  %v4974_v2 = vrot.slane %v13036_v44, 5  ;;  %v11895_v31 = vrot.slane %v6107_v0, 9  ;;  %v6195_v4 = vsel %vm13306_vm4, %v6193_v40, %v6194_v45  ;;  %v13040_v40 = vld [vmem:[#allocation3 + $0x4c] sm:$0xf] }
 0x3bc   : > { %v6847_v41 = vunpack.c.l.b16 %v6195_v4 }
 0x3bd   : > { %v6606_v11 = vpack.c.b16 %v6581_v18, %v6580_v36  ;;  %v6192_v56 = vsel %vm13306_vm4, %v11895_v31, %v6191_v25  ;;  %v4976_v39 = vrot.slane %v4974_v2, 4  ;;  %v4975_v25 = vsel %vm13306_vm4, %v11863_v61, %v4974_v2  ;;  %v13042_v61 = vld [vmem:[#allocation3 + $0x34] sm:$0xf] }
 0x3be   : > { %v6541_v21 = vpop.permute.xlu0 %6540  ;;  %v6846_v36 = vunpack.c.l.b16 %v6192_v56  ;;  %v6108_v56 = vld [vmem:[#allocation3 + $0x48] sm:$0xe] }
 0x3bf   : > { %7696 = vmatmul.bf16.gmra.mxu3 %v7039_v55  ;;  %v5295_v55 = vrot.slane %v5293_v50, 4  ;;  %v7043_v19 = vsel %vm6888_vm10, %v6606_v11, %v6677_v29  ;;  %v6963_v63 = vsel %vm6888_vm10, %v6458_v60, %v6541_v21  ;;  %v15923_v30 = vpop.f32.mrf.mxu1  ;;  %v12790_v29 = vld [vmem:[#allocation3 + $0x30] sm:$0xff] }
 0x3c0   : > { %7587 = vmatmul.bf16.gmra.mxu2 %v6959_v33  ;;  %v5282_v33 = vrot.slane %v5280_v59, 4  ;;  %17712 = vst [vmem:[#allocation14_spill] sm:$0xff] %v15923_v30  ;;  %v5079_v59 = vld [vmem:[#allocation3 + $0x6c] sm:$0xf]  ;;  %v6875_v21 = vpack.c.b16 %v6847_v41, %v6846_v36  ;;  %v7091_v60 = vsel %vm6888_vm10, %v12790_v29, %v6813_v47  ;;  %v4891_v29 = vld [vmem:[#allocation3 + $0x30] sm:$0xe] }
 0x3c1   : > { %v5296_v43 = vor.u32 %v5295_v55, %v5291_v57  ;;  %v5307_v0 = vshll.u32 %v5079_v59, 16 }
 0x3c2   : > { %v5286_v9 = vor.u32 %v5285_v32, %v5282_v33  ;;  %v6198_v33 = vrot.slane %v13040_v40, 5 }
 0x3c3   : > { %v5297_v50 = vrot.slane %v5296_v43, 4  ;;  %v5304_v43 = vshrl.u32 %v5079_v59, 16  ;;  %v5309_v10 = vrot.slane %v5307_v0, 5  ;;  %v11896_v59 = vrot.slane %v6108_v56, 9  ;;  %v13045_v0 = vld [vmem:[#allocation3 + $0x7c] sm:$0xf] }
 0x3c4   : > { %v5287_v38 = vrot.slane %v5286_v9, 4  ;;  %v6200_v31 = vrot.slane %v6198_v33, 4 }
 0x3c5   : > { %v5302_v18 = vsel %vm13361_vm7, %v5297_v50, %v5301_v37  ;;  %v5306_v4 = vrot.slane %v5304_v43, 4  ;;  %v13041_v37 = vld [vmem:[#allocation3 + $0x50] sm:$0x1]  ;;  %v6199_v36 = vsel %vm13306_vm4, %v11896_v59, %v6198_v33 }
 0x3c6   : > { %v5292_v11 = vsel %vm13361_vm7, %v5287_v38, %v5291_v57  ;;  %v6583_v32 = vunpack.c.l.b16 %v5302_v18  ;;  %v6430_v57 = vunpack.c.l.b16 %v4975_v25  ;;  %v6201_v41 = vrot.slane %v13041_v37, 5 }
 0x3c7   : > { %v6582_v44 = vunpack.c.l.b16 %v5292_v11  ;;  %v15940_v2 = vpop.f32.mrf.mxu1 }
 0x3c8   : > { %17713 = vst [vmem:[#allocation15_spill] sm:$0xff] %v15940_v2 }
 0x3c9   : > { %7765 = vmatmul.bf16.gmra.mxu0 %v7087_v51  ;;  %v13039_v51 = vld [vmem:[#allocation3 + $0x70] sm:$0xf]  ;;  %v6607_v1 = vpack.c.b16 %v6583_v32, %v6582_v44  ;;  %v6815_v44 = vpop.permute.xlu2 %6814 }
 0x3ca   : > { %12246 = vmatmul.msk.bf16.gmra.mxu1 %vm6888_vm10, %v6874_v34  ;;  %v4977_v34 = vrot.slane %v13038_v23, 5  ;;  %v5313_v49 = vshll.u32 %v13039_v51, 16  ;;  %v5317_v55 = vshrl.u32 %v13039_v51, 16  ;;  %v4981_v23 = vrot.slane %v13042_v61, 5  ;;  %v13046_v61 = vld [vmem:[#allocation3 + $0x58] sm:$0xf] }
 0x3cb   : > { %v6202_v51 = vsel %vm13306_vm4, %v6200_v31, %v6201_v41 }
 0x3cc   : > { %v4978_v14 = vsel %vm13306_vm4, %v4976_v39, %v4977_v34  ;;  %v5319_v27 = vrot.slane %v5317_v55, 4  ;;  %v7047_v39 = vsel %vm6888_vm10, %v6607_v1, %v6679_v62  ;;  %v13043_v34 = vld [vmem:[#allocation3 + $0x74] sm:$0x1]  ;;  %v4983_v25 = vrot.slane %v4981_v23, 4  ;;  %v12791_v1 = vld [vmem:[#allocation3 + $0x3c] sm:$0xff] }
 0x3cd   : > { %v6431_v45 = vunpack.c.l.b16 %v4978_v14  ;;  %v5323_v38 = vshll.u32 %v13043_v34, 16  ;;  %v6849_v11 = vunpack.c.l.b16 %v6202_v51  ;;  %v6848_v62 = vunpack.c.l.b16 %v6199_v36 }
 0x3ce   : > { %v6205_v34 = vrot.slane %v13046_v61, 5  ;;  %v12792_v61 = vld [vmem:[#allocation3 + $0x48] sm:$0xff] }
 0x3cf   : > { %7701 = vmatmul.bf16.gmra.mxu3 %v7043_v19  ;;  %v15938_v19 = vrot.slane %v5313_v49, 5  ;;  %v6459_v50 = vpack.c.b16 %v6431_v45, %v6430_v57  ;;  %v5310_v49 = vor.u32 %v5309_v10, %v5306_v4  ;;  %v15948_v47 = vpop.f32.mrf.mxu1  ;;  %v5325_v14 = vrot.slane %v5323_v38, 5 }
 0x3d0   : > { %7592 = vmatmul.bf16.gmra.mxu2 %v6963_v63  ;;  %v6543_v63 = vpop.permute.xlu0 %6542  ;;  %17714 = vst [vmem:[#allocation16_spill] sm:$0xff] %v15948_v47  ;;  %v5341_v45 = vshrl.u32 %v13045_v0, 16  ;;  %v11864_v57 = vrot.slane %v4891_v29, 9  ;;  %v6876_v31 = vpack.c.b16 %v6849_v11, %v6848_v62  ;;  %v6109_v11 = vld [vmem:[#allocation3 + $0x54] sm:$0xe] }
 0x3d1   : > { %v5320_v9 = vor.u32 %v5319_v27, %v15938_v19  ;;  %v6967_v18 = vsel %vm6888_vm10, %v6459_v50, %v6543_v63  ;;  %v5311_v32 = vrot.slane %v5310_v49, 4  ;;  %v5337_v27 = vshll.u32 %v13045_v0, 16  ;;  %v13049_v0 = vld [vmem:[#allocation3 + $0x5c] sm:$0x1] }
 0x3d2   : > { %v4982_v4 = vsel %vm13306_vm4, %v11864_v57, %v4981_v23  ;;  %v7095_v50 = vsel %vm6888_vm10, %v12791_v1, %v6815_v44  ;;  %v5343_v37 = vrot.slane %v5341_v45, 4  ;;  %v11897_v62 = vrot.slane %v6109_v11, 9 }
 0x3d3   : > { %v5321_v55 = vrot.slane %v5320_v9, 4  ;;  %v5316_v63 = vsel %vm13361_vm7, %v5311_v32, %v15938_v19  ;;  %v6432_v19 = vunpack.c.l.b16 %v4982_v4  ;;  %v13048_v32 = vld [vmem:[#allocation3 + $0x80] sm:$0x1] }
 0x3d4   : > { %v6584_v38 = vunpack.c.l.b16 %v5316_v63  ;;  %v6206_v63 = vsel %vm13306_vm4, %v11897_v62, %v6205_v34 }
 0x3d5   : > { %v5326_v43 = vsel %vm13361_vm7, %v5321_v55, %v5325_v14 }
 0x3d6   : > { %v6585_v10 = vunpack.c.l.b16 %v5326_v43  ;;  %v5347_v43 = vshll.u32 %v13048_v32, 16 }
 0x3d7   : > { %v15963_v51 = vpop.f32.mrf.mxu1 }
 0x3d8   : > { %v6608_v59 = vpack.c.b16 %v6585_v10, %v6584_v38  ;;  %17715 = vst [vmem:[#allocation17_spill] sm:$0xff] %v15963_v51  ;;  %v6545_v23 = vpop.permute.xlu0 %6544  ;;  %v13050_v10 = vld [vmem:[#allocation3 + $0x44] sm:$0x1]  ;;  %v6850_v38 = vunpack.c.l.b16 %v6206_v63 }
 0x3d9   : > { %7770 = vmatmul.bf16.gmra.mxu0 %v7091_v60  ;;  %v5081_v60 = vld [vmem:[#allocation3 + $0x78] sm:$0xf] }
 0x3da   : > { %12247 = vmatmul.msk.bf16.gmra.mxu1 %vm6888_vm10, %v6875_v21  ;;  %v13044_v21 = vld [vmem:[#allocation3 + $0x38] sm:$0x1]  ;;  %v5328_v9 = vshrl.u32 %v5081_v60, 16  ;;  %v5331_v56 = vshll.u32 %v5081_v60, 16 }
 0x3db   : > { %v4984_v40 = vrot.slane %v13044_v21, 5  ;;  %v13047_v21 = vld [vmem:[#allocation3 + $0x40] sm:$0xf] }
 0x3dc   : > { %v5330_v49 = vrot.slane %v5328_v9, 4  ;;  %v5333_v55 = vrot.slane %v5331_v56, 5  ;;  %v4991_v9 = vrot.slane %v13050_v10, 5 }
 0x3dd   : > { %v4985_v33 = vsel %vm13306_vm4, %v4983_v25, %v4984_v40  ;;  %v6207_v25 = vrot.slane %v6205_v34, 4  ;;  %v4988_v40 = vrot.slane %v13047_v21, 5 }
 0x3de   : > { %v6433_v41 = vunpack.c.l.b16 %v4985_v33  ;;  %v5334_v45 = vor.u32 %v5333_v55, %v5330_v49  ;;  %v5349_v33 = vrot.slane %v5347_v43, 5  ;;  %v5083_v43 = vld [vmem:[#allocation3 + $0x84] sm:$0xf] }
 0x3df   : > { %7706 = vmatmul.bf16.gmra.mxu3 %v7047_v39  ;;  %v5339_v39 = vrot.slane %v5337_v27, 5  ;;  %v6208_v27 = vrot.slane %v13049_v0, 5  ;;  %v4990_v1 = vrot.slane %v4988_v40, 4  ;;  %v5355_v10 = vshll.u32 %v5083_v43, 16 }
 0x3e0   : > { %7597 = vmatmul.bf16.gmra.mxu2 %v6967_v18  ;;  %v6681_v18 = vpop.permute.xlu1 %6680  ;;  %v6460_v29 = vpack.c.b16 %v6433_v41, %v6432_v19  ;;  %v15973_v41 = vpop.f32.mrf.mxu1 }
 0x3e1   : > { %v5344_v36 = vor.u32 %v5343_v37, %v5339_v39  ;;  %v7051_v14 = vsel %vm6888_vm10, %v6608_v59, %v6681_v18  ;;  %v6209_v57 = vsel %vm13306_vm4, %v6207_v25, %v6208_v27  ;;  %v6817_v37 = vpop.permute.xlu2 %6816  ;;  %17716 = vst [vmem:[#allocation18_spill] sm:$0xff] %v15973_v41  ;;  %v4992_v19 = vsel %vm13306_vm4, %v4990_v1, %v4991_v9  ;;  %v6547_v27 = vpop.permute.xlu0 %6546  ;;  %v13084_v41 = vld [vmem:[#allocation3 + $0xa4] sm:$0x1] }
 0x3e2   : > { %v6971_v60 = vsel %vm6888_vm10, %v6460_v29, %v6545_v23  ;;  %v6851_v4 = vunpack.c.l.b16 %v6209_v57  ;;  %v7099_v23 = vsel %vm6888_vm10, %v12792_v61, %v6817_v37  ;;  %v13051_v29 = vld [vmem:[#allocation3 + $0x64] sm:$0xf]  ;;  %v13053_v57 = vld [vmem:[#allocation3 + $0x68] sm:$0x1] }
 0x3e3   : > { %v5345_v44 = vrot.slane %v5344_v36, 4  ;;  %v6435_v36 = vunpack.c.l.b16 %v4992_v19  ;;  %v6212_v25 = vrot.slane %v13051_v29, 5  ;;  %v6215_v1 = vrot.slane %v13053_v57, 5 }
 0x3e4   : > { %v6877_v49 = vpack.c.b16 %v6851_v4, %v6850_v38  ;;  %v4893_v38 = vld [vmem:[#allocation3 + $0x48] sm:$0xe] }
 0x3e5   : > { %v5350_v56 = vsel %vm13361_vm7, %v5345_v44, %v5349_v33  ;;  %v6214_v44 = vrot.slane %v6212_v25, 4  ;;  %v13054_v33 = vld [vmem:[#allocation3 + $0x4c] sm:$0xf] }
 0x3e6   : > { %v6587_v59 = vunpack.c.l.b16 %v5350_v56  ;;  %v4995_v63 = vrot.slane %v13054_v33, 5 }
 0x3e7   : > { %v6216_v61 = vsel %vm13306_vm4, %v6214_v44, %v6215_v1 }
 0x3e8   : > { %v6683_v11 = vpop.permute.xlu1 %6682  ;;  %v15985_v56 = vpop.f32.mrf.mxu1 }
 0x3e9   : > { %7775 = vmatmul.bf16.gmra.mxu0 %v7095_v50  ;;  %v5335_v50 = vrot.slane %v5334_v45, 4  ;;  %17717 = vst [vmem:[#allocation19_spill] sm:$0xff] %v15985_v56  ;;  %v6819_v29 = vpop.permute.xlu2 %6818 }
 0x3ea   : > { %12248 = vmatmul.msk.bf16.gmra.mxu1 %vm6888_vm10, %v6876_v31  ;;  %v4892_v31 = vld [vmem:[#allocation3 + $0x3c] sm:$0xe] }
 0x3eb   : > { %v11865_v18 = vrot.slane %v4892_v31, 9  ;;  %v5340_v34 = vsel %vm13361_vm7, %v5335_v50, %v5339_v39  ;;  %v5352_v31 = vshrl.u32 %v5083_v43, 16 }
 0x3ed   : > { %v4989_v55 = vsel %vm13306_vm4, %v11865_v18, %v4988_v40  ;;  %v6110_v40 = vld [vmem:[#allocation3 + $0x60] sm:$0xe]  ;;  %v4997_v18 = vrot.slane %v4995_v63, 4 }
 0x3ee   : > { %v6434_v21 = vunpack.c.l.b16 %v4989_v55  ;;  %v11898_v37 = vrot.slane %v6110_v40, 9  ;;  %v13055_v55 = vld [vmem:[#allocation3 + $0x50] sm:$0x1] }
 0x3ef   : > { %7711 = vmatmul.bf16.gmra.mxu3 %v7051_v14  ;;  %v6586_v14 = vunpack.c.l.b16 %v5340_v34  ;;  %v5354_v34 = vrot.slane %v5352_v31, 4  ;;  %v13057_v40 = vld [vmem:[#allocation3 + $0x70] sm:$0xf] }
 0x3f0   : > { %7602 = vmatmul.bf16.gmra.mxu2 %v6971_v60  ;;  %v13052_v60 = vld [vmem:[#allocation3 + $0x88] sm:$0xf]  ;;  %v6461_v45 = vpack.c.b16 %v6435_v36, %v6434_v21  ;;  %v6213_v19 = vsel %vm13306_vm4, %v11898_v37, %v6212_v25  ;;  %v4998_v36 = vrot.slane %v13055_v55, 5  ;;  %v6219_v57 = vrot.slane %v13057_v40, 5 }
 0x3f1   : > { %v6609_v32 = vpack.c.b16 %v6587_v59, %v6586_v14  ;;  %v5361_v39 = vshll.u32 %v13052_v60, 16  ;;  %v5365_v0 = vshrl.u32 %v13052_v60, 16  ;;  %v5357_v59 = vrot.slane %v5355_v10, 5  ;;  %v13058_v10 = vld [vmem:[#allocation3 + $0x94] sm:$0xf] }
 0x3f2   : > { %v6975_v4 = vsel %vm6888_vm10, %v6461_v45, %v6547_v27  ;;  %v11866_v14 = vrot.slane %v4893_v38, 9  ;;  %v6852_v43 = vunpack.c.l.b16 %v6213_v19  ;;  %v4999_v60 = vsel %vm13306_vm4, %v4997_v18, %v4998_v36  ;;  %v15995_v27 = vpop.f32.mrf.mxu1 }
 0x3f3   : > { %v7055_v62 = vsel %vm6888_vm10, %v6609_v32, %v6683_v11  ;;  %v5363_v9 = vrot.slane %v5361_v39, 5  ;;  %v5367_v50 = vrot.slane %v5365_v0, 4  ;;  %v13056_v11 = vld [vmem:[#allocation3 + $0x8c] sm:$0x1]  ;;  %v12793_v32 = vld [vmem:[#allocation3 + $0x54] sm:$0xff]  ;;  %v5358_v0 = vor.u32 %v5357_v59, %v5354_v34  ;;  %17718 = vst [vmem:[#allocation20_spill] sm:$0xff] %v15995_v27 }
 0x3f4   : > { %v5371_v21 = vshll.u32 %v13056_v11, 16  ;;  %v4996_v39 = vsel %vm13306_vm4, %v11866_v14, %v4995_v63  ;;  %v7103_v45 = vsel %vm6888_vm10, %v12793_v32, %v6819_v29  ;;  %v5085_v63 = vld [vmem:[#allocation3 + $0x90] sm:$0xf]  ;;  %v5389_v37 = vshrl.u32 %v13058_v10, 16  ;;  %v6111_v34 = vld [vmem:[#allocation3 + $0x6c] sm:$0xe] }
 0x3f5   : > { %v6436_v33 = vunpack.c.l.b16 %v4996_v39  ;;  %v5359_v31 = vrot.slane %v5358_v0, 4  ;;  %v6221_v18 = vrot.slane %v6219_v57, 4  ;;  %v13059_v59 = vld [vmem:[#allocation3 + $0x74] sm:$0x1]  ;;  %v5376_v29 = vshrl.u32 %v5085_v63, 16 }
 0x3f6   : > { %v5373_v1 = vrot.slane %v5371_v21, 5  ;;  %v5379_v11 = vshll.u32 %v5085_v63, 16  ;;  %v5391_v32 = vrot.slane %v5389_v37, 4  ;;  %v11899_v39 = vrot.slane %v6111_v34, 9 }
 0x3f7   : > { %v5364_v19 = vsel %vm13361_vm7, %v5359_v31, %v5363_v9 }
 0x3f8   : > { %v6220_v31 = vsel %vm13306_vm4, %v11899_v39, %v6219_v57  ;;  %v5381_v63 = vrot.slane %v5379_v11, 5  ;;  %v13062_v57 = vld [vmem:[#allocation3 + $0x64] sm:$0xf] }
 0x3f9   : > { %7780 = vmatmul.bf16.gmra.mxu0 %v7099_v23  ;;  %v5368_v23 = vor.u32 %v5367_v50, %v5363_v9  ;;  %v5385_v50 = vshll.u32 %v13058_v10, 16  ;;  %v6588_v9 = vunpack.c.l.b16 %v5364_v19  ;;  %v5009_v34 = vrot.slane %v13062_v57, 5 }
 0x3fa   : > { %12249 = vmatmul.msk.bf16.gmra.mxu1 %vm6888_vm10, %v6877_v49  ;;  %v6853_v49 = vunpack.c.l.b16 %v6216_v61  ;;  %v6549_v61 = vpop.permute.xlu0 %6548 }
 0x3fb   : > { %v5369_v25 = vrot.slane %v5368_v23, 4  ;;  %v6222_v23 = vrot.slane %v13059_v59, 5  ;;  %v16004_v21 = vrot.slane %v5385_v50, 5  ;;  %v13061_v50 = vld [vmem:[#allocation3 + $0x5c] sm:$0x1] }
 0x3fc   : > { %v6878_v44 = vpack.c.b16 %v6853_v49, %v6852_v43  ;;  %v13060_v49 = vld [vmem:[#allocation3 + $0x58] sm:$0xf]  ;;  %v16009_v43 = vld [vmem:[%s17643_s4] ss:$0 sm:$0xff]  ;;  %v5005_v37 = vrot.slane %v13061_v50, 5  ;;  %v5011_v50 = vrot.slane %v5009_v34, 4 }
 0x3fd   : > { %v5002_v55 = vrot.slane %v13060_v49, 5  ;;  %v6223_v0 = vsel %vm13306_vm4, %v6221_v18, %v6222_v23  ;;  %v5392_v10 = vor.u32 %v5391_v32, %v16004_v21  ;;  %v6821_v18 = vpop.permute.xlu2 %6820  ;;  %v13063_v59 = vld [vmem:[#allocation3 + $0x98] sm:$0x1]  ;;  %v12794_v49 = vld [vmem:[#allocation3 + $0x60] sm:$0xff]  ;;  %v16055_v39 = vadd.f32 %v16009_v43, %v15675_v35 }
 0x3fe   : > { %v5395_v23 = vshll.u32 %v13063_v59, 16 }
 0x3ff   : > { %7716 = vmatmul.bf16.gmra.mxu3 %v7055_v62  ;;  %v6437_v62 = vunpack.c.l.b16 %v4999_v60  ;;  %v6685_v60 = vpop.permute.xlu1 %6684  ;;  %v5004_v40 = vrot.slane %v5002_v55, 4 }
 0x400   : > { %7607 = vmatmul.bf16.gmra.mxu2 %v6975_v4  ;;  %v5374_v4 = vsel %vm13361_vm7, %v5369_v25, %v5373_v1  ;;  %v16015_v25 = vadd.f32 %v16009_v43, %v15425_v13  ;;  %v16030_v13 = vadd.f32 %v16009_v43, %v15489_v6  ;;  %v16039_v6 = vadd.f32 %v16009_v43, %v15549_v20 }
 0x401   : > { %v6462_v38 = vpack.c.b16 %v6437_v62, %v6436_v33  ;;  %v6589_v36 = vunpack.c.l.b16 %v5374_v4  ;;  %v4894_v62 = vld [vmem:[#allocation3 + $0x54] sm:$0xe]  ;;  %v5378_v4 = vrot.slane %v5376_v29, 4  ;;  %v5006_v29 = vsel %vm13306_vm4, %v5004_v40, %v5005_v37  ;;  %v4895_v40 = vld [vmem:[#allocation3 + $0x60] sm:$0xe] }
 0x402   : > { %v11867_v19 = vrot.slane %v4894_v62, 9  ;;  %v16051_v20 = vadd.f32 %v16009_v43, %v15634_v58  ;;  %v16064_v58 = vadd.f32 %v16009_v43, %v15730_v28  ;;  %v16075_v28 = vadd.f32 %v16009_v43, %v15760_v22 }
 0x403   : > { %v6979_v14 = vsel %vm6888_vm10, %v6462_v38, %v6549_v61  ;;  %v6610_v1 = vpack.c.b16 %v6589_v36, %v6588_v9  ;;  %v16035_v38 = vadd.f32 %v16009_v43, %v15524_v46  ;;  %v6854_v36 = vunpack.c.l.b16 %v6220_v31 }
 0x404   : > { %v16045_v46 = vadd.f32 %v16009_v43, %v15588_v8  ;;  %v5003_v32 = vsel %vm13306_vm4, %v11867_v19, %v5002_v55  ;;  %v5382_v9 = vor.u32 %v5381_v63, %v5378_v4  ;;  %v6439_v8 = vunpack.c.l.b16 %v5006_v29  ;;  %v4896_v4 = vld [vmem:[#allocation3 + $0x6c] sm:$0xe]  ;;  %v13068_v29 = vld [vmem:[#allocation3 + $0x74] sm:$0x1] }
 0x405   : > { %v7059_v61 = vsel %vm6888_vm10, %v6610_v1, %v6685_v60  ;;  %v5393_v60 = vrot.slane %v5392_v10, 4  ;;  %v13065_v1 = vld [vmem:[#allocation3 + $0x7c] sm:$0xf]  ;;  %v5397_v55 = vrot.slane %v5395_v23, 5  ;;  %v16060_v63 = vadd.f32 %v16009_v43, %v15699_v52  ;;  %v6551_v23 = vpop.permute.xlu0 %6550 }
 0x406   : > { %v6226_v31 = vrot.slane %v13065_v1, 5  ;;  %v6438_v10 = vunpack.c.l.b16 %v5003_v32  ;;  %v5383_v19 = vrot.slane %v5382_v9, 4  ;;  %v13067_v52 = vld [vmem:[#allocation3 + $0x7c] sm:$0xf] }
 0x407   : > { %v5398_v57 = vsel %vm13361_vm7, %v5393_v60, %v5397_v55  ;;  %v5023_v59 = vrot.slane %v13067_v52, 5 }
 0x408   : > { %v6463_v32 = vpack.c.b16 %v6439_v8, %v6438_v10  ;;  %v5388_v60 = vsel %vm13361_vm7, %v5383_v19, %v16004_v21  ;;  %v6591_v22 = vunpack.c.l.b16 %v5398_v57  ;;  %v4897_v8 = vld [vmem:[#allocation3 + $0x78] sm:$0xe]  ;;  %v13069_v10 = vld [vmem:[#allocation3 + $0x80] sm:$0x1]  ;;  %v16091_v21 = vadd.f32 %v16009_v43, %v15790_v53 }
 0x409   : > { %7785 = vmatmul.bf16.gmra.mxu0 %v7103_v45  ;;  %v16019_v45 = vadd.f32 %v16009_v43, %v15457_v5  ;;  %v6855_v5 = vunpack.c.l.b16 %v6223_v0  ;;  %v7107_v0 = vsel %vm6888_vm10, %v12794_v49, %v6821_v18  ;;  %v11868_v49 = vrot.slane %v4895_v40, 9  ;;  %v4898_v43 = vld [vmem:[#allocation3 + $0x84] sm:$0xe] }
 0x40a   : > { %12250 = vmatmul.msk.bf16.gmra.mxu1 %vm6888_vm10, %v6878_v44  ;;  %v16021_v44 = vpop.f32.mrf.mxu1  ;;  %v5025_v52 = vrot.slane %v5023_v59, 4  ;;  %v6590_v57 = vunpack.c.l.b16 %v5388_v60  ;;  %v13072_v60 = vld [vmem:[#allocation3 + $0x88] sm:$0xf] }
 0x40b   : > { %17719 = vst [vmem:[#allocation21_spill] sm:$0xff] %v16021_v44  ;;  %v6879_v62 = vpack.c.b16 %v6855_v5, %v6854_v36  ;;  %v11869_v36 = vrot.slane %v4896_v4, 9  ;;  %v5010_v1 = vsel %vm13306_vm4, %v11868_v49, %v5009_v34  ;;  %v6983_v4 = vsel %vm6888_vm10, %v6463_v32, %v6551_v23  ;;  %v6113_v49 = vld [vmem:[#allocation3 + $0x84] sm:$0xe] }
 0x40c   : > { %v11870_v23 = vrot.slane %v4897_v8, 9 }
 0x40f   : > { %7721 = vmatmul.bf16.gmra.mxu3 %v7059_v61  ;;  %v13066_v61 = vld [vmem:[#allocation3 + $0x68] sm:$0x1] }
 0x410   : > { %7612 = vmatmul.bf16.gmra.mxu2 %v6979_v14  ;;  %v13064_v14 = vld [vmem:[#allocation3 + $0x70] sm:$0xf]  ;;  %v5012_v18 = vrot.slane %v13066_v61, 5  ;;  %v6229_v61 = vrot.slane %v13069_v10, 5  ;;  %v6440_v10 = vunpack.c.l.b16 %v5010_v1  ;;  %v11901_v1 = vrot.slane %v6113_v49, 9 }
 0x411   : > { %v5016_v11 = vrot.slane %v13064_v14, 5  ;;  %v5019_v14 = vrot.slane %v13068_v29, 5  ;;  %v13071_v29 = vld [vmem:[#allocation3 + $0x80] sm:$0x1]  ;;  %v13075_v49 = vld [vmem:[%s17641_s2] ss:$0 sm:$0xff] }
 0x412   : > { %v5013_v9 = vsel %vm13306_vm4, %v5011_v50, %v5012_v18  ;;  %v13070_v50 = vld [vmem:[#allocation3 + $0x88] sm:$0xf] }
 0x413   : > { %v16023_v33 = vpop.f32.mrf.mxu2  ;;  %v5018_v5 = vrot.slane %v5016_v11, 4  ;;  %v5017_v40 = vsel %vm13306_vm4, %v11869_v36, %v5016_v11  ;;  %v6233_v18 = vrot.slane %v13070_v50, 5  ;;  %v6441_v19 = vunpack.c.l.b16 %v5013_v9  ;;  %v6687_v11 = vpop.permute.xlu1 %6686 }
 0x414   : > { %17720 = vst [vmem:[#allocation22_spill] sm:$0xff] %v16023_v33  ;;  %v6611_v50 = vpack.c.b16 %v6591_v22, %v6590_v57  ;;  %v6442_v53 = vunpack.c.l.b16 %v5017_v40  ;;  %v5024_v9 = vsel %vm13306_vm4, %v11870_v23, %v5023_v59  ;;  %v6823_v22 = vpop.permute.xlu2 %6822  ;;  %v13073_v40 = vld [vmem:[#allocation3 + $0x8c] sm:$0x1]  ;;  %v13074_v59 = vld [vmem:[#allocation3 + $0x94] sm:$0xf] }
 0x415   : > { %v5020_v55 = vsel %vm13306_vm4, %v5018_v5, %v5019_v14  ;;  %v5026_v14 = vrot.slane %v13071_v29, 5  ;;  %v16105_v29 = vpack.c.b16 %v6441_v19, %v6440_v10  ;;  %v6240_v23 = vrot.slane %v13074_v59, 5  ;;  %v5087_v19 = vld [vmem:[#allocation3 + $0x9c] sm:$0xf] }
 0x416   : > { %v6443_v36 = vunpack.c.l.b16 %v5020_v55  ;;  %v5030_v55 = vrot.slane %v13072_v60, 5  ;;  %v6444_v10 = vunpack.c.l.b16 %v5024_v9 }
 0x417   : > { %v16066_v35 = vpop.f32.mrf.mxu1  ;;  %v6242_v33 = vrot.slane %v6240_v23, 4 }
 0x418   : > { %17721 = vst [vmem:[#allocation23_spill] sm:$0xff] %v16066_v35  ;;  %v16108_v57 = vpack.c.b16 %v6443_v36, %v6442_v53 }
 0x419   : > { %7790 = vmatmul.bf16.gmra.mxu0 %v7107_v0  ;;  %v6112_v0 = vld [vmem:[#allocation3 + $0x78] sm:$0xe] }
 0x41a   : > { %12251 = vmatmul.msk.bf16.gmra.mxu1 %vm6888_vm10, %v6879_v62  ;;  %v6228_v62 = vrot.slane %v6226_v31, 4  ;;  %v11900_v34 = vrot.slane %v6112_v0, 9  ;;  %v6235_v0 = vrot.slane %v6233_v18, 4 }
 0x41b   : > { %v16069_v37 = vpop.f32.mrf.mxu2 }
 0x41c   : > { %17722 = vst [vmem:[#allocation24_spill] sm:$0xff] %v16069_v37  ;;  %v6230_v5 = vsel %vm13306_vm4, %v6228_v62, %v6229_v61  ;;  %v6227_v32 = vsel %vm13306_vm4, %v11900_v34, %v6226_v31  ;;  %v5027_v62 = vsel %vm13306_vm4, %v5025_v52, %v5026_v14  ;;  %v7063_v31 = vsel %vm6888_vm10, %v6611_v50, %v6687_v11  ;;  %v12795_v14 = vld [vmem:[#allocation3 + $0x6c] sm:$0xff] }
 0x41d   : > { %v6857_v61 = vunpack.c.l.b16 %v6230_v5  ;;  %v6236_v34 = vrot.slane %v13073_v40, 5  ;;  %v11871_v37 = vrot.slane %v4898_v43, 9  ;;  %v6856_v60 = vunpack.c.l.b16 %v6227_v32 }
 0x41e   : > { %v16112_v5 = vsel %vm13306_vm4, %v11901_v1, %v6233_v18  ;;  %v6445_v11 = vunpack.c.l.b16 %v5027_v62  ;;  %v5032_v32 = vrot.slane %v5030_v55, 4  ;;  %v7111_v43 = vsel %vm6888_vm10, %v12795_v14, %v6823_v22  ;;  %v13076_v1 = vld [vmem:[#allocation3 + $0x8c] sm:$0x1]  ;;  %v13077_v62 = vld [vmem:[#allocation3 + $0x94] sm:$0xf] }
 0x41f   : > { %v16103_v8 = vpop.f32.mrf.mxu1  ;;  %7726 = vmatmul.bf16.gmra.mxu3 %v7063_v31  ;;  %v6237_v36 = vsel %vm13306_vm4, %v6235_v0, %v6236_v34  ;;  %v16121_v53 = vsel %vm13306_vm4, %v11871_v37, %v5030_v55  ;;  %v6880_v18 = vpack.c.b16 %v6857_v61, %v6856_v60  ;;  %v6114_v31 = vld [vmem:[#allocation3 + $0x90] sm:$0xe]  ;;  %v5033_v9 = vrot.slane %v13076_v1, 5  ;;  %v16124_v0 = vpop.f32.mrf.mxu3 }
 0x420   : > { %7617 = vmatmul.bf16.gmra.mxu2 %v6983_v4  ;;  %17724 = vst [vmem:[#allocation26_spill] sm:$0xff] %v16103_v8  ;;  %v5037_v40 = vrot.slane %v13077_v62, 5  ;;  %v4899_v8 = vld [vmem:[#allocation3 + $0x90] sm:$0xe]  ;;  %v6858_v37 = vunpack.c.l.b16 %v16112_v5  ;;  %v6859_v55 = vunpack.c.l.b16 %v6237_v36  ;;  %v16128_v22 = vpack.c.b16 %v6445_v11, %v6444_v10  ;;  %v6553_v1 = vpop.permute.xlu0 %6552  ;;  %v13079_v62 = vld [vmem:[#allocation3 + $0xa0] sm:$0xf] }
 0x421   : > { %v6446_v61 = vunpack.c.l.b16 %v16121_v53  ;;  %v11902_v60 = vrot.slane %v6114_v31, 9  ;;  %v5409_v35 = vshll.u32 %v13079_v62, 16  ;;  %v11872_v44 = vrot.slane %v4899_v8, 9 }
 0x422   : > { %v5039_v5 = vrot.slane %v5037_v40, 4 }
 0x423   : > { %v16097_v4 = vpop.f32.mrf.mxu2  ;;  %v16149_v27 = vrot.slane %v5409_v35, 5 }
 0x424   : > { %17723 = vst [vmem:[#allocation25_spill] sm:$0xff] %v16097_v4  ;;  %v5400_v4 = vshrl.u32 %v5087_v19, 16 }
 0x426   : > { %v3949_v52 = vpop.f32.mrf.mxu0  ;;  %v5402_v10 = vrot.slane %v5400_v4, 4 }
 0x427   : > { %v3950_v50 = vadd.f32 %v13075_v49, %v3949_v52  ;;  %v5403_v52 = vshll.u32 %v5087_v19, 16  ;;  %v5034_v19 = vsel %vm13306_vm4, %v5032_v32, %v5033_v9  ;;  %v16143_v32 = vsel %vm13306_vm4, %v11872_v44, %v5037_v40  ;;  %v13080_v9 = vld [vmem:[#allocation3 + $0x98] sm:$0x1] }
 0x428   : > { %v5040_v8 = vrot.slane %v13080_v9, 5 }
 0x429   : > { %v3984_v59 = vmax.f32 %v3950_v50, 0.0  ;;  %7795 = vmatmul.bf16.gmra.mxu0 %v7111_v43  ;;  %v13078_v50 = vld [vmem:[#allocation3 + $0x98] sm:$0x1]  ;;  %v5405_v11 = vrot.slane %v5403_v52, 5 }
 0x42a   : > { %12252 = vmatmul.msk.bf16.gmra.mxu1 %vm6888_vm10, %v6880_v18  ;;  %v6243_v43 = vrot.slane %v13078_v50, 5  ;;  %v5413_v18 = vshrl.u32 %v13079_v62, 16  ;;  %v6241_v50 = vsel %vm13306_vm4, %v11902_v60, %v6240_v23  ;;  %v16153_v60 = vsel %vm13306_vm4, %v5039_v5, %v5040_v8  ;;  %v5089_v8 = vld [vmem:[#allocation3 + $0xa8] sm:$0xf] }
 0x42b   : > { %v4016_v34 = vpack.c.bf16 %v3984_v59, %v3984_v59  ;;  %v16131_v14 = vpop.f32.mrf.mxu2  ;;  %v16137_v59 = vpop.f32.mrf.mxu1  ;;  %v5424_v51 = vshrl.u32 %v5089_v8, 16  ;;  %v5427_v47 = vshll.u32 %v5089_v8, 16 }
 0x42c   : > { %17725 = vst [vmem:[#allocation27_spill] sm:$0xff] %v16131_v14  ;;  %v6244_v53 = vsel %vm13306_vm4, %v6242_v33, %v6243_v43  ;;  %v6447_v14 = vunpack.c.l.b16 %v5034_v19  ;;  %v6987_v33 = vsel %vm6888_vm10, %v16105_v29, %v6553_v1  ;;  %v4448_v43 = vld [vmem:[#allocation3 + $0xc0] sm:$0xf]  ;;  %v5415_v56 = vrot.slane %v5413_v18, 4  ;;  %v4900_v1 = vld [vmem:[#allocation3 + $0x9c] sm:$0xe] }
 0x42d   : > { %v4274_v36 = vshrl.u32 %v4016_v34, 16  ;;  %v4277_v4 = vshll.u32 %v4016_v34, 16  ;;  %v6861_v23 = vunpack.c.l.b16 %v6244_v53  ;;  %v6881_v19 = vpack.c.b16 %v6859_v55, %v6858_v37  ;;  %v6115_v34 = vld [vmem:[#allocation3 + $0x9c] sm:$0xe]  ;;  %v16162_v55 = vpop.f32.mrf.mxu3 }
 0x42e   : > { %v3951_v31 = vpop.f32.mrf.mxu0  ;;  %v16156_v29 = vpack.c.b16 %v6447_v14, %v6446_v61  ;;  %v13083_v14 = vld [vmem:[#allocation3 + $0xac] sm:$0xf]  ;;  %v5426_v30 = vrot.slane %v5424_v51, 4  ;;  %v5429_v24 = vrot.slane %v5427_v47, 5  ;;  %v13087_v51 = vld [vmem:[#allocation3 + $0xa4] sm:$0x1] }
 0x42f   : > { %v16145_v62 = vrot.slane %v4274_v36, 7  ;;  %v3952_v52 = vadd.f32 %v13075_v49, %v3951_v31  ;;  %v5406_v36 = vor.u32 %v5405_v11, %v5402_v10  ;;  %v6860_v49 = vunpack.c.l.b16 %v6241_v50  ;;  %v13081_v31 = vld [vmem:[#allocation3 + $0xa0] sm:$0xf] }
 0x430   : > { %7622 = vmatmul.bf16.gmra.mxu2 %v6987_v33  ;;  %v6247_v9 = vrot.slane %v13081_v31, 5  ;;  %v5416_v10 = vor.u32 %v5415_v56, %v16149_v27  ;;  %v5433_v11 = vshll.u32 %v13083_v14, 16  ;;  %v11903_v50 = vrot.slane %v6115_v34, 9  ;;  %v6825_v33 = vpop.permute.xlu2 %6824 }
 0x431   : > { %v4279_v44 = vor.u32 %v4277_v4, %v16145_v62  ;;  %v3985_v40 = vmax.f32 %v3952_v52, 0.0  ;;  %v13082_v52 = vld [vmem:[#allocation3 + $0xa0] sm:$0xf]  ;;  %v16165_v61 = vpack.c.b16 %v6861_v23, %v6860_v49  ;;  %v12796_v4 = vld [vmem:[#allocation3 + $0x78] sm:$0xff]  ;;  %v5047_v47 = vrot.slane %v13087_v51, 5 }
 0x432   : > { %v5044_v37 = vrot.slane %v13082_v52, 5  ;;  %v5419_v52 = vshll.u32 %v13084_v41, 16  ;;  %v16171_v56 = vsel %vm13306_vm4, %v11903_v50, %v6247_v9  ;;  %v5417_v8 = vrot.slane %v5416_v10, 4 }
 0x433   : > { %v4449_v18 = vsel %vm14588_vm13, %v4279_v44, %v4448_v43  ;;  %v4017_v53 = vpack.c.bf16 %v3985_v40, %v3985_v40  ;;  %v7583_v5 = vpop.f32.mrf.mxu2  ;;  %v5407_v43 = vrot.slane %v5406_v36, 4  ;;  %v5437_v44 = vshrl.u32 %v13083_v14, 16  ;;  %v4452_v36 = vld [vmem:[#allocation3 + $0xc8] sm:$0x1] }
 0x434   : > { %4450 = vst [vmem:[#allocation3 + $0xc0] sm:$0xf] %v4449_v18  ;;  %v11873_v40 = vrot.slane %v4900_v1, 9  ;;  %v6249_v18 = vrot.slane %v6247_v9, 4  ;;  %v16177_v1 = vpop.f32.mrf.mxu1  ;;  %v7115_v14 = vsel %vm6888_vm10, %v12796_v4, %v6825_v33  ;;  %v16183_v2 = vrot.slane %v5433_v11, 5 }
 0x435   : > { %v4282_v31 = vshrl.u32 %v4017_v53, 16  ;;  %v4285_v49 = vshll.u32 %v4017_v53, 16  ;;  %v5412_v41 = vsel %vm13361_vm7, %v5407_v43, %v16149_v27  ;;  %v4280_v50 = vrot.slane %v16145_v62, 4  ;;  %v13085_v4 = vld [vmem:[#allocation3 + $0xac] sm:$0xf] }
 0x436   : > { %v16167_v35 = vpop.f32.mrf.mxu0  ;;  %v16175_v34 = vsel %vm13306_vm4, %v11873_v40, %v5044_v37  ;;  %v7584_v40 = vadd.f32 %v7583_v5, %v16015_v25  ;;  %v6254_v33 = vrot.slane %v13085_v4, 5  ;;  %v5421_v62 = vrot.slane %v5419_v52, 5  ;;  %v13086_v43 = vld [vmem:[#allocation3 + $0xa4] sm:$0x1] }
 0x437   : > { %v4284_v23 = vrot.slane %v4282_v31, 7  ;;  %v5439_v31 = vrot.slane %v5437_v44, 4  ;;  %v6862_v25 = vunpack.c.l.b16 %v16171_v56  ;;  %v6592_v44 = vunpack.c.l.b16 %v5412_v41 }
 0x438   : > { %v5422_v48 = vsel %vm13361_vm7, %v5417_v8, %v5421_v62  ;;  %v13089_v8 = vld [vmem:[#allocation3 + $0xb8] sm:$0xf] }
 0x439   : > { %v4287_v53 = vor.u32 %v4285_v49, %v4284_v23  ;;  %v4289_v9 = vrot.slane %v4284_v23, 4  ;;  %7800 = vmatmul.bf16.gmra.mxu0 %v7115_v14  ;;  %v6250_v23 = vrot.slane %v13086_v43, 5  ;;  %v6555_v49 = vpop.permute.xlu0 %6554  ;;  %v6116_v14 = vld [vmem:[#allocation3 + $0xa8] sm:$0xe]  ;;  %v6256_v43 = vrot.slane %v6254_v33, 4 }
 0x43a   : > { %12253 = vmatmul.msk.bf16.gmra.mxu1 %vm6888_vm10, %v6881_v19  ;;  %v5046_v19 = vrot.slane %v5044_v37, 4  ;;  %v5430_v37 = vor.u32 %v5429_v24, %v5426_v30  ;;  %v6991_v41 = vsel %vm6888_vm10, %v16108_v57, %v6555_v49  ;;  %v5461_v62 = vshrl.u32 %v13089_v8, 16 }
 0x43b   : > { %v4288_v27 = vsel %vm13427_vm12, %v4280_v50, %v4287_v53  ;;  %v4453_v10 = vsel %vm14643_vm9, %v4289_v9, %v4452_v36  ;;  %v7585_v11 = vpop.f32.mrf.mxu2  ;;  %v5440_v36 = vor.u32 %v5439_v31, %v16183_v2  ;;  %v6251_v52 = vsel %vm13306_vm4, %v6249_v18, %v6250_v23  ;;  %v7677_v50 = vpop.f32.mrf.mxu3  ;;  %v13088_v9 = vld [vmem:[#allocation3 + $0xb0] sm:$0x1] }
 0x43c   : > { %4451 = vst.msk [vmem:[#allocation3 + $0xc4] sm:$0xf] %vm17726_vm3, %v4288_v27  ;;  %v7673_v53 = vadd.f32 %v16124_v0, %v7584_v40  ;;  %v5443_v4 = vshll.u32 %v13088_v9, 16  ;;  %v5091_v27 = vld [vmem:[#allocation3 + $0xb4] sm:$0xf]  ;;  %v5457_v31 = vshll.u32 %v13089_v8, 16  ;;  %v6593_v18 = vunpack.c.l.b16 %v5422_v48  ;;  %v6689_v48 = vpop.permute.xlu1 %6688 }
 0x43d   : > { %4454 = vst [vmem:[#allocation3 + $0xc8] sm:$0x1] %v4453_v10  ;;  %v7586_v10 = vadd.f32 %v7585_v11, %v16019_v45  ;;  %v6863_v23 = vunpack.c.l.b16 %v6251_v52  ;;  %v11904_v51 = vrot.slane %v6116_v14, 9  ;;  %v16206_v0 = vsel %vm13306_vm4, %v5046_v19, %v5047_v47  ;;  %v13090_v9 = vld [vmem:[#allocation3 + $0xb0] sm:$0x1]  ;;  %v7855_v11 = vpop.f32.mrf.mxu1 }
 0x43e   : > { %v7763_v56 = vpop.f32.mrf.mxu0  ;;  %v5441_v24 = vrot.slane %v5440_v36, 4  ;;  %v5448_v30 = vshrl.u32 %v5091_v27, 16  ;;  %v5451_v40 = vshll.u32 %v5091_v27, 16  ;;  %v6257_v5 = vrot.slane %v13090_v9, 5 }
 0x43f   : > { %v7762_v45 = vadd.f32 %v16167_v35, %v7673_v53  ;;  %v5431_v57 = vrot.slane %v5430_v37, 4  ;;  %v5445_v49 = vrot.slane %v5443_v4, 5  ;;  %v7675_v52 = vadd.f32 %v16162_v55, %v7586_v10 }
 0x440   : > { %7627 = vmatmul.bf16.gmra.mxu2 %v6991_v41  ;;  %v6255_v41 = vsel %vm13306_vm4, %v11904_v51, %v6254_v33  ;;  %v16212_v19 = vrot.slane %v5457_v31, 5  ;;  %v5463_v47 = vrot.slane %v5461_v62, 4  ;;  %v6258_v36 = vsel %vm13306_vm4, %v6256_v43, %v6257_v5  ;;  %v6827_v33 = vpop.permute.xlu2 %6826  ;;  %v12797_v62 = vld [vmem:[#allocation3 + $0x84] sm:$0xff]  ;;  %v5510_v51 = vld [vmem:[#allocation3 + $0xc0] sm:$0xe] }
 0x441   : > { %v6612_v35 = vpack.c.b16 %v6593_v18, %v6592_v44  ;;  %v5436_v53 = vsel %vm13361_vm7, %v5431_v57, %v16183_v2  ;;  %v16220_v37 = vpack.c.b16 %v6863_v23, %v6862_v25  ;;  %v5446_v55 = vsel %vm13361_vm7, %v5441_v24, %v5445_v49 }
 0x442   : > { %v5450_v4 = vrot.slane %v5448_v30, 4  ;;  %v5453_v10 = vrot.slane %v5451_v40, 5  ;;  %v6864_v31 = vunpack.c.l.b16 %v6255_v41  ;;  %v7851_v5 = vadd.f32 %v16137_v59, %v7762_v45 }
 0x443   : > { %v7588_v14 = vpop.f32.mrf.mxu2  ;;  %v12787_v8 = vld [vmem:[#allocation3 + $0xc0] sm:$0xff]  ;;  %v7067_v44 = vsel %vm6888_vm10, %v6612_v35, %v6689_v48  ;;  %v6865_v25 = vunpack.c.l.b16 %v6258_v36  ;;  %v7764_v23 = vadd.f32 %v7763_v56, %v7675_v52  ;;  %v16227_v57 = vunpack.c.l.b16 %v5436_v53  ;;  %v7679_v30 = vpop.f32.mrf.mxu3 }
 0x444   : > { %v7589_v27 = vadd.f32 %v7588_v14, %v16030_v13  ;;  %6566 = vrot.lane.b32.xlu0 %v12787_v8, %s13190_s23  ;;  %v5094_v18 = vld [vmem:[#allocation3 + $0xc4] sm:$0xf]  ;;  %v5110_v2 = vld [vmem:[#allocation3 + $0xc8] sm:$0x1]  ;;  %7731 = vmatmul.bf16.gmra.mxu3 %v7067_v44  ;;  %v5464_v24 = vor.u32 %v5463_v47, %v16212_v19  ;;  %v7119_v59 = vsel %vm6888_vm10, %v12797_v62, %v6827_v33  ;;  %v16231_v45 = vunpack.c.l.b16 %v5446_v55  ;;  %v13091_v14 = vld [vmem:[#allocation3 + $0xbc] sm:$0x1] }
 0x445   : > { %v5666_v9 = vrot.slane %v5094_v18, 5  ;;  %v5669_v41 = vrot.slane %v5110_v2, 5  ;;  %v5454_v48 = vor.u32 %v5453_v10, %v5450_v4  ;;  %v5467_v56 = vshll.u32 %v13091_v14, 16  ;;  %v16242_v55 = vld [vmem:[#allocation3 + $0xb8] sm:$0xf]  ;;  %v6557_v14 = vpop.permute.xlu0 %6556 }
 0x446   : > { %v7678_v43 = vadd.f32 %v7677_v50, %v7589_v27  ;;  %v7766_v13 = vpop.f32.mrf.mxu0  ;;  %v11891_v50 = vrot.slane %v5510_v51, 9  ;;  %v7930_v52 = vmax.f32 %v7851_v5, 0.0  ;;  %v16237_v47 = vpack.c.b16 %v6865_v25, %v6864_v31  ;;  %v16248_v44 = vld [vmem:[#allocation3 + $0xb4] sm:$0xe] }
 0x447   : > { %v5668_v49 = vrot.slane %v5666_v9, 4  ;;  %v7853_v27 = vadd.f32 %v16177_v1, %v7764_v23  ;;  %v5465_v33 = vrot.slane %v5464_v24, 4  ;;  %v17656_v4 = vrot.slane %v16242_v55, 5 }
 0x448   : > { %v7767_v40 = vadd.f32 %v7766_v13, %v7678_v43  ;;  %v5667_v36 = vsel %vm13306_vm4, %v11891_v50, %v5666_v9  ;;  %vm8122_vm12 = vcmask 517120   ;;  %v5455_v1 = vrot.slane %v5454_v48, 4 }
 0x449   : > { %7805 = vmatmul.bf16.gmra.mxu0 %v7119_v59  ;;  %v5670_v53 = vsel %vm13306_vm4, %v5668_v49, %v5669_v41  ;;  %v6646_v43 = vunpack.c.l.b16 %v5667_v36  ;;  %v5469_v31 = vrot.slane %v5467_v56, 5  ;;  %v7962_v62 = vsel %vm6888_vm10, %v7930_v52, -inf }
 0x44a   : > { %v7856_v8 = vadd.f32 %v7855_v11, %v7767_v40  ;;  %12254 = vmatmul.msk.bf16.gmra.mxu1 %vm6888_vm10, %v16165_v61  ;;  %v7857_v11 = vpop.f32.mrf.mxu1  ;;  %v6647_v13 = vunpack.c.l.b16 %v5670_v53  ;;  %v6613_v61 = vpack.c.b16 %v16231_v45, %v16227_v57  ;;  %v7931_v51 = vmax.f32 %v7853_v27, 0.0  ;;  %v6691_v45 = vpop.permute.xlu1 %6690 }
 0x44b   : > { %v7590_v35 = vpop.f32.mrf.mxu2  ;;  %v5470_v57 = vsel %vm13361_vm7, %v5465_v33, %v5469_v31  ;;  %v16261_v59 = vrot.slane %v17656_v4, 4  ;;  %v16267_v56 = vpop.f32.mrf.mxu3 }
 0x44c   : > { %v7932_v10 = vmax.f32 %v7856_v8, 0.0  ;;  %v7591_v5 = vadd.f32 %v7590_v35, %v16035_v38  ;;  %v6663_v2 = vpack.c.b16 %v6647_v13, %v6646_v43  ;;  %v5460_v38 = vsel %vm13361_vm7, %v5455_v1, %v16212_v19 }
 0x44d   : > { %v16269_v36 = vunpack.c.l.b16 %v5460_v38  ;;  %v16271_v27 = vunpack.c.l.b16 %v5470_v57  ;;  %v7965_v35 = vsel %vm6888_vm10, %v7931_v51, -inf }
 0x44e   : > { %v7963_v18 = vsel %vm6888_vm10, %v7932_v10, -inf  ;;  %v7680_v25 = vadd.f32 %v7679_v30, %v7591_v5  ;;  %v7768_v23 = vpop.f32.mrf.mxu0  ;;  %6694 = vrot.lane.b32.xlu1 %v6663_v2, %s13190_s23  ;;  %v16263_v30 = vld [vmem:[#allocation3 + $0xbc] sm:$0x1]  ;;  %v16279_v2 = vld [vmem:[#allocation3 + $0xc4] sm:$0xf] }
 0x44f   : > { %v7964_v9 = vmax.f32 %v7962_v62, %v7963_v18  ;;  %v5700_v18 = vld [vmem:[#allocation3 + $0xc0] sm:$0xf] }
 0x450   : > { %v7769_v24 = vadd.f32 %v7768_v23, %v7680_v25  ;;  %v7071_v23 = vsel %vm6888_vm10, %v6613_v61, %v6691_v45 }
 0x451   : > { %v8026_v49 = vrot.slane %v7964_v9, 2  ;;  %v8027_v41 = vrot.slane %v7964_v9, 4  ;;  %v8028_v19 = vrot.slane %v7964_v9, 6  ;;  %v8123_v48 = vsel %vm8122_vm12, %v7964_v9, -inf }
 0x452   : > { %v8124_v52 = vrot.slane %v8123_v48, 4  ;;  %v7858_v8 = vadd.f32 %v7857_v11, %v7769_v24  ;;  %v6995_v11 = vsel %vm6888_vm10, %v16128_v22, %v6557_v14  ;;  %v16285_v24 = vpop.f32.mrf.mxu1  ;;  %v6057_v22 = vshrl.u32 %v5700_v18, 16 }
 0x453   : > { %v8130_v53 = vsel %vm8122_vm12, %v8026_v49, -inf  ;;  %v8137_v33 = vsel %vm8122_vm12, %v8027_v41, -inf  ;;  %v8144_v10 = vsel %vm8122_vm12, %v8028_v19, -inf  ;;  %v7593_v31 = vpop.f32.mrf.mxu2  ;;  %7632 = vmatmul.bf16.gmra.mxu2 %v6995_v11  ;;  %v6060_v19 = vshll.u32 %v5700_v18, 16  ;;  %v16296_v18 = vpop.f32.mrf.mxu3 }
 0x454   : > { %v8125_v5 = vmax.f32 %v8123_v48, %v8124_v52  ;;  %v8131_v43 = vrot.slane %v8130_v53, 4  ;;  %v8138_v13 = vrot.slane %v8137_v33, 4  ;;  %v8145_v1 = vrot.slane %v8144_v10, 4  ;;  %7736 = vmatmul.bf16.gmra.mxu3 %v7071_v23 }
 0x455   : > { %v7933_v62 = vmax.f32 %v7858_v8, 0.0  ;;  %v16282_v25 = vadd.f32 %v7593_v31, %v16039_v6  ;;  %v6066_v48 = vshll.u32 %v16279_v2, 16  ;;  %v6059_v8 = vrot.slane %v6057_v22, 4 }
 0x456   : > { %v8126_v51 = vrot.slane %v8125_v5, 2  ;;  %v8132_v9 = vmax.f32 %v8130_v53, %v8131_v43  ;;  %v8139_v38 = vmax.f32 %v8137_v33, %v8138_v13  ;;  %v8146_v57 = vmax.f32 %v8144_v10, %v8145_v1  ;;  %v16287_v49 = vpop.f32.mrf.mxu0 }
 0x457   : > { %v7966_v41 = vsel %vm6888_vm10, %v7933_v62, -inf  ;;  %v6062_v53 = vrot.slane %v6060_v19, 5  ;;  %v16291_v33 = vrot.slane %v6066_v48, 5 }
 0x458   : > { %v8127_v6 = vmax.f32 %v8125_v5, %v8126_v51  ;;  %v8133_v14 = vrot.slane %v8132_v9, 2  ;;  %v8140_v52 = vrot.slane %v8139_v38, 2  ;;  %v8147_v61 = vrot.slane %v8146_v57, 2 }
 0x459   : > { %v7967_v45 = vmax.f32 %v7965_v35, %v7966_v41 }
 0x45a   : > { %v8128_v10 = vrot.slane %v8127_v6, 1  ;;  %v8134_v43 = vmax.f32 %v8132_v9, %v8133_v14  ;;  %v8141_v13 = vmax.f32 %v8139_v38, %v8140_v52  ;;  %v8148_v1 = vmax.f32 %v8146_v57, %v8147_v61  ;;  %12255 = vmatmul.msk.bf16.gmra.mxu1 %vm6888_vm10, %v16220_v37  ;;  %v16305_v16 = vpop.f32.mrf.mxu1 }
 0x45b   : > { %v8029_v31 = vrot.slane %v7967_v45, 2  ;;  %v8030_v5 = vrot.slane %v7967_v45, 4  ;;  %v8031_v62 = vrot.slane %v7967_v45, 6  ;;  %v8151_v11 = vsel %vm8122_vm12, %v7967_v45, -inf  ;;  %v16301_v37 = vpop.f32.mrf.mxu2 }
 0x45c   : > { %v8129_v35 = vmax.f32 %v8127_v6, %v8128_v10  ;;  %v8135_v23 = vrot.slane %v8134_v43, 1  ;;  %v8142_v51 = vrot.slane %v8141_v13, 1  ;;  %v8149_v41 = vrot.slane %v8148_v1, 1 }
 0x45d   : > { %v8152_v22 = vrot.slane %v8151_v11, 4  ;;  %v8158_v9 = vsel %vm8122_vm12, %v8029_v31, -inf  ;;  %v8165_v38 = vsel %vm8122_vm12, %v8030_v5, -inf  ;;  %v8172_v57 = vsel %vm8122_vm12, %v8031_v62, -inf }
 0x45e   : > { %v8136_v19 = vmax.f32 %v8134_v43, %v8135_v23  ;;  %v8143_v48 = vmax.f32 %v8141_v13, %v8142_v51  ;;  %v8150_v14 = vmax.f32 %v8148_v1, %v8149_v41  ;;  %v8571_v52 = vpack.c.bf16 %v8129_v35, %v8129_v35  ;;  %v16303_v10 = vpop.f32.mrf.mxu0  ;;  %v16307_v43 = vld [vmem:[#allocation3 + $0xc8] sm:$0x1] }
 0x45f   : > { %v8153_v61 = vmax.f32 %v8151_v11, %v8152_v22  ;;  %v8159_v45 = vrot.slane %v8158_v9, 4  ;;  %v8166_v40 = vrot.slane %v8165_v38, 4  ;;  %v8173_v6 = vrot.slane %v8172_v57, 4 }
 0x460   : > { %v8572_v4 = vpack.c.bf16 %v8136_v19, %v8136_v19  ;;  %v8573_v50 = vpack.c.bf16 %v8143_v48, %v8143_v48  ;;  %v8574_v42 = vpack.c.bf16 %v8150_v14, %v8150_v14  ;;  %v8699_v31 = vunpack.c.l.b16 %v8571_v52 }
 0x461   : > { %v8154_v5 = vrot.slane %v8153_v61, 2  ;;  %v8160_v62 = vmax.f32 %v8158_v9, %v8159_v45  ;;  %v8167_v7 = vmax.f32 %v8165_v38, %v8166_v40  ;;  %v8174_v17 = vmax.f32 %v8172_v57, %v8173_v6  ;;  %v7687_v57 = vpop.f32.mrf.mxu3 }
 0x462   : > { %v8700_v13 = vunpack.c.l.b16 %v8572_v4  ;;  %v8701_v1 = vunpack.c.l.b16 %v8573_v50  ;;  %v8702_v11 = vunpack.c.l.b16 %v8574_v42  ;;  %v6063_v35 = vor.u32 %v6062_v53, %v6059_v8  ;;  %v6829_v42 = vpop.permute.xlu2 %6828 }
 0x463   : > { %v8155_v23 = vmax.f32 %v8153_v61, %v8154_v5  ;;  %v8161_v51 = vrot.slane %v8160_v62, 2  ;;  %v8168_v41 = vrot.slane %v8167_v7, 2  ;;  %v8175_v22 = vrot.slane %v8174_v17, 2  ;;  %v12798_v5 = vld [vmem:[#allocation3 + $0x90] sm:$0xff] }
 0x464   : > { %v8764_v19 = vsel %vm8763_vm5, %v8700_v13, %v8699_v31  ;;  %v6064_v48 = vrot.slane %v6063_v35, 4  ;;  %v6070_v14 = vshrl.u32 %v16279_v2, 16  ;;  %v6076_v40 = vshll.u32 %v16307_v43, 16  ;;  %v7598_v13 = vpop.f32.mrf.mxu2 }
 0x465   : > { %v8766_v9 = vsel %vm8765_vm6, %v8701_v1, %v8764_v19  ;;  %v8156_v38 = vrot.slane %v8155_v23, 1  ;;  %v8162_v4 = vmax.f32 %v8160_v62, %v8161_v51  ;;  %v8169_v50 = vmax.f32 %v8167_v7, %v8168_v41  ;;  %v6559_v1 = vpop.permute.xlu0 %6558 }
 0x466   : > { %v8768_v8 = vsel %vm8767_vm0, %v8702_v11, %v8766_v9  ;;  %v8176_v53 = vmax.f32 %v8174_v17, %v8175_v22  ;;  %v6072_v52 = vrot.slane %v6070_v14, 4  ;;  %v6069_v31 = vsel %vm13361_vm7, %v6064_v48, %v16291_v33  ;;  %v7776_v22 = vpop.f32.mrf.mxu0 }
 0x467   : > { %v8157_v61 = vmax.f32 %v8155_v23, %v8156_v38  ;;  %v8163_v45 = vrot.slane %v8162_v4, 1  ;;  %v8170_v6 = vrot.slane %v8169_v50, 1  ;;  %v6078_v62 = vrot.slane %v6076_v40, 5  ;;  %v7865_v38 = vpop.f32.mrf.mxu1 }
 0x468   : > { %v8177_v35 = vrot.slane %v8176_v53, 1  ;;  %v6073_v7 = vor.u32 %v6072_v52, %v16291_v33  ;;  %v7683_v11 = vadd.f32 %v16267_v56, %v16282_v25  ;;  %v7123_v23 = vsel %vm6888_vm10, %v12798_v5, %v6829_v42  ;;  %v8853_v5 = vld [vmem:[#allocation4 + $0xc] sm:$0x1] }
 0x469   : > { %v8164_v17 = vmax.f32 %v8162_v4, %v8163_v45  ;;  %v8171_v51 = vmax.f32 %v8169_v50, %v8170_v6  ;;  %v8575_v41 = vpack.c.bf16 %v8157_v61, %v8157_v61  ;;  %v6788_v9 = vunpack.c.l.b16 %v6069_v31  ;;  %7810 = vmatmul.bf16.gmra.mxu0 %v7123_v23  ;;  %v6693_v61 = vpop.permute.xlu1 %6692  ;;  %v5719_v23 = vld [vmem:[#allocation3 + $0xd4] sm:$0x1] }
 0x46a   : > { %v8178_v19 = vmax.f32 %v8176_v53, %v8177_v35  ;;  %v6074_v14 = vrot.slane %v6073_v7, 4  ;;  %v7596_v48 = vadd.f32 %v16301_v37, %v16045_v46  ;;  %12256 = vmatmul.msk.bf16.gmra.mxu1 %vm6888_vm10, %v16237_v47  ;;  %v6999_v25 = vsel %vm6888_vm10, %v16156_v29, %v6559_v1  ;;  %v7689_v7 = vpop.f32.mrf.mxu3 }
 0x46b   : > { %v8576_v33 = vpack.c.bf16 %v8164_v17, %v8164_v17  ;;  %v8577_v40 = vpack.c.bf16 %v8171_v51, %v8171_v51  ;;  %v8703_v56 = vunpack.c.l.b16 %v8575_v41  ;;  %v7772_v42 = vadd.f32 %v16287_v49, %v7683_v11  ;;  %7637 = vmatmul.bf16.gmra.mxu2 %v6999_v25  ;;  %v5702_v51 = vld [vmem:[#allocation3 + $0xcc] sm:$0xf]  ;;  %v5703_v41 = vld [vmem:[#allocation3 + $0xd0] sm:$0xf] }
 0x46c   : > { %v8578_v4 = vpack.c.bf16 %v8178_v19, %v8178_v19  ;;  %v6079_v50 = vsel %vm13361_vm7, %v6074_v14, %v6078_v62  ;;  %v7685_v53 = vadd.f32 %v16296_v18, %v7596_v48  ;;  %v7599_v29 = vadd.f32 %v7598_v13, %v16051_v20  ;;  %v8850_v20 = vld [vmem:[#allocation4 + $0x8] sm:$0xf] }
 0x46d   : > { %v8704_v46 = vunpack.c.l.b16 %v8576_v33  ;;  %v8705_v37 = vunpack.c.l.b16 %v8577_v40  ;;  %v8770_v52 = vsel %vm8769_vm14, %v8703_v56, %v8768_v8  ;;  %v6789_v47 = vunpack.c.l.b16 %v6079_v50 }
 0x46e   : > { %v8706_v45 = vunpack.c.l.b16 %v8578_v4  ;;  %v7774_v6 = vadd.f32 %v16303_v10, %v7685_v53  ;;  %v17727_v31 = vrot.slane %v16263_v30, 5  ;;  %v6614_v8 = vpack.c.b16 %v16271_v27, %v16269_v36  ;;  %v7600_v27 = vpop.f32.mrf.mxu2  ;;  %v7778_v56 = vpop.f32.mrf.mxu0 }
 0x46f   : > { %v8772_v18 = vsel %vm8771_vm8, %v8704_v46, %v8770_v52  ;;  %v6806_v1 = vpack.c.b16 %v6789_v47, %v6788_v9  ;;  %v6451_v35 = vunpack.c.l.b16 %v16206_v0  ;;  %v7861_v30 = vadd.f32 %v16285_v24, %v7772_v42  ;;  %v6831_v9 = vpop.permute.xlu2 %6830  ;;  %v7867_v4 = vpop.f32.mrf.mxu1  ;;  %v12799_v52 = vld [vmem:[#allocation3 + $0x9c] sm:$0xff] }
 0x470   : > { %v6265_v49 = vsel %vm13306_vm4, %v16261_v59, %v17727_v31  ;;  %v8774_v10 = vsel %vm8773_vm11, %v8705_v37, %v8772_v18  ;;  %v8818_v62 = vpack.c.b16 %v8706_v45, %v8706_v45  ;;  %v17728_v13 = vrot.slane %v16242_v55, 5 }
 0x471   : > { %v17729_v59 = vrot.slane %v16248_v44, 9  ;;  %v8817_v17 = vpack.c.b16 %v8774_v10, %v8774_v10  ;;  %6836 = vrot.lane.b32.xlu2 %v6806_v1, %s13190_s23  ;;  %v7688_v36 = vadd.f32 %v7687_v57, %v7599_v29  ;;  %v7075_v0 = vsel %vm6888_vm10, %v6614_v8, %v6693_v61  ;;  %v6561_v8 = vpop.permute.xlu0 %6560 }
 0x472   : > { %v6867_v19 = vunpack.c.l.b16 %v6265_v49  ;;  %v8854_v24 = vsel %vm14643_vm9, %v8818_v62, %v8853_v5  ;;  %v7863_v55 = vadd.f32 %v16305_v16, %v7774_v6  ;;  %7741 = vmatmul.bf16.gmra.mxu3 %v7075_v0  ;;  %v7601_v44 = vadd.f32 %v7600_v27, %v16055_v39 }
 0x473   : > { %v6262_v11 = vsel %vm13306_vm4, %v17729_v59, %v17728_v13  ;;  %v6081_v14 = vshrl.u32 %v5702_v51, 16  ;;  %v8851_v57 = vsel %vm14588_vm13, %v8817_v17, %v8850_v20  ;;  %8855 = vst [vmem:[#allocation4 + $0xc] sm:$0x1] %v8854_v24  ;;  %v7777_v48 = vadd.f32 %v7776_v22, %v7688_v36  ;;  %v16376_v17 = vld [vmem:[#allocation3 + $0xac] sm:$0xf] }
 0x474   : > { %v6084_v33 = vshll.u32 %v5702_v51, 16  ;;  %v6090_v40 = vshll.u32 %v5703_v41, 16  ;;  %8852 = vst [vmem:[#allocation4 + $0x8] sm:$0xf] %v8851_v57  ;;  %v7934_v25 = vmax.f32 %v7861_v30, 0.0  ;;  %v6094_v42 = vshrl.u32 %v5703_v41, 16 }
 0x475   : > { %v6083_v50 = vrot.slane %v6081_v14, 4  ;;  %v6100_v53 = vshll.u32 %v5719_v23, 16  ;;  %v7866_v16 = vadd.f32 %v7865_v38, %v7777_v48  ;;  %v7690_v39 = vadd.f32 %v7689_v7, %v7601_v44  ;;  %v16367_v38 = vld [vmem:[#allocation3 + $0xa8] sm:$0xe] }
 0x476   : > { %v6086_v46 = vrot.slane %v6084_v33, 5  ;;  %v6092_v37 = vrot.slane %v6090_v40, 5  ;;  %v6096_v47 = vrot.slane %v6094_v42, 4  ;;  %v17730_v61 = vunpack.c.l.b16 %v16143_v32  ;;  %v16384_v44 = vpop.f32.mrf.mxu2  ;;  %v16389_v40 = vpop.f32.mrf.mxu0 }
 0x477   : > { %v17731_v45 = vunpack.c.l.b16 %v16153_v60  ;;  %v6866_v6 = vunpack.c.l.b16 %v6262_v11  ;;  %v17732_v29 = vunpack.c.l.b16 %v16175_v34  ;;  %v7935_v49 = vmax.f32 %v7863_v55, 0.0  ;;  %v6833_v14 = vpop.permute.xlu2 %6832 }
 0x478   : > { %v7936_v18 = vmax.f32 %v7866_v16, 0.0  ;;  %v6087_v5 = vor.u32 %v6086_v46, %v6083_v50  ;;  %v7779_v1 = vadd.f32 %v7778_v56, %v7690_v39  ;;  %v7968_v7 = vsel %vm6888_vm10, %v7934_v25, -inf  ;;  %v16394_v50 = vpop.f32.mrf.mxu1 }
 0x479   : > { %v6468_v22 = vpack.c.b16 %v17731_v45, %v17730_v61  ;;  %v16365_v31 = vpack.c.b16 %v6451_v35, %v17732_v29  ;;  %v7127_v10 = vsel %vm6888_vm10, %v12799_v52, %v6831_v9  ;;  %v6097_v32 = vor.u32 %v6096_v47, %v6092_v37  ;;  %v16372_v35 = vpop.f32.mrf.mxu3  ;;  %v16397_v45 = vld [vmem:[#allocation3 + $0xb0] sm:$0x1] }
 0x47a   : > { %v6885_v62 = vpack.c.b16 %v6867_v19, %v6866_v6  ;;  %v7969_v60 = vsel %vm6888_vm10, %v7936_v18, -inf  ;;  %v6088_v20 = vrot.slane %v6087_v5, 4  ;;  %v6102_v30 = vrot.slane %v6100_v53, 5  ;;  %7815 = vmatmul.bf16.gmra.mxu0 %v7127_v10  ;;  %v12800_v53 = vld [vmem:[#allocation3 + $0xa8] sm:$0xff] }
 0x47b   : > { %v7868_v34 = vadd.f32 %v7867_v4, %v7779_v1  ;;  %v7970_v13 = vmax.f32 %v7968_v7, %v7969_v60  ;;  %v6098_v59 = vrot.slane %v6097_v32, 4  ;;  %v11874_v11 = vrot.slane %v16367_v38, 9 }
 0x47c   : > { %12257 = vmatmul.msk.bf16.gmra.mxu1 %vm6888_vm10, %v6885_v62  ;;  %v5051_v36 = vrot.slane %v16376_v17, 5  ;;  %v7971_v0 = vsel %vm6888_vm10, %v7935_v49, -inf  ;;  %v6093_v27 = vsel %vm13361_vm7, %v6088_v20, %v6092_v37  ;;  %v7003_v41 = vsel %vm6888_vm10, %v6468_v22, %v6561_v8  ;;  %v8859_v17 = vld [vmem:[#allocation4 + $0x14] sm:$0x1] }
 0x47d   : > { %v7937_v51 = vmax.f32 %v7868_v34, 0.0  ;;  %v8032_v23 = vrot.slane %v7970_v13, 2  ;;  %v8033_v19 = vrot.slane %v7970_v13, 4  ;;  %v8034_v24 = vrot.slane %v7970_v13, 6  ;;  %7642 = vmatmul.bf16.gmra.mxu2 %v7003_v41 }
 0x47e   : > { %v8179_v55 = vsel %vm8122_vm12, %v7970_v13, -inf  ;;  %v6103_v57 = vsel %vm13361_vm7, %v6098_v59, %v6102_v30  ;;  %v6790_v48 = vunpack.c.l.b16 %v6093_v27  ;;  %v7131_v61 = vsel %vm6888_vm10, %v12800_v53, %v6833_v14  ;;  %v7605_v14 = vpop.f32.mrf.mxu2 }
 0x47f   : > { %v8180_v9 = vrot.slane %v8179_v55, 4  ;;  %v7972_v33 = vsel %vm6888_vm10, %v7937_v51, -inf  ;;  %v8186_v56 = vsel %vm8122_vm12, %v8032_v23, -inf  ;;  %v8193_v25 = vsel %vm8122_vm12, %v8033_v19, -inf }
 0x480   : > { %v8200_v4 = vsel %vm8122_vm12, %v8034_v24, -inf  ;;  %v6791_v42 = vunpack.c.l.b16 %v6103_v57  ;;  %v8187_v46 = vrot.slane %v8186_v56, 4  ;;  %v8194_v37 = vrot.slane %v8193_v25, 4 }
 0x481   : > { %v8181_v16 = vmax.f32 %v8179_v55, %v8180_v9  ;;  %v8201_v39 = vrot.slane %v8200_v4, 4  ;;  %v7973_v47 = vmax.f32 %v7971_v0, %v7972_v33  ;;  %v5054_v22 = vrot.slane %v16397_v45, 5  ;;  %v16402_v20 = vpop.f32.mrf.mxu3 }
 0x482   : > { %v6807_v52 = vpack.c.b16 %v6791_v42, %v6790_v48  ;;  %v8188_v29 = vmax.f32 %v8186_v56, %v8187_v46  ;;  %v8195_v49 = vmax.f32 %v8193_v25, %v8194_v37  ;;  %v16407_v56 = vpop.f32.mrf.mxu0  ;;  %v6563_v25 = vpop.permute.xlu0 %6562 }
 0x483   : > { %v8182_v6 = vrot.slane %v8181_v16, 2  ;;  %v8202_v18 = vmax.f32 %v8200_v4, %v8201_v39  ;;  %v8035_v5 = vrot.slane %v7973_v47, 2  ;;  %v8036_v1 = vrot.slane %v7973_v47, 4  ;;  %v16409_v46 = vpop.f32.mrf.mxu1 }
 0x484   : > { %6838 = vrot.lane.b32.xlu2 %v6807_v52, %s13190_s23  ;;  %v8037_v8 = vrot.slane %v7973_v47, 6  ;;  %v8207_v7 = vsel %vm8122_vm12, %v7973_v47, -inf  ;;  %v8189_v32 = vrot.slane %v8188_v29, 2  ;;  %v8196_v62 = vrot.slane %v8195_v49, 2 }
 0x485   : > { %v8183_v10 = vmax.f32 %v8181_v16, %v8182_v6  ;;  %v8203_v60 = vrot.slane %v8202_v18, 2  ;;  %v8208_v30 = vrot.slane %v8207_v7, 4  ;;  %v8214_v34 = vsel %vm8122_vm12, %v8035_v5, -inf }
 0x486   : > { %v8221_v13 = vsel %vm8122_vm12, %v8036_v1, -inf  ;;  %v8228_v59 = vsel %vm8122_vm12, %v8037_v8, -inf  ;;  %v8190_v27 = vmax.f32 %v8188_v29, %v8189_v32  ;;  %v8197_v51 = vmax.f32 %v8195_v49, %v8196_v62 }
 0x487   : > { %v8184_v0 = vrot.slane %v8183_v10, 1  ;;  %v8204_v41 = vmax.f32 %v8202_v18, %v8203_v60  ;;  %v8209_v23 = vmax.f32 %v8207_v7, %v8208_v30  ;;  %v8215_v19 = vrot.slane %v8214_v34, 4 }
 0x488   : > { %v8222_v24 = vrot.slane %v8221_v13, 4  ;;  %v8229_v55 = vrot.slane %v8228_v59, 4  ;;  %v8191_v57 = vrot.slane %v8190_v27, 1  ;;  %v8198_v48 = vrot.slane %v8197_v51, 1 }
 0x489   : > { %v8185_v9 = vmax.f32 %v8183_v10, %v8184_v0  ;;  %v8205_v33 = vrot.slane %v8204_v41, 1  ;;  %v8210_v4 = vrot.slane %v8209_v23, 2  ;;  %v8216_v42 = vmax.f32 %v8214_v34, %v8215_v19  ;;  %v16415_v0 = vpop.f32.mrf.mxu3 }
 0x48a   : > { %v8223_v53 = vmax.f32 %v8221_v13, %v8222_v24  ;;  %v8230_v16 = vmax.f32 %v8228_v59, %v8229_v55  ;;  %v8192_v37 = vmax.f32 %v8190_v27, %v8191_v57  ;;  %v8199_v39 = vmax.f32 %v8197_v51, %v8198_v48  ;;  %7820 = vmatmul.bf16.gmra.mxu0 %v7131_v61  ;;  %v7608_v48 = vpop.f32.mrf.mxu2 }
 0x48b   : > { %v8206_v52 = vmax.f32 %v8204_v41, %v8205_v33  ;;  %v8579_v47 = vpack.c.bf16 %v8185_v9, %v8185_v9  ;;  %v8211_v6 = vmax.f32 %v8209_v23, %v8210_v4  ;;  %v8217_v29 = vrot.slane %v8216_v42, 2  ;;  %v8898_v23 = vld [vmem:[#allocation4] sm:$0xf] }
 0x48c   : > { %v8224_v49 = vrot.slane %v8223_v53, 2  ;;  %v8231_v18 = vrot.slane %v8230_v16, 2  ;;  %v8580_v5 = vpack.c.bf16 %v8192_v37, %v8192_v37  ;;  %v8581_v1 = vpack.c.bf16 %v8199_v39, %v8199_v39 }
 0x48d   : > { %v7604_v8 = vadd.f32 %v16384_v44, %v16060_v63  ;;  %v7007_v7 = vsel %vm6888_vm10, %v16365_v31, %v6563_v25  ;;  %v8212_v10 = vrot.slane %v8211_v6, 1  ;;  %v8218_v32 = vmax.f32 %v8216_v42, %v8217_v29 }
 0x48e   : > { %v8225_v62 = vmax.f32 %v8223_v53, %v8224_v49  ;;  %v8232_v60 = vmax.f32 %v8230_v16, %v8231_v18  ;;  %7647 = vmatmul.bf16.gmra.mxu2 %v7007_v7  ;;  %v8582_v30 = vpack.c.bf16 %v8206_v52, %v8206_v52  ;;  %v8707_v34 = vunpack.c.l.b16 %v8579_v47  ;;  %v7875_v53 = vpop.f32.mrf.mxu1  ;;  %v8899_v52 = vld [vmem:[#allocation4 + $0x8] sm:$0xf] }
 0x48f   : > { %v8708_v13 = vunpack.c.l.b16 %v8580_v5  ;;  %v8709_v59 = vunpack.c.l.b16 %v8581_v1  ;;  %v8213_v61 = vmax.f32 %v8211_v6, %v8212_v10  ;;  %v8219_v27 = vrot.slane %v8218_v32, 1  ;;  %v8906_v1 = vld [vmem:[#allocation4 + $0x4] sm:$0x1] }
 0x490   : > { %v8226_v51 = vrot.slane %v8225_v62, 1  ;;  %v8233_v41 = vrot.slane %v8232_v60, 1  ;;  %v7693_v44 = vadd.f32 %v16372_v35, %v7604_v8  ;;  %v7606_v31 = vadd.f32 %v7605_v14, %v16064_v58  ;;  %v7786_v58 = vpop.f32.mrf.mxu0 }
 0x491   : > { %v8775_v63 = vsel %vm8763_vm5, %v8708_v13, %v8707_v34  ;;  %v16426_v19 = vsel %vm13306_vm4, %v11874_v11, %v5051_v36  ;;  %v8220_v55 = vmax.f32 %v8218_v32, %v8219_v27  ;;  %v8710_v33 = vunpack.c.l.b16 %v8582_v30  ;;  %v8907_v32 = vld [vmem:[#allocation4 + $0xc] sm:$0x1]  ;;  %v8856_v34 = vld [vmem:[#allocation4 + $0x10] sm:$0xf] }
 0x492   : > { %v8776_v24 = vsel %vm8765_vm6, %v8709_v59, %v8775_v63  ;;  %v8227_v9 = vmax.f32 %v8225_v62, %v8226_v51  ;;  %v8234_v57 = vmax.f32 %v8232_v60, %v8233_v41  ;;  %v8583_v25 = vpack.c.bf16 %v8213_v61, %v8213_v61  ;;  %v6835_v60 = vpop.permute.xlu2 %6834  ;;  %v12801_v63 = vld [vmem:[#allocation3 + $0xb4] sm:$0xff] }
 0x493   : > { %v7695_v35 = vadd.f32 %v16402_v20, %v7606_v31  ;;  %v5053_v14 = vrot.slane %v5051_v36, 4  ;;  %v8584_v4 = vpack.c.bf16 %v8220_v55, %v8220_v55  ;;  %v8915_v11 = vshrl.u32 %v8898_v23, 16 }
 0x494   : > { %v8585_v38 = vpack.c.bf16 %v8227_v9, %v8227_v9  ;;  %v8586_v42 = vpack.c.bf16 %v8234_v57, %v8234_v57  ;;  %v8777_v16 = vsel %vm8767_vm0, %v8710_v33, %v8776_v24  ;;  %v8711_v37 = vunpack.c.l.b16 %v8583_v25  ;;  %v12859_v57 = vld [vmem:[%s17644_s5 + $0x38] sm:$0xff] }
 0x495   : > { %v7782_v39 = vadd.f32 %v16389_v40, %v7693_v44  ;;  %v8918_v47 = vshll.u32 %v8898_v23, 16  ;;  %v8712_v6 = vunpack.c.l.b16 %v8584_v4  ;;  %v8917_v20 = vrot.slane %v8915_v11, 4  ;;  %9983 = vmatpush.bf16.msra.mxu2 %v12859_v57 }
 0x496   : > { %v8713_v29 = vunpack.c.l.b16 %v8585_v38  ;;  %v8714_v49 = vunpack.c.l.b16 %v8586_v42  ;;  %v8778_v18 = vsel %vm8769_vm14, %v8711_v37, %v8777_v16  ;;  %v7784_v36 = vadd.f32 %v16407_v56, %v7695_v35 }
 0x497   : > { %v7609_v5 = vadd.f32 %v7608_v48, %v16075_v28  ;;  %v8920_v8 = vrot.slane %v8918_v47, 5  ;;  %v8779_v7 = vsel %vm8771_vm8, %v8712_v6, %v8778_v18  ;;  %v8924_v40 = vshll.u32 %v8906_v1, 16  ;;  %v7699_v28 = vpop.f32.mrf.mxu3  ;;  %v7610_v48 = vpop.f32.mrf.mxu2 }
 0x498   : > { %v8820_v10 = vpack.c.b16 %v8714_v49, %v8714_v49  ;;  %v8929_v62 = vshrl.u32 %v8899_v52, 16  ;;  %v8780_v30 = vsel %vm8773_vm11, %v8713_v29, %v8779_v7  ;;  %v8932_v59 = vshll.u32 %v8899_v52, 16  ;;  %v7788_v35 = vpop.f32.mrf.mxu0  ;;  %v6565_v52 = vpop.permute.xlu0 %6564 }
 0x499   : > { %v8921_v13 = vor.u32 %v8920_v8, %v8917_v20  ;;  %v5055_v56 = vsel %vm13306_vm4, %v5053_v14, %v5054_v22  ;;  %v8819_v61 = vpack.c.b16 %v8780_v30, %v8780_v30  ;;  %v8926_v51 = vrot.slane %v8924_v40, 5  ;;  %v7877_v14 = vpop.f32.mrf.mxu1 }
 0x49a   : > { %v8860_v27 = vsel %vm14643_vm9, %v8820_v10, %v8859_v17  ;;  %v8931_v41 = vrot.slane %v8929_v62, 4  ;;  %v7871_v44 = vadd.f32 %v16394_v50, %v7782_v39  ;;  %v8934_v23 = vrot.slane %v8932_v59, 5  ;;  %v17734_v17 = vld [vmem:[#allocation10_spill] sm:$0xff]  ;;  %v16484_v59 = vld [vmem:[#allocation3 + $0xb8] sm:$0xf] }
 0x49b   : > { %8861 = vst [vmem:[#allocation4 + $0x14] sm:$0x1] %v8860_v27  ;;  %v8922_v31 = vrot.slane %v8921_v13, 4  ;;  %v8938_v24 = vshll.u32 %v8907_v32, 16  ;;  %v8857_v45 = vsel %vm14588_vm13, %v8819_v61, %v8856_v34  ;;  %v7873_v55 = vadd.f32 %v16409_v46, %v7784_v36 }
 0x49c   : > { %v7698_v22 = vadd.f32 %v16415_v0, %v7609_v5  ;;  %v7135_v9 = vsel %vm6888_vm10, %v12801_v63, %v6835_v60  ;;  %8858 = vst [vmem:[#allocation4 + $0x10] sm:$0xf] %v8857_v45  ;;  %v8935_v33 = vor.u32 %v8934_v23, %v8931_v41  ;;  %v7611_v25 = vadd.f32 %v7610_v48, %v16091_v21  ;;  %v16463_v21 = vld [vmem:[%s17643_s4] ss:$0 sm:$0xff] }
 0x49d   : > { %v8927_v50 = vsel %vm13361_vm7, %v8922_v31, %v8926_v51  ;;  %7825 = vmatmul.bf16.gmra.mxu0 %v7135_v9  ;;  %v6453_v0 = vunpack.c.l.b16 %v5055_v56  ;;  %v7938_v4 = vmax.f32 %v7871_v44, 0.0  ;;  %v8940_v42 = vrot.slane %v8938_v24, 5 }
 0x49e   : > { %v7787_v46 = vadd.f32 %v7786_v58, %v7698_v22  ;;  %v8936_v38 = vrot.slane %v8935_v33, 4  ;;  %v7700_v11 = vadd.f32 %v7699_v28, %v7611_v25  ;;  %v9471_v16 = vunpack.c.l.b16 %v8927_v50 }
 0x49f   : > { %v6452_v39 = vunpack.c.l.b16 %v16426_v19  ;;  %v7939_v47 = vmax.f32 %v7873_v55, 0.0  ;;  %v7525_v58 = vadd.f32 %v16463_v21, %v15814_v12  ;;  %v16473_v36 = vadd.f32 %v16463_v21, %v17734_v17  ;;  %v16476_v8 = vpop.f32.mrf.mxu3  ;;  %v6118_v12 = vld [vmem:[#allocation3 + $0xc0] sm:$0xe]  ;;  %v7613_v62 = vpop.f32.mrf.mxu2 }
 0x4a0   : > { %v7876_v37 = vadd.f32 %v7875_v53, %v7787_v46  ;;  %v8941_v6 = vsel %vm13361_vm7, %v8936_v38, %v8940_v42  ;;  %v7789_v29 = vadd.f32 %v7788_v35, %v7700_v11  ;;  %v17733_v53 = vld [vmem:[#allocation9_spill] sm:$0xff]  ;;  %v7974_v5 = vsel %vm6888_vm10, %v7938_v4, -inf  ;;  %v16482_v13 = vpop.f32.mrf.mxu0 }
 0x4a1   : > { %v9472_v49 = vunpack.c.l.b16 %v8941_v6  ;;  %v6470_v18 = vpack.c.b16 %v6453_v0, %v6452_v39  ;;  %v16469_v19 = vadd.f32 %v16463_v21, %v17733_v53  ;;  %v6268_v32 = vrot.slane %v16279_v2, 5  ;;  %v16492_v23 = vpop.f32.mrf.mxu1 }
 0x4a2   : > { %v7940_v20 = vmax.f32 %v7876_v37, 0.0  ;;  %v7878_v1 = vadd.f32 %v7877_v14, %v7789_v29  ;;  %v7977_v60 = vsel %vm6888_vm10, %v7939_v47, -inf  ;;  %v5058_v56 = vrot.slane %v16484_v59, 5  ;;  %v17738_v59 = vld [vmem:[#allocation14_spill] sm:$0xff] }
 0x4a3   : > { %v9479_v7 = vpack.c.b16 %v9472_v49, %v9471_v16  ;;  %v7011_v40 = vsel %vm6888_vm10, %v6470_v18, %v6565_v52  ;;  %v11906_v28 = vrot.slane %v6118_v12, 9  ;;  %v6270_v61 = vrot.slane %v6268_v32, 4 }
 0x4a4   : > { %v7975_v10 = vsel %vm6888_vm10, %v7940_v20, -inf  ;;  %v7941_v34 = vmax.f32 %v7878_v1, 0.0  ;;  %7652 = vmatmul.bf16.gmra.mxu2 %v7011_v40  ;;  %v6271_v2 = vrot.slane %v16307_v43, 5  ;;  %v16489_v27 = vadd.f32 %v7613_v62, %v7525_v58 }
 0x4a5   : > { %v7976_v30 = vmax.f32 %v7974_v5, %v7975_v10  ;;  %9483 = vrot.lane.b32.xlu0 %v9479_v7, %s13190_s23  ;;  %v16497_v45 = vsel %vm13306_vm4, %v11906_v28, %v6268_v32 }
 0x4a6   : > { %v7978_v24 = vsel %vm6888_vm10, %v7941_v34, -inf  ;;  %v16501_v55 = vsel %vm13306_vm4, %v6270_v61, %v6271_v2 }
 0x4a7   : > { %v8038_v51 = vrot.slane %v7976_v30, 2  ;;  %v8039_v41 = vrot.slane %v7976_v30, 4  ;;  %v8040_v63 = vrot.slane %v7976_v30, 6  ;;  %v8235_v44 = vsel %vm8122_vm12, %v7976_v30, -inf  ;;  %v7615_v16 = vpop.f32.mrf.mxu2  ;;  %v16510_v6 = vpop.f32.mrf.mxu3 }
 0x4a8   : > { %v8236_v31 = vrot.slane %v8235_v44, 4  ;;  %v7979_v57 = vmax.f32 %v7977_v60, %v7978_v24  ;;  %v16512_v18 = vpop.f32.mrf.mxu0 }
 0x4a9   : > { %v8242_v43 = vsel %vm8122_vm12, %v8038_v51, -inf  ;;  %v8249_v22 = vsel %vm8122_vm12, %v8039_v41, -inf  ;;  %v8256_v9 = vsel %vm8122_vm12, %v8040_v63, -inf  ;;  %v16514_v51 = vpop.f32.mrf.mxu1 }
 0x4aa   : > { %v8237_v48 = vmax.f32 %v8235_v44, %v8236_v31  ;;  %v8243_v50 = vrot.slane %v8242_v43, 4  ;;  %v8250_v33 = vrot.slane %v8249_v22, 4  ;;  %v8257_v25 = vrot.slane %v8256_v9, 4 }
 0x4ab   : > { %v8041_v35 = vrot.slane %v7979_v57, 2  ;;  %v8042_v14 = vrot.slane %v7979_v57, 4  ;;  %v8043_v46 = vrot.slane %v7979_v57, 6  ;;  %v8263_v0 = vsel %vm8122_vm12, %v7979_v57, -inf }
 0x4ac   : > { %v8238_v4 = vrot.slane %v8237_v48, 2  ;;  %v8244_v38 = vmax.f32 %v8242_v43, %v8243_v50  ;;  %v8251_v42 = vmax.f32 %v8249_v22, %v8250_v33  ;;  %v8258_v11 = vmax.f32 %v8256_v9, %v8257_v25 }
 0x4ad   : > { %v8264_v37 = vrot.slane %v8263_v0, 4  ;;  %v8270_v39 = vsel %vm8122_vm12, %v8041_v35, -inf  ;;  %v8277_v52 = vsel %vm8122_vm12, %v8042_v14, -inf  ;;  %v8284_v47 = vsel %vm8122_vm12, %v8043_v46, -inf }
 0x4ae   : > { %v8239_v29 = vmax.f32 %v8237_v48, %v8238_v4  ;;  %v8245_v58 = vrot.slane %v8244_v38, 2  ;;  %v8252_v49 = vrot.slane %v8251_v42, 2  ;;  %v8259_v20 = vrot.slane %v8258_v11, 2 }
 0x4af   : > { %v8265_v53 = vmax.f32 %v8263_v0, %v8264_v37  ;;  %v8271_v17 = vrot.slane %v8270_v39, 4  ;;  %v8278_v5 = vrot.slane %v8277_v52, 4  ;;  %v8285_v1 = vrot.slane %v8284_v47, 4  ;;  %v7618_v0 = vpop.f32.mrf.mxu2  ;;  %v7707_v37 = vpop.f32.mrf.mxu3 }
 0x4b0   : > { %v8240_v7 = vrot.slane %v8239_v29, 1  ;;  %v8246_v10 = vmax.f32 %v8244_v38, %v8245_v58  ;;  %v8253_v12 = vmax.f32 %v8251_v42, %v8252_v49  ;;  %v8260_v32 = vmax.f32 %v8258_v11, %v8259_v20  ;;  %v7796_v58 = vpop.f32.mrf.mxu0 }
 0x4b1   : > { %v8266_v40 = vrot.slane %v8265_v53, 2  ;;  %v8272_v62 = vmax.f32 %v8270_v39, %v8271_v17  ;;  %v8279_v60 = vmax.f32 %v8277_v52, %v8278_v5  ;;  %v8286_v30 = vmax.f32 %v8284_v47, %v8285_v1 }
 0x4b2   : > { %v8241_v34 = vmax.f32 %v8239_v29, %v8240_v7  ;;  %v8247_v28 = vrot.slane %v8246_v10, 1  ;;  %v8254_v61 = vrot.slane %v8253_v12, 1  ;;  %v8261_v2 = vrot.slane %v8260_v32, 1 }
 0x4b3   : > { %v8267_v41 = vmax.f32 %v8265_v53, %v8266_v40  ;;  %v8273_v63 = vrot.slane %v8272_v62, 2  ;;  %v8280_v44 = vrot.slane %v8279_v60, 2  ;;  %v8287_v31 = vrot.slane %v8286_v30, 2 }
 0x4b4   : > { %v8248_v24 = vmax.f32 %v8246_v10, %v8247_v28  ;;  %v8255_v43 = vmax.f32 %v8253_v12, %v8254_v61  ;;  %v8262_v22 = vmax.f32 %v8260_v32, %v8261_v2  ;;  %v8587_v9 = vpack.c.bf16 %v8241_v34, %v8241_v34  ;;  %v7885_v28 = vpop.f32.mrf.mxu1 }
 0x4b5   : > { %v8268_v57 = vrot.slane %v8267_v41, 1  ;;  %v8274_v48 = vmax.f32 %v8272_v62, %v8273_v63  ;;  %v8281_v50 = vmax.f32 %v8279_v60, %v8280_v44  ;;  %v8288_v33 = vmax.f32 %v8286_v30, %v8287_v31 }
 0x4b6   : > { %v8588_v25 = vpack.c.bf16 %v8248_v24, %v8248_v24  ;;  %v8589_v35 = vpack.c.bf16 %v8255_v43, %v8255_v43  ;;  %v8590_v14 = vpack.c.bf16 %v8262_v22, %v8262_v22  ;;  %v8715_v46 = vunpack.c.l.b16 %v8587_v9  ;;  %v8862_v43 = vld [vmem:[#allocation4 + $0x18] sm:$0xf] }
 0x4b7   : > { %v8269_v4 = vmax.f32 %v8267_v41, %v8268_v57  ;;  %v8275_v38 = vrot.slane %v8274_v48, 1  ;;  %v8282_v42 = vrot.slane %v8281_v50, 1  ;;  %v8289_v11 = vrot.slane %v8288_v33, 1  ;;  %v12858_v57 = vld [vmem:[%s17644_s5 + $0x30] sm:$0xff] }
 0x4b8   : > { %v8716_v39 = vunpack.c.l.b16 %v8588_v25  ;;  %v8717_v52 = vunpack.c.l.b16 %v8589_v35  ;;  %v8718_v47 = vunpack.c.l.b16 %v8590_v14  ;;  %v6868_v29 = vunpack.c.l.b16 %v16497_v45  ;;  %v13098_v25 = vld [vmem:[#allocation3 + $0xbc] sm:$0x1]  ;;  %v7709_v14 = vpop.f32.mrf.mxu3  ;;  %9984 = vmatpush.bf16.msra.mxu2 %v12858_v57 }
 0x4b9   : > { %v8276_v49 = vmax.f32 %v8274_v48, %v8275_v38  ;;  %v8283_v20 = vmax.f32 %v8281_v50, %v8282_v42  ;;  %v8290_v53 = vmax.f32 %v8288_v33, %v8289_v11  ;;  %v8591_v17 = vpack.c.bf16 %v8269_v4, %v8269_v4  ;;  %v7620_v48 = vpop.f32.mrf.mxu2 }
 0x4ba   : > { %v8781_v5 = vsel %vm8763_vm5, %v8716_v39, %v8715_v46  ;;  %v6869_v1 = vunpack.c.l.b16 %v16501_v55  ;;  %v7703_v7 = vadd.f32 %v16476_v8, %v16489_v27  ;;  %v7616_v10 = vadd.f32 %v7615_v16, %v16469_v19  ;;  %v17735_v8 = vld [vmem:[#allocation11_spill] sm:$0xff]  ;;  %v8865_v16 = vld [vmem:[#allocation4 + $0x1c] sm:$0x1] }
 0x4bb   : > { %v8782_v12 = vsel %vm8765_vm6, %v8717_v52, %v8781_v5  ;;  %v8592_v32 = vpack.c.bf16 %v8276_v49, %v8276_v49  ;;  %v8593_v40 = vpack.c.bf16 %v8283_v20, %v8283_v20  ;;  %v8594_v62 = vpack.c.bf16 %v8290_v53, %v8290_v53  ;;  %v17736_v53 = vld [vmem:[#allocation12_spill] sm:$0xff] }
 0x4bc   : > { %v8783_v45 = vsel %vm8767_vm0, %v8718_v47, %v8782_v12  ;;  %v8719_v60 = vunpack.c.l.b16 %v8591_v17  ;;  %v6886_v30 = vpack.c.b16 %v6869_v1, %v6868_v29  ;;  %v7792_v34 = vadd.f32 %v16482_v13, %v7703_v7  ;;  %v7887_v29 = vpop.f32.mrf.mxu1 }
 0x4bd   : > { %v8720_v61 = vunpack.c.l.b16 %v8592_v32  ;;  %v8721_v2 = vunpack.c.l.b16 %v8593_v40  ;;  %v8722_v55 = vunpack.c.l.b16 %v8594_v62  ;;  %v7705_v41 = vadd.f32 %v16510_v6, %v7616_v10  ;;  %v17737_v10 = vld [vmem:[#allocation13_spill] sm:$0xff] }
 0x4be   : > { %v7532_v19 = vadd.f32 %v16463_v21, %v17735_v8  ;;  %v8784_v27 = vsel %vm8769_vm14, %v8719_v60, %v8783_v45  ;;  %12258 = vmatmul.msk.bf16.gmra.mxu1 %vm6888_vm10, %v6886_v30  ;;  %v7619_v63 = vadd.f32 %v7618_v0, %v16473_v36  ;;  %v5060_v24 = vrot.slane %v5058_v56, 4  ;;  %v4902_v36 = vld [vmem:[#allocation3 + $0xb4] sm:$0xe]  ;;  %v16563_v45 = vld [vmem:[#allocation3 + $0xc0] sm:$0xf] }
 0x4bf   : > { %v8785_v44 = vsel %vm8771_vm8, %v8720_v61, %v8784_v27  ;;  %v8822_v31 = vpack.c.b16 %v8722_v55, %v8722_v55  ;;  %v7794_v13 = vadd.f32 %v16512_v18, %v7705_v41  ;;  %v7881_v22 = vadd.f32 %v16492_v23, %v7792_v34  ;;  %v7798_v23 = vpop.f32.mrf.mxu0 }
 0x4c0   : > { %v8786_v6 = vsel %vm8773_vm11, %v8721_v2, %v8785_v44  ;;  %v7708_v9 = vadd.f32 %v7707_v37, %v7619_v63  ;;  %v7621_v18 = vadd.f32 %v7620_v48, %v7532_v19  ;;  %v5061_v35 = vrot.slane %v13098_v25, 5  ;;  %v6567_v19 = vpop.permute.xlu0 %6566  ;;  %v16572_v27 = vpop.f32.mrf.mxu3 }
 0x4c1   : > { %v8821_v50 = vpack.c.b16 %v8786_v6, %v8786_v6  ;;  %v8866_v33 = vsel %vm14643_vm9, %v8822_v31, %v8865_v16  ;;  %v7883_v46 = vadd.f32 %v16514_v51, %v7794_v13  ;;  %v11875_v42 = vrot.slane %v4902_v36, 9  ;;  %v7623_v62 = vpop.f32.mrf.mxu2 }
 0x4c2   : > { %8867 = vst [vmem:[#allocation4 + $0x1c] sm:$0x1] %v8866_v33  ;;  %v7797_v0 = vadd.f32 %v7796_v58, %v7708_v9  ;;  %v7710_v38 = vadd.f32 %v7709_v14, %v7621_v18  ;;  %v5062_v11 = vsel %vm13306_vm4, %v5060_v24, %v5061_v35  ;;  %v7942_v37 = vmax.f32 %v7881_v22, 0.0  ;;  %v12802_v22 = vld [vmem:[#allocation3 + $0xc0] sm:$0xff] }
 0x4c3   : > { %v8863_v4 = vsel %vm14588_vm13, %v8821_v50, %v8862_v43  ;;  %v5059_v51 = vsel %vm13306_vm4, %v11875_v42, %v5058_v56  ;;  %v7943_v47 = vmax.f32 %v7883_v46, 0.0  ;;  %v6455_v49 = vunpack.c.l.b16 %v5062_v11 }
 0x4c4   : > { %8864 = vst [vmem:[#allocation4 + $0x18] sm:$0xf] %v8863_v4  ;;  %v7886_v39 = vadd.f32 %v7885_v28, %v7797_v0  ;;  %v7799_v52 = vadd.f32 %v7798_v23, %v7710_v38  ;;  %v7535_v17 = vadd.f32 %v16463_v21, %v17736_v53  ;;  %v7980_v5 = vsel %vm6888_vm10, %v7942_v37, -inf  ;;  %v16568_v28 = vld [vmem:[#allocation3 + $0xc4] sm:$0xf]  ;;  %v16583_v38 = vpop.f32.mrf.mxu1 }
 0x4c5   : > { %v6454_v7 = vunpack.c.l.b16 %v5059_v51  ;;  %v16557_v12 = vadd.f32 %v16463_v21, %v17737_v10  ;;  %v16561_v56 = vadd.f32 %v16463_v21, %v17738_v59  ;;  %v7983_v60 = vsel %vm6888_vm10, %v7943_v47, -inf }
 0x4c6   : > { %v7944_v58 = vmax.f32 %v7886_v39, 0.0  ;;  %v7888_v20 = vadd.f32 %v7887_v29, %v7799_v52  ;;  %v16566_v30 = vadd.f32 %v7623_v62, %v7535_v17  ;;  %v5481_v61 = vshll.u32 %v16568_v28, 16 }
 0x4c7   : > { %v6471_v34 = vpack.c.b16 %v6455_v49, %v6454_v7  ;;  %v5472_v31 = vshrl.u32 %v16563_v45, 16  ;;  %v16580_v33 = vpop.f32.mrf.mxu0 }
 0x4c8   : > { %v7981_v1 = vsel %vm6888_vm10, %v7944_v58, -inf  ;;  %v7945_v40 = vmax.f32 %v7888_v20, 0.0  ;;  %v7714_v62 = vpop.f32.mrf.mxu3 }
 0x4c9   : > { %v7982_v32 = vmax.f32 %v7980_v5, %v7981_v1  ;;  %v7015_v44 = vsel %vm6888_vm10, %v6471_v34, %v6567_v19 }
 0x4ca   : > { %v7984_v63 = vsel %vm6888_vm10, %v7945_v40, -inf  ;;  %7657 = vmatmul.bf16.gmra.mxu2 %v7015_v44 }
 0x4cb   : > { %v8044_v2 = vrot.slane %v7982_v32, 2  ;;  %v8045_v55 = vrot.slane %v7982_v32, 4  ;;  %v8046_v41 = vrot.slane %v7982_v32, 6  ;;  %v8291_v8 = vsel %vm8122_vm12, %v7982_v32, -inf  ;;  %v6837_v43 = vpop.permute.xlu2 %6836 }
 0x4cc   : > { %v8292_v16 = vrot.slane %v8291_v8, 4  ;;  %v7985_v9 = vmax.f32 %v7983_v60, %v7984_v63  ;;  %v7139_v18 = vsel %vm6888_vm10, %v12802_v22, %v6837_v43  ;;  %v7625_v63 = vpop.f32.mrf.mxu2 }
 0x4cd   : > { %v8298_v13 = vsel %vm8122_vm12, %v8044_v2, -inf  ;;  %v8305_v24 = vsel %vm8122_vm12, %v8045_v55, -inf  ;;  %v8312_v6 = vsel %vm8122_vm12, %v8046_v41, -inf  ;;  %7830 = vmatmul.bf16.gmra.mxu0 %v7139_v18  ;;  %v16589_v18 = vpop.f32.mrf.mxu1 }
 0x4ce   : > { %v8293_v57 = vmax.f32 %v8291_v8, %v8292_v16  ;;  %v8299_v48 = vrot.slane %v8298_v13, 4  ;;  %v8306_v36 = vrot.slane %v8305_v24, 4  ;;  %v8313_v50 = vrot.slane %v8312_v6, 4 }
 0x4cf   : > { %v8047_v25 = vrot.slane %v7985_v9, 2  ;;  %v8048_v35 = vrot.slane %v7985_v9, 4  ;;  %v8049_v14 = vrot.slane %v7985_v9, 6  ;;  %v8319_v42 = vsel %vm8122_vm12, %v7985_v9, -inf  ;;  %v7803_v43 = vpop.f32.mrf.mxu0 }
 0x4d0   : > { %v8294_v46 = vrot.slane %v8293_v57, 2  ;;  %v8300_v0 = vmax.f32 %v8298_v13, %v8299_v48  ;;  %v8307_v23 = vmax.f32 %v8305_v24, %v8306_v36  ;;  %v8314_v4 = vmax.f32 %v8312_v6, %v8313_v50 }
 0x4d1   : > { %v8326_v11 = vsel %vm8122_vm12, %v8047_v25, -inf  ;;  %v8333_v37 = vsel %vm8122_vm12, %v8048_v35, -inf  ;;  %v8340_v39 = vsel %vm8122_vm12, %v8049_v14, -inf  ;;  %v8320_v58 = vrot.slane %v8319_v42, 4 }
 0x4d2   : > { %v8295_v52 = vmax.f32 %v8293_v57, %v8294_v46  ;;  %v8301_v51 = vrot.slane %v8300_v0, 2  ;;  %v8308_v47 = vrot.slane %v8307_v23, 2  ;;  %v8315_v29 = vrot.slane %v8314_v4, 2 }
 0x4d3   : > { %v8327_v49 = vrot.slane %v8326_v11, 4  ;;  %v8334_v20 = vrot.slane %v8333_v37, 4  ;;  %v8341_v53 = vrot.slane %v8340_v39, 4  ;;  %v8321_v10 = vmax.f32 %v8319_v42, %v8320_v58 }
 0x4d4   : > { %v8296_v17 = vrot.slane %v8295_v52, 1  ;;  %v8302_v5 = vmax.f32 %v8300_v0, %v8301_v51  ;;  %v8309_v1 = vmax.f32 %v8307_v23, %v8308_v47  ;;  %v8316_v7 = vmax.f32 %v8314_v4, %v8315_v29 }
 0x4d5   : > { %v8328_v59 = vmax.f32 %v8326_v11, %v8327_v49  ;;  %v8335_v32 = vmax.f32 %v8333_v37, %v8334_v20  ;;  %v8342_v40 = vmax.f32 %v8340_v39, %v8341_v53  ;;  %v8322_v41 = vrot.slane %v8321_v10, 2 }
 0x4d6   : > { %v8297_v60 = vmax.f32 %v8295_v52, %v8296_v17  ;;  %v8303_v34 = vrot.slane %v8302_v5, 1  ;;  %v8310_v2 = vrot.slane %v8309_v1, 1  ;;  %v8317_v55 = vrot.slane %v8316_v7, 1 }
 0x4d7   : > { %v8329_v8 = vrot.slane %v8328_v59, 2  ;;  %v8336_v19 = vrot.slane %v8335_v32, 2  ;;  %v8343_v16 = vrot.slane %v8342_v40, 2  ;;  %v8323_v22 = vmax.f32 %v8321_v10, %v8322_v41 }
 0x4d8   : > { %v8304_v44 = vmax.f32 %v8302_v5, %v8303_v34  ;;  %v8311_v13 = vmax.f32 %v8309_v1, %v8310_v2  ;;  %v8318_v24 = vmax.f32 %v8316_v7, %v8317_v55  ;;  %v8595_v6 = vpack.c.bf16 %v8297_v60, %v8297_v60  ;;  %v7717_v5 = vpop.f32.mrf.mxu3  ;;  %v7628_v34 = vpop.f32.mrf.mxu2 }
 0x4d9   : > { %v8330_v9 = vmax.f32 %v8328_v59, %v8329_v8  ;;  %v8337_v57 = vmax.f32 %v8335_v32, %v8336_v19  ;;  %v8344_v48 = vmax.f32 %v8342_v40, %v8343_v16  ;;  %v7713_v25 = vadd.f32 %v16572_v27, %v16566_v30  ;;  %v7806_v8 = vpop.f32.mrf.mxu0 }
 0x4da   : > { %v8596_v36 = vpack.c.bf16 %v8304_v44, %v8304_v44  ;;  %v8597_v50 = vpack.c.bf16 %v8311_v13, %v8311_v13  ;;  %v5475_v35 = vshll.u32 %v16563_v45, 16  ;;  %v8324_v14 = vrot.slane %v8323_v22, 1  ;;  %v17739_v45 = vld [vmem:[#allocation15_spill] sm:$0xff] }
 0x4db   : > { %v8331_v46 = vrot.slane %v8330_v9, 1  ;;  %v8338_v0 = vrot.slane %v8337_v57, 1  ;;  %v8345_v23 = vrot.slane %v8344_v48, 1  ;;  %v8598_v4 = vpack.c.bf16 %v8318_v24, %v8318_v24  ;;  %v8900_v13 = vld [vmem:[#allocation4 + $0x10] sm:$0xf] }
 0x4dc   : > { %v8723_v42 = vunpack.c.l.b16 %v8595_v6  ;;  %v8724_v11 = vunpack.c.l.b16 %v8596_v36  ;;  %v8725_v37 = vunpack.c.l.b16 %v8597_v50  ;;  %v8325_v39 = vmax.f32 %v8323_v22, %v8324_v14 }
 0x4dd   : > { %v8332_v52 = vmax.f32 %v8330_v9, %v8331_v46  ;;  %v8339_v51 = vmax.f32 %v8337_v57, %v8338_v0  ;;  %v8346_v47 = vmax.f32 %v8344_v48, %v8345_v23  ;;  %v7626_v58 = vadd.f32 %v7625_v63, %v16557_v12  ;;  %v13100_v63 = vld [vmem:[#allocation3 + $0xc8] sm:$0x1]  ;;  %v7895_v9 = vpop.f32.mrf.mxu1  ;;  %v8908_v48 = vld [vmem:[#allocation4 + $0x14] sm:$0x1]  ;;  %v8901_v0 = vld [vmem:[#allocation4 + $0x18] sm:$0xf] }
 0x4de   : > { %v8787_v29 = vsel %vm8763_vm5, %v8724_v11, %v8723_v42  ;;  %v5474_v30 = vrot.slane %v5472_v31, 4  ;;  %v5485_v27 = vshrl.u32 %v16568_v28, 16  ;;  %v8599_v20 = vpack.c.bf16 %v8325_v39, %v8325_v39  ;;  %v8909_v39 = vld [vmem:[#allocation4 + $0x1c] sm:$0x1] }
 0x4df   : > { %v8788_v49 = vsel %vm8765_vm6, %v8725_v37, %v8787_v29  ;;  %v8600_v53 = vpack.c.bf16 %v8332_v52, %v8332_v52  ;;  %v8601_v17 = vpack.c.bf16 %v8339_v51, %v8339_v51  ;;  %v8726_v1 = vunpack.c.l.b16 %v8598_v4 }
 0x4e0   : > { %v8602_v7 = vpack.c.bf16 %v8346_v47, %v8346_v47  ;;  %v7802_v10 = vadd.f32 %v16580_v33, %v7713_v25  ;;  %v7715_v59 = vadd.f32 %v7714_v62, %v7626_v58  ;;  %v8727_v32 = vunpack.c.l.b16 %v8599_v20  ;;  %v8871_v33 = vld [vmem:[#allocation4 + $0x24] sm:$0x1] }
 0x4e1   : > { %v8728_v40 = vunpack.c.l.b16 %v8600_v53  ;;  %v8729_v60 = vunpack.c.l.b16 %v8601_v17  ;;  %v5477_v12 = vrot.slane %v5475_v35, 5  ;;  %v16603_v31 = vadd.f32 %v16463_v21, %v17739_v45  ;;  %v6839_v17 = vpop.permute.xlu2 %6838 }
 0x4e2   : > { %v8789_v2 = vsel %vm8767_vm0, %v8726_v1, %v8788_v49  ;;  %v8730_v55 = vunpack.c.l.b16 %v8602_v7  ;;  %v5483_v41 = vrot.slane %v5481_v61, 5  ;;  %v5487_v16 = vrot.slane %v5485_v27, 4  ;;  %v8868_v61 = vld [vmem:[#allocation4 + $0x20] sm:$0xf]  ;;  %v12803_v1 = vld [vmem:[#allocation3 + $0xcc] sm:$0xff] }
 0x4e3   : > { %v8790_v19 = vsel %vm8769_vm14, %v8727_v32, %v8789_v2  ;;  %v5478_v62 = vor.u32 %v5477_v12, %v5474_v30  ;;  %v5491_v44 = vshll.u32 %v13100_v63, 16  ;;  %v16611_v22 = vadd.f32 %v16583_v38, %v7802_v10  ;;  %v7719_v30 = vpop.f32.mrf.mxu3  ;;  %v12857_v7 = vld [vmem:[%s17644_s5 + $0x28] sm:$0xff]  ;;  %v6695_v10 = vpop.permute.xlu1 %6694  ;;  %v6119_v12 = vld [vmem:[#allocation3 + $0xcc] sm:$0xe] }
 0x4e4   : > { %v8791_v24 = vsel %vm8771_vm8, %v8728_v40, %v8790_v19  ;;  %v8824_v6 = vpack.c.b16 %v8730_v55, %v8730_v55  ;;  %v7804_v57 = vadd.f32 %v7803_v43, %v7715_v59  ;;  %v5488_v50 = vor.u32 %v5487_v16, %v5483_v41  ;;  %9985 = vmatpush.bf16.msra.mxu2 %v12857_v7 }
 0x4e5   : > { %v8792_v28 = vsel %vm8773_vm11, %v8729_v60, %v8791_v24  ;;  %v5479_v36 = vrot.slane %v5478_v62, 4  ;;  %v7629_v25 = vadd.f32 %v7628_v34, %v16561_v56  ;;  %v5493_v46 = vrot.slane %v5491_v44, 5  ;;  %v7630_v60 = vpop.f32.mrf.mxu2  ;;  %v13101_v34 = vld [vmem:[#allocation3 + $0xd0] sm:$0xf]  ;;  %v7897_v24 = vpop.f32.mrf.mxu1 }
 0x4e6   : > { %v8823_v35 = vpack.c.b16 %v8792_v28, %v8792_v28  ;;  %v8872_v14 = vsel %vm14643_vm9, %v8824_v6, %v8871_v33  ;;  %v8943_v23 = vshrl.u32 %v8900_v13, 16  ;;  %v5489_v43 = vrot.slane %v5488_v50, 4  ;;  %v7808_v33 = vpop.f32.mrf.mxu0 }
 0x4e7   : > { %8873 = vst [vmem:[#allocation4 + $0x24] sm:$0x1] %v8872_v14  ;;  %v5484_v38 = vsel %vm13361_vm7, %v5479_v36, %v5483_v41  ;;  %v8946_v4 = vshll.u32 %v8900_v13, 16  ;;  %v8952_v42 = vshll.u32 %v8908_v48, 16  ;;  %v7946_v37 = vmax.f32 %v16611_v22, 0.0 }
 0x4e8   : > { %v8869_v11 = vsel %vm14588_vm13, %v8823_v35, %v8868_v61  ;;  %v16623_v56 = vadd.f32 %v16589_v18, %v7804_v57  ;;  %v8945_v52 = vrot.slane %v8943_v23, 4  ;;  %v5494_v51 = vsel %vm13361_vm7, %v5489_v43, %v5493_v46  ;;  %v12867_v18 = vld [vmem:[%s17644_s5 + $0x78] sm:$0xff]  ;;  %v13102_v41 = vld [vmem:[#allocation3 + $0xd4] sm:$0x1] }
 0x4e9   : > { %8870 = vst [vmem:[#allocation4 + $0x20] sm:$0xf] %v8869_v11  ;;  %v6598_v47 = vunpack.c.l.b16 %v5484_v38  ;;  %v8948_v29 = vrot.slane %v8946_v4, 5  ;;  %v8957_v58 = vshrl.u32 %v8901_v0, 16  ;;  %v6599_v27 = vunpack.c.l.b16 %v5494_v51  ;;  %10012 = vmatpush.bf16.msrb.mxu3 %v12867_v18 }
 0x4ea   : > { %v8954_v49 = vrot.slane %v8952_v42, 5  ;;  %v8960_v20 = vshll.u32 %v8901_v0, 16  ;;  %v7718_v53 = vadd.f32 %v7717_v5, %v7629_v25  ;;  %v8966_v40 = vshll.u32 %v8909_v39, 16  ;;  %v17740_v39 = vld [vmem:[#allocation16_spill] sm:$0xff] }
 0x4eb   : > { %v8949_v59 = vor.u32 %v8948_v29, %v8945_v52  ;;  %v8959_v32 = vrot.slane %v8957_v58, 4  ;;  %v6275_v45 = vrot.slane %v13101_v34, 5  ;;  %v6615_v2 = vpack.c.b16 %v6599_v27, %v6598_v47  ;;  %v16649_v51 = vpop.f32.mrf.mxu3  ;;  %v17741_v27 = vld [vmem:[#allocation17_spill] sm:$0xff] }
 0x4ec   : > { %v8962_v5 = vrot.slane %v8960_v20, 5  ;;  %v7807_v55 = vadd.f32 %v7806_v8, %v7718_v53  ;;  %v6278_v19 = vrot.slane %v13102_v41, 5  ;;  %v7143_v16 = vsel %vm6888_vm10, %v12803_v1, %v6839_v17  ;;  %v12844_v17 = vld [vmem:[#allocation4 + $0xc] sm:$0xf0] }
 0x4ed   : > { %v8950_v62 = vrot.slane %v8949_v59, 4  ;;  %v7631_v63 = vadd.f32 %v7630_v60, %v16603_v31  ;;  %v11907_v44 = vrot.slane %v6119_v12, 9  ;;  %v7079_v13 = vsel %vm6888_vm10, %v6615_v2, %v6695_v10  ;;  %7835 = vmatmul.bf16.gmra.mxu0 %v7143_v16  ;;  %v16666_v34 = vpop.f32.mrf.mxu1 }
 0x4ee   : > { %v8963_v6 = vor.u32 %v8962_v5, %v8959_v32  ;;  %v7896_v22 = vadd.f32 %v7895_v9, %v7807_v55  ;;  %v6277_v57 = vrot.slane %v6275_v45, 4  ;;  %7746 = vmatmul.bf16.gmra.mxu3 %v7079_v13  ;;  %v8968_v36 = vrot.slane %v8966_v40, 5  ;;  %v16664_v32 = vld [vmem:[#allocation4 + $0x18] sm:$0xe] }
 0x4ef   : > { %v8955_v8 = vsel %vm13361_vm7, %v8950_v62, %v8954_v49  ;;  %v6276_v48 = vsel %vm13306_vm4, %v11907_v44, %v6275_v45  ;;  %v7720_v28 = vadd.f32 %v7719_v30, %v7631_v63  ;;  %v7986_v25 = vsel %vm6888_vm10, %v7946_v37, -inf  ;;  %v7633_v37 = vpop.f32.mrf.mxu2  ;;  %v16652_v30 = vpop.f32.mrf.mxu0  ;;  %v12302_v45 = vld [vmem:[#allocation4 + $0x8] sm:$0xf] }
 0x4f0   : > { %v8964_v61 = vrot.slane %v8963_v6, 4  ;;  %v7948_v50 = vmax.f32 %v7896_v22, 0.0  ;;  %v6279_v31 = vsel %vm13306_vm4, %v6277_v57, %v6278_v19  ;;  %v6870_v35 = vunpack.c.l.b16 %v6276_v48 }
 0x4f1   : > { %v6871_v9 = vunpack.c.l.b16 %v6279_v31  ;;  %v7809_v14 = vadd.f32 %v7808_v33, %v7720_v28  ;;  %v7947_v46 = vmax.f32 %v16623_v56, 0.0  ;;  %v9473_v23 = vunpack.c.l.b16 %v8955_v8 }
 0x4f2   : > { %v8969_v0 = vsel %vm13361_vm7, %v8964_v61, %v8968_v36  ;;  %v7987_v38 = vsel %vm6888_vm10, %v7948_v50, -inf  ;;  %v7545_v52 = vadd.f32 %v16463_v21, %v17740_v39  ;;  %v16656_v49 = vadd.f32 %v16463_v21, %v17741_v27 }
 0x4f3   : > { %v9474_v43 = vunpack.c.l.b16 %v8969_v0  ;;  %v7988_v4 = vmax.f32 %v7986_v25, %v7987_v38  ;;  %v6887_v42 = vpack.c.b16 %v6871_v9, %v6870_v35  ;;  %v7898_v11 = vadd.f32 %v7897_v24, %v7809_v14  ;;  %v7724_v25 = vpop.f32.mrf.mxu3 }
 0x4f4   : > { %v7989_v20 = vsel %vm6888_vm10, %v7947_v46, -inf  ;;  %v12303_v55 = vor.u32 %v12844_v17, %v12302_v45  ;;  %v7634_v19 = vadd.f32 %v7633_v37, %v7545_v52  ;;  %v12270_v63 = vrot.slane %v16664_v32, 9  ;;  %v9092_v45 = vld [vmem:[#allocation4 + $0x1c] sm:$0x1] }
 0x4f5   : > { %v9480_v47 = vpack.c.b16 %v9474_v43, %v9473_v23  ;;  %v8050_v29 = vrot.slane %v7988_v4, 2  ;;  %v8051_v58 = vrot.slane %v7988_v4, 4  ;;  %v8052_v56 = vrot.slane %v7988_v4, 6  ;;  %12259 = vmatmul.msk.bf16.gmra.mxu1 %vm6888_vm10, %v6887_v42  ;;  %v16677_v17 = vpop.f32.mrf.mxu1 }
 0x4f6   : > { %v8347_v53 = vsel %vm8122_vm12, %v7988_v4, -inf  ;;  %v7949_v18 = vmax.f32 %v7898_v11, 0.0 }
 0x4f7   : > { %9485 = vrot.lane.b32.xlu1 %v9480_v47, %s13190_s23  ;;  %v8348_v1 = vrot.slane %v8347_v53, 4  ;;  %v8354_v7 = vsel %vm8122_vm12, %v8050_v29, -inf  ;;  %v8361_v10 = vsel %vm8122_vm12, %v8051_v58, -inf  ;;  %v8368_v59 = vsel %vm8122_vm12, %v8052_v56, -inf  ;;  %v7635_v31 = vpop.f32.mrf.mxu2  ;;  %v16673_v0 = vpop.f32.mrf.mxu0 }
 0x4f8   : > { %v8355_v40 = vrot.slane %v8354_v7, 4  ;;  %v8362_v60 = vrot.slane %v8361_v10, 4  ;;  %v8369_v12 = vrot.slane %v8368_v59, 4  ;;  %v7990_v2 = vsel %vm6888_vm10, %v7949_v18, -inf }
 0x4f9   : > { %v8349_v5 = vmax.f32 %v8347_v53, %v8348_v1  ;;  %v7991_v41 = vmax.f32 %v7989_v20, %v7990_v2 }
 0x4fa   : > { %v8356_v33 = vmax.f32 %v8354_v7, %v8355_v40  ;;  %v8363_v62 = vmax.f32 %v8361_v10, %v8362_v60  ;;  %v8370_v16 = vmax.f32 %v8368_v59, %v8369_v12  ;;  %v7723_v12 = vadd.f32 %v16649_v51, %v7634_v19  ;;  %v9093_v19 = vld [vmem:[#allocation4 + $0x24] sm:$0x1] }
 0x4fb   : > { %v8350_v44 = vrot.slane %v8349_v5, 2  ;;  %v8053_v13 = vrot.slane %v7991_v41, 2  ;;  %v8054_v24 = vrot.slane %v7991_v41, 4  ;;  %v8055_v6 = vrot.slane %v7991_v41, 6 }
 0x4fc   : > { %v8357_v22 = vrot.slane %v8356_v33, 2  ;;  %v8364_v57 = vrot.slane %v8363_v62, 2  ;;  %v8371_v8 = vrot.slane %v8370_v16, 2  ;;  %v8375_v48 = vsel %vm8122_vm12, %v7991_v41, -inf }
 0x4fd   : > { %v8351_v28 = vmax.f32 %v8349_v5, %v8350_v44  ;;  %v8376_v61 = vrot.slane %v8375_v48, 4  ;;  %v8382_v36 = vsel %vm8122_vm12, %v8053_v13, -inf  ;;  %v8389_v50 = vsel %vm8122_vm12, %v8054_v24, -inf }
 0x4fe   : > { %v8358_v35 = vmax.f32 %v8356_v33, %v8357_v22  ;;  %v8365_v9 = vmax.f32 %v8363_v62, %v8364_v57  ;;  %v8372_v14 = vmax.f32 %v8370_v16, %v8371_v8  ;;  %v8383_v46 = vrot.slane %v8382_v36, 4  ;;  %v9213_v33 = vld [vmem:[#allocation4 + $0x20] sm:$0xe] }
 0x4ff   : > { %v8352_v23 = vrot.slane %v8351_v28, 1  ;;  %9523 = vrot.lane.b32.xlu1 %v12303_v55, %s13190_s23  ;;  %v8377_v38 = vmax.f32 %v8375_v48, %v8376_v61  ;;  %v8390_v43 = vrot.slane %v8389_v50, 4  ;;  %v8396_v4 = vsel %vm8122_vm12, %v8055_v6, -inf  ;;  %v7638_v8 = vpop.f32.mrf.mxu2  ;;  %v7727_v48 = vpop.f32.mrf.mxu3 }
 0x500   : > { %v8359_v42 = vrot.slane %v8358_v35, 1  ;;  %v8366_v11 = vrot.slane %v8365_v9, 1  ;;  %v8373_v39 = vrot.slane %v8372_v14, 1  ;;  %v8384_v52 = vmax.f32 %v8382_v36, %v8383_v46 }
 0x501   : > { %v8353_v37 = vmax.f32 %v8351_v28, %v8352_v23  ;;  %v8378_v47 = vrot.slane %v8377_v38, 2  ;;  %v8391_v29 = vmax.f32 %v8389_v50, %v8390_v43  ;;  %v8397_v58 = vrot.slane %v8396_v4, 4  ;;  %v7816_v50 = vpop.f32.mrf.mxu0 }
 0x502   : > { %v8360_v56 = vmax.f32 %v8358_v35, %v8359_v42  ;;  %v8367_v27 = vmax.f32 %v8365_v9, %v8366_v11  ;;  %v8374_v20 = vmax.f32 %v8372_v14, %v8373_v39  ;;  %v8385_v53 = vrot.slane %v8384_v52, 2 }
 0x503   : > { %v8603_v18 = vpack.c.bf16 %v8353_v37, %v8353_v37  ;;  %v8379_v1 = vmax.f32 %v8377_v38, %v8378_v47  ;;  %v8392_v7 = vrot.slane %v8391_v29, 2  ;;  %v8398_v10 = vmax.f32 %v8396_v4, %v8397_v58  ;;  %v7905_v58 = vpop.f32.mrf.mxu1 }
 0x504   : > { %v8604_v59 = vpack.c.bf16 %v8360_v56, %v8360_v56  ;;  %v8605_v40 = vpack.c.bf16 %v8367_v27, %v8367_v27  ;;  %v8386_v60 = vmax.f32 %v8384_v52, %v8385_v53  ;;  %v8606_v2 = vpack.c.bf16 %v8374_v20, %v8374_v20 }
 0x505   : > { %v8380_v5 = vrot.slane %v8379_v1, 1  ;;  %v8393_v55 = vmax.f32 %v8391_v29, %v8392_v7  ;;  %v8399_v41 = vrot.slane %v8398_v10, 2  ;;  %v8731_v62 = vunpack.c.l.b16 %v8603_v18 }
 0x506   : > { %v8732_v16 = vunpack.c.l.b16 %v8604_v59  ;;  %v8733_v44 = vunpack.c.l.b16 %v8605_v40  ;;  %v8387_v13 = vrot.slane %v8386_v60, 1  ;;  %v9244_v57 = vrot.slane %v9092_v45, 5  ;;  %v17743_v59 = vld [vmem:[#allocation19_spill] sm:$0xff] }
 0x507   : > { %v8381_v24 = vmax.f32 %v8379_v1, %v8380_v5  ;;  %v8394_v6 = vrot.slane %v8393_v55, 1  ;;  %v8400_v22 = vmax.f32 %v8398_v10, %v8399_v41  ;;  %v7636_v51 = vadd.f32 %v7635_v31, %v16656_v49  ;;  %v17742_v31 = vld [vmem:[#allocation18_spill] sm:$0xff]  ;;  %v12866_v41 = vld [vmem:[%s17644_s5 + $0x70] sm:$0xff] }
 0x508   : > { %v8793_v28 = vsel %vm8763_vm5, %v8732_v16, %v8731_v62  ;;  %v8388_v61 = vmax.f32 %v8386_v60, %v8387_v13  ;;  %v12271_v36 = vrot.slane %v9213_v33, 9  ;;  %v8734_v23 = vunpack.c.l.b16 %v8606_v2  ;;  %v8874_v1 = vld [vmem:[#allocation4 + $0x28] sm:$0xf]  ;;  %v7640_v33 = vpop.f32.mrf.mxu2  ;;  %v7729_v62 = vpop.f32.mrf.mxu3  ;;  %10013 = vmatpush.bf16.msrb.mxu3 %v12866_v41 }
 0x509   : > { %v8794_v35 = vsel %vm8765_vm6, %v8733_v44, %v8793_v28  ;;  %v8395_v9 = vmax.f32 %v8393_v55, %v8394_v6  ;;  %v8401_v14 = vrot.slane %v8400_v22, 1  ;;  %v8607_v46 = vpack.c.bf16 %v8381_v24, %v8381_v24  ;;  %v7818_v13 = vpop.f32.mrf.mxu0 }
 0x50a   : > { %v8608_v38 = vpack.c.bf16 %v8388_v61, %v8388_v61  ;;  %v7725_v43 = vadd.f32 %v7724_v25, %v7636_v51  ;;  %v9245_v4 = vsel %vm13306_vm4, %v12270_v63, %v9244_v57  ;;  %v9248_v49 = vrot.slane %v9093_v19, 5 }
 0x50b   : > { %v8402_v42 = vmax.f32 %v8400_v22, %v8401_v14  ;;  %v8609_v11 = vpack.c.bf16 %v8395_v9, %v8395_v9  ;;  %v8735_v39 = vunpack.c.l.b16 %v8607_v46  ;;  %v7550_v52 = vadd.f32 %v16463_v21, %v17742_v31  ;;  %v12855_v22 = vld [vmem:[%s17644_s5 + $0x18] sm:$0xff]  ;;  %v7907_v28 = vpop.f32.mrf.mxu1 }
 0x50c   : > { %v8795_v37 = vsel %vm8767_vm0, %v8734_v23, %v8794_v35  ;;  %v8736_v47 = vunpack.c.l.b16 %v8608_v38  ;;  %v7812_v29 = vadd.f32 %v16652_v30, %v7723_v12  ;;  %v9249_v63 = vsel %vm13306_vm4, %v12271_v36, %v9248_v49  ;;  %v16700_v30 = vld [vmem:[%s17643_s4] ss:$0 sm:$0xff]  ;;  %v8877_v12 = vld [vmem:[#allocation4 + $0x2c] sm:$0x1]  ;;  %v12286_v23 = vld [vmem:[#allocation4] sm:$0xf] }
 0x50d   : > { %v8610_v56 = vpack.c.bf16 %v8402_v42, %v8402_v42  ;;  %v8737_v25 = vunpack.c.l.b16 %v8609_v11  ;;  %v8796_v32 = vsel %vm8769_vm14, %v8735_v39, %v8795_v37  ;;  %v9545_v20 = vunpack.c.l.b16 %v9245_v4  ;;  %v12840_v38 = vld [vmem:[#allocation4 + $0x4] sm:$0xf0]  ;;  %v12853_v11 = vld [vmem:[%s17644_s5 + $0x8] sm:$0xff] }
 0x50e   : > { %v8797_v27 = vsel %vm8771_vm8, %v8736_v47, %v8796_v32  ;;  %v9546_v53 = vunpack.c.l.b16 %v9249_v63  ;;  %v7814_v7 = vadd.f32 %v16673_v0, %v7725_v43  ;;  %v7639_v10 = vadd.f32 %v7638_v8, %v7550_v52  ;;  %v12856_v0 = vld [vmem:[%s17644_s5 + $0x20] sm:$0xff]  ;;  %v17744_v43 = vld [vmem:[#allocation20_spill] sm:$0xff] }
 0x50f   : > { %v8738_v18 = vunpack.c.l.b16 %v8610_v56  ;;  %v8798_v21 = vsel %vm8773_vm11, %v8737_v25, %v8797_v27  ;;  %v7552_v40 = vadd.f32 %v16700_v30, %v17743_v59  ;;  %v7901_v5 = vadd.f32 %v16666_v34, %v7812_v29  ;;  %9986 = vmatpush.bf16.msra.mxu2 %v12856_v0  ;;  %v12852_v59 = vld [vmem:[%s17644_s5] sm:$0xff] }
 0x510   : > { %v8825_v60 = vpack.c.b16 %v8798_v21, %v8798_v21  ;;  %v9552_v45 = vpack.c.b16 %v9546_v53, %v9545_v20  ;;  %v7728_v55 = vadd.f32 %v7727_v48, %v7639_v10  ;;  %v7903_v24 = vadd.f32 %v16677_v17, %v7814_v7  ;;  %v7643_v46 = vpop.f32.mrf.mxu2  ;;  %v16731_v31 = vpop.f32.mrf.mxu3 }
 0x511   : > { %v8826_v2 = vpack.c.b16 %v8738_v18, %v8738_v18  ;;  %v7641_v44 = vadd.f32 %v7640_v33, %v7552_v40  ;;  %v7950_v8 = vmax.f32 %v7901_v5, 0.0  ;;  %v7555_v4 = vadd.f32 %v16700_v30, %v17744_v43 }
 0x512   : > { %v8875_v16 = vsel %vm14588_vm13, %v8825_v60, %v8874_v1  ;;  %9557 = vrot.lane.b32.xlu1 %v9552_v45, %s13190_s23  ;;  %v7817_v6 = vadd.f32 %v7816_v50, %v7728_v55  ;;  %v7951_v51 = vmax.f32 %v7903_v24, 0.0  ;;  %v12854_v50 = vld [vmem:[%s17644_s5 + $0x10] sm:$0xff]  ;;  %v12287_v39 = vor.u32 %v12840_v38, %v12286_v23 }
 0x513   : > { %8876 = vst [vmem:[#allocation4 + $0x28] sm:$0xf] %v8875_v16  ;;  %v8878_v34 = vsel %vm14643_vm9, %v8826_v2, %v8877_v12  ;;  %v7730_v57 = vadd.f32 %v7729_v62, %v7641_v44  ;;  %9987 = vmatpush.bf16.msra.mxu2 %v12855_v22  ;;  %v7992_v35 = vsel %vm6888_vm10, %v7950_v8, -inf  ;;  %v16737_v32 = vadd.f32 %v7643_v46, %v7555_v4  ;;  %v16746_v40 = vpop.f32.mrf.mxu1 }
 0x514   : > { %8879 = vst [vmem:[#allocation4 + $0x2c] sm:$0x1] %v8878_v34  ;;  %v7906_v48 = vadd.f32 %v7905_v58, %v7817_v6  ;;  %v7995_v42 = vsel %vm6888_vm10, %v7951_v51, -inf  ;;  %v16734_v58 = vpop.f32.mrf.mxu0 }
 0x515   : > { %v7819_v61 = vadd.f32 %v7818_v13, %v7730_v57 }
 0x516   : > { %v7952_v19 = vmax.f32 %v7906_v48, 0.0 }
 0x517   : > { %v7908_v36 = vadd.f32 %v7907_v28, %v7819_v61  ;;  %9988 = vmatpush.bf16.msra.mxu2 %v12854_v50  ;;  %v9484_v49 = vpop.permute.xlu0 %9483 }
 0x518   : > { %v7993_v17 = vsel %vm6888_vm10, %v7952_v19, -inf  ;;  %v9617_v63 = vsel %vm6888_vm10, %v12287_v39, %v9484_v49  ;;  %v7645_v28 = vpop.f32.mrf.mxu2 }
 0x519   : > { %v7994_v9 = vmax.f32 %v7992_v35, %v7993_v17  ;;  %v7953_v14 = vmax.f32 %v7908_v36, 0.0  ;;  %v7734_v35 = vpop.f32.mrf.mxu3 }
 0x51b   : > { %v8056_v52 = vrot.slane %v7994_v9, 2  ;;  %v8057_v37 = vrot.slane %v7994_v9, 4  ;;  %v8058_v47 = vrot.slane %v7994_v9, 6  ;;  %v8403_v29 = vsel %vm8122_vm12, %v7994_v9, -inf  ;;  %9989 = vmatpush.bf16.msra.mxu2 %v12853_v11 }
 0x51c   : > { %v8404_v56 = vrot.slane %v8403_v29, 4  ;;  %v7996_v25 = vsel %vm6888_vm10, %v7953_v14, -inf  ;;  %v16752_v46 = vpop.f32.mrf.mxu0 }
 0x51d   : > { %v8410_v27 = vsel %vm8122_vm12, %v8056_v52, -inf  ;;  %v8417_v20 = vsel %vm8122_vm12, %v8057_v37, -inf  ;;  %v8424_v53 = vsel %vm8122_vm12, %v8058_v47, -inf  ;;  %v7997_v18 = vmax.f32 %v7995_v42, %v7996_v25 }
 0x51e   : > { %v8405_v21 = vmax.f32 %v8403_v29, %v8404_v56  ;;  %v8411_v1 = vrot.slane %v8410_v27, 4  ;;  %v8418_v7 = vrot.slane %v8417_v20, 4  ;;  %v8425_v10 = vrot.slane %v8424_v53, 4 }
 0x51f   : > { %v8059_v60 = vrot.slane %v7997_v18, 2  ;;  %v8060_v12 = vrot.slane %v7997_v18, 4  ;;  %v8061_v45 = vrot.slane %v7997_v18, 6  ;;  %v8431_v2 = vsel %vm8122_vm12, %v7997_v18, -inf  ;;  %9990 = vmatpush.bf16.msra.mxu2 %v12852_v59 }
 0x520   : > { %v8406_v5 = vrot.slane %v8405_v21, 2  ;;  %v8412_v55 = vmax.f32 %v8410_v27, %v8411_v1  ;;  %v8419_v0 = vmax.f32 %v8417_v20, %v8418_v7  ;;  %v8426_v41 = vmax.f32 %v8424_v53, %v8425_v10  ;;  %v16754_v53 = vpop.f32.mrf.mxu1 }
 0x521   : > { %v8432_v33 = vrot.slane %v8431_v2, 4  ;;  %v8438_v62 = vsel %vm8122_vm12, %v8059_v60, -inf  ;;  %v8445_v16 = vsel %vm8122_vm12, %v8060_v12, -inf  ;;  %v8452_v44 = vsel %vm8122_vm12, %v8061_v45, -inf  ;;  %v17745_v12 = vld [vmem:[#allocation21_spill] sm:$0xff] }
 0x522   : > { %v8407_v13 = vmax.f32 %v8405_v21, %v8406_v5  ;;  %v8413_v34 = vrot.slane %v8412_v55, 2  ;;  %v8420_v24 = vrot.slane %v8419_v0, 2  ;;  %v8427_v6 = vrot.slane %v8426_v41, 2  ;;  %9991 = vmatmul.bf16.vlgmr.msra.gmra.mxu2 %v9617_v63 }
 0x523   : > { %v8433_v22 = vmax.f32 %v8431_v2, %v8432_v33  ;;  %v8439_v57 = vrot.slane %v8438_v62, 4  ;;  %v8446_v8 = vrot.slane %v8445_v16, 4  ;;  %v8453_v48 = vrot.slane %v8452_v44, 4 }
 0x524   : > { %v8408_v61 = vrot.slane %v8407_v13, 1  ;;  %v8414_v51 = vmax.f32 %v8412_v55, %v8413_v34  ;;  %v8421_v19 = vmax.f32 %v8419_v0, %v8420_v24  ;;  %v8428_v36 = vmax.f32 %v8426_v41, %v8427_v6  ;;  %v8902_v34 = vld [vmem:[#allocation4 + $0x20] sm:$0xf]  ;;  %v7737_v24 = vpop.f32.mrf.mxu3 }
 0x525   : > { %v8434_v17 = vrot.slane %v8433_v22, 2  ;;  %v8440_v50 = vmax.f32 %v8438_v62, %v8439_v57  ;;  %v8447_v9 = vmax.f32 %v8445_v16, %v8446_v8  ;;  %v8454_v14 = vmax.f32 %v8452_v44, %v8453_v48  ;;  %v7648_v16 = vpop.f32.mrf.mxu2  ;;  %v7826_v48 = vpop.f32.mrf.mxu0 }
 0x526   : > { %v8409_v23 = vmax.f32 %v8407_v13, %v8408_v61  ;;  %v8415_v38 = vrot.slane %v8414_v51, 1  ;;  %v8422_v43 = vrot.slane %v8421_v19, 1  ;;  %v8429_v4 = vrot.slane %v8428_v36, 1  ;;  %v17746_v61 = vld [vmem:[#allocation23_spill] sm:$0xff] }
 0x527   : > { %v8435_v42 = vmax.f32 %v8433_v22, %v8434_v17  ;;  %v8441_v11 = vrot.slane %v8440_v50, 2  ;;  %v8448_v39 = vrot.slane %v8447_v9, 2  ;;  %v8455_v49 = vrot.slane %v8454_v14, 2 }
 0x528   : > { %v8416_v52 = vmax.f32 %v8414_v51, %v8415_v38  ;;  %v8423_v37 = vmax.f32 %v8421_v19, %v8422_v43  ;;  %v8430_v47 = vmax.f32 %v8428_v36, %v8429_v4  ;;  %v8611_v29 = vpack.c.bf16 %v8409_v23, %v8409_v23  ;;  %v8883_v43 = vld [vmem:[#allocation4 + $0x34] sm:$0x1] }
 0x529   : > { %v8436_v56 = vrot.slane %v8435_v42, 1  ;;  %v8442_v25 = vmax.f32 %v8440_v50, %v8441_v11  ;;  %v8449_v27 = vmax.f32 %v8447_v9, %v8448_v39  ;;  %v8456_v20 = vmax.f32 %v8454_v14, %v8455_v49  ;;  %v8880_v49 = vld [vmem:[#allocation4 + $0x30] sm:$0xf] }
 0x52a   : > { %v8612_v63 = vpack.c.bf16 %v8416_v52, %v8416_v52  ;;  %v8613_v18 = vpack.c.bf16 %v8423_v37, %v8423_v37  ;;  %v8614_v21 = vpack.c.bf16 %v8430_v47, %v8430_v47  ;;  %v7733_v1 = vadd.f32 %v16731_v31, %v16737_v32  ;;  %v7915_v52 = vpop.f32.mrf.mxu1 }
 0x52b   : > { %v8437_v7 = vmax.f32 %v8435_v42, %v8436_v56  ;;  %v8443_v10 = vrot.slane %v8442_v25, 1  ;;  %v8450_v59 = vrot.slane %v8449_v27, 1  ;;  %v8457_v60 = vrot.slane %v8456_v20, 1 }
 0x52c   : > { %v7557_v45 = vadd.f32 %v16700_v30, %v17745_v12  ;;  %v8739_v2 = vunpack.c.l.b16 %v8611_v29  ;;  %v8740_v5 = vunpack.c.l.b16 %v8612_v63  ;;  %v8741_v55 = vunpack.c.l.b16 %v8613_v18  ;;  %v8911_v29 = vld [vmem:[#allocation4 + $0x2c] sm:$0x1] }
 0x52d   : > { %v8444_v0 = vmax.f32 %v8442_v25, %v8443_v10  ;;  %v8451_v41 = vmax.f32 %v8449_v27, %v8450_v59  ;;  %v8458_v33 = vmax.f32 %v8456_v20, %v8457_v60  ;;  %v8615_v62 = vpack.c.bf16 %v8437_v7, %v8437_v7 }
 0x52e   : > { %v8742_v44 = vunpack.c.l.b16 %v8614_v21  ;;  %v8799_v13 = vsel %vm8763_vm5, %v8740_v5, %v8739_v2  ;;  %v7822_v31 = vadd.f32 %v16734_v58, %v7733_v1  ;;  %v7646_v32 = vadd.f32 %v7645_v28, %v7557_v45  ;;  %v8903_v58 = vld [vmem:[#allocation4 + $0x28] sm:$0xf]  ;;  %v8910_v28 = vld [vmem:[#allocation4 + $0x24] sm:$0x1]  ;;  %v12865_v2 = vld [vmem:[%s17644_s5 + $0x68] sm:$0xff]  ;;  %v7650_v5 = vpop.f32.mrf.mxu2 }
 0x52f   : > { %v8800_v6 = vsel %vm8765_vm6, %v8741_v55, %v8799_v13  ;;  %v8616_v22 = vpack.c.bf16 %v8444_v0, %v8444_v0  ;;  %v8617_v57 = vpack.c.bf16 %v8451_v41, %v8451_v41  ;;  %v8618_v8 = vpack.c.bf16 %v8458_v33, %v8458_v33  ;;  %v17747_v21 = vld [vmem:[#allocation26_spill] sm:$0xff]  ;;  %v9091_v55 = vld [vmem:[#allocation4 + $0x14] sm:$0x1]  ;;  %10014 = vmatpush.bf16.msrb.mxu3 %v12865_v2 }
 0x530   : > { %v7560_v51 = vadd.f32 %v16700_v30, %v17746_v61  ;;  %v8801_v19 = vsel %vm8767_vm0, %v8742_v44, %v8800_v6  ;;  %v8743_v36 = vunpack.c.l.b16 %v8615_v62  ;;  %v7735_v17 = vadd.f32 %v7734_v35, %v7646_v32  ;;  %v7739_v62 = vpop.f32.mrf.mxu3  ;;  %v9210_v32 = vld [vmem:[#allocation4 + $0x8] sm:$0xe] }
 0x531   : > { %v8744_v50 = vunpack.c.l.b16 %v8616_v22  ;;  %v8745_v9 = vunpack.c.l.b16 %v8617_v57  ;;  %v8746_v14 = vunpack.c.l.b16 %v8618_v8  ;;  %v8971_v23 = vshrl.u32 %v8902_v34, 16 }
 0x532   : > { %v8802_v38 = vsel %vm8769_vm14, %v8743_v36, %v8801_v19  ;;  %v7911_v4 = vadd.f32 %v16746_v40, %v7822_v31  ;;  %v8974_v42 = vshll.u32 %v8902_v34, 16  ;;  %v7649_v37 = vadd.f32 %v7648_v16, %v7560_v51  ;;  %v9090_v31 = vld [vmem:[#allocation4 + $0xc] sm:$0x1]  ;;  %v9211_v34 = vld [vmem:[#allocation4 + $0x10] sm:$0xe] }
 0x533   : > { %v8803_v11 = vsel %vm8771_vm8, %v8744_v50, %v8802_v38  ;;  %v8828_v39 = vpack.c.b16 %v8746_v14, %v8746_v14  ;;  %v8973_v47 = vrot.slane %v8971_v23, 4  ;;  %v8980_v25 = vshll.u32 %v8910_v28, 16 }
 0x534   : > { %v8804_v35 = vsel %vm8773_vm11, %v8745_v9, %v8803_v11  ;;  %v8976_v56 = vrot.slane %v8974_v42, 5  ;;  %v8985_v27 = vshrl.u32 %v8903_v58, 16  ;;  %v7824_v40 = vadd.f32 %v16752_v46, %v7735_v17  ;;  %v7917_v9 = vpop.f32.mrf.mxu1 }
 0x535   : > { %v8827_v20 = vpack.c.b16 %v8804_v35, %v8804_v35  ;;  %v8884_v63 = vsel %vm14643_vm9, %v8828_v39, %v8883_v43  ;;  %v8988_v18 = vshll.u32 %v8903_v58, 16  ;;  %v7562_v1 = vadd.f32 %v16700_v30, %v17747_v21  ;;  %v12864_v39 = vld [vmem:[%s17644_s5 + $0x60] sm:$0xff] }
 0x536   : > { %8885 = vst [vmem:[#allocation4 + $0x34] sm:$0x1] %v8884_v63  ;;  %v8977_v7 = vor.u32 %v8976_v56, %v8973_v47  ;;  %v8987_v10 = vrot.slane %v8985_v27, 4  ;;  %v8994_v12 = vshll.u32 %v8911_v29, 16  ;;  %v7738_v45 = vadd.f32 %v7737_v24, %v7649_v37  ;;  %v7828_v24 = vpop.f32.mrf.mxu0  ;;  %10015 = vmatpush.bf16.msrb.mxu3 %v12864_v39  ;;  %v12863_v56 = vld [vmem:[%s17644_s5 + $0x58] sm:$0xff]  ;;  %v12860_v39 = vld [vmem:[%s17644_s5 + $0x40] sm:$0xff] }
 0x537   : > { %v8881_v59 = vsel %vm14588_vm13, %v8827_v20, %v8880_v49  ;;  %v8990_v60 = vrot.slane %v8988_v18, 5  ;;  %v7954_v46 = vmax.f32 %v7911_v4, 0.0  ;;  %v8982_v41 = vrot.slane %v8980_v25, 5 }
 0x538   : > { %8882 = vst [vmem:[#allocation4 + $0x30] sm:$0xf] %v8881_v59  ;;  %v8978_v0 = vrot.slane %v8977_v7, 4  ;;  %v7651_v33 = vadd.f32 %v7650_v5, %v7562_v1  ;;  %v7913_v16 = vadd.f32 %v16754_v53, %v7824_v40  ;;  %v7827_v13 = vadd.f32 %v7826_v48, %v7738_v45  ;;  %v16802_v40 = vld [vmem:[#allocation4 + $0x28] sm:$0xf] }
 0x539   : > { %v8991_v44 = vor.u32 %v8990_v60, %v8987_v10  ;;  %v12268_v6 = vrot.slane %v9210_v32, 9  ;;  %v12269_v22 = vrot.slane %v9211_v34, 9  ;;  %v9240_v57 = vrot.slane %v9091_v55, 5 }
 0x53a   : > { %v7740_v8 = vadd.f32 %v7739_v62, %v7651_v33  ;;  %v8983_v61 = vsel %vm13361_vm7, %v8978_v0, %v8982_v41  ;;  %v8996_v19 = vrot.slane %v8994_v12, 5  ;;  %v7916_v36 = vadd.f32 %v7915_v52, %v7827_v13  ;;  %10016 = vmatpush.bf16.msrb.mxu3 %v12863_v56 }
 0x53b   : > { %v8992_v51 = vrot.slane %v8991_v44, 4  ;;  %v9236_v17 = vrot.slane %v9090_v31, 5  ;;  %v9241_v53 = vsel %vm13306_vm4, %v12269_v22, %v9240_v57  ;;  %v7955_v50 = vmax.f32 %v7913_v16, 0.0 }
 0x53c   : > { %v7829_v48 = vadd.f32 %v7828_v24, %v7740_v8  ;;  %v7956_v58 = vmax.f32 %v7916_v36, 0.0  ;;  %v9475_v28 = vunpack.c.l.b16 %v8983_v61  ;;  %v7998_v4 = vsel %vm6888_vm10, %v7954_v46, -inf  ;;  %v12862_v46 = vld [vmem:[%s17644_s5 + $0x50] sm:$0xff] }
 0x53d   : > { %v8997_v14 = vsel %vm13361_vm7, %v8992_v51, %v8996_v19  ;;  %v9237_v38 = vsel %vm13306_vm4, %v12268_v6, %v9236_v17  ;;  %v9544_v11 = vunpack.c.l.b16 %v9241_v53  ;;  %v8001_v35 = vsel %vm6888_vm10, %v7955_v50, -inf  ;;  %v12861_v53 = vld [vmem:[%s17644_s5 + $0x48] sm:$0xff] }
 0x53e   : > { %v9476_v23 = vunpack.c.l.b16 %v8997_v14  ;;  %v7918_v43 = vadd.f32 %v7917_v9, %v7829_v48  ;;  %v7999_v42 = vsel %vm6888_vm10, %v7956_v58, -inf  ;;  %v9543_v29 = vunpack.c.l.b16 %v9237_v38  ;;  %10017 = vmatpush.bf16.msrb.mxu3 %v12862_v46 }
 0x53f   : > { %v8000_v52 = vmax.f32 %v7998_v4, %v7999_v42  ;;  %v16794_v47 = vld [vmem:[#allocation4 + $0x2c] sm:$0xf0] }
 0x540   : > { %v9481_v49 = vpack.c.b16 %v9476_v23, %v9475_v28  ;;  %v7957_v37 = vmax.f32 %v7918_v43, 0.0  ;;  %v9551_v21 = vpack.c.b16 %v9544_v11, %v9543_v29  ;;  %v12311_v7 = vor.u32 %v16794_v47, %v16802_v40 }
 0x541   : > { %v8062_v25 = vrot.slane %v8000_v52, 2  ;;  %v8063_v27 = vrot.slane %v8000_v52, 4  ;;  %v8064_v20 = vrot.slane %v8000_v52, 6  ;;  %v8459_v63 = vsel %vm8122_vm12, %v8000_v52, -inf }
 0x542   : > { %9487 = vrot.lane.b32.xlu2 %v9481_v49, %s13190_s23  ;;  %v8460_v18 = vrot.slane %v8459_v63, 4  ;;  %v8002_v1 = vsel %vm6888_vm10, %v7957_v37, -inf  ;;  %10018 = vmatpush.bf16.msrb.mxu3 %v12861_v53 }
 0x543   : > { %v8466_v10 = vsel %vm8122_vm12, %v8062_v25, -inf  ;;  %v8473_v59 = vsel %vm8122_vm12, %v8063_v27, -inf  ;;  %v8480_v60 = vsel %vm8122_vm12, %v8064_v20, -inf  ;;  %v8003_v12 = vmax.f32 %v8001_v35, %v8002_v1 }
 0x544   : > { %v8461_v45 = vmax.f32 %v8459_v63, %v8460_v18  ;;  %v8467_v2 = vrot.slane %v8466_v10, 4  ;;  %v8474_v5 = vrot.slane %v8473_v59, 4  ;;  %v8481_v55 = vrot.slane %v8480_v60, 4 }
 0x545   : > { %v8065_v0 = vrot.slane %v8003_v12, 2  ;;  %v8066_v41 = vrot.slane %v8003_v12, 4  ;;  %v8067_v33 = vrot.slane %v8003_v12, 6  ;;  %v8487_v62 = vsel %vm8122_vm12, %v8003_v12, -inf }
 0x546   : > { %v8462_v16 = vrot.slane %v8461_v45, 2  ;;  %v8468_v44 = vmax.f32 %v8466_v10, %v8467_v2  ;;  %v8475_v13 = vmax.f32 %v8473_v59, %v8474_v5  ;;  %v8482_v31 = vmax.f32 %v8480_v60, %v8481_v55  ;;  %10019 = vmatpush.bf16.msrb.mxu3 %v12860_v39  ;;  %v12841_v39 = vld [vmem:[#allocation4 + $0x14] sm:$0xf0] }
 0x547   : > { %v8488_v32 = vrot.slane %v8487_v62, 4  ;;  %v8494_v34 = vsel %vm8122_vm12, %v8065_v0, -inf  ;;  %v8501_v24 = vsel %vm8122_vm12, %v8066_v41, -inf  ;;  %v8508_v6 = vsel %vm8122_vm12, %v8067_v33, -inf }
 0x548   : > { %v8463_v22 = vmax.f32 %v8461_v45, %v8462_v16  ;;  %v8469_v57 = vrot.slane %v8468_v44, 2  ;;  %v8476_v8 = vrot.slane %v8475_v13, 2  ;;  %v8483_v61 = vrot.slane %v8482_v31, 2 }
 0x549   : > { %v8489_v51 = vmax.f32 %v8487_v62, %v8488_v32  ;;  %v8495_v19 = vrot.slane %v8494_v34, 4  ;;  %v8502_v36 = vrot.slane %v8501_v24, 4  ;;  %v8509_v17 = vrot.slane %v8508_v6, 4 }
 0x54a   : > { %9555 = vrot.lane.b32.xlu2 %v9551_v21, %s13190_s23  ;;  %v8464_v48 = vrot.slane %v8463_v22, 1  ;;  %v8470_v50 = vmax.f32 %v8468_v44, %v8469_v57  ;;  %v8477_v9 = vmax.f32 %v8475_v13, %v8476_v8  ;;  %v8484_v14 = vmax.f32 %v8482_v31, %v8483_v61  ;;  %v8889_v57 = vld [vmem:[#allocation4 + $0x3c] sm:$0x1]  ;;  %v7653_v8 = vpop.f32.mrf.mxu2  ;;  %v8904_v61 = vld [vmem:[#allocation4 + $0x30] sm:$0xf] }
 0x54b   : > { %v8490_v58 = vrot.slane %v8489_v51, 2  ;;  %v8496_v28 = vmax.f32 %v8494_v34, %v8495_v19  ;;  %v8503_v23 = vmax.f32 %v8501_v24, %v8502_v36  ;;  %v8510_v38 = vmax.f32 %v8508_v6, %v8509_v17  ;;  %v8886_v17 = vld [vmem:[#allocation4 + $0x38] sm:$0xf] }
 0x54c   : > { %v8465_v43 = vmax.f32 %v8463_v22, %v8464_v48  ;;  %v8471_v4 = vrot.slane %v8470_v50, 1  ;;  %v8478_v42 = vrot.slane %v8477_v9, 1  ;;  %v8485_v11 = vrot.slane %v8484_v14, 1 }
 0x54d   : > { %v8491_v49 = vmax.f32 %v8489_v51, %v8490_v58  ;;  %v8497_v52 = vrot.slane %v8496_v28, 2  ;;  %v8504_v37 = vrot.slane %v8503_v23, 2  ;;  %v8511_v35 = vrot.slane %v8510_v38, 2 }
 0x54e   : > { %v8472_v29 = vmax.f32 %v8470_v50, %v8471_v4  ;;  %v8479_v56 = vmax.f32 %v8477_v9, %v8478_v42  ;;  %v8486_v25 = vmax.f32 %v8484_v14, %v8485_v11  ;;  %v8619_v27 = vpack.c.bf16 %v8465_v43, %v8465_v43  ;;  %v7831_v9 = vpop.f32.mrf.mxu0  ;;  %v9026_v4 = vld [vmem:[#allocation4] sm:$0xe]  ;;  %v9027_v42 = vld [vmem:[#allocation4 + $0x8] sm:$0xe] }
 0x54f   : > { %v8492_v20 = vrot.slane %v8491_v49, 1  ;;  %v8498_v63 = vmax.f32 %v8496_v28, %v8497_v52  ;;  %v8505_v18 = vmax.f32 %v8503_v23, %v8504_v37  ;;  %v8512_v21 = vmax.f32 %v8510_v38, %v8511_v35  ;;  %v7742_v28 = vpop.f32.mrf.mxu3  ;;  %v7920_v23 = vpop.f32.mrf.mxu1  ;;  %v13104_v52 = vld [vmem:[#allocation4 + $0x4] sm:$0x1] }
 0x550   : > { %v8620_v1 = vpack.c.bf16 %v8472_v29, %v8472_v29  ;;  %v8621_v10 = vpack.c.bf16 %v8479_v56, %v8479_v56  ;;  %v8622_v59 = vpack.c.bf16 %v8486_v25, %v8486_v25  ;;  %v8747_v5 = vunpack.c.l.b16 %v8619_v27  ;;  %v16838_v29 = vld [vmem:[#allocation4 + $0x34] sm:$0x1]  ;;  %v12290_v25 = vld [vmem:[#allocation4 + $0x10] sm:$0xf]  ;;  %v17748_v27 = vld [vmem:[#allocation22_spill] sm:$0xff] }
 0x551   : > { %v8493_v60 = vmax.f32 %v8491_v49, %v8492_v20  ;;  %v8499_v12 = vrot.slane %v8498_v63, 1  ;;  %v8506_v45 = vrot.slane %v8505_v18, 1  ;;  %v8513_v2 = vrot.slane %v8512_v21, 1 }
 0x552   : > { %9527 = vrot.lane.b32.xlu2 %v12311_v7, %s13190_s23  ;;  %v8748_v55 = vunpack.c.l.b16 %v8620_v1  ;;  %v8749_v46 = vunpack.c.l.b16 %v8621_v10  ;;  %v8750_v16 = vunpack.c.l.b16 %v8622_v59  ;;  %v8999_v50 = vshrl.u32 %v8904_v61, 16  ;;  %v7655_v11 = vpop.f32.mrf.mxu2 }
 0x553   : > { %v8500_v0 = vmax.f32 %v8498_v63, %v8499_v12  ;;  %v8507_v41 = vmax.f32 %v8505_v18, %v8506_v45  ;;  %v8514_v33 = vmax.f32 %v8512_v21, %v8513_v2  ;;  %v8623_v62 = vpack.c.bf16 %v8493_v60, %v8493_v60  ;;  %v13105_v63 = vld [vmem:[#allocation4 + $0xc] sm:$0x1] }
 0x554   : > { %v8805_v44 = vsel %vm8763_vm5, %v8748_v55, %v8747_v5  ;;  %v9002_v14 = vshll.u32 %v8904_v61, 16  ;;  %v9001_v38 = vrot.slane %v8999_v50, 4  ;;  %v12260_v49 = vrot.slane %v9026_v4, 9 }
 0x555   : > { %v8806_v13 = vsel %vm8765_vm6, %v8749_v46, %v8805_v44  ;;  %v8624_v31 = vpack.c.bf16 %v8500_v0, %v8500_v0  ;;  %v8625_v32 = vpack.c.bf16 %v8507_v41, %v8507_v41  ;;  %v8626_v34 = vpack.c.bf16 %v8514_v33, %v8514_v33 }
 0x556   : > { %v8751_v24 = vunpack.c.l.b16 %v8623_v62  ;;  %v8807_v6 = vsel %vm8767_vm0, %v8750_v16, %v8806_v13  ;;  %v9004_v43 = vrot.slane %v9002_v14, 5  ;;  %v9052_v37 = vrot.slane %v13104_v52, 5  ;;  %v7833_v10 = vpop.f32.mrf.mxu0 }
 0x557   : > { %v8752_v47 = vunpack.c.l.b16 %v8624_v31  ;;  %v8753_v40 = vunpack.c.l.b16 %v8625_v32  ;;  %v8754_v7 = vunpack.c.l.b16 %v8626_v34  ;;  %v12261_v35 = vrot.slane %v9027_v42, 9  ;;  %v7744_v41 = vpop.f32.mrf.mxu3  ;;  %v7922_v33 = vpop.f32.mrf.mxu1 }
 0x558   : > { %v8808_v22 = vsel %vm8769_vm14, %v8751_v24, %v8807_v6  ;;  %v9005_v56 = vor.u32 %v9004_v43, %v9001_v38  ;;  %v7565_v20 = vadd.f32 %v16700_v30, %v17748_v27  ;;  %v9056_v18 = vrot.slane %v13105_v63, 5 }
 0x559   : > { %v8809_v51 = vsel %vm8771_vm8, %v8752_v47, %v8808_v22  ;;  %v8830_v19 = vpack.c.b16 %v8754_v7, %v8754_v7  ;;  %v12291_v59 = vor.u32 %v12841_v39, %v12290_v25  ;;  %v9008_v60 = vshll.u32 %v16838_v29, 16 }
 0x55a   : > { %v8810_v36 = vsel %vm8773_vm11, %v8753_v40, %v8809_v51  ;;  %v7654_v2 = vadd.f32 %v7653_v8, %v7565_v20  ;;  %v9053_v55 = vsel %vm13306_vm4, %v12260_v49, %v9052_v37  ;;  %v9057_v46 = vsel %vm13306_vm4, %v12261_v35, %v9056_v18  ;;  %v7658_v31 = vpop.f32.mrf.mxu2  ;;  %v17750_v51 = vld [vmem:[#allocation24_spill] sm:$0xff]  ;;  %v17751_v35 = vld [vmem:[#allocation27_spill] sm:$0xff] }
 0x55b   : > { %v8829_v53 = vpack.c.b16 %v8810_v36, %v8810_v36  ;;  %v8890_v48 = vsel %vm14643_vm9, %v8830_v19, %v8889_v57  ;;  %v9006_v0 = vrot.slane %v9005_v56, 4  ;;  %v9491_v32 = vunpack.c.l.b16 %v9053_v55  ;;  %v17749_v57 = vld [vmem:[#allocation25_spill] sm:$0xff] }
 0x55c   : > { %8891 = vst [vmem:[#allocation4 + $0x3c] sm:$0x1] %v8890_v48  ;;  %v9492_v34 = vunpack.c.l.b16 %v9057_v46  ;;  %v9010_v24 = vrot.slane %v9008_v60, 5  ;;  %v7743_v47 = vadd.f32 %v7742_v28, %v7654_v2  ;;  %v7570_v8 = vadd.f32 %v16700_v30, %v17749_v57 }
 0x55d   : > { %v8887_v58 = vsel %vm14588_vm13, %v8829_v53, %v8886_v17  ;;  %v7567_v19 = vadd.f32 %v16700_v30, %v17750_v51  ;;  %v7572_v56 = vadd.f32 %v16700_v30, %v17751_v35 }
 0x55e   : > { %8888 = vst [vmem:[#allocation4 + $0x38] sm:$0xf] %v8887_v58  ;;  %v9011_v40 = vsel %vm13361_vm7, %v9006_v0, %v9010_v24  ;;  %v7832_v61 = vadd.f32 %v7831_v9, %v7743_v47  ;;  %v9499_v36 = vpack.c.b16 %v9492_v34, %v9491_v32  ;;  %v7659_v48 = vadd.f32 %v7658_v31, %v7570_v8 }
 0x55f   : > { %v9477_v14 = vunpack.c.l.b16 %v9011_v40  ;;  %v7656_v28 = vadd.f32 %v7655_v11, %v7567_v19  ;;  %v12845_v11 = vld [vmem:[#allocation4 + $0x1c] sm:$0xf0]  ;;  %v9214_v19 = vld [vmem:[#allocation4 + $0x28] sm:$0xe] }
 0x560   : > { %v7921_v42 = vadd.f32 %v7920_v23, %v7832_v61 }
 0x561   : > { %v7745_v52 = vadd.f32 %v7744_v41, %v7656_v28 }
 0x562   : > { %v7660_v37 = vpop.f32.mrf.mxu2  ;;  %v7958_v25 = vmax.f32 %v7921_v42, 0.0 }
 0x563   : > { %v16842_v1 = vld [vmem:[#allocation4 + $0x3c] sm:$0x1]  ;;  %v7834_v20 = vadd.f32 %v7833_v10, %v7745_v52  ;;  %v7661_v63 = vadd.f32 %v7660_v37, %v7572_v56 }
 0x564   : > { %v9022_v13 = vshll.u32 %v16842_v1, 16  ;;  %v8004_v60 = vsel %vm6888_vm10, %v7958_v25, -inf }
 0x565   : > { %v8905_v21 = vld [vmem:[#allocation4 + $0x38] sm:$0xf] }
 0x566   : > { %v9013_v12 = vshrl.u32 %v8905_v21, 16  ;;  %v9016_v45 = vshll.u32 %v8905_v21, 16  ;;  %v9024_v22 = vrot.slane %v9022_v13, 5 }
 0x568   : > { %v9015_v16 = vrot.slane %v9013_v12, 4  ;;  %v9018_v44 = vrot.slane %v9016_v45, 5 }
 0x569   : > { %v9486_v5 = vpop.permute.xlu1 %9485 }
 0x56a   : > { %v9621_v62 = vsel %vm6888_vm10, %v12291_v59, %v9486_v5  ;;  %v9019_v6 = vor.u32 %v9018_v44, %v9015_v16  ;;  %v7836_v53 = vpop.f32.mrf.mxu0  ;;  %v12306_v59 = vld [vmem:[#allocation4 + $0x18] sm:$0xf]  ;;  %v7923_v5 = vadd.f32 %v7922_v33, %v7834_v20 }
 0x56b   : > { %9996 = vmatmul.bf16.gmra.mxu2 %v9621_v62  ;;  %v12307_v2 = vor.u32 %v12845_v11, %v12306_v59 }
 0x56c   : > { %v9020_v7 = vrot.slane %v9019_v6, 4  ;;  %v7959_v13 = vmax.f32 %v7923_v5, 0.0 }
 0x56e   : > { %v9025_v17 = vsel %vm13361_vm7, %v9020_v7, %v9024_v22  ;;  %v16870_v7 = vld [vmem:[#allocation4 + $0x2c] sm:$0x1]  ;;  %v16872_v22 = vld [vmem:[#allocation4 + $0x34] sm:$0x1] }
 0x56f   : > { %v9478_v58 = vunpack.c.l.b16 %v9025_v17  ;;  %v8007_v17 = vsel %vm6888_vm10, %v7959_v13, -inf }
 0x571   : > { %v9524_v50 = vpop.permute.xlu1 %9523  ;;  %v7747_v43 = vpop.f32.mrf.mxu3  ;;  %v9482_v39 = vpack.c.b16 %v9478_v58, %v9477_v14 }
 0x572   : > { %v9633_v38 = vsel %vm6888_vm10, %v9499_v36, %v9524_v50  ;;  %v7925_v4 = vpop.f32.mrf.mxu1  ;;  %v7748_v9 = vadd.f32 %v7747_v43, %v7659_v48  ;;  %v7838_v23 = vpop.f32.mrf.mxu0  ;;  %v9215_v36 = vld [vmem:[#allocation4 + $0x30] sm:$0xe]  ;;  %v12272_v48 = vrot.slane %v9214_v19, 9  ;;  %v9252_v50 = vrot.slane %v16870_v7, 5 }
 0x573   : > { %10020 = vmatmul.bf16.vlgmr.msrb.gmra.mxu3 %v9633_v38  ;;  %9489 = vrot.lane.b32.xlu0 %v9482_v39, %s13190_s23  ;;  %v12273_v42 = vrot.slane %v9215_v36, 9 }
 0x574   : > { %v7837_v49 = vadd.f32 %v7836_v53, %v7748_v9  ;;  %v9256_v9 = vrot.slane %v16872_v22, 5 }
 0x576   : > { %v7926_v27 = vadd.f32 %v7925_v4, %v7837_v49  ;;  %v9253_v4 = vsel %vm13306_vm4, %v12272_v48, %v9252_v50 }
 0x577   : > { %v9547_v36 = vunpack.c.l.b16 %v9253_v4  ;;  %v16892_v4 = vld [vmem:[#allocation4 + $0x1c] sm:$0x1] }
 0x578   : > { %v7960_v18 = vmax.f32 %v7926_v27, 0.0 }
 0x579   : > { %v7749_v21 = vpop.f32.mrf.mxu3 }
 0x57a   : > { %v8005_v12 = vsel %vm6888_vm10, %v7960_v18, -inf  ;;  %v7750_v45 = vadd.f32 %v7749_v21, %v7661_v63  ;;  %v7927_v46 = vpop.f32.mrf.mxu1 }
 0x57b   : > { %v8006_v55 = vmax.f32 %v8004_v60, %v8005_v12  ;;  %9525 = vrot.lane.b32.xlu0 %v12307_v2, %s13190_s23  ;;  %v9267_v12 = vld [vmem:[#allocation4 + $0x10] sm:$0xf] }
 0x57c   : > { %v7839_v30 = vadd.f32 %v7838_v23, %v7750_v45 }
 0x57d   : > { %v8068_v0 = vrot.slane %v8006_v55, 2  ;;  %v8069_v10 = vrot.slane %v8006_v55, 4  ;;  %v8070_v41 = vrot.slane %v8006_v55, 6  ;;  %v8515_v62 = vsel %vm8122_vm12, %v8006_v55, -inf }
 0x57e   : > { %v8516_v16 = vrot.slane %v8515_v62, 4  ;;  %v7928_v44 = vadd.f32 %v7927_v46, %v7839_v30 }
 0x57f   : > { %v8522_v31 = vsel %vm8122_vm12, %v8068_v0, -inf  ;;  %v8529_v32 = vsel %vm8122_vm12, %v8069_v10, -inf  ;;  %v8536_v34 = vsel %vm8122_vm12, %v8070_v41, -inf }
 0x580   : > { %v8517_v33 = vmax.f32 %v8515_v62, %v8516_v16  ;;  %v8523_v24 = vrot.slane %v8522_v31, 4  ;;  %v8530_v6 = vrot.slane %v8529_v32, 4  ;;  %v8537_v47 = vrot.slane %v8536_v34, 4 }
 0x581   : > { %v7961_v40 = vmax.f32 %v7928_v44, 0.0  ;;  %v9284_v44 = vshrl.u32 %v9267_v12, 16 }
 0x582   : > { %v8518_v57 = vrot.slane %v8517_v33, 2  ;;  %v8524_v8 = vmax.f32 %v8522_v31, %v8523_v24  ;;  %v8531_v61 = vmax.f32 %v8529_v32, %v8530_v6  ;;  %v8538_v51 = vmax.f32 %v8536_v34, %v8537_v47 }
 0x583   : > { %v8008_v53 = vsel %vm6888_vm10, %v7961_v40, -inf  ;;  %v9257_v47 = vsel %vm13306_vm4, %v12273_v42, %v9256_v9  ;;  %v9287_v9 = vshll.u32 %v9267_v12, 16 }
 0x584   : > { %v8519_v14 = vmax.f32 %v8517_v33, %v8518_v57  ;;  %v8525_v58 = vrot.slane %v8524_v8, 2  ;;  %v8532_v28 = vrot.slane %v8531_v61, 2  ;;  %v8539_v38 = vrot.slane %v8538_v51, 2 }
 0x585   : > { %v8009_v43 = vmax.f32 %v8007_v17, %v8008_v53  ;;  %v9548_v17 = vunpack.c.l.b16 %v9257_v47  ;;  %v16887_v53 = vld [vmem:[#allocation4 + $0x14] sm:$0x1]  ;;  %v12875_v47 = vld [vmem:[%s17644_s5 + $0xb8] sm:$0xff] }
 0x586   : > { %v8520_v39 = vrot.slane %v8519_v14, 1  ;;  %v8526_v49 = vmax.f32 %v8524_v8, %v8525_v58  ;;  %v8533_v52 = vmax.f32 %v8531_v61, %v8532_v28  ;;  %v8540_v37 = vmax.f32 %v8538_v51, %v8539_v38  ;;  %v9268_v58 = vld [vmem:[#allocation4 + $0x18] sm:$0xf]  ;;  %10041 = vmatpush.bf16.msrb.mxu2 %v12875_v47 }
 0x587   : > { %v8071_v35 = vrot.slane %v8009_v43, 2  ;;  %v8072_v56 = vrot.slane %v8009_v43, 4  ;;  %v8073_v25 = vrot.slane %v8009_v43, 6  ;;  %v8543_v27 = vsel %vm8122_vm12, %v8009_v43, -inf }
 0x588   : > { %v8521_v20 = vmax.f32 %v8519_v14, %v8520_v39  ;;  %v8527_v11 = vrot.slane %v8526_v49, 1  ;;  %v8534_v63 = vrot.slane %v8533_v52, 1  ;;  %v8541_v18 = vrot.slane %v8540_v37, 1 }
 0x589   : > { %v8544_v21 = vrot.slane %v8543_v27, 4  ;;  %v8550_v59 = vsel %vm8122_vm12, %v8071_v35, -inf  ;;  %v8557_v23 = vsel %vm8122_vm12, %v8072_v56, -inf  ;;  %v8564_v60 = vsel %vm8122_vm12, %v8073_v25, -inf }
 0x58a   : > { %v8528_v45 = vmax.f32 %v8526_v49, %v8527_v11  ;;  %v8535_v2 = vmax.f32 %v8533_v52, %v8534_v63  ;;  %v8542_v5 = vmax.f32 %v8540_v37, %v8541_v18  ;;  %v8627_v55 = vpack.c.bf16 %v8521_v20, %v8521_v20 }
 0x58b   : > { %v8545_v46 = vmax.f32 %v8543_v27, %v8544_v21  ;;  %v8551_v30 = vrot.slane %v8550_v59, 4  ;;  %v8558_v0 = vrot.slane %v8557_v23, 4  ;;  %v8565_v10 = vrot.slane %v8564_v60, 4 }
 0x58c   : > { %v8628_v41 = vpack.c.bf16 %v8528_v45, %v8528_v45  ;;  %v8629_v62 = vpack.c.bf16 %v8535_v2, %v8535_v2  ;;  %v8630_v16 = vpack.c.bf16 %v8542_v5, %v8542_v5  ;;  %v8755_v33 = vunpack.c.l.b16 %v8627_v55 }
 0x58d   : > { %v8546_v13 = vrot.slane %v8545_v46, 2  ;;  %v8552_v31 = vmax.f32 %v8550_v59, %v8551_v30  ;;  %v8559_v32 = vmax.f32 %v8557_v23, %v8558_v0  ;;  %v8566_v34 = vmax.f32 %v8564_v60, %v8565_v10  ;;  %v12842_v10 = vld [vmem:[#allocation4 + $0x24] sm:$0xf0] }
 0x58e   : > { %v8756_v24 = vunpack.c.l.b16 %v8628_v41  ;;  %v8757_v6 = vunpack.c.l.b16 %v8629_v62  ;;  %v8758_v51 = vunpack.c.l.b16 %v8630_v16  ;;  %v9286_v28 = vrot.slane %v9284_v44, 4 }
 0x58f   : > { %v8547_v40 = vmax.f32 %v8545_v46, %v8546_v13  ;;  %v8553_v57 = vrot.slane %v8552_v31, 2  ;;  %v8560_v8 = vrot.slane %v8559_v32, 2  ;;  %v8567_v61 = vrot.slane %v8566_v34, 2 }
 0x590   : > { %v8811_v19 = vsel %vm8763_vm5, %v8756_v24, %v8755_v33  ;;  %v9553_v42 = vpack.c.b16 %v9548_v17, %v9547_v36  ;;  %v9293_v37 = vshll.u32 %v16887_v53, 16  ;;  %v9289_v56 = vrot.slane %v9287_v9, 5  ;;  %v8895_v24 = vld [vmem:[#allocation4 + $0x44] sm:$0x1] }
 0x591   : > { %v8548_v48 = vrot.slane %v8547_v40, 1  ;;  %v8554_v50 = vmax.f32 %v8552_v31, %v8553_v57  ;;  %v8561_v14 = vmax.f32 %v8559_v32, %v8560_v8  ;;  %v8812_v38 = vsel %vm8765_vm6, %v8757_v6, %v8811_v19  ;;  %v8892_v8 = vld [vmem:[#allocation4 + $0x40] sm:$0xf] }
 0x592   : > { %v8568_v43 = vmax.f32 %v8566_v34, %v8567_v61  ;;  %9559 = vrot.lane.b32.xlu0 %v9553_v42, %s13190_s23  ;;  %v9298_v25 = vshrl.u32 %v9268_v58, 16  ;;  %v9301_v27 = vshll.u32 %v9268_v58, 16  ;;  %v8813_v20 = vsel %vm8767_vm0, %v8758_v51, %v8812_v38  ;;  %v12294_v34 = vld [vmem:[#allocation4 + $0x20] sm:$0xf]  ;;  %v9270_v38 = vld [vmem:[#allocation4 + $0x28] sm:$0xf] }
 0x593   : > { %v8549_v39 = vmax.f32 %v8547_v40, %v8548_v48  ;;  %v8555_v49 = vrot.slane %v8554_v50, 1  ;;  %v8562_v52 = vrot.slane %v8561_v14, 1  ;;  %v9290_v59 = vor.u32 %v9289_v56, %v9286_v28  ;;  %v9269_v19 = vld [vmem:[#allocation4 + $0x20] sm:$0xf]  ;;  %v9216_v28 = vld [vmem:[#allocation4 + $0x38] sm:$0xe] }
 0x594   : > { %v8569_v35 = vrot.slane %v8568_v43, 1  ;;  %v9300_v23 = vrot.slane %v9298_v25, 4  ;;  %v9303_v60 = vrot.slane %v9301_v27, 5  ;;  %v9307_v5 = vshll.u32 %v16892_v4, 16 }
 0x595   : > { %v8556_v11 = vmax.f32 %v8554_v50, %v8555_v49  ;;  %v8563_v63 = vmax.f32 %v8561_v14, %v8562_v52  ;;  %v8631_v18 = vpack.c.bf16 %v8549_v39, %v8549_v39  ;;  %v9291_v46 = vrot.slane %v9290_v59, 4  ;;  %v12874_v14 = vld [vmem:[%s17644_s5 + $0xb0] sm:$0xff]  ;;  %v16916_v39 = vld [vmem:[#allocation4 + $0x3c] sm:$0x1]  ;;  %v16918_v49 = vld [vmem:[#allocation4 + $0x2c] sm:$0x1] }
 0x596   : > { %v8570_v21 = vmax.f32 %v8568_v43, %v8569_v35  ;;  %v9295_v30 = vrot.slane %v9293_v37, 5  ;;  %v9304_v0 = vor.u32 %v9303_v60, %v9300_v23  ;;  %v9309_v32 = vrot.slane %v9307_v5, 5  ;;  %v16912_v43 = vld [vmem:[#allocation4 + $0x24] sm:$0x1]  ;;  %v9274_v35 = vld [vmem:[#allocation4 + $0x48] sm:$0xf]  ;;  %10042 = vmatpush.bf16.msrb.mxu2 %v12874_v14 }
 0x597   : > { %v8632_v12 = vpack.c.bf16 %v8556_v11, %v8556_v11  ;;  %v8633_v45 = vpack.c.bf16 %v8563_v63, %v8563_v63  ;;  %v8759_v2 = vunpack.c.l.b16 %v8631_v18  ;;  %v12295_v6 = vor.u32 %v12842_v10, %v12294_v34  ;;  %v12873_v11 = vld [vmem:[%s17644_s5 + $0xa8] sm:$0xff] }
 0x598   : > { %v8634_v55 = vpack.c.bf16 %v8570_v21, %v8570_v21  ;;  %v9296_v13 = vsel %vm13361_vm7, %v9291_v46, %v9295_v30  ;;  %v9305_v31 = vrot.slane %v9304_v0, 4  ;;  %v9312_v52 = vshrl.u32 %v9269_v19, 16 }
 0x599   : > { %v8760_v41 = vunpack.c.l.b16 %v8632_v12  ;;  %v8761_v62 = vunpack.c.l.b16 %v8633_v45  ;;  %v8814_v16 = vsel %vm8769_vm14, %v8759_v2, %v8813_v20  ;;  %v9583_v17 = vunpack.c.l.b16 %v9296_v13  ;;  %v16927_v2 = vld [vmem:[#allocation4 + $0x4c] sm:$0x1] }
 0x59a   : > { %v8762_v44 = vunpack.c.l.b16 %v8634_v55  ;;  %v9310_v61 = vsel %vm13361_vm7, %v9305_v31, %v9309_v32  ;;  %v9315_v37 = vshll.u32 %v9269_v19, 16  ;;  %v9314_v56 = vrot.slane %v9312_v52, 4  ;;  %v12314_v55 = vld [vmem:[#allocation4 + $0x38] sm:$0xf]  ;;  %10043 = vmatpush.bf16.msrb.mxu2 %v12873_v11  ;;  %v9271_v19 = vld [vmem:[#allocation4 + $0x30] sm:$0xf] }
 0x59b   : > { %v8815_v33 = vsel %vm8771_vm8, %v8760_v41, %v8814_v16  ;;  %v9584_v48 = vunpack.c.l.b16 %v9310_v61  ;;  %v9321_v25 = vshll.u32 %v16912_v43, 16  ;;  %v9326_v27 = vshrl.u32 %v9270_v38, 16  ;;  %v12872_v41 = vld [vmem:[%s17644_s5 + $0xa0] sm:$0xff] }
 0x59c   : > { %v8816_v40 = vsel %vm8773_vm11, %v8761_v62, %v8815_v33  ;;  %v8832_v57 = vpack.c.b16 %v8762_v44, %v8762_v44  ;;  %v9488_v51 = vpop.permute.xlu2 %9487  ;;  %v9329_v20 = vshll.u32 %v9270_v38, 16  ;;  %v12274_v63 = vrot.slane %v9216_v28, 9 }
 0x59d   : > { %v8831_v36 = vpack.c.b16 %v8816_v40, %v8816_v40  ;;  %v9625_v50 = vsel %vm6888_vm10, %v12295_v6, %v9488_v51  ;;  %v9591_v9 = vpack.c.b16 %v9584_v48, %v9583_v17  ;;  %v9317_v18 = vrot.slane %v9315_v37, 5 }
 0x59e   : > { %v8896_v58 = vsel %vm14643_vm9, %v8832_v57, %v8895_v24  ;;  %10001 = vmatmul.bf16.gmra.mxu2 %v9625_v50  ;;  %v9328_v21 = vrot.slane %v9326_v27, 4  ;;  %v9331_v59 = vrot.slane %v9329_v20, 5  ;;  %v9335_v23 = vshll.u32 %v16918_v49, 16 }
 0x59f   : > { %v8893_v42 = vsel %vm14588_vm13, %v8831_v36, %v8892_v8  ;;  %8897 = vst [vmem:[#allocation4 + $0x44] sm:$0x1] %v8896_v58  ;;  %9595 = vrot.lane.b32.xlu0 %v9591_v9, %s13190_s23  ;;  %v9382_v60 = vshrl.u32 %v9274_v35, 16  ;;  %v9260_v12 = vrot.slane %v16916_v39, 5  ;;  %v9318_v45 = vor.u32 %v9317_v18, %v9314_v56  ;;  %10044 = vmatpush.bf16.msrb.mxu2 %v12872_v41  ;;  %v12871_v36 = vld [vmem:[%s17644_s5 + $0x98] sm:$0xff] }
 0x5a0   : > { %8894 = vst [vmem:[#allocation4 + $0x40] sm:$0xf] %v8893_v42  ;;  %v9385_v5 = vshll.u32 %v9274_v35, 16  ;;  %v9323_v46 = vrot.slane %v9321_v25, 5  ;;  %v9332_v30 = vor.u32 %v9331_v59, %v9328_v21  ;;  %v9337_v0 = vrot.slane %v9335_v23, 5  ;;  %v12870_v21 = vld [vmem:[%s17644_s5 + $0x90] sm:$0xff] }
 0x5a1   : > { %v9391_v10 = vshll.u32 %v16927_v2, 16  ;;  %v9319_v16 = vrot.slane %v9318_v45, 4  ;;  %v9384_v13 = vrot.slane %v9382_v60, 4  ;;  %v9261_v34 = vsel %vm13306_vm4, %v12274_v63, %v9260_v12  ;;  %v9272_v9 = vld [vmem:[#allocation4 + $0x38] sm:$0xf] }
 0x5a2   : > { %v9333_v33 = vrot.slane %v9332_v30, 4  ;;  %v9387_v24 = vrot.slane %v9385_v5, 5  ;;  %v9549_v48 = vunpack.c.l.b16 %v9261_v34  ;;  %v16951_v56 = vld [vmem:[#allocation4 + $0x34] sm:$0x1]  ;;  %v9340_v25 = vshrl.u32 %v9271_v19, 16 }
 0x5a3   : > { %v9324_v8 = vsel %vm13361_vm7, %v9319_v16, %v9323_v46  ;;  %v9393_v42 = vrot.slane %v9391_v10, 5  ;;  %v16953_v63 = vld [vmem:[#allocation4 + $0x3c] sm:$0x1]  ;;  %v9343_v18 = vshll.u32 %v9271_v19, 16  ;;  %10045 = vmatpush.bf16.msrb.mxu2 %v12871_v36  ;;  %v9354_v60 = vshrl.u32 %v9272_v9, 16 }
 0x5a4   : > { %v9338_v61 = vsel %vm13361_vm7, %v9333_v33, %v9337_v0  ;;  %v9388_v38 = vor.u32 %v9387_v24, %v9384_v13  ;;  %v9585_v52 = vunpack.c.l.b16 %v9324_v8  ;;  %v9342_v23 = vrot.slane %v9340_v25, 4  ;;  %v9395_v8 = vld [vmem:[#allocation4 + $0x10] sm:$0xe]  ;;  %v9082_v25 = vld [vmem:[#allocation4 + $0x8] sm:$0xf] }
 0x5a5   : > { %v9586_v28 = vunpack.c.l.b16 %v9338_v61  ;;  %v9357_v12 = vshll.u32 %v9272_v9, 16  ;;  %v9349_v46 = vshll.u32 %v16951_v56, 16  ;;  %v9356_v0 = vrot.slane %v9354_v60, 4  ;;  %v9396_v61 = vld [vmem:[#allocation4 + $0x18] sm:$0xe] }
 0x5a6   : > { %v16933_v62 = vld [vmem:[#allocation4 + $0x44] sm:$0x1]  ;;  %v9389_v11 = vrot.slane %v9388_v38, 4  ;;  %v9363_v41 = vshll.u32 %v16953_v63, 16 }
 0x5a7   : > { %v16935_v44 = vld [vmem:[#allocation4 + $0x44] sm:$0x1]  ;;  %v12847_v31 = vld [vmem:[#allocation4 + $0x3c] sm:$0xf0]  ;;  %v9264_v40 = vrot.slane %v16933_v62, 5  ;;  %v9592_v45 = vpack.c.b16 %v9586_v28, %v9585_v52  ;;  %v9359_v10 = vrot.slane %v9357_v12, 5  ;;  %10046 = vmatpush.bf16.msrb.mxu2 %v12870_v21 }
 0x5a8   : > { %v9217_v32 = vld [vmem:[#allocation4 + $0x40] sm:$0xe]  ;;  %v12315_v6 = vor.u32 %v12847_v31, %v12314_v55  ;;  %v9377_v51 = vshll.u32 %v16935_v44, 16  ;;  %v9394_v5 = vsel %vm13361_vm7, %v9389_v11, %v9393_v42  ;;  %v9345_v55 = vrot.slane %v9343_v18, 5  ;;  %v9029_v11 = vld [vmem:[#allocation4 + $0x18] sm:$0xe] }
 0x5a9   : > { %v12275_v47 = vrot.slane %v9217_v32, 9  ;;  %v9273_v57 = vld [vmem:[#allocation4 + $0x40] sm:$0xf]  ;;  %v9590_v16 = vunpack.c.l.b16 %v9394_v5  ;;  %v9360_v32 = vor.u32 %v9359_v10, %v9356_v0  ;;  %v9351_v24 = vrot.slane %v9349_v46, 5  ;;  %v12843_v12 = vld [vmem:[#allocation4 + $0x34] sm:$0xf0] }
 0x5aa   : > { %9529 = vrot.lane.b32.xlu1 %v12315_v6, %s13190_s23  ;;  %v9368_v50 = vshrl.u32 %v9273_v57, 16  ;;  %v9371_v14 = vshll.u32 %v9273_v57, 16  ;;  %v9379_v20 = vrot.slane %v9377_v51, 5  ;;  %v9346_v13 = vor.u32 %v9345_v55, %v9342_v23  ;;  %v12298_v46 = vld [vmem:[#allocation4 + $0x30] sm:$0xf] }
 0x5ab   : > { %v9265_v17 = vsel %vm13306_vm4, %v12275_v47, %v9264_v40  ;;  %v9361_v6 = vrot.slane %v9360_v32, 4  ;;  %v9365_v47 = vrot.slane %v9363_v41, 5  ;;  %v9099_v18 = vshrl.u32 %v9082_v25, 16  ;;  %v13106_v0 = vld [vmem:[#allocation4 + $0x1c] sm:$0x1] }
 0x5ac   : > { %v9550_v58 = vunpack.c.l.b16 %v9265_v17  ;;  %v9370_v37 = vrot.slane %v9368_v50, 4  ;;  %v9373_v35 = vrot.slane %v9371_v14, 5  ;;  %v9347_v33 = vrot.slane %v9346_v13, 4 }
 0x5ad   : > { %v9366_v51 = vsel %vm13361_vm7, %v9361_v6, %v9365_v47  ;;  %v9421_v17 = vrot.slane %v16887_v53, 5  ;;  %v12276_v50 = vrot.slane %v9395_v8, 9  ;;  %v12277_v14 = vrot.slane %v9396_v61, 9  ;;  %v12869_v53 = vld [vmem:[%s17644_s5 + $0x88] sm:$0xff] }
 0x5ae   : > { %v9554_v27 = vpack.c.b16 %v9550_v58, %v9549_v48  ;;  %v9374_v59 = vor.u32 %v9373_v35, %v9370_v37  ;;  %v9352_v57 = vsel %vm13361_vm7, %v9347_v33, %v9351_v24  ;;  %v9588_v36 = vunpack.c.l.b16 %v9366_v51  ;;  %10047 = vmatpush.bf16.msrb.mxu2 %v12869_v53  ;;  %v12883_v37 = vld [vmem:[%s17644_s5 + $0xf8] sm:$0xff]  ;;  %v9083_v35 = vld [vmem:[#allocation4 + $0x10] sm:$0xf]  ;;  %v12882_v24 = vld [vmem:[%s17644_s5 + $0xf0] sm:$0xff] }
 0x5af   : > { %v9587_v19 = vunpack.c.l.b16 %v9352_v57  ;;  %v9425_v48 = vrot.slane %v16892_v4, 5  ;;  %v9422_v28 = vsel %vm13306_vm4, %v12276_v50, %v9421_v17  ;;  %v12868_v4 = vld [vmem:[%s17644_s5 + $0x80] sm:$0xff]  ;;  %10070 = vmatpush.bf16.msra.mxu3 %v12883_v37  ;;  %v9102_v21 = vshll.u32 %v9082_v25, 16  ;;  %v12887_v33 = vld [vmem:[%s17644_s5 + $0x118] sm:$0xff] }
 0x5b0   : > { %9561 = vrot.lane.b32.xlu2 %v9554_v27, %s13190_s23  ;;  %v9375_v30 = vrot.slane %v9374_v59, 4  ;;  %v9603_v42 = vunpack.c.l.b16 %v9422_v28  ;;  %v9113_v27 = vshrl.u32 %v9083_v35, 16  ;;  %v9028_v59 = vld [vmem:[#allocation4 + $0x10] sm:$0xe]  ;;  %v9101_v5 = vrot.slane %v9099_v18, 4 }
 0x5b1   : > { %v9593_v58 = vpack.c.b16 %v9588_v36, %v9587_v19  ;;  %v9426_v38 = vsel %vm13306_vm4, %v12277_v14, %v9425_v48  ;;  %v9104_v55 = vrot.slane %v9102_v21, 5  ;;  %v9064_v10 = vrot.slane %v13106_v0, 5  ;;  %v13109_v51 = vld [vmem:[#allocation4 + $0xc] sm:$0x1]  ;;  %v9085_v48 = vld [vmem:[#allocation4 + $0x20] sm:$0xf] }
 0x5b2   : > { %9597 = vrot.lane.b32.xlu1 %v9592_v45, %s13190_s23  ;;  %v9380_v31 = vsel %vm13361_vm7, %v9375_v30, %v9379_v20  ;;  %v9604_v9 = vunpack.c.l.b16 %v9426_v38  ;;  %10048 = vmatpush.bf16.msrb.mxu2 %v12868_v4  ;;  %v9116_v20 = vshll.u32 %v9083_v35, 16  ;;  %v9115_v23 = vrot.slane %v9113_v27, 4 }
 0x5b3   : > { %v9589_v34 = vunpack.c.l.b16 %v9380_v31  ;;  %v12263_v45 = vrot.slane %v9029_v11, 9  ;;  %v12262_v30 = vrot.slane %v9028_v59, 9  ;;  %v12299_v41 = vor.u32 %v12843_v12, %v12298_v46  ;;  %v13107_v31 = vld [vmem:[#allocation4 + $0x14] sm:$0x1]  ;;  %10071 = vmatpush.bf16.msra.mxu3 %v12882_v24  ;;  %v9030_v11 = vld [vmem:[#allocation4 + $0x20] sm:$0xe]  ;;  %v9556_v12 = vpop.permute.xlu2 %9555 }
 0x5b4   : > { %v16978_v52 = vpack.c.b16 %v9604_v9, %v9603_v42  ;;  %v9118_v60 = vrot.slane %v9116_v20, 5  ;;  %v9060_v32 = vrot.slane %v13107_v31, 5  ;;  %v9105_v47 = vor.u32 %v9104_v55, %v9101_v5  ;;  %v13110_v55 = vld [vmem:[#allocation4 + $0x2c] sm:$0x1] }
 0x5b5   : > { %v9594_v40 = vpack.c.b16 %v9590_v16, %v9589_v34  ;;  %v9065_v34 = vsel %vm13306_vm4, %v12263_v45, %v9064_v10  ;;  %v9108_v19 = vshll.u32 %v13109_v51, 16  ;;  %v9141_v53 = vshrl.u32 %v9085_v48, 16  ;;  %v12886_v10 = vld [vmem:[%s17644_s5 + $0x110] sm:$0xff] }
 0x5b6   : > { %v9119_v16 = vor.u32 %v9118_v60, %v9115_v23  ;;  %v9061_v8 = vsel %vm13306_vm4, %v12262_v30, %v9060_v32  ;;  %v9494_v61 = vunpack.c.l.b16 %v9065_v34  ;;  %10103 = vmatpush.bf16.msra.mxu2 %v12887_v33  ;;  %v9106_v50 = vrot.slane %v9105_v47, 4  ;;  %v9031_v23 = vld [vmem:[#allocation4 + $0x28] sm:$0xe]  ;;  %v12881_v30 = vld [vmem:[%s17644_s5 + $0xe8] sm:$0xff]  ;;  %v12880_v34 = vld [vmem:[%s17644_s5 + $0xe0] sm:$0xff] }
 0x5b7   : > { %9601 = vrot.lane.b32.xlu0 %v9594_v40, %s13190_s23  ;;  %v13108_v40 = vld [vmem:[#allocation4 + $0x14] sm:$0x1]  ;;  %v9493_v17 = vunpack.c.l.b16 %v9061_v8  ;;  %v9110_v38 = vrot.slane %v9108_v19, 5  ;;  %v9144_v4 = vshll.u32 %v9085_v48, 16  ;;  %v9143_v18 = vrot.slane %v9141_v53, 4  ;;  %10072 = vmatpush.bf16.msra.mxu3 %v12881_v30 }
 0x5b8   : > { %9599 = vrot.lane.b32.xlu2 %v9593_v58, %s13190_s23  ;;  %v9122_v57 = vshll.u32 %v13108_v40, 16  ;;  %v9120_v36 = vrot.slane %v9119_v16, 4  ;;  %v9084_v58 = vld [vmem:[#allocation4 + $0x18] sm:$0xf]  ;;  %v12264_v45 = vrot.slane %v9030_v11, 9  ;;  %v12265_v5 = vrot.slane %v9031_v23, 9 }
 0x5b9   : > { %v9500_v28 = vpack.c.b16 %v9494_v61, %v9493_v17  ;;  %v9127_v35 = vshrl.u32 %v9084_v58, 16  ;;  %v9111_v25 = vsel %vm13361_vm7, %v9106_v50, %v9110_v38  ;;  %v9130_v27 = vshll.u32 %v9084_v58, 16  ;;  %v13111_v16 = vld [vmem:[#allocation4 + $0x24] sm:$0x1]  ;;  %v13113_v8 = vld [vmem:[#allocation4 + $0x1c] sm:$0x1] }
 0x5ba   : > { %v9124_v14 = vrot.slane %v9122_v57, 5  ;;  %v9146_v21 = vrot.slane %v9144_v4, 5  ;;  %v9531_v59 = vunpack.c.l.b16 %v9111_v25  ;;  %v9072_v46 = vrot.slane %v13110_v55, 5  ;;  %10104 = vmatpush.bf16.msra.mxu2 %v12886_v10  ;;  %v13112_v47 = vld [vmem:[#allocation4 + $0x24] sm:$0x1]  ;;  %v12885_v25 = vld [vmem:[%s17644_s5 + $0x108] sm:$0xff] }
 0x5bb   : > { %v9129_v60 = vrot.slane %v9127_v35, 4  ;;  %v9132_v0 = vrot.slane %v9130_v27, 5  ;;  %v9150_v40 = vshll.u32 %v13112_v47, 16  ;;  %v9136_v61 = vshll.u32 %v13113_v8, 16  ;;  %10073 = vmatpush.bf16.msra.mxu3 %v12880_v34  ;;  %v9087_v35 = vld [vmem:[#allocation4 + $0x30] sm:$0xf] }
 0x5bc   : > { %v9125_v42 = vsel %vm13361_vm7, %v9120_v36, %v9124_v14  ;;  %v9073_v31 = vsel %vm13306_vm4, %v12265_v5, %v9072_v46  ;;  %v9147_v32 = vor.u32 %v9146_v21, %v9143_v18  ;;  %v9528_v36 = vpop.permute.xlu2 %9527  ;;  %v9086_v14 = vld [vmem:[#allocation4 + $0x28] sm:$0xf]  ;;  %v9172_v11 = vshll.u32 %v9087_v35, 16  ;;  %v9558_v18 = vpop.permute.xlu1 %9557  ;;  %v12878_v10 = vld [vmem:[%s17644_s5 + $0xd0] sm:$0xff]  ;;  %v9088_v34 = vld [vmem:[#allocation4 + $0x38] sm:$0xf] }
 0x5bd   : > { %v9532_v20 = vunpack.c.l.b16 %v9125_v42  ;;  %v9496_v57 = vunpack.c.l.b16 %v9073_v31  ;;  %v9152_v48 = vrot.slane %v9150_v40, 5  ;;  %v9138_v58 = vrot.slane %v9136_v61, 5  ;;  %v12884_v31 = vld [vmem:[%s17644_s5 + $0x100] sm:$0xff] }
 0x5be   : > { %v9148_v51 = vrot.slane %v9147_v32, 4  ;;  %v9158_v53 = vshll.u32 %v9086_v14, 16  ;;  %10105 = vmatpush.bf16.msra.mxu2 %v12885_v25  ;;  %v9178_v46 = vshll.u32 %v16872_v22, 16  ;;  %v9164_v30 = vshll.u32 %v16870_v7, 16  ;;  %v9033_v32 = vld [vmem:[#allocation4 + $0x38] sm:$0xe] }
 0x5bf   : > { %v12877_v22 = vld [vmem:[%s17644_s5 + $0xc8] sm:$0xff]  ;;  %v9032_v47 = vld [vmem:[#allocation4 + $0x30] sm:$0xe]  ;;  %v9183_v8 = vshrl.u32 %v9088_v34, 16  ;;  %v9186_v61 = vshll.u32 %v9088_v34, 16 }
 0x5c0   : > { %v9166_v7 = vrot.slane %v9164_v30, 5 }
 0x5c2   : > { %10106 = vmatpush.bf16.msra.mxu2 %v12884_v31  ;;  %v17065_v31 = vpop.f32.mrf.mxu2 }
 0x5e5   : > { %v9490_v13 = vpop.permute.xlu0 %9489 }
 0x5e6   : > { %v9629_v6 = vsel %vm6888_vm10, %v12299_v41, %v9490_v13  ;;  %v9539_v41 = vpack.c.b16 %v9532_v20, %v9531_v59  ;;  %v9068_v13 = vrot.slane %v13111_v16, 5  ;;  %v9169_v20 = vshrl.u32 %v9087_v35, 16 }
 0x5e7   : > { %10006 = vmatmul.bf16.gmra.mxu2 %v9629_v6  ;;  %v9133_v6 = vor.u32 %v9132_v0, %v9129_v60  ;;  %v9160_v59 = vrot.slane %v9158_v53, 5  ;;  %v9180_v16 = vrot.slane %v9178_v46, 5 }
 0x5e8   : > { %v9649_v33 = vsel %vm6888_vm10, %v9539_v41, %v9556_v12  ;;  %v9069_v24 = vsel %vm13306_vm4, %v12264_v45, %v9068_v13  ;;  %v9171_v60 = vrot.slane %v9169_v20, 4  ;;  %v9174_v12 = vrot.slane %v9172_v11, 5  ;;  %v9089_v13 = vld [vmem:[#allocation4 + $0x40] sm:$0xf] }
 0x5e9   : > { %v9495_v19 = vunpack.c.l.b16 %v9069_v24  ;;  %v9134_v17 = vrot.slane %v9133_v6, 4  ;;  %v9197_v24 = vshrl.u32 %v9089_v13, 16  ;;  %v9200_v6 = vshll.u32 %v9089_v13, 16 }
 0x5ea   : > { %v9175_v5 = vor.u32 %v9174_v12, %v9171_v60 }
 0x5eb   : > { %v9501_v50 = vpack.c.b16 %v9496_v57, %v9495_v19  ;;  %v9139_v42 = vsel %vm13361_vm7, %v9134_v17, %v9138_v58  ;;  %v12267_v57 = vrot.slane %v9033_v32, 9  ;;  %v12876_v19 = vld [vmem:[%s17644_s5 + $0xc0] sm:$0xff]  ;;  %v9080_v17 = vrot.slane %v16842_v1, 5  ;;  %v12849_v32 = vld [vmem:[#allocation4 + $0x24] sm:$0xf0] }
 0x5ec   : > { %v9533_v27 = vunpack.c.l.b16 %v9139_v42  ;;  %v9176_v0 = vrot.slane %v9175_v5, 4  ;;  %v9185_v42 = vrot.slane %v9183_v8, 4  ;;  %v17071_v8 = vpop.f32.mrf.mxu2 }
 0x5ed   : > { %v9526_v9 = vpop.permute.xlu0 %9525  ;;  %v9641_v38 = vsel %vm6888_vm10, %v9501_v50, %v9528_v36  ;;  %v12266_v36 = vrot.slane %v9032_v47, 9  ;;  %v9202_v50 = vrot.slane %v9200_v6, 5 }
 0x5ee   : > { %v9637_v37 = vsel %vm6888_vm10, %v9500_v28, %v9526_v9  ;;  %v9153_v28 = vsel %vm13361_vm7, %v9148_v51, %v9152_v48  ;;  %v9155_v9 = vshrl.u32 %v9086_v14, 16  ;;  %v9199_v48 = vrot.slane %v9197_v24, 4 }
 0x5ef   : > { %10025 = vmatmul.bf16.gmra.mxu3 %v9637_v37  ;;  %v9534_v4 = vunpack.c.l.b16 %v9153_v28  ;;  %v12879_v37 = vld [vmem:[%s17644_s5 + $0xd8] sm:$0xff]  ;;  %v9076_v28 = vrot.slane %v16838_v29, 5  ;;  %v9192_v29 = vshll.u32 %v16916_v39, 16 }
 0x5f0   : > { %10074 = vmatpush.bf16.msra.mxu3 %v12879_v37  ;;  %v9157_v21 = vrot.slane %v9155_v9, 4  ;;  %v9188_v9 = vrot.slane %v9186_v61, 5  ;;  %v9203_v37 = vor.u32 %v9202_v50, %v9199_v48  ;;  %v9429_v61 = vrot.slane %v16912_v43, 5  ;;  %v12850_v50 = vld [vmem:[#allocation4 + $0x34] sm:$0xf0] }
 0x5f1   : > { %v9540_v23 = vpack.c.b16 %v9534_v4, %v9533_v27  ;;  %v9077_v4 = vsel %vm13306_vm4, %v12266_v36, %v9076_v28  ;;  %v9206_v27 = vshll.u32 %v16933_v62, 16  ;;  %v9194_v12 = vrot.slane %v9192_v29, 5  ;;  %v9399_v28 = vld [vmem:[#allocation4 + $0x30] sm:$0xe]  ;;  %v12330_v29 = vld [vmem:[#allocation4 + $0x40] sm:$0xf] }
 0x5f2   : > { %v9161_v55 = vor.u32 %v9160_v59, %v9157_v21  ;;  %v9189_v25 = vor.u32 %v9188_v9, %v9185_v42  ;;  %v9497_v20 = vunpack.c.l.b16 %v9077_v4  ;;  %v9204_v11 = vrot.slane %v9203_v37, 4 }
 0x5f3   : > { %v9653_v45 = vsel %vm6888_vm10, %v9540_v23, %v9558_v18  ;;  %v9208_v23 = vrot.slane %v9206_v27, 5  ;;  %v12280_v9 = vrot.slane %v9399_v28, 9  ;;  %v9437_v4 = vrot.slane %v16951_v56, 5 }
 0x5f4   : > { %v9162_v41 = vrot.slane %v9161_v55, 4  ;;  %10075 = vmatpush.bf16.msra.mxu3 %v12878_v10  ;;  %v9190_v59 = vrot.slane %v9189_v25, 4  ;;  %v12318_v10 = vld [vmem:[#allocation4 + $0x10] sm:$0xf]  ;;  %v17078_v48 = vpop.f32.mrf.mxu2 }
 0x5f6   : > { %v9167_v40 = vsel %vm13361_vm7, %v9162_v41, %v9166_v7  ;;  %v9195_v5 = vsel %vm13361_vm7, %v9190_v59, %v9194_v12  ;;  %v12322_v7 = vld [vmem:[#allocation4 + $0x20] sm:$0xf]  ;;  %v9449_v12 = vrot.slane %v16927_v2, 5 }
 0x5f7   : > { %10049 = vmatmul.bf16.vlgmr.msrb.gmra.mxu2 %v9649_v33  ;;  %v9181_v33 = vsel %vm13361_vm7, %v9176_v0, %v9180_v16  ;;  %v9535_v14 = vunpack.c.l.b16 %v9167_v40  ;;  %v9537_v62 = vunpack.c.l.b16 %v9195_v5  ;;  %v12848_v0 = vld [vmem:[#allocation4 + $0x14] sm:$0xf0]  ;;  %v12323_v24 = vor.u32 %v12849_v32, %v12322_v7 }
 0x5f8   : > { %v9536_v51 = vunpack.c.l.b16 %v9181_v33  ;;  %10076 = vmatpush.bf16.msra.mxu3 %v12877_v22  ;;  %v12319_v16 = vor.u32 %v12848_v0, %v12318_v10  ;;  %v9398_v22 = vld [vmem:[#allocation4 + $0x28] sm:$0xe]  ;;  %v9397_v33 = vld [vmem:[#allocation4 + $0x20] sm:$0xe]  ;;  %v9445_v5 = vrot.slane %v16935_v44, 5  ;;  %v10021_v10 = vpop.f32.mrf.mxu3 }
 0x5f9   : > { %v12279_v6 = vrot.slane %v9398_v22, 9  ;;  %v12278_v40 = vrot.slane %v9397_v33, 9 }
 0x5fa   : > { %v9541_v53 = vpack.c.b16 %v9536_v51, %v9535_v14 }
 0x5fb   : > { %v9430_v51 = vsel %vm13306_vm4, %v12278_v40, %v9429_v61 }
 0x5fc   : > { %10077 = vmatpush.bf16.msra.mxu3 %v12876_v19  ;;  %v9605_v36 = vunpack.c.l.b16 %v9430_v51 }
 0x5ff   : > { %10030 = vmatmul.bf16.gmra.mxu3 %v9641_v38  ;;  %v9081_v38 = vsel %vm13306_vm4, %v12267_v57, %v9080_v17  ;;  %v9433_v57 = vrot.slane %v16918_v49, 5  ;;  %v9400_v49 = vld [vmem:[#allocation4 + $0x38] sm:$0xe] }
 0x600   : > { %v9498_v1 = vunpack.c.l.b16 %v9081_v38  ;;  %v12281_v43 = vrot.slane %v9400_v49, 9 }
 0x602   : > { %v9502_v18 = vpack.c.b16 %v9498_v1, %v9497_v20  ;;  %v9438_v1 = vsel %vm13306_vm4, %v12280_v9, %v9437_v4 }
 0x603   : > { %v9607_v27 = vunpack.c.l.b16 %v9438_v1 }
 0x604   : > { %v9560_v58 = vpop.permute.xlu0 %9559 }
 0x605   : > { %v9657_v35 = vsel %vm6888_vm10, %v9541_v53, %v9560_v58  ;;  %v12326_v58 = vld [vmem:[#allocation4 + $0x30] sm:$0xf]  ;;  %v9441_v53 = vrot.slane %v16953_v63, 5  ;;  %v9402_v63 = vld [vmem:[#allocation4 + $0x48] sm:$0xe] }
 0x606   : > { %v12327_v38 = vor.u32 %v12850_v50, %v12326_v58 }
 0x607   : > { %10054 = vmatmul.bf16.gmra.mxu2 %v9653_v45  ;;  %v9209_v45 = vsel %vm13361_vm7, %v9204_v11, %v9208_v23  ;;  %v9442_v37 = vsel %vm13306_vm4, %v12281_v43, %v9441_v53  ;;  %v12851_v11 = vld [vmem:[#allocation4 + $0x44] sm:$0xf0] }
 0x608   : > { %v9538_v55 = vunpack.c.l.b16 %v9209_v45  ;;  %v9608_v25 = vunpack.c.l.b16 %v9442_v37  ;;  %v12331_v59 = vor.u32 %v12851_v11, %v12330_v29 }
 0x60a   : > { %v9562_v46 = vpop.permute.xlu2 %9561  ;;  %v9542_v30 = vpack.c.b16 %v9538_v55, %v9537_v62  ;;  %v9613_v20 = vpack.c.b16 %v9608_v25, %v9607_v27 }
 0x60c   : > { %v9661_v39 = vsel %vm6888_vm10, %v9542_v30, %v9562_v46 }
 0x611   : > { %v9596_v41 = vpop.permute.xlu0 %9595 }
 0x612   : > { %v9665_v13 = vsel %vm6888_vm10, %v12319_v16, %v9596_v41  ;;  %v9600_v14 = vpop.permute.xlu2 %9599  ;;  %v10023_v41 = vpop.f32.mrf.mxu3 }
 0x613   : > { %v9673_v42 = vsel %vm6888_vm10, %v12327_v38, %v9600_v14 }
 0x617   : > { %10059 = vmatmul.bf16.gmra.mxu2 %v9657_v35  ;;  %v17086_v35 = vpop.f32.mrf.mxu2 }
 0x61c   : > { %v9530_v21 = vpop.permute.xlu1 %9529 }
 0x61d   : > { %v9645_v60 = vsel %vm6888_vm10, %v9502_v18, %v9530_v21  ;;  %v9401_v18 = vld [vmem:[#allocation4 + $0x40] sm:$0xe] }
 0x61e   : > { %10035 = vmatmul.bf16.gmra.mxu3 %v9645_v60  ;;  %v12282_v23 = vrot.slane %v9401_v18, 9  ;;  %v12283_v60 = vrot.slane %v9402_v63, 9 }
 0x620   : > { %v9446_v55 = vsel %vm13306_vm4, %v12282_v23, %v9445_v5  ;;  %v9450_v62 = vsel %vm13306_vm4, %v12283_v60, %v9449_v12 }
 0x621   : > { %v17091_v21 = vpop.f32.mrf.mxu2  ;;  %v9609_v46 = vunpack.c.l.b16 %v9446_v55  ;;  %v9610_v30 = vunpack.c.l.b16 %v9450_v62 }
 0x623   : > { %v9614_v0 = vpack.c.b16 %v9610_v30, %v9609_v46 }
 0x624   : > { %v9598_v34 = vpop.permute.xlu1 %9597 }
 0x625   : > { %v9669_v47 = vsel %vm6888_vm10, %v12323_v24, %v9598_v34  ;;  %v12935_v34 = vld [vmem:[%s17646_s7 + $0x118] sm:$0xff] }
 0x626   : > { %11478 = vmatpush.bf16.msra.mxu1 %v12935_v34 }
 0x627   : > { %10064 = vmatmul.bf16.gmra.mxu2 %v9661_v39 }
 0x629   : > { %v9602_v56 = vpop.permute.xlu0 %9601  ;;  %v17100_v39 = vpop.f32.mrf.mxu2 }
 0x62a   : > { %v9677_v45 = vsel %vm6888_vm10, %v12331_v59, %v9602_v56  ;;  %v10228_v56 = vld [vmem:[#allocation5 + $0xc] sm:$0x1] }
 0x62e   : > { %10078 = vmatmul.bf16.vlgmr.msra.gmra.mxu3 %v9665_v13 }
 0x637   : > { %12476 = vmatmul.msk.bf16.vlgmr.msra.gmra.mxu2 %vm6888_vm10, %v16978_v52  ;;  %v9434_v52 = vsel %vm13306_vm4, %v12279_v6, %v9433_v57 }
 0x638   : > { %v9606_v19 = vunpack.c.l.b16 %v9434_v52 }
 0x63a   : > { %v9612_v17 = vpack.c.b16 %v9606_v19, %v9605_v36  ;;  %v17134_v19 = vld [vmem:[%s17645_s6] ss:$0 sm:$0xff] }
 0x63b   : > { %v9993_v50 = vadd.f32 %v17134_v19, %v17065_v31  ;;  %v9995_v43 = vadd.f32 %v17134_v19, %v17071_v8  ;;  %v12930_v31 = vld [vmem:[%s17646_s7 + $0xf0] sm:$0xff]  ;;  %v9998_v29 = vadd.f32 %v17134_v19, %v17078_v48  ;;  %v10225_v8 = vld [vmem:[#allocation5 + $0x8] sm:$0xf] }
 0x63d   : > { %v10022_v49 = vadd.f32 %v10021_v10, %v9993_v50  ;;  %v10024_v9 = vadd.f32 %v10023_v41, %v9995_v43  ;;  %v10000_v10 = vadd.f32 %v17134_v19, %v17086_v35  ;;  %v12933_v50 = vld [vmem:[%s17646_s7 + $0x108] sm:$0xff] }
 0x63e   : > { %10083 = vmatmul.bf16.gmra.mxu3 %v9669_v47  ;;  %v12931_v47 = vld [vmem:[%s17646_s7 + $0xf8] sm:$0xff] }
 0x63f   : > { %11445 = vmatpush.bf16.msra.mxu0 %v12931_v47 }
 0x643   : > { %11446 = vmatpush.bf16.msra.mxu0 %v12930_v31 }
 0x647   : > { %12477 = vmatmul.msk.bf16.gmra.mxu2 %vm6888_vm10, %v9612_v17 }
 0x64e   : > { %10088 = vmatmul.bf16.gmra.mxu3 %v9673_v42 }
 0x657   : > { %12478 = vmatmul.msk.bf16.gmra.mxu2 %vm6888_vm10, %v9613_v20 }
 0x65e   : > { %10093 = vmatmul.bf16.gmra.mxu3 %v9677_v45 }
 0x667   : > { %12479 = vmatmul.msk.bf16.gmra.mxu2 %vm6888_vm10, %v9614_v0  ;;  %v12934_v0 = vld [vmem:[%s17646_s7 + $0x110] sm:$0xff] }
 0x668   : > { %11479 = vmatpush.bf16.msra.mxu1 %v12934_v0 }
 0x66a   : > { %v17103_v2 = vpop.f32.mrf.mxu2 }
 0x66c   : > { %11480 = vmatpush.bf16.msra.mxu1 %v12933_v50 }
 0x672   : > { %v17105_v16 = vpop.f32.mrf.mxu2  ;;  %v10026_v44 = vpop.f32.mrf.mxu3 }
 0x673   : > { %v10027_v59 = vadd.f32 %v10026_v44, %v9998_v29 }
 0x67a   : > { %v10050_v13 = vpop.f32.mrf.mxu2  ;;  %v17107_v22 = vpop.f32.mrf.mxu3 }
 0x67b   : > { %v10051_v14 = vadd.f32 %v10050_v13, %v10022_v49  ;;  %v10273_v13 = vld [vmem:[#allocation5] sm:$0xf]  ;;  %v10029_v49 = vadd.f32 %v17107_v22, %v10000_v10 }
 0x67c   : > { %v10290_v47 = vshrl.u32 %v10273_v13, 16 }
 0x682   : > { %v10052_v32 = vpop.f32.mrf.mxu2  ;;  %v17112_v33 = vpop.f32.mrf.mxu3 }
 0x683   : > { %v10053_v4 = vadd.f32 %v10052_v32, %v10024_v9 }
 0x68a   : > { %v10055_v7 = vpop.f32.mrf.mxu2  ;;  %v17116_v6 = vpop.f32.mrf.mxu3 }
 0x68b   : > { %v10056_v45 = vadd.f32 %v10055_v7, %v10027_v59  ;;  %v10281_v7 = vld [vmem:[#allocation5 + $0x4] sm:$0x1] }
 0x692   : > { %v17114_v24 = vpop.f32.mrf.mxu2 }
 0x693   : > { %v10058_v9 = vadd.f32 %v17114_v24, %v10029_v49  ;;  %v10003_v24 = vadd.f32 %v17134_v19, %v17091_v21  ;;  %v10237_v21 = vld [vmem:[#allocation5 + $0x18] sm:$0xf] }
 0x69a   : > { %v17121_v40 = vpop.f32.mrf.mxu2 }
 0x6a1   : > { %v17123_v57 = vpop.f32.mrf.mxu3 }
 0x6a2   : > { %v17125_v61 = vpop.f32.mrf.mxu2 }
 0x6a9   : > { %v17127_v52 = vpop.f32.mrf.mxu3 }
 0x6aa   : > { %v17129_v51 = vpop.f32.mrf.mxu2 }
 0x6b1   : > { %v10079_v36 = vpop.f32.mrf.mxu3 }
 0x6b2   : > { %v17136_v17 = vpop.f32.mrf.mxu2  ;;  %v10080_v28 = vadd.f32 %v10079_v36, %v10051_v14  ;;  %v10293_v36 = vshll.u32 %v10273_v13, 16  ;;  %v10231_v14 = vld [vmem:[#allocation5 + $0x10] sm:$0xf] }
 0x6b9   : > { %v10081_v58 = vpop.f32.mrf.mxu3 }
 0x6ba   : > { %v10108_v38 = vpop.f32.mrf.mxu2  ;;  %v10082_v25 = vadd.f32 %v10081_v58, %v10053_v4  ;;  %v10234_v58 = vld [vmem:[#allocation5 + $0x14] sm:$0x1] }
 0x6bb   : > { %v10109_v42 = vadd.f32 %v10108_v38, %v10080_v28  ;;  %v10299_v28 = vshll.u32 %v10281_v7, 16 }
 0x6bd   : > { %v10128_v53 = vmax.f32 %v10109_v42, 0.0  ;;  %v10292_v42 = vrot.slane %v10290_v47, 4 }
 0x6bf   : > { %v10136_v37 = vpack.c.bf16 %v10128_v53, %v10128_v53  ;;  %v10295_v53 = vrot.slane %v10293_v36, 5  ;;  %v10005_v36 = vadd.f32 %v17134_v19, %v17100_v39 }
 0x6c1   : > { %v10084_v1 = vpop.f32.mrf.mxu3  ;;  %v10145_v27 = vshrl.u32 %v10136_v37, 16  ;;  %v10148_v18 = vshll.u32 %v10136_v37, 16  ;;  %v10034_v39 = vadd.f32 %v17116_v6, %v10005_v36  ;;  %v10252_v36 = vld [vmem:[#allocation5 + $0x2c] sm:$0x1] }
 0x6c2   : > { %v10110_v20 = vpop.f32.mrf.mxu2  ;;  %v10085_v46 = vadd.f32 %v10084_v1, %v10056_v45 }
 0x6c3   : > { %v10147_v11 = vrot.slane %v10145_v27, 7  ;;  %v10111_v63 = vadd.f32 %v10110_v20, %v10082_v25  ;;  %v10301_v27 = vrot.slane %v10299_v28, 5  ;;  %v10296_v20 = vor.u32 %v10295_v53, %v10292_v42 }
 0x6c5   : > { %v10150_v23 = vor.u32 %v10148_v18, %v10147_v11  ;;  %v10151_v60 = vrot.slane %v10147_v11, 4  ;;  %v10129_v12 = vmax.f32 %v10111_v63, 0.0  ;;  %v10297_v59 = vrot.slane %v10296_v20, 4 }
 0x6c7   : > { %v10226_v5 = vsel %vm14588_vm13, %v10150_v23, %v10225_v8  ;;  %v10229_v55 = vsel %vm14643_vm9, %v10151_v60, %v10228_v56  ;;  %v10137_v62 = vpack.c.bf16 %v10129_v12, %v10129_v12  ;;  %v12932_v8 = vld [vmem:[%s17646_s7 + $0x100] sm:$0xff] }
 0x6c8   : > { %10227 = vst [vmem:[#allocation5 + $0x8] sm:$0xf] %v10226_v5  ;;  %11481 = vmatpush.bf16.msra.mxu1 %v12932_v8 }
 0x6c9   : > { %v10086_v48 = vpop.f32.mrf.mxu3  ;;  %10230 = vst [vmem:[#allocation5 + $0xc] sm:$0x1] %v10229_v55  ;;  %v10153_v30 = vshrl.u32 %v10137_v62, 16  ;;  %v10156_v41 = vshll.u32 %v10137_v62, 16  ;;  %v10032_v62 = vadd.f32 %v17112_v33, %v10003_v24 }
 0x6ca   : > { %v10113_v44 = vpop.f32.mrf.mxu2  ;;  %v10087_v18 = vadd.f32 %v10086_v48, %v10058_v9  ;;  %v10302_v48 = vsel %vm13361_vm7, %v10297_v59, %v10301_v27 }
 0x6cb   : > { %v10155_v32 = vrot.slane %v10153_v30, 7  ;;  %v10114_v34 = vadd.f32 %v10113_v44, %v10085_v46  ;;  %v10240_v46 = vld [vmem:[#allocation5 + $0x1c] sm:$0x1]  ;;  %v10061_v44 = vadd.f32 %v17121_v40, %v10032_v62  ;;  %v10846_v47 = vunpack.c.l.b16 %v10302_v48 }
 0x6cd   : > { %v10158_v38 = vor.u32 %v10156_v41, %v10155_v32  ;;  %v10159_v35 = vrot.slane %v10155_v32, 4  ;;  %v10130_v43 = vmax.f32 %v10114_v34, 0.0 }
 0x6cf   : > { %v10232_v4 = vsel %vm14588_vm13, %v10158_v38, %v10231_v14  ;;  %v10235_v37 = vsel %vm14643_vm9, %v10159_v35, %v10234_v58  ;;  %v10138_v1 = vpack.c.bf16 %v10130_v43, %v10130_v43  ;;  %v10274_v25 = vld [vmem:[#allocation5 + $0x8] sm:$0xf]  ;;  %v10008_v35 = vadd.f32 %v17134_v19, %v17103_v2 }
 0x6d0   : > { %10233 = vst [vmem:[#allocation5 + $0x10] sm:$0xf] %v10232_v4  ;;  %v17165_v31 = vld [vmem:[#allocation5 + $0xc] sm:$0x1]  ;;  %v10304_v29 = vshrl.u32 %v10274_v25, 16  ;;  %v10307_v11 = vshll.u32 %v10274_v25, 16  ;;  %v10010_v43 = vadd.f32 %v17134_v19, %v17105_v16 }
 0x6d1   : > { %v10089_v22 = vpop.f32.mrf.mxu3  ;;  %10236 = vst [vmem:[#allocation5 + $0x14] sm:$0x1] %v10235_v37  ;;  %v10161_v63 = vshrl.u32 %v10138_v1, 16  ;;  %v10313_v12 = vshll.u32 %v17165_v31, 16  ;;  %v10164_v5 = vshll.u32 %v10138_v1, 16  ;;  %v10037_v20 = vadd.f32 %v17123_v57, %v10008_v35 }
 0x6d2   : > { %v10115_v56 = vpop.f32.mrf.mxu2  ;;  %v10306_v23 = vrot.slane %v10304_v29, 4  ;;  %v10309_v60 = vrot.slane %v10307_v11, 5  ;;  %v10090_v40 = vadd.f32 %v10089_v22, %v10061_v44  ;;  %v10243_v1 = vld [vmem:[#allocation5 + $0x20] sm:$0xf]  ;;  %v10246_v29 = vld [vmem:[#allocation5 + $0x24] sm:$0x1]  ;;  %v10039_v8 = vadd.f32 %v17127_v52, %v10010_v43 }
 0x6d3   : > { %v10163_v45 = vrot.slane %v10161_v63, 7  ;;  %v10116_v55 = vadd.f32 %v10115_v56, %v10087_v18  ;;  %v10315_v32 = vrot.slane %v10313_v12, 5  ;;  %v10063_v63 = vadd.f32 %v17125_v61, %v10034_v39  ;;  %v10249_v44 = vld [vmem:[#allocation5 + $0x28] sm:$0xf] }
 0x6d4   : > { %v10310_v30 = vor.u32 %v10309_v60, %v10306_v23  ;;  %v10066_v57 = vadd.f32 %v17129_v51, %v10037_v20 }
 0x6d5   : > { %v10166_v0 = vor.u32 %v10164_v5, %v10163_v45  ;;  %v10167_v10 = vrot.slane %v10163_v45, 4  ;;  %v10131_v41 = vmax.f32 %v10116_v55, 0.0 }
 0x6d6   : > { %v10311_v13 = vrot.slane %v10310_v30, 4 }
 0x6d7   : > { %v10238_v34 = vsel %vm14588_vm13, %v10166_v0, %v10237_v21  ;;  %v10241_v7 = vsel %vm14643_vm9, %v10167_v10, %v10240_v46  ;;  %v10139_v33 = vpack.c.bf16 %v10131_v41, %v10131_v41  ;;  %v10770_v14 = vld [vmem:[#allocation5 + $0x10] sm:$0xe]  ;;  %v17213_v10 = vld [vmem:[%s17646_s7 + $0xe8] sm:$0xff] }
 0x6d8   : > { %10239 = vst [vmem:[#allocation5 + $0x18] sm:$0xf] %v10238_v34  ;;  %v10316_v49 = vsel %vm13361_vm7, %v10311_v13, %v10315_v32  ;;  %v17185_v38 = vld [vmem:[#allocation5 + $0x14] sm:$0x1]  ;;  %v10275_v53 = vld [vmem:[#allocation5 + $0x10] sm:$0xf]  ;;  %11447 = vmatpush.bf16.msra.mxu0 %v17213_v10 }
 0x6d9   : > { %v10091_v50 = vpop.f32.mrf.mxu3  ;;  %10242 = vst [vmem:[#allocation5 + $0x1c] sm:$0x1] %v10241_v7  ;;  %v10169_v58 = vshrl.u32 %v10139_v33, 16  ;;  %v10847_v28 = vunpack.c.l.b16 %v10316_v49  ;;  %v10172_v42 = vshll.u32 %v10139_v33, 16  ;;  %v17192_v4 = vld [vmem:[#allocation5 + $0x14] sm:$0x1] }
 0x6da   : > { %v10118_v9 = vpop.f32.mrf.mxu2  ;;  %v10318_v22 = vshrl.u32 %v10275_v53, 16  ;;  %v12496_v11 = vrot.slane %v10770_v14, 9  ;;  %v10796_v2 = vrot.slane %v17185_v38, 5  ;;  %v10321_v24 = vshll.u32 %v10275_v53, 16  ;;  %v17225_v39 = vld [vmem:[#allocation5 + $0x14] sm:$0x1] }
 0x6db   : > { %v10171_v37 = vrot.slane %v10169_v58, 7  ;;  %v10119_v25 = vadd.f32 %v10118_v9, %v10090_v40  ;;  %v10854_v27 = vpack.c.b16 %v10847_v28, %v10846_v47  ;;  %v10327_v18 = vshll.u32 %v17192_v4, 16  ;;  %v17220_v40 = vld [vmem:[#allocation5 + $0xc] sm:$0x1] }
 0x6dc   : > { %v10320_v56 = vrot.slane %v10318_v22, 4  ;;  %v10323_v59 = vrot.slane %v10321_v24, 5  ;;  %v10092_v55 = vadd.f32 %v10091_v50, %v10063_v63  ;;  %v10797_v51 = vsel %vm13306_vm4, %v12496_v11, %v10796_v2 }
 0x6dd   : > { %v10174_v16 = vor.u32 %v10172_v42, %v10171_v37  ;;  %v10175_v19 = vrot.slane %v10171_v37, 4  ;;  %v10132_v6 = vmax.f32 %v10119_v25, 0.0  ;;  %10858 = vrot.lane.b32.xlu1 %v10854_v27, %s13190_s23  ;;  %v10329_v0 = vrot.slane %v10327_v18, 5  ;;  %v10585_v42 = vld [vmem:[#allocation5 + $0x8] sm:$0xe] }
 0x6de   : > { %v10324_v21 = vor.u32 %v10323_v59, %v10320_v56  ;;  %v10978_v58 = vunpack.c.l.b16 %v10797_v51  ;;  %v10611_v25 = vrot.slane %v17220_v40, 5  ;;  %v10615_v18 = vrot.slane %v17225_v39, 5 }
 0x6df   : > { %v10244_v23 = vsel %vm14588_vm13, %v10174_v16, %v10243_v1  ;;  %v10247_v60 = vsel %vm14643_vm9, %v10175_v19, %v10246_v29  ;;  %v10140_v12 = vpack.c.bf16 %v10132_v6, %v10132_v6  ;;  %v10771_v45 = vld [vmem:[#allocation5 + $0x18] sm:$0xe]  ;;  %v10586_v1 = vld [vmem:[#allocation5 + $0x10] sm:$0xe]  ;;  %v12488_v29 = vrot.slane %v10585_v42, 9 }
 0x6e0   : > { %v10276_v5 = vld [vmem:[#allocation5 + $0x18] sm:$0xf]  ;;  %10245 = vst [vmem:[#allocation5 + $0x20] sm:$0xf] %v10244_v23  ;;  %v17205_v62 = vld [vmem:[#allocation5 + $0x1c] sm:$0x1]  ;;  %v10068_v56 = vadd.f32 %v17136_v17, %v10039_v8 }
 0x6e1   : > { %v12497_v61 = vrot.slane %v10771_v45, 9  ;;  %v10332_v52 = vshrl.u32 %v10276_v5, 16  ;;  %10248 = vst [vmem:[#allocation5 + $0x24] sm:$0x1] %v10247_v60  ;;  %v10177_v46 = vshrl.u32 %v10140_v12, 16  ;;  %v10094_v48 = vpop.f32.mrf.mxu3  ;;  %v10800_v30 = vrot.slane %v17205_v62, 5 }
 0x6e2   : > { %v10180_v41 = vshll.u32 %v10140_v12, 16  ;;  %v10120_v13 = vpop.f32.mrf.mxu2  ;;  %v17215_v32 = vld [vmem:[#allocation5 + $0x1c] sm:$0x1]  ;;  %v10325_v34 = vrot.slane %v10324_v21, 4  ;;  %v10335_v33 = vshll.u32 %v10276_v5, 16  ;;  %v12489_v16 = vrot.slane %v10586_v1, 9 }
 0x6e3   : > { %v10334_v7 = vrot.slane %v10332_v52, 4  ;;  %v10179_v47 = vrot.slane %v10177_v46, 7  ;;  %v10121_v50 = vadd.f32 %v10120_v13, %v10092_v55  ;;  %v10801_v49 = vsel %vm13306_vm4, %v12497_v61, %v10800_v30  ;;  %v10255_v46 = vld [vmem:[#allocation5 + $0x30] sm:$0xf]  ;;  %v10258_v30 = vld [vmem:[#allocation5 + $0x34] sm:$0x1] }
 0x6e4   : > { %v10341_v14 = vshll.u32 %v17215_v32, 16  ;;  %v10979_v28 = vunpack.c.l.b16 %v10801_v49  ;;  %v10330_v35 = vsel %vm13361_vm7, %v10325_v34, %v10329_v0  ;;  %v10337_v43 = vrot.slane %v10335_v33, 5 }
 0x6e5   : > { %v10182_v9 = vor.u32 %v10180_v41, %v10179_v47  ;;  %v10183_v53 = vrot.slane %v10179_v47, 4  ;;  %v10133_v37 = vmax.f32 %v10121_v50, 0.0  ;;  %v10095_v59 = vadd.f32 %v10094_v48, %v10066_v57 }
 0x6e6   : > { %v10986_v27 = vpack.c.b16 %v10979_v28, %v10978_v58  ;;  %v10338_v22 = vor.u32 %v10337_v43, %v10334_v7  ;;  %v10343_v20 = vrot.slane %v10341_v14, 5  ;;  %v10848_v60 = vunpack.c.l.b16 %v10330_v35 }
 0x6e7   : > { %v10250_v11 = vsel %vm14588_vm13, %v10182_v9, %v10249_v44  ;;  %v10253_v2 = vsel %vm14643_vm9, %v10183_v53, %v10252_v36  ;;  %v10141_v24 = vpack.c.bf16 %v10133_v37, %v10133_v37  ;;  %v10772_v19 = vld [vmem:[#allocation5 + $0x20] sm:$0xe]  ;;  %v10612_v61 = vsel %vm13306_vm4, %v12488_v29, %v10611_v25  ;;  %v12907_v53 = vld [vmem:[%s17646_s7 + $0x38] sm:$0xff] }
 0x6e8   : > { %10251 = vst [vmem:[#allocation5 + $0x28] sm:$0xf] %v10250_v11  ;;  %12696 = vmatmul.msk.bf16.vlgmr.msra.gmra.mxu1 %vm6888_vm10, %v10986_v27  ;;  %v10339_v6 = vrot.slane %v10338_v22, 4  ;;  %v17234_v63 = vld [vmem:[#allocation5 + $0x24] sm:$0x1]  ;;  %v10616_v21 = vsel %vm13306_vm4, %v12489_v16, %v10615_v18  ;;  %v12498_v57 = vrot.slane %v10772_v19, 9  ;;  %v10918_v43 = vunpack.c.l.b16 %v10612_v61  ;;  %11358 = vmatpush.bf16.msrb.mxu3 %v12907_v53 }
 0x6e9   : > { %10254 = vst [vmem:[#allocation5 + $0x2c] sm:$0x1] %v10253_v2  ;;  %v10185_v23 = vshrl.u32 %v10141_v24, 16  ;;  %v10277_v12 = vld [vmem:[#allocation5 + $0x20] sm:$0xf]  ;;  %v10188_v45 = vshll.u32 %v10141_v24, 16  ;;  %v10096_v51 = vpop.f32.mrf.mxu3  ;;  %v10919_v0 = vunpack.c.l.b16 %v10616_v21 }
 0x6ea   : > { %v10123_v5 = vpop.f32.mrf.mxu2  ;;  %v10344_v55 = vsel %vm13361_vm7, %v10339_v6, %v10343_v20  ;;  %v17243_v48 = vld [vmem:[#allocation5 + $0x24] sm:$0x1]  ;;  %v10804_v41 = vrot.slane %v17234_v63, 5  ;;  %v10346_v44 = vshrl.u32 %v10277_v12, 16  ;;  %v10349_v13 = vshll.u32 %v10277_v12, 16 }
 0x6eb   : > { %v10187_v52 = vrot.slane %v10185_v23, 7  ;;  %v10124_v17 = vadd.f32 %v10123_v5, %v10095_v59  ;;  %v10849_v8 = vunpack.c.l.b16 %v10344_v55  ;;  %v10097_v36 = vadd.f32 %v10096_v51, %v10068_v56  ;;  %v10261_v55 = vld [vmem:[#allocation5 + $0x38] sm:$0xf]  ;;  %v10264_v61 = vld [vmem:[#allocation5 + $0x3c] sm:$0x1] }
 0x6ec   : > { %v10348_v50 = vrot.slane %v10346_v44, 4  ;;  %v10351_v49 = vrot.slane %v10349_v13, 5  ;;  %v10355_v14 = vshll.u32 %v17243_v48, 16  ;;  %v10805_v1 = vsel %vm13306_vm4, %v12498_v57, %v10804_v41  ;;  %v12526_v41 = vld [vmem:[#allocation5 + $0x18] sm:$0xf] }
 0x6ed   : > { %v10190_v34 = vor.u32 %v10188_v45, %v10187_v52  ;;  %v10191_v7 = vrot.slane %v10187_v52, 4  ;;  %v10134_v33 = vmax.f32 %v10124_v17, 0.0  ;;  %v10855_v47 = vpack.c.b16 %v10849_v8, %v10848_v60  ;;  %v12893_v44 = vld [vmem:[#allocation5 + $0x1c] sm:$0xf0] }
 0x6ee   : > { %v10352_v27 = vor.u32 %v10351_v49, %v10348_v50  ;;  %v10926_v29 = vpack.c.b16 %v10919_v0, %v10918_v43  ;;  %v10357_v18 = vrot.slane %v10355_v14, 5  ;;  %v10980_v21 = vunpack.c.l.b16 %v10805_v1  ;;  %v17275_v49 = vld [vmem:[#allocation5 + $0xc] sm:$0xf0]  ;;  %v17289_v1 = vld [vmem:[#allocation5 + $0x1c] sm:$0x1] }
 0x6ef   : > { %v10256_v58 = vsel %vm14588_vm13, %v10190_v34, %v10255_v46  ;;  %v10259_v28 = vsel %vm14643_vm9, %v10191_v7, %v10258_v30  ;;  %v10142_v35 = vpack.c.bf16 %v10134_v33, %v10134_v33  ;;  %10860 = vrot.lane.b32.xlu2 %v10855_v47, %s13190_s23  ;;  %v10773_v42 = vld [vmem:[#allocation5 + $0x28] sm:$0xe] }
 0x6f0   : > { %v10278_v9 = vld [vmem:[#allocation5 + $0x28] sm:$0xf]  ;;  %10257 = vst [vmem:[#allocation5 + $0x30] sm:$0xf] %v10256_v58  ;;  %v17255_v37 = vld [vmem:[#allocation5 + $0x2c] sm:$0x1] }
 0x6f1   : > { %v12499_v25 = vrot.slane %v10773_v42, 9  ;;  %v10360_v22 = vshrl.u32 %v10278_v9, 16  ;;  %10260 = vst [vmem:[#allocation5 + $0x34] sm:$0x1] %v10259_v28  ;;  %v10193_v20 = vshrl.u32 %v10142_v35, 16  ;;  %v10808_v11 = vrot.slane %v17255_v37, 5 }
 0x6f2   : > { %v10363_v2 = vshll.u32 %v10278_v9, 16  ;;  %v10196_v24 = vshll.u32 %v10142_v35, 16  ;;  %v10125_v16 = vpop.f32.mrf.mxu2  ;;  %v17260_v19 = vld [vmem:[#allocation5 + $0x2c] sm:$0x1]  ;;  %v10353_v6 = vrot.slane %v10352_v27, 4  ;;  %v17280_v58 = vld [vmem:[%s17646_s7 + $0xe0] sm:$0xff]  ;;  %v12527_v42 = vor.u32 %v12893_v44, %v12526_v41 }
 0x6f3   : > { %v10362_v56 = vrot.slane %v10360_v22, 4  ;;  %v10195_v59 = vrot.slane %v10193_v20, 7  ;;  %v10126_v23 = vadd.f32 %v10125_v16, %v10097_v36  ;;  %v10809_v60 = vsel %vm13306_vm4, %v12499_v25, %v10808_v11  ;;  %v17264_v45 = vld [vmem:[#allocation5 + $0x2c] sm:$0x1]  ;;  %v10589_v5 = vld [vmem:[#allocation5 + $0x28] sm:$0xe]  ;;  %11448 = vmatpush.bf16.msra.mxu0 %v17280_v58 }
 0x6f4   : > { %v10365_v12 = vrot.slane %v10363_v2, 5  ;;  %v10981_v52 = vunpack.c.l.b16 %v10809_v60  ;;  %v10358_v46 = vsel %vm13361_vm7, %v10353_v6, %v10357_v18  ;;  %v10369_v51 = vshll.u32 %v17260_v19, 16  ;;  %v17283_v28 = vld [vmem:[#allocation5 + $0x8] sm:$0xf]  ;;  %v17291_v25 = vld [vmem:[#allocation5 + $0x18] sm:$0xe] }
 0x6f5   : > { %v10198_v17 = vor.u32 %v10196_v24, %v10195_v59  ;;  %v10199_v8 = vrot.slane %v10195_v59, 4  ;;  %v10135_v57 = vmax.f32 %v10126_v23, 0.0  ;;  %v12492_v34 = vrot.slane %v10589_v5, 9  ;;  %v12906_v27 = vld [vmem:[%s17646_s7 + $0x30] sm:$0xff]  ;;  %v10267_v22 = vld [vmem:[#allocation5 + $0x40] sm:$0xf] }
 0x6f6   : > { %v10366_v30 = vor.u32 %v10365_v12, %v10362_v56  ;;  %v10987_v0 = vpack.c.b16 %v10981_v52, %v10980_v21  ;;  %v10371_v13 = vrot.slane %v10369_v51, 5  ;;  %v10627_v7 = vrot.slane %v17264_v45, 5  ;;  %v10270_v20 = vld [vmem:[#allocation5 + $0x44] sm:$0x1]  ;;  %11359 = vmatpush.bf16.msrb.mxu3 %v12906_v27  ;;  %v10588_v52 = vld [vmem:[#allocation5 + $0x20] sm:$0xe] }
 0x6f7   : > { %v10262_v33 = vsel %vm14588_vm13, %v10198_v17, %v10261_v55  ;;  %v10265_v47 = vsel %vm14643_vm9, %v10199_v8, %v10264_v61  ;;  %v10143_v36 = vpack.c.bf16 %v10135_v57, %v10135_v57  ;;  %10930 = vrot.lane.b32.xlu2 %v10926_v29, %s13190_s23  ;;  %v10774_v14 = vld [vmem:[#allocation5 + $0x30] sm:$0xe]  ;;  %v10850_v29 = vunpack.c.l.b16 %v10358_v46  ;;  %v17309_v57 = vld [vmem:[#allocation5 + $0x24] sm:$0x1] }
 0x6f8   : > { %v10367_v50 = vrot.slane %v10366_v30, 4  ;;  %10263 = vst [vmem:[#allocation5 + $0x38] sm:$0xf] %v10262_v33  ;;  %12697 = vmatmul.msk.bf16.gmra.mxu1 %vm6888_vm10, %v10987_v0  ;;  %v17285_v35 = vld [vmem:[#allocation5 + $0x34] sm:$0x1]  ;;  %v12500_v53 = vrot.slane %v10774_v14, 9  ;;  %v12523_v2 = vor.u32 %v17275_v49, %v17283_v28  ;;  %v17305_v18 = vsel %vm13306_vm4, %v12492_v34, %v10627_v7 }
 0x6f9   : > { %10266 = vst [vmem:[#allocation5 + $0x3c] sm:$0x1] %v10265_v47  ;;  %v10201_v43 = vshrl.u32 %v10143_v36, 16  ;;  %v10279_v24 = vld [vmem:[#allocation5 + $0x30] sm:$0xf]  ;;  %v10204_v59 = vshll.u32 %v10143_v36, 16 }
 0x6fa   : > { %v10372_v9 = vsel %vm13361_vm7, %v10367_v50, %v10371_v13  ;;  %v17299_v16 = vld [vmem:[#allocation5 + $0x34] sm:$0x1]  ;;  %v10374_v23 = vshrl.u32 %v10279_v24, 16  ;;  %v10377_v60 = vshll.u32 %v10279_v24, 16  ;;  %v10590_v12 = vld [vmem:[#allocation5 + $0x30] sm:$0xe] }
 0x6fb   : > { %v10851_v11 = vunpack.c.l.b16 %v10372_v9  ;;  %v17301_v6 = vld [vmem:[#allocation5 + $0x34] sm:$0x1]  ;;  %v10203_v56 = vrot.slane %v10201_v43, 7  ;;  %v10812_v55 = vrot.slane %v17285_v35, 5  ;;  %v10383_v61 = vshll.u32 %v17299_v16, 16 }
 0x6fc   : > { %v12493_v21 = vrot.slane %v10590_v12, 9  ;;  %v10376_v17 = vrot.slane %v10374_v23, 4  ;;  %v10379_v8 = vrot.slane %v10377_v60, 5  ;;  %v12530_v30 = vld [vmem:[#allocation5 + $0x28] sm:$0xf]  ;;  %v10631_v44 = vrot.slane %v17301_v6, 5 }
 0x6fd   : > { %v10856_v5 = vpack.c.b16 %v10851_v11, %v10850_v29  ;;  %v10206_v46 = vor.u32 %v10204_v59, %v10203_v56  ;;  %v10207_v51 = vrot.slane %v10203_v56, 4  ;;  %v12894_v0 = vld [vmem:[#allocation5 + $0x2c] sm:$0xf0]  ;;  %v10385_v41 = vrot.slane %v10383_v61, 5  ;;  %v17330_v24 = vld [vmem:[#allocation5 + $0x4c] sm:$0x1] }
 0x6fe   : > { %v12490_v13 = vrot.slane %v17291_v25, 9  ;;  %v10619_v34 = vrot.slane %v17289_v1, 5  ;;  %v10380_v50 = vor.u32 %v10379_v8, %v10376_v17  ;;  %v12491_v14 = vrot.slane %v10588_v52, 9  ;;  %v12905_v52 = vld [vmem:[%s17646_s7 + $0x28] sm:$0xff] }
 0x6ff   : > { %10862 = vrot.lane.b32.xlu0 %v10856_v5, %s13190_s23  ;;  %v10268_v7 = vsel %vm14588_vm13, %v10206_v46, %v10267_v22  ;;  %v10271_v33 = vsel %vm14643_vm9, %v10207_v51, %v10270_v20  ;;  %10900 = vrot.lane.b32.xlu2 %v12527_v42, %s13190_s23  ;;  %v10775_v47 = vld [vmem:[#allocation5 + $0x38] sm:$0xe]  ;;  %v10813_v9 = vsel %vm13306_vm4, %v12500_v53, %v10812_v55  ;;  %v10777_v22 = vld [vmem:[#allocation5 + $0x48] sm:$0xe]  ;;  %v10922_v11 = vunpack.c.l.b16 %v17305_v18  ;;  %v10642_v18 = vld [vmem:[#allocation5 + $0x10] sm:$0xf] }
 0x700   : > { %v10280_v36 = vld [vmem:[#allocation5 + $0x38] sm:$0xf]  ;;  %10269 = vst [vmem:[#allocation5 + $0x40] sm:$0xf] %v10268_v7  ;;  %v17320_v43 = vld [vmem:[#allocation5 + $0x3c] sm:$0x1]  ;;  %v10632_v15 = vsel %vm13306_vm4, %v12493_v21, %v10631_v44  ;;  %v12531_v54 = vor.u32 %v12894_v0, %v12530_v30  ;;  %v10982_v5 = vunpack.c.l.b16 %v10813_v9  ;;  %v10620_v61 = vsel %vm13306_vm4, %v12490_v13, %v10619_v34  ;;  %11360 = vmatpush.bf16.msrb.mxu3 %v12905_v52 }
 0x701   : > { %v12501_v25 = vrot.slane %v10775_v47, 9  ;;  %v10388_v27 = vshrl.u32 %v10280_v36, 16  ;;  %10272 = vst [vmem:[#allocation5 + $0x44] sm:$0x1] %v10271_v33  ;;  %v10816_v42 = vrot.slane %v17320_v43, 5  ;;  %v10381_v29 = vrot.slane %v10380_v50, 4 }
 0x702   : > { %v17327_v20 = vld [vmem:[#allocation5 + $0x3c] sm:$0x1]  ;;  %v10391_v59 = vshll.u32 %v10280_v36, 16  ;;  %v10623_v23 = vrot.slane %v17309_v57, 5  ;;  %v10923_v55 = vunpack.c.l.b16 %v10632_v15  ;;  %v10591_v21 = vld [vmem:[#allocation5 + $0x38] sm:$0xe]  ;;  %v10920_v50 = vunpack.c.l.b16 %v10620_v61 }
 0x703   : > { %v10390_v56 = vrot.slane %v10388_v27, 4  ;;  %v10397_v53 = vshll.u32 %v17327_v20, 16  ;;  %v17334_v60 = vld [vmem:[#allocation5 + $0x3c] sm:$0x1]  ;;  %v10817_v12 = vsel %vm13306_vm4, %v12501_v25, %v10816_v42  ;;  %v10386_v51 = vsel %vm13361_vm7, %v10381_v29, %v10385_v41  ;;  %v10643_v25 = vld [vmem:[#allocation5 + $0x18] sm:$0xf] }
 0x704   : > { %v10983_v46 = vunpack.c.l.b16 %v10817_v12  ;;  %v10393_v17 = vrot.slane %v10391_v59, 5  ;;  %v10635_v8 = vrot.slane %v17334_v60, 5  ;;  %v10624_v0 = vsel %vm13306_vm4, %v12491_v14, %v10623_v23  ;;  %v12534_v42 = vld [vmem:[#allocation5 + $0x38] sm:$0xf]  ;;  %v12904_v59 = vld [vmem:[%s17646_s7 + $0x20] sm:$0xff] }
 0x705   : > { %v10399_v30 = vrot.slane %v10397_v53, 5  ;;  %v12494_v44 = vrot.slane %v10591_v21, 9  ;;  %v12503_v7 = vrot.slane %v10777_v22, 9  ;;  %v10824_v33 = vrot.slane %v17330_v24, 5  ;;  %11361 = vmatpush.bf16.msrb.mxu3 %v12904_v59 }
 0x706   : > { %v10988_v13 = vpack.c.b16 %v10983_v46, %v10982_v5  ;;  %v10394_v34 = vor.u32 %v10393_v17, %v10390_v56  ;;  %v10659_v41 = vshrl.u32 %v10642_v18, 16  ;;  %v10928_v36 = vpack.c.b16 %v10923_v55, %v10922_v11 }
 0x707   : > { %10898 = vrot.lane.b32.xlu0 %v12523_v2, %s13190_s23  ;;  %10902 = vrot.lane.b32.xlu2 %v12531_v54, %s13190_s23  ;;  %v12895_v47 = vld [vmem:[#allocation5 + $0x3c] sm:$0xf0]  ;;  %v10852_v15 = vunpack.c.l.b16 %v10386_v51  ;;  %v10921_v22 = vunpack.c.l.b16 %v10624_v0  ;;  %v10636_v29 = vsel %vm13306_vm4, %v12494_v44, %v10635_v8  ;;  %v17367_v12 = vsel %vm13306_vm4, %v12503_v7, %v10824_v33 }
 0x708   : > { %v10592_v9 = vld [vmem:[#allocation5 + $0x40] sm:$0xe]  ;;  %12698 = vmatmul.msk.bf16.gmra.mxu1 %vm6888_vm10, %v10988_v13  ;;  %v10395_v27 = vrot.slane %v10394_v34, 4  ;;  %v17355_v49 = vld [vmem:[#allocation5 + $0x44] sm:$0x1]  ;;  %v12535_v23 = vor.u32 %v12895_v47, %v12534_v42  ;;  %v10662_v5 = vshll.u32 %v10642_v18, 16  ;;  %v10924_v44 = vunpack.c.l.b16 %v10636_v29 }
 0x709   : > { %v10776_v14 = vld [vmem:[#allocation5 + $0x40] sm:$0xe]  ;;  %v12495_v28 = vrot.slane %v10592_v9, 9  ;;  %v10656_v2 = vld [vmem:[#allocation5 + $0x44] sm:$0x1]  ;;  %v10639_v54 = vrot.slane %v17355_v49, 5  ;;  %v10927_v46 = vpack.c.b16 %v10921_v22, %v10920_v50  ;;  %v10985_v7 = vunpack.c.l.b16 %v17367_v12 }
 0x70a   : > { %v12502_v11 = vrot.slane %v10776_v14, 9  ;;  %v10820_v56 = vrot.slane %v10656_v2, 5  ;;  %v10400_v53 = vsel %vm13361_vm7, %v10395_v27, %v10399_v30  ;;  %v10661_v52 = vrot.slane %v10659_v41, 4  ;;  %v10648_v30 = vld [vmem:[#allocation5 + $0x40] sm:$0xf] }
 0x70b   : > { %v10853_v55 = vunpack.c.l.b16 %v10400_v53  ;;  %v10640_v61 = vsel %vm13306_vm4, %v12495_v28, %v10639_v54  ;;  %v10664_v51 = vrot.slane %v10662_v5, 5  ;;  %v10668_v17 = vshll.u32 %v17185_v38, 16  ;;  %v10649_v13 = vld [vmem:[#allocation5 + $0x48] sm:$0xf] }
 0x70c   : > { %v10821_v21 = vsel %vm13306_vm4, %v12502_v11, %v10820_v56  ;;  %v10673_v8 = vshrl.u32 %v10643_v25, 16  ;;  %v10676_v18 = vshll.u32 %v10643_v25, 16  ;;  %v10925_v34 = vunpack.c.l.b16 %v10640_v61  ;;  %v12903_v25 = vld [vmem:[%s17646_s7 + $0x18] sm:$0xff]  ;;  %v10644_v11 = vld [vmem:[#allocation5 + $0x20] sm:$0xf]  ;;  %v12902_v56 = vld [vmem:[%s17646_s7 + $0x10] sm:$0xff] }
 0x70d   : > { %v10857_v0 = vpack.c.b16 %v10853_v55, %v10852_v15  ;;  %v10984_v33 = vunpack.c.l.b16 %v10821_v21  ;;  %v10682_v41 = vshll.u32 %v17205_v62, 16  ;;  %v10665_v38 = vor.u32 %v10664_v51, %v10661_v52  ;;  %11362 = vmatpush.bf16.msrb.mxu3 %v12903_v25 }
 0x70e   : > { %v10675_v47 = vrot.slane %v10673_v8, 4  ;;  %v10678_v50 = vrot.slane %v10676_v18, 5  ;;  %v10743_v9 = vshrl.u32 %v10648_v30, 16  ;;  %v10746_v14 = vshll.u32 %v10648_v30, 16 }
 0x70f   : > { %10934 = vrot.lane.b32.xlu0 %v10928_v36, %s13190_s23  ;;  %10864 = vrot.lane.b32.xlu1 %v10857_v0, %s13190_s23  ;;  %v17385_v36 = vld [vmem:[%s17646_s7 + $0xd8] sm:$0xff]  ;;  %v10670_v27 = vrot.slane %v10668_v17, 5  ;;  %v10752_v15 = vshll.u32 %v10656_v2, 16  ;;  %v10757_v62 = vshrl.u32 %v10649_v13, 16  ;;  %v10760_v22 = vshll.u32 %v10649_v13, 16 }
 0x710   : > { %10904 = vrot.lane.b32.xlu2 %v12535_v23, %s13190_s23  ;;  %v10679_v28 = vor.u32 %v10678_v50, %v10675_v47  ;;  %v10745_v42 = vrot.slane %v10743_v9, 4  ;;  %v10748_v29 = vrot.slane %v10746_v14, 5  ;;  %v10766_v54 = vshll.u32 %v17330_v24, 16  ;;  %11449 = vmatpush.bf16.msra.mxu0 %v17385_v36  ;;  %v10645_v2 = vld [vmem:[#allocation5 + $0x28] sm:$0xf] }
 0x711   : > { %v10929_v59 = vpack.c.b16 %v10925_v34, %v10924_v44  ;;  %v10684_v53 = vrot.slane %v10682_v41, 5  ;;  %v10759_v23 = vrot.slane %v10757_v62, 4  ;;  %v10762_v12 = vrot.slane %v10760_v22, 5  ;;  %11363 = vmatpush.bf16.msrb.mxu3 %v12902_v56  ;;  %v12901_v44 = vld [vmem:[%s17646_s7 + $0x8] sm:$0xff] }
 0x712   : > { %v10666_v5 = vrot.slane %v10665_v38, 4  ;;  %v10680_v55 = vrot.slane %v10679_v28, 4  ;;  %v10749_v61 = vor.u32 %v10748_v29, %v10745_v42  ;;  %v10754_v21 = vrot.slane %v10752_v15, 5  ;;  %v10646_v38 = vld [vmem:[#allocation5 + $0x30] sm:$0xf] }
 0x713   : > { %v10763_v52 = vor.u32 %v10762_v12, %v10759_v23  ;;  %v10768_v51 = vrot.slane %v10766_v54, 5  ;;  %v10687_v24 = vshrl.u32 %v10644_v11, 16  ;;  %v10690_v17 = vshll.u32 %v10644_v11, 16  ;;  %v10647_v15 = vld [vmem:[#allocation5 + $0x38] sm:$0xf] }
 0x714   : > { %v10685_v8 = vsel %vm13361_vm7, %v10680_v55, %v10684_v53  ;;  %v10750_v30 = vrot.slane %v10749_v61, 4  ;;  %v10701_v0 = vshrl.u32 %v10645_v2, 16  ;;  %v10704_v18 = vshll.u32 %v10645_v2, 16 }
 0x715   : > { %v10989_v13 = vpack.c.b16 %v10985_v7, %v10984_v33  ;;  %v10764_v34 = vrot.slane %v10763_v52, 4  ;;  %v10689_v47 = vrot.slane %v10687_v24, 4  ;;  %v10692_v41 = vrot.slane %v10690_v17, 5  ;;  %11364 = vmatpush.bf16.msrb.mxu3 %v12901_v44 }
 0x716   : > { %v10671_v50 = vsel %vm13361_vm7, %v10666_v5, %v10670_v27  ;;  %v10755_v9 = vsel %vm13361_vm7, %v10750_v30, %v10754_v21  ;;  %v10703_v14 = vrot.slane %v10701_v0, 4  ;;  %v10706_v25 = vrot.slane %v10704_v18, 5 }
 0x717   : > { %10936 = vrot.lane.b32.xlu0 %v10929_v59, %s13190_s23  ;;  %10932 = vrot.lane.b32.xlu1 %v10927_v46, %s13190_s23  ;;  %v10959_v62 = vunpack.c.l.b16 %v10685_v8  ;;  %v10769_v7 = vsel %vm13361_vm7, %v10764_v34, %v10768_v51  ;;  %v10964_v33 = vunpack.c.l.b16 %v10755_v9  ;;  %v10693_v22 = vor.u32 %v10692_v41, %v10689_v47 }
 0x718   : > { %12699 = vmatmul.msk.bf16.gmra.mxu1 %vm6888_vm10, %v10989_v13  ;;  %v10965_v28 = vunpack.c.l.b16 %v10769_v7  ;;  %v10707_v42 = vor.u32 %v10706_v25, %v10703_v14  ;;  %v10710_v46 = vshll.u32 %v17255_v37, 16  ;;  %v10715_v29 = vshrl.u32 %v10646_v38, 16  ;;  %v12923_v25 = vld [vmem:[%s17646_s7 + $0xb8] sm:$0xff] }
 0x719   : > { %v10696_v27 = vshll.u32 %v17234_v63, 16  ;;  %v10718_v54 = vshll.u32 %v10646_v38, 16  ;;  %v10729_v11 = vshrl.u32 %v10647_v15, 16  ;;  %v10958_v56 = vunpack.c.l.b16 %v10671_v50  ;;  %v12915_v7 = vld [vmem:[%s17646_s7 + $0x78] sm:$0xff] }
 0x71a   : > { %v10694_v59 = vrot.slane %v10693_v22, 4  ;;  %v10708_v53 = vrot.slane %v10707_v42, 4  ;;  %v10969_v23 = vpack.c.b16 %v10965_v28, %v10964_v33  ;;  %v10712_v12 = vrot.slane %v10710_v46, 5  ;;  %11387 = vmatpush.bf16.msrb.mxu2 %v12915_v7  ;;  %v12914_v33 = vld [vmem:[%s17646_s7 + $0x70] sm:$0xff]  ;;  %v12921_v22 = vld [vmem:[%s17646_s7 + $0xa8] sm:$0xff]  ;;  %v12912_v42 = vld [vmem:[%s17646_s7 + $0x60] sm:$0xff] }
 0x71b   : > { %v10717_v2 = vrot.slane %v10715_v29, 4  ;;  %v10720_v5 = vrot.slane %v10718_v54, 5  ;;  %v10966_v55 = vpack.c.b16 %v10959_v62, %v10958_v56  ;;  %v10731_v61 = vrot.slane %v10729_v11, 4  ;;  %v12922_v62 = vld [vmem:[%s17646_s7 + $0xb0] sm:$0xff]  ;;  %v12913_v28 = vld [vmem:[%s17646_s7 + $0x68] sm:$0xff]  ;;  %v12920_v46 = vld [vmem:[%s17646_s7 + $0xa0] sm:$0xff] }
 0x71c   : > { %v10732_v21 = vshll.u32 %v10647_v15, 16  ;;  %v10698_v52 = vrot.slane %v10696_v27, 5  ;;  %v10713_v37 = vsel %vm13361_vm7, %v10708_v53, %v10712_v12  ;;  %v10738_v17 = vshll.u32 %v17320_v43, 16  ;;  %v12900_v43 = vld [vmem:[%s17646_s7] sm:$0xff]  ;;  %v17431_v15 = vld [vmem:[%s17646_s7 + $0xd0] sm:$0xff]  ;;  %v12911_v29 = vld [vmem:[%s17646_s7 + $0x58] sm:$0xff] }
 0x71d   : > { %v10721_v24 = vor.u32 %v10720_v5, %v10717_v2  ;;  %v10961_v8 = vunpack.c.l.b16 %v10713_v37  ;;  %v10724_v0 = vshll.u32 %v17285_v35, 16  ;;  %11365 = vmatpush.bf16.msrb.mxu3 %v12900_v43  ;;  %11450 = vmatpush.bf16.msra.mxu0 %v17431_v15  ;;  %v12506_v27 = vld [vmem:[#allocation5] sm:$0xf]  ;;  %v12888_v54 = vld [vmem:[#allocation5 + $0x4] sm:$0xf0]  ;;  %v12910_v11 = vld [vmem:[%s17646_s7 + $0x50] sm:$0xff] }
 0x71e   : > { %v10734_v63 = vrot.slane %v10732_v21, 5  ;;  %v10699_v51 = vsel %vm13361_vm7, %v10694_v59, %v10698_v52  ;;  %v10740_v34 = vrot.slane %v10738_v17, 5  ;;  %11388 = vmatpush.bf16.msrb.mxu2 %v12914_v33  ;;  %v12507_v56 = vor.u32 %v12888_v54, %v12506_v27  ;;  %v12909_v12 = vld [vmem:[%s17646_s7 + $0x48] sm:$0xff]  ;;  %v12908_v2 = vld [vmem:[%s17646_s7 + $0x40] sm:$0xff]  ;;  %v12510_v52 = vld [vmem:[#allocation5 + $0x10] sm:$0xf] }
 0x71f   : > { %10976 = vrot.lane.b32.xlu0 %v10969_v23, %s13190_s23  ;;  %10970 = vrot.lane.b32.xlu1 %v10966_v55, %s13190_s23  ;;  %v10960_v18 = vunpack.c.l.b16 %v10699_v51  ;;  %v10722_v13 = vrot.slane %v10721_v24, 4  ;;  %v10726_v41 = vrot.slane %v10724_v0, 5  ;;  %v12919_v23 = vld [vmem:[%s17646_s7 + $0x98] sm:$0xff]  ;;  %v17474_v5 = vld [vmem:[%s17646_s7 + $0xc8] sm:$0xff]  ;;  %v10401_v24 = vld [vmem:[#allocation5] sm:$0xe] }
 0x720   : > { %v10735_v30 = vor.u32 %v10734_v63, %v10731_v61  ;;  %v12918_v55 = vld [vmem:[%s17646_s7 + $0x90] sm:$0xff]  ;;  %v12889_v61 = vld [vmem:[#allocation5 + $0x14] sm:$0xf0]  ;;  %v12917_v51 = vld [vmem:[%s17646_s7 + $0x88] sm:$0xff]  ;;  %v12480_v0 = vrot.slane %v10401_v24, 9 }
 0x721   : > { %v10967_v47 = vpack.c.b16 %v10961_v8, %v10960_v18  ;;  %v10727_v50 = vsel %vm13361_vm7, %v10722_v13, %v10726_v41  ;;  %11416 = vmatpush.bf16.msra.mxu3 %v12923_v25  ;;  %11451 = vmatpush.bf16.msra.mxu0 %v17474_v5  ;;  %v12511_v37 = vor.u32 %v12889_v61, %v12510_v52  ;;  %v10402_v17 = vld [vmem:[#allocation5 + $0x8] sm:$0xe]  ;;  %v12916_v8 = vld [vmem:[%s17646_s7 + $0x80] sm:$0xff]  ;;  %v13115_v41 = vld [vmem:[%s17646_s7 + $0xf8] sm:$0xff]  ;;  %v10435_v52 = vrot.slane %v17192_v4, 5 }
 0x722   : > { %v10736_v44 = vrot.slane %v10735_v30, 4  ;;  %v10962_v35 = vunpack.c.l.b16 %v10727_v50  ;;  %11389 = vmatpush.bf16.msrb.mxu2 %v12913_v28  ;;  %v12890_v30 = vld [vmem:[#allocation5 + $0x24] sm:$0xf0]  ;;  %v13114_v18 = vld [vmem:[#allocation5 + $0x4] sm:$0x1]  ;;  %v12481_v13 = vrot.slane %v10402_v17, 9 }
 0x723   : > { %v10458_v7 = vld [vmem:[#allocation5 + $0x10] sm:$0xf]  ;;  %v10457_v33 = vld [vmem:[#allocation5 + $0x8] sm:$0xf]  ;;  %v10404_v27 = vld [vmem:[#allocation5 + $0x18] sm:$0xe] }
 0x724   : > { %v10741_v38 = vsel %vm13361_vm7, %v10736_v44, %v10740_v34  ;;  %v10427_v44 = vrot.slane %v13114_v18, 5  ;;  %v10431_v34 = vrot.slane %v17165_v31, 5  ;;  %v10474_v54 = vshrl.u32 %v10457_v33, 16 }
 0x725   : > { %v10963_v9 = vunpack.c.l.b16 %v10741_v38  ;;  %11417 = vmatpush.bf16.msra.mxu3 %v12922_v62  ;;  %v12514_v38 = vld [vmem:[#allocation5 + $0x20] sm:$0xf]  ;;  %v10483_v4 = vshll.u32 %v17220_v40, 16 }
 0x726   : > { %11390 = vmatpush.bf16.msrb.mxu2 %v12912_v42  ;;  %v12515_v50 = vor.u32 %v12890_v30, %v12514_v38  ;;  %v10428_v43 = vsel %vm13306_vm4, %v12480_v0, %v10427_v44  ;;  %v10432_v31 = vsel %vm13306_vm4, %v12481_v13, %v10431_v34  ;;  %v10488_v42 = vshrl.u32 %v10458_v7, 16  ;;  %v10460_v34 = vld [vmem:[#allocation5 + $0x20] sm:$0xf] }
 0x727   : > { %10972 = vrot.lane.b32.xlu1 %v10967_v47, %s13190_s23  ;;  %v10968_v14 = vpack.c.b16 %v10963_v9, %v10962_v35  ;;  %v17491_v47 = vld [vmem:[%s17646_s7 + $0xc0] sm:$0xff]  ;;  %v10866_v25 = vunpack.c.l.b16 %v10428_v43  ;;  %v10867_v62 = vunpack.c.l.b16 %v10432_v31  ;;  %v10485_v38 = vrot.slane %v10483_v4, 5 }
 0x728   : > { %11452 = vmatpush.bf16.msra.mxu0 %v17491_v47  ;;  %v10516_v40 = vshrl.u32 %v10460_v34, 16 }
 0x729   : > { %11418 = vmatpush.bf16.msra.mxu3 %v12921_v22  ;;  %v10874_v22 = vpack.c.b16 %v10867_v62, %v10866_v25  ;;  %v10447_v62 = vrot.slane %v17260_v19, 5 }
 0x72a   : > { %11391 = vmatpush.bf16.msrb.mxu2 %v12911_v29 }
 0x72d   : > { %11419 = vmatpush.bf16.msra.mxu3 %v12920_v46  ;;  %v10491_v46 = vshll.u32 %v10458_v7, 16 }
 0x72e   : > { %11392 = vmatpush.bf16.msrb.mxu2 %v12910_v11  ;;  %v10477_v11 = vshll.u32 %v10457_v33, 16 }
 0x72f   : > { %10974 = vrot.lane.b32.xlu1 %v10968_v14, %s13190_s23  ;;  %v13116_v14 = vld [vmem:[%s17646_s7 + $0xf0] sm:$0xff]  ;;  %s11526_s23 = sshll.u32 %s11523_s16, 4  ;;  %s11527_s23 = int_to_ptr.hbm [resolvable:$true] %s11526_s23 }
 0x730   : > { %v10479_v61 = vrot.slane %v10477_v11, 5  ;;  %v12538_v11 = vld [vmem:[#allocation5 + $0x10] sm:$0xf]  ;;  %s13131_s24 = sshra.s32 %s11527_s23, 4  ;;  %s13132_s24 = int_to_ptr.hbm [resolvable:$true] %s13131_s24 }
 0x731   : > { %11420 = vmatpush.bf16.msra.mxu3 %v12919_v23  ;;  %v10490_v23 = vrot.slane %v10488_v42, 4  ;;  %s13133_s28 = scalar_lea.hbm %s13132_s24, 64  ;;  %p13138_p0 = scmp.lt.s32.totalorder %s13132_s24, %s17648_s9 }
 0x732   : > { %11393 = vmatpush.bf16.msrb.mxu2 %v12909_v12  ;;  %v10493_v12 = vrot.slane %v10491_v46, 5  ;;  %v10443_v46 = vrot.slane %v17243_v48, 5  ;;  %p13134_p11 = scmp.ne.s32.totalorder %s13132_s24, %s13133_s28  ;;  %p13139_p1 = scmp.lt.s32.totalorder %s13137_s17, %s13133_s28 }
 0x734   : > { %p13135_p12 = pnand %p13134_p11, %p13280_p5  ;;  %p13140_p2 = por %p13139_p1, %p13138_p0 }
 0x735   : > { %11421 = vmatpush.bf16.msra.mxu3 %v12918_v55  ;;  %v10476_v55 = vrot.slane %v10474_v54, 4 }
 0x736   : > { %11394 = vmatpush.bf16.msrb.mxu2 %v12908_v2  ;;  %v12891_v2 = vld [vmem:[#allocation5 + $0x34] sm:$0xf0]  ;;  %p13136_p13 = pneg %p13135_p12 }
 0x738   : > { %p13141_p3 = pnand %p13140_p2, %p13136_p13 }
 0x739   : > { %11422 = vmatpush.bf16.msra.mxu3 %v12917_v51  ;;  %v10494_v51 = vor.u32 %v10493_v12, %v10490_v23 }
 0x73b   : > { %v10495_v0 = vrot.slane %v10494_v51, 4 }
 0x73d   : > { %11423 = vmatpush.bf16.msra.mxu3 %v12916_v8  ;;  %v10497_v8 = vshll.u32 %v17225_v39, 16 }
 0x749   : > { %v10861_v21 = vpop.permute.xlu2 %10860 }
 0x74a   : > { %v10996_v63 = vsel %vm6888_vm10, %v12511_v37, %v10861_v21 }
 0x74f   : > { %v10859_v59 = vpop.permute.xlu1 %10858 }
 0x750   : > { %v10992_v53 = vsel %vm6888_vm10, %v12507_v56, %v10859_v59  ;;  %v10403_v56 = vld [vmem:[#allocation5 + $0x10] sm:$0xe] }
 0x751   : > { %11366 = vmatmul.bf16.vlgmr.msrb.gmra.mxu3 %v10992_v53  ;;  %v17508_v59 = vpop.permute.xlu2 %10930  ;;  %v12483_v53 = vrot.slane %v10404_v27, 9  ;;  %v12482_v21 = vrot.slane %v10403_v56, 9 }
 0x752   : > { %12945 = vmatpush.bf16.msrb.mxu3 %v13115_v41 }
 0x756   : > { %12946 = vmatpush.bf16.msrb.mxu3 %v13116_v14  ;;  %v10405_v14 = vld [vmem:[#allocation5 + $0x20] sm:$0xe] }
 0x757   : > { %v12484_v42 = vrot.slane %v10405_v14, 9  ;;  %v12542_v14 = vld [vmem:[#allocation5 + $0x20] sm:$0xf] }
 0x759   : > { %v10901_v13 = vpop.permute.xlu2 %10900  ;;  %v10444_v19 = vsel %vm13306_vm4, %v12484_v42, %v10443_v46 }
 0x75a   : > { %12947 = vmatpush.bf16.msrb.mxu3 %v17213_v10  ;;  %v10439_v10 = vrot.slane %v17215_v32, 5  ;;  %v10480_v32 = vor.u32 %v10479_v61, %v10476_v55 }
 0x75c   : > { %v10481_v44 = vrot.slane %v10480_v32, 4  ;;  %v10462_v32 = vld [vmem:[#allocation5 + $0x30] sm:$0xf] }
 0x75e   : > { %12948 = vmatpush.bf16.msrb.mxu3 %v17280_v58  ;;  %v12518_v58 = vld [vmem:[#allocation5 + $0x30] sm:$0xf] }
 0x75f   : > { %v12519_v37 = vor.u32 %v12891_v2, %v12518_v58  ;;  %v10870_v58 = vunpack.c.l.b16 %v10444_v19  ;;  %v10463_v19 = vld [vmem:[#allocation5 + $0x38] sm:$0xf] }
 0x761   : > { %11371 = vmatmul.bf16.gmra.mxu3 %v10996_v63  ;;  %v10440_v63 = vsel %vm13306_vm4, %v12483_v53, %v10439_v10 }
 0x762   : > { %12949 = vmatpush.bf16.msrb.mxu3 %v17385_v36  ;;  %v10436_v36 = vsel %vm13306_vm4, %v12482_v21, %v10435_v52  ;;  %v10869_v30 = vunpack.c.l.b16 %v10440_v63  ;;  %v10525_v52 = vshll.u32 %v17309_v57, 16  ;;  %v10511_v63 = vshll.u32 %v17289_v1, 16  ;;  %v10407_v1 = vld [vmem:[#allocation5 + $0x30] sm:$0xe] }
 0x763   : > { %v10868_v18 = vunpack.c.l.b16 %v10436_v36 }
 0x764   : > { %v10527_v36 = vrot.slane %v10525_v52, 5  ;;  %v12898_v52 = vld [vmem:[#allocation5 + $0x34] sm:$0xf0] }
 0x765   : > { %v10875_v41 = vpack.c.b16 %v10869_v30, %v10868_v18  ;;  %v10513_v30 = vrot.slane %v10511_v63, 5  ;;  %v10544_v18 = vshrl.u32 %v10462_v32, 16 }
 0x766   : > { %12950 = vmatpush.bf16.msrb.mxu3 %v17431_v15  ;;  %v10499_v15 = vrot.slane %v10497_v8, 5 }
 0x767   : > { %v11012_v31 = vsel %vm6888_vm10, %v10875_v41, %v10901_v13 }
 0x768   : > { %v10500_v43 = vsel %vm13361_vm7, %v10495_v0, %v10499_v15  ;;  %v10408_v0 = vld [vmem:[#allocation5 + $0x38] sm:$0xe] }
 0x769   : > { %v12487_v41 = vrot.slane %v10408_v0, 9 }
 0x76a   : > { %12951 = vmatpush.bf16.msrb.mxu3 %v17474_v5  ;;  %v10486_v5 = vsel %vm13361_vm7, %v10481_v44, %v10485_v38  ;;  %v10547_v44 = vshll.u32 %v10462_v32, 16  ;;  %v10455_v38 = vrot.slane %v17327_v20, 5  ;;  %v12546_v32 = vld [vmem:[#allocation5 + $0x30] sm:$0xf] }
 0x76b   : > { %v10906_v54 = vunpack.c.l.b16 %v10486_v5 }
 0x76e   : > { %12952 = vmatpush.bf16.msrb.mxu3 %v17491_v47 }
 0x771   : > { %v10863_v9 = vpop.permute.xlu0 %10862 }
 0x772   : > { %v11000_v35 = vsel %vm6888_vm10, %v12515_v50, %v10863_v9  ;;  %v10406_v50 = vld [vmem:[#allocation5 + $0x28] sm:$0xe]  ;;  %v10459_v9 = vld [vmem:[#allocation5 + $0x18] sm:$0xf] }
 0x773   : > { %11376 = vmatmul.bf16.gmra.mxu3 %v11000_v35  ;;  %v10519_v35 = vshll.u32 %v10460_v34, 16  ;;  %v12485_v25 = vrot.slane %v10406_v50, 9  ;;  %v10502_v7 = vshrl.u32 %v10459_v9, 16  ;;  %v10505_v33 = vshll.u32 %v10459_v9, 16  ;;  %v12897_v50 = vld [vmem:[#allocation5 + $0x24] sm:$0xf0] }
 0x774   : > { %v10546_v9 = vrot.slane %v10544_v18, 4 }
 0x775   : > { %v10521_v27 = vrot.slane %v10519_v35, 5  ;;  %v10448_v47 = vsel %vm13306_vm4, %v12485_v25, %v10447_v62  ;;  %v10504_v56 = vrot.slane %v10502_v7, 4  ;;  %v10507_v53 = vrot.slane %v10505_v33, 5 }
 0x776   : > { %v10871_v61 = vunpack.c.l.b16 %v10448_v47  ;;  %v10451_v35 = vrot.slane %v17299_v16, 5  ;;  %v12543_v33 = vor.u32 %v12897_v50, %v12542_v14 }
 0x777   : > { %v10508_v21 = vor.u32 %v10507_v53, %v10504_v56  ;;  %v10464_v53 = vld [vmem:[#allocation5 + $0x40] sm:$0xf] }
 0x779   : > { %v10899_v28 = vpop.permute.xlu0 %10898 }
 0x77a   : > { %v11008_v29 = vsel %vm6888_vm10, %v10874_v22, %v10899_v28  ;;  %v10907_v22 = vunpack.c.l.b16 %v10500_v43  ;;  %v12896_v28 = vld [vmem:[#allocation5 + $0x14] sm:$0xf0]  ;;  %v10549_v43 = vrot.slane %v10547_v44, 5  ;;  %v10581_v44 = vshll.u32 %v17355_v49, 16  ;;  %v12550_v49 = vld [vmem:[#allocation5 + $0x40] sm:$0xf] }
 0x77b   : > { %11395 = vmatmul.bf16.vlgmr.msrb.gmra.mxu2 %v11008_v29  ;;  %v10518_v29 = vrot.slane %v10516_v40, 4  ;;  %v12539_v23 = vor.u32 %v12896_v28, %v12538_v11  ;;  %v12486_v40 = vrot.slane %v10407_v1, 9 }
 0x77c   : > { %v10914_v10 = vpack.c.b16 %v10907_v22, %v10906_v54  ;;  %v10456_v22 = vsel %vm13306_vm4, %v12487_v41, %v10455_v38  ;;  %v10550_v28 = vor.u32 %v10549_v43, %v10546_v9  ;;  %v10539_v54 = vshll.u32 %v17264_v45, 16 }
 0x77d   : > { %v10522_v2 = vor.u32 %v10521_v27, %v10518_v29  ;;  %v10452_v46 = vsel %vm13306_vm4, %v12486_v40, %v10451_v35  ;;  %v10873_v16 = vunpack.c.l.b16 %v10456_v22  ;;  %v10553_v27 = vshll.u32 %v17301_v6, 16  ;;  %v12899_v35 = vld [vmem:[#allocation5 + $0x44] sm:$0xf0] }
 0x77e   : > { %v11024_v55 = vsel %vm6888_vm10, %v10914_v10, %v17508_v59  ;;  %v10461_v59 = vld [vmem:[#allocation5 + $0x28] sm:$0xf]  ;;  %v10872_v11 = vunpack.c.l.b16 %v10452_v46  ;;  %v10551_v47 = vrot.slane %v10550_v28, 4  ;;  %v10558_v6 = vshrl.u32 %v10463_v19, 16 }
 0x77f   : > { %v10523_v51 = vrot.slane %v10522_v2, 4  ;;  %v10530_v13 = vshrl.u32 %v10461_v59, 16  ;;  %v10533_v34 = vshll.u32 %v10461_v59, 16  ;;  %v12547_v59 = vor.u32 %v12898_v52, %v12546_v32 }
 0x780   : > { %v10877_v10 = vpack.c.b16 %v10873_v16, %v10872_v11 }
 0x781   : > { %v10865_v24 = vpop.permute.xlu1 %10864  ;;  %v10528_v4 = vsel %vm13361_vm7, %v10523_v51, %v10527_v36  ;;  %v10532_v25 = vrot.slane %v10530_v13, 4  ;;  %v10535_v62 = vrot.slane %v10533_v34, 5  ;;  %v10935_v51 = vpop.permute.xlu0 %10934  ;;  %v10583_v34 = vrot.slane %v10581_v44, 5 }
 0x782   : > { %v11004_v17 = vsel %vm6888_vm10, %v12519_v37, %v10865_v24  ;;  %v10903_v37 = vpop.permute.xlu2 %10902  ;;  %v10876_v24 = vpack.c.b16 %v10871_v61, %v10870_v58  ;;  %v10909_v15 = vunpack.c.l.b16 %v10528_v4  ;;  %v10561_v61 = vshll.u32 %v10463_v19, 16 }
 0x783   : > { %11381 = vmatmul.bf16.gmra.mxu3 %v11004_v17  ;;  %v10509_v17 = vrot.slane %v10508_v21, 4  ;;  %v10536_v29 = vor.u32 %v10535_v62, %v10532_v25 }
 0x784   : > { %v11016_v8 = vsel %vm6888_vm10, %v10876_v24, %v10903_v37  ;;  %v10563_v36 = vrot.slane %v10561_v61, 5 }
 0x785   : > { %v10514_v57 = vsel %vm13361_vm7, %v10509_v17, %v10513_v30  ;;  %v10560_v17 = vrot.slane %v10558_v6, 4 }
 0x787   : > { %v10564_v18 = vor.u32 %v10563_v36, %v10560_v17 }
 0x789   : > { %v17524_v39 = vpop.permute.xlu1 %10932  ;;  %v10565_v13 = vrot.slane %v10564_v18, 4  ;;  %v10937_v43 = vpop.permute.xlu0 %10936 }
 0x78a   : > { %v10905_v56 = vpop.permute.xlu2 %10904 }
 0x78b   : > { %11400 = vmatmul.bf16.gmra.mxu2 %v11012_v31  ;;  %v10908_v31 = vunpack.c.l.b16 %v10514_v57  ;;  %v11020_v3 = vsel %vm6888_vm10, %v10877_v10, %v10905_v56  ;;  %v10567_v57 = vshll.u32 %v17334_v60, 16 }
 0x78d   : > { %v10915_v7 = vpack.c.b16 %v10909_v15, %v10908_v31  ;;  %v10569_v15 = vrot.slane %v10567_v57, 5 }
 0x78f   : > { %v11028_v20 = vsel %vm6888_vm10, %v10915_v7, %v17524_v39  ;;  %v10555_v39 = vrot.slane %v10553_v27, 5  ;;  %v10570_v38 = vsel %vm13361_vm7, %v10565_v13, %v10569_v15 }
 0x790   : > { %v10912_v9 = vunpack.c.l.b16 %v10570_v38 }
 0x791   : > { %v10971_v12 = vpop.permute.xlu1 %10970  ;;  %v10556_v2 = vsel %vm13361_vm7, %v10551_v47, %v10555_v39  ;;  %v10977_v60 = vpop.permute.xlu0 %10976 }
 0x792   : > { %v11040_v48 = vsel %vm6888_vm10, %v12539_v23, %v10971_v12  ;;  %v10537_v23 = vrot.slane %v10536_v29, 4  ;;  %v10541_v12 = vrot.slane %v10539_v54, 5  ;;  %v10911_v21 = vunpack.c.l.b16 %v10556_v2  ;;  %v11483_v29 = vpop.f32.mrf.mxu1 }
 0x793   : > { %11424 = vmatmul.bf16.vlgmr.msra.gmra.mxu3 %v11024_v55  ;;  %11453 = vmatmul.bf16.vlgmr.msra.gmra.mxu0 %v11040_v48  ;;  %v10572_v55 = vshrl.u32 %v10464_v53, 16  ;;  %v10575_v48 = vshll.u32 %v10464_v53, 16 }
 0x794   : > { %v10542_v45 = vsel %vm13361_vm7, %v10537_v23, %v10541_v12 }
 0x795   : > { %v10574_v58 = vrot.slane %v10572_v55, 4  ;;  %v10577_v37 = vrot.slane %v10575_v48, 5  ;;  %v10910_v63 = vunpack.c.l.b16 %v10542_v45 }
 0x797   : > { %v10578_v30 = vor.u32 %v10577_v37, %v10574_v58 }
 0x799   : > { %v10973_v5 = vpop.permute.xlu1 %10972  ;;  %v10579_v1 = vrot.slane %v10578_v30, 4 }
 0x79a   : > { %v11044_v42 = vsel %vm6888_vm10, %v12543_v33, %v10973_v5  ;;  %v12551_v5 = vor.u32 %v12899_v35, %v12550_v49  ;;  %v11485_v39 = vpop.f32.mrf.mxu1 }
 0x79b   : > { %11405 = vmatmul.bf16.gmra.mxu2 %v11016_v8  ;;  %v10916_v8 = vpack.c.b16 %v10911_v21, %v10910_v63  ;;  %v10584_v41 = vsel %vm13361_vm7, %v10579_v1, %v10583_v34 }
 0x79c   : > { %v10913_v50 = vunpack.c.l.b16 %v10584_v41  ;;  %v11052_v14 = vsel %vm6888_vm10, %v12551_v5, %v10977_v60 }
 0x79d   : > { %v11032_v4 = vsel %vm6888_vm10, %v10916_v8, %v10935_v51 }
 0x79e   : > { %v10917_v31 = vpack.c.b16 %v10913_v50, %v10912_v9 }
 0x7a0   : > { %v11036_v40 = vsel %vm6888_vm10, %v10917_v31, %v10937_v43 }
 0x7a1   : > { %v10975_v24 = vpop.permute.xlu1 %10974 }
 0x7a2   : > { %v11048_v0 = vsel %vm6888_vm10, %v12547_v59, %v10975_v24  ;;  %v11488_v52 = vpop.f32.mrf.mxu1 }
 0x7a3   : > { %11429 = vmatmul.bf16.gmra.mxu3 %v11028_v20  ;;  %11458 = vmatmul.bf16.gmra.mxu0 %v11044_v42  ;;  %v17577_v42 = vld [vmem:[%s17647_s8] ss:$0 sm:$0xff] }
 0x7aa   : > { %v11490_v59 = vpop.f32.mrf.mxu1 }
 0x7ab   : > { %11410 = vmatmul.bf16.gmra.mxu2 %v11020_v3 }
 0x7b2   : > { %v11493_v41 = vpop.f32.mrf.mxu1 }
 0x7b3   : > { %11434 = vmatmul.bf16.gmra.mxu3 %v11032_v4  ;;  %11463 = vmatmul.bf16.gmra.mxu0 %v11048_v0 }
 0x7ba   : > { %v11495_v5 = vpop.f32.mrf.mxu1 }
 0x7c3   : > { %11439 = vmatmul.bf16.gmra.mxu3 %v11036_v40 }
 0x7d3   : > { %11468 = vmatmul.bf16.vlgmr.msrb.gmra.mxu3 %v11052_v14 }
 0x7d4   : > { %v11367_v25 = vpop.f32.mrf.mxu3 }
 0x7d5   : > { %v11368_v11 = vadd.f32 %v17577_v42, %v11367_v25 }
 0x7dc   : > { %v11369_v62 = vpop.f32.mrf.mxu3 }
 0x7dd   : > { %v11370_v12 = vadd.f32 %v17577_v42, %v11369_v62 }
 0x7e4   : > { %v11372_v7 = vpop.f32.mrf.mxu3 }
 0x7e5   : > { %v11373_v61 = vadd.f32 %v17577_v42, %v11372_v7 }
 0x7ec   : > { %v11374_v26 = vpop.f32.mrf.mxu3 }
 0x7ed   : > { %v11375_v32 = vadd.f32 %v17577_v42, %v11374_v26 }
 0x7f6   : > { %v11377_v33 = vpop.f32.mrf.mxu3 }
 0x7f7   : > { %v11378_v44 = vadd.f32 %v17577_v42, %v11377_v33 }
 0x7fe   : > { %v11379_v22 = vpop.f32.mrf.mxu3  ;;  %v11396_v20 = vpop.f32.mrf.mxu2 }
 0x7ff   : > { %v11397_v47 = vadd.f32 %v11396_v20, %v11368_v11  ;;  %v11380_v9 = vadd.f32 %v17577_v42, %v11379_v22  ;;  %v11498_v20 = vpop.f32.mrf.mxu1 }
 0x806   : > { %v17572_v28 = vpop.f32.mrf.mxu3  ;;  %v11398_v54 = vpop.f32.mrf.mxu2 }
 0x807   : > { %v11399_v2 = vadd.f32 %v11398_v54, %v11370_v12  ;;  %v11383_v26 = vadd.f32 %v17577_v42, %v17572_v28 }
 0x80e   : > { %v11384_v46 = vpop.f32.mrf.mxu3  ;;  %v11401_v3 = vpop.f32.mrf.mxu2 }
 0x80f   : > { %v17580_v16 = vadd.f32 %v17577_v42, %v11384_v46  ;;  %v11402_v58 = vadd.f32 %v11401_v3, %v11373_v61 }
 0x810   : > { %v11454_v27 = vpop.f32.mrf.mxu0 }
 0x816   : > { %v11425_v56 = vpop.f32.mrf.mxu3  ;;  %v11403_v37 = vpop.f32.mrf.mxu2 }
 0x817   : > { %v11426_v53 = vadd.f32 %v11425_v56, %v11397_v47  ;;  %v11404_v8 = vadd.f32 %v11403_v37, %v11375_v32  ;;  %v11500_v56 = vpop.f32.mrf.mxu1 }
 0x818   : > { %v11456_v10 = vpop.f32.mrf.mxu0 }
 0x819   : > { %v11455_v23 = vadd.f32 %v11454_v27, %v11426_v53 }
 0x81b   : > { %v11484_v19 = vadd.f32 %v11483_v29, %v11455_v23 }
 0x81d   : > { %11503 = vst [vmem:[%s17587_s25] sm:$0xff] %v11484_v19 }
 0x81e   : > { %v11427_v55 = vpop.f32.mrf.mxu3  ;;  %v11406_v0 = vpop.f32.mrf.mxu2 }
 0x81f   : > { %v11428_v48 = vadd.f32 %v11427_v55, %v11399_v2  ;;  %v11407_v1 = vadd.f32 %v11406_v0, %v11378_v44 }
 0x820   : > { %v11459_v6 = vpop.f32.mrf.mxu0 }
 0x821   : > { %v11457_v45 = vadd.f32 %v11456_v10, %v11428_v48 }
 0x823   : > { %v11486_v21 = vadd.f32 %v11485_v39, %v11457_v45 }
 0x825   : > { %11504 = vst [vmem:[%s17587_s25 + $0x8] sm:$0xff] %v11486_v21 }
 0x826   : > { %v11430_v63 = vpop.f32.mrf.mxu3  ;;  %v11408_v50 = vpop.f32.mrf.mxu2 }
 0x827   : > { %v11431_v51 = vadd.f32 %v11430_v63, %v11402_v58  ;;  %v11409_v31 = vadd.f32 %v11408_v50, %v11380_v9 }
 0x828   : > { %v11461_v36 = vpop.f32.mrf.mxu0 }
 0x829   : > { %v11460_v24 = vadd.f32 %v11459_v6, %v11431_v51 }
 0x82b   : > { %v11489_v17 = vadd.f32 %v11488_v52, %v11460_v24 }
 0x82d   : > { %11505 = vst [vmem:[%s17587_s25 + $0x10] sm:$0xff] %v11489_v17 }
 0x82e   : > { %v11432_v30 = vpop.f32.mrf.mxu3  ;;  %v11411_v62 = vpop.f32.mrf.mxu2 }
 0x82f   : > { %v11433_v4 = vadd.f32 %v11432_v30, %v11404_v8  ;;  %v11412_v33 = vadd.f32 %v11411_v62, %v11383_v26 }
 0x830   : > { %v11464_v13 = vpop.f32.mrf.mxu0 }
 0x831   : > { %v11462_v18 = vadd.f32 %v11461_v36, %v11433_v4 }
 0x833   : > { %v11491_v57 = vadd.f32 %v11490_v59, %v11462_v18 }
 0x835   : > { %11506 = vst [vmem:[%s17587_s25 + $0x18] sm:$0xff] %v11491_v57 }
 0x836   : > { %v11435_v34 = vpop.f32.mrf.mxu3  ;;  %v11413_v27 = vpop.f32.mrf.mxu2 }
 0x837   : > { %v11436_v15 = vadd.f32 %v11435_v34, %v11407_v1  ;;  %v11414_v11 = vadd.f32 %v11413_v27, %v17580_v16 }
 0x838   : > { %v11466_v35 = vpop.f32.mrf.mxu0 }
 0x839   : > { %v11465_v38 = vadd.f32 %v11464_v13, %v11436_v15 }
 0x83b   : > { %v11494_v43 = vadd.f32 %v11493_v41, %v11465_v38 }
 0x83d   : > { %11507 = vst [vmem:[%s17587_s25 + $0x20] sm:$0xff] %v11494_v43 }
 0x83e   : > { %v11437_v40 = vpop.f32.mrf.mxu3 }
 0x83f   : > { %v11438_v49 = vadd.f32 %v11437_v40, %v11409_v31 }
 0x841   : > { %v11467_v60 = vadd.f32 %v11466_v35, %v11438_v49 }
 0x843   : > { %v11496_v14 = vadd.f32 %v11495_v5, %v11467_v60 }
 0x845   : > { %11508 = vst [vmem:[%s17587_s25 + $0x28] sm:$0xff] %v11496_v14 }
 0x846   : > { %v11440_v25 = vpop.f32.mrf.mxu3 }
 0x847   : > { %v11441_v22 = vadd.f32 %v11440_v25, %v11412_v33 }
 0x84e   : > { %v11442_v7 = vpop.f32.mrf.mxu3 }
 0x84f   : > { %v11443_v47 = vadd.f32 %v11442_v7, %v11414_v11 }
 0x856   : > { %v11469_v46 = vpop.f32.mrf.mxu3 }
 0x857   : > { %v11470_v29 = vadd.f32 %v11469_v46, %v11441_v22 }
 0x859   : > { %v11499_v54 = vadd.f32 %v11498_v20, %v11470_v29 }
 0x85b   : > { %11509 = vst [vmem:[%s17587_s25 + $0x30] sm:$0xff] %v11499_v54 }
 0x85e   : > { %v11471_v28 = vpop.f32.mrf.mxu3 }
 0x85f   : > { %v11472_v42 = vadd.f32 %v11471_v28, %v11443_v47 }
 0x861   : > { %v11501_v53 = vadd.f32 %v11500_v56, %v11472_v42 }
 0x863   : > { %11510 = vst [vmem:[%s17587_s25 + $0x38] sm:$0xff] %v11501_v53 }
 0x864   : > { %13144 = shalt.err (!%p13141_p3)
}
 0x865   : > { %s13191_s26 = smov 128  }
 0x866   : > { %12953 = dma.vmem_to_hbm [thread:$0]  (%p13280_p5), %s11525_s29, 1024, %s11527_s23, %s11512_s13, %s13191_s26, %s13191_s26, %s13182_s21  }
 0x867 PF: > { %p12959_p4 = scmp.ge.s32.totalorder %s13179_s12, 2  ;;  %s11541_s25 = sand.u32 1, %s13167_s30  }
 0x868   : > { %s11542_s27 = scalar_lea.sflag [#allocation7], %s11541_s25 }
 0x869   : > { %p12956_p7 = pnand %p12959_p4, %p13284_p6 }
 0x86b   : > { %p12957_p8 = pneg %p12956_p7 }
 0x86d   : > { %13162 = dma.done.wait (%p12957_p8), %s11542_s27, 1024  }
 0x86e   : > { %13164 = vsyncadd (%p12957_p8), %s11542_s27, 4294966272  ;;  %p19_p9 = scmp.ge.s32.totalorder %s13267_s15, 4   ;;  %s17752_s30 = smov %s13171_s10 }
 0x86f   : > { %s17753_s10 = smov %s13175_s11  ;;  %s17754_s11 = smov %s13278_s18 }
 0x870   : > { %s17755_s12 = smov %s13267_s15  ;;  %21 = sbr.rel (!%p19_p9) target bundleno = 3 (0x3), region = 99 }
 0x875   :  { %11548 = vsyncpa [#allocation7], 1 }
 0x876   :  { %11550 = vsyncpa [#allocation7 + $0x1], 1 }

</bundles_post_ra>
